<compile_context>
chip_gen: v5e
topology: v5e:2x2
jax: 0.10.0
libtpu: 0.0.40
codegen_flags: <defaults>
</compile_context>

<pallas_src>
import functools

import jax
import jax.numpy as jnp
from jax.experimental import pallas as pl
from jax.experimental.pallas import tpu as pltpu

LANE = 128


def _fused_aux_kernel(hw_group, xp_ref, wpc_ref, bc_ref, w1_ref, b1_ref,
                      w2_ref, b2_ref, o_ref, acc_ref):
    """One grid step handles `hw_group` of the 16 pooled spatial bins.

    Per step:
      stage 1 (pool + conv + folded-BN + ReLU) for this step's bins -> y (hw_group*N, 128)
      fc1 partial sums for those bins (local accumulation, one acc_ref write per step)
    Last step: ReLU(acc + b1) @ w2 + b2 -> lane-padded logits.
    """
    k = pl.program_id(0)
    n = acc_ref.shape[0]

    # Stage 1: adaptive 4x4 avg-pool + 1x1 conv + folded BN, one bf16 MXU matmul.
    y = jnp.dot(xp_ref[...].astype(jnp.bfloat16), wpc_ref[...],
                preferred_element_type=jnp.float32)
    y = jnp.maximum(y + bc_ref[...], 0.0)                    # (hw_group * N, 128) f32
    y_bf = y.astype(jnp.bfloat16)                            # native bf16 MXU path for fc1

    # fc1 partials: spatial bin g of this step contributes y[g*N:(g+1)*N] @ w1_block[g].
    part = jnp.zeros(acc_ref.shape, jnp.float32)
    for g in range(hw_group):                                # small static unroll
        part = part + jnp.dot(y_bf[g * n:(g + 1) * n, :], w1_ref[g],
                              preferred_element_type=jnp.float32)

    @pl.when(k == 0)
    def _init():
        acc_ref[...] = part

    @pl.when(k > 0)
    def _accum():
        acc_ref[...] = acc_ref[...] + part

    @pl.when(k == pl.num_programs(0) - 1)
    def _finalize():
        h = jnp.maximum(acc_ref[...] + b1_ref[...], 0.0)     # fc1 bias + ReLU
        # Dropout(p=0.7) is identity at inference time.
        o_ref[...] = (jnp.dot(h.astype(jnp.bfloat16), w2_ref[...],
                              preferred_element_type=jnp.float32)
                      + b2_ref[...])


def _const_spec(shape):
    """BlockSpec for an input fetched once (constant index_map); single-buffer if possible."""
    index_map = lambda k: (0,) * len(shape)
    if hasattr(pl, "Buffered"):
        try:
            return pl.BlockSpec(shape, index_map, pipeline_mode=pl.Buffered(1))
        except TypeError:
            pass
    return pl.BlockSpec(shape, index_map)


def prepare_params(params, H, W, num_classes):
    """One-time re-layout / folding of the PyTorch parameters."""
    # TODO(synk): adaptive_avg_pool2d with non-divisible H/W bins not implemented.
    assert H % 4 == 0 and W % 4 == 0
    ph, pw = H // 4, W // 4
    pp = ph * pw

    # Fold BatchNorm (eps=0.001, inference form) into the 1x1-conv weight / bias.
    scale = params["bn_gamma"] * jax.lax.rsqrt(params["bn_var"] + 1e-3)   # (1, 128)
    w_fused = params["conv_w_t"] * scale                                  # (C, 128)
    b_fused = params["bn_beta"] - params["bn_mean"] * scale               # (1, 128)

    # Fold the average-pool into the conv weight: replicate each input-channel row over
    # its ph*pw window and divide by the window size -> (C*pp, 128).
    w_pc = jnp.repeat(w_fused, pp, axis=0) / float(pp)

    # Fold torch.flatten's (c, hw)-major ordering into fc1's weight: block hw holds the
    # rows of fc1_w_t that multiply conv channel c at spatial bin hw.
    w1p = params["fc1_w_t"].reshape(128, 16, 1024).transpose(1, 0, 2)     # (16, 128, 1024)

    # Pad fc2 columns to a lane-dense multiple of 128; wrapper slices them back off.
    ncp = max(LANE, ((num_classes + LANE - 1) // LANE) * LANE)
    w2 = params["fc2_w_t"]
    b2 = params["fc2_b"]
    w2p = jnp.zeros((w2.shape[0], ncp), jnp.float32).at[:, :num_classes].set(w2)
    b2p = jnp.zeros((1, ncp), jnp.float32).at[:, :num_classes].set(b2)

    return {
        "w_pc": w_pc.astype(jnp.bfloat16),     # bf16 storage, bf16 MXU operand
        "b_fused": b_fused.astype(jnp.float32),
        "w1p": w1p.astype(jnp.bfloat16),
        "b1": params["fc1_b"].astype(jnp.float32),
        "w2p": w2p.astype(jnp.bfloat16),
        "b2p": b2p.astype(jnp.float32),
    }


@functools.partial(jax.jit, static_argnames=("num_classes", "hw_group"))
def inception_aux_forward(x, prep, num_classes, hw_group=16):
    N, C, H, W = x.shape
    ph, pw = H // 4, W // 4
    pp = ph * pw
    assert 16 % hw_group == 0
    n_steps = 16 // hw_group
    ncp = prep["w2p"].shape[1]

    # Glue: gather each of the 16 pooling windows into a lane-dense row, ordered
    # (spatial bin, batch) so each grid step sees a contiguous (hw_group*N, C*pp) block.
    xp = x.reshape(N, C, 4, ph, 4, pw).transpose(2, 4, 0, 1, 3, 5)
    xp = xp.reshape(16 * N, C * pp)

    kernel = functools.partial(_fused_aux_kernel, hw_group)

    out_padded = pl.pallas_call(
        kernel,
        out_shape=jax.ShapeDtypeStruct((N, ncp), jnp.float32),
        grid_spec=pltpu.PrefetchScalarGridSpec(
            num_scalar_prefetch=0,
            grid=(n_steps,),
            in_specs=[
                pl.BlockSpec((hw_group * N, C * pp), lambda k: (k, 0)),    # xp tile
                _const_spec((C * pp, 128)),                                # pool+conv weight
                _const_spec((1, 128)),                                     # folded BN bias
                pl.BlockSpec((hw_group, 128, 1024), lambda k: (k, 0, 0)),  # fc1 weight tile
                _const_spec((1, 1024)),                                    # fc1 bias
                _const_spec((1024, ncp)),                                  # fc2 weight (padded)
                _const_spec((1, ncp)),                                     # fc2 bias (padded)
            ],
            out_specs=pl.BlockSpec((N, ncp), lambda k: (0, 0)),
            scratch_shapes=[pltpu.VMEM((N, 1024), jnp.float32)],           # fc1 accumulator
        ),
        compiler_params=pltpu.CompilerParams(
            dimension_semantics=("arbitrary",),                            # reduction axis
        ),
    )(xp, prep["w_pc"], prep["b_fused"], prep["w1p"], prep["b1"],
      prep["w2p"], prep["b2p"])

    return out_padded[:, :num_classes]


def reference_torch(x, params):
    """Plain-JAX mirror of the PyTorch forward (eval mode), all f32."""
    N, C, H, W = x.shape
    ph, pw = H // 4, W // 4
    pooled = x.reshape(N, C, 4, ph, 4, pw).mean(axis=(3, 5))               # (N, C, 4, 4)
    conv = jnp.einsum("co,nchw->nohw", params["conv_w_t"], pooled)         # (N, 128, 4, 4)
    g = params["bn_gamma"].reshape(1, 128, 1, 1)
    b = params["bn_beta"].reshape(1, 128, 1, 1)
    mu = params["bn_mean"].reshape(1, 128, 1, 1)
    var = params["bn_var"].reshape(1, 128, 1, 1)
    y = jnp.maximum((conv - mu) * jax.lax.rsqrt(var + 1e-3) * g + b, 0.0)
    f = y.reshape(N, 128 * 16)                                             # torch.flatten(x, 1)
    h = jnp.maximum(f @ params["fc1_w_t"] + params["fc1_b"], 0.0)
    return h @ params["fc2_w_t"] + params["fc2_b"]                         # dropout = identity


def reference_prepared(x, prep, num_classes):
    """Mirror of the kernel math (bf16 weights AND bf16 activation casts, f32 accumulation)."""
    N, C, H, W = x.shape
    ph, pw = H // 4, W // 4
    pp = ph * pw
    xp = x.reshape(N, C, 4, ph, 4, pw).transpose(2, 4, 0, 1, 3, 5).reshape(16 * N, C * pp)
    y = jnp.dot(xp.astype(jnp.bfloat16), prep["w_pc"], preferred_element_type=jnp.float32)
    y = jnp.maximum(y + prep["b_fused"], 0.0)
    y_bf = y.astype(jnp.bfloat16)
    acc = jnp.zeros((N, prep["b1"].shape[1]), jnp.float32)
    for hw in range(16):
        acc = acc + jnp.dot(y_bf[hw * N:(hw + 1) * N], prep["w1p"][hw],
                            preferred_element_type=jnp.float32)
    h = jnp.maximum(acc + prep["b1"], 0.0)
    out = jnp.dot(h.astype(jnp.bfloat16), prep["w2p"],
                  preferred_element_type=jnp.float32) + prep["b2p"]
    return out[:, :num_classes]


if __name__ == "__main__":
    N, C, H, W = 2, 4, 16, 16
    num_classes = 10

    keys = jax.random.split(jax.random.PRNGKey(0), 10)
    x = jax.random.normal(keys[0], (N, C, H, W), jnp.float32)

    params = {
        # nn.Conv2d(C, 128, kernel_size=1, bias=False): weight (128, C, 1, 1) -> (C, 128)
        "conv_w_t": 0.1 * jax.random.normal(keys[1], (C, 128), jnp.float32),
        # nn.BatchNorm2d(128, eps=0.001) inference stats / affine params
        "bn_gamma": 1.0 + 0.1 * jax.random.normal(keys[2], (1, 128), jnp.float32),
        "bn_beta": 0.1 * jax.random.normal(keys[3], (1, 128), jnp.float32),
        "bn_mean": 0.1 * jax.random.normal(keys[4], (1, 128), jnp.float32),
        "bn_var": 0.5 + 0.5 * jax.nn.softplus(
            jax.random.normal(keys[5], (1, 128), jnp.float32)),
        # nn.Linear(2048, 1024): weight (1024, 2048) stored transposed as (2048, 1024)
        "fc1_w_t": 0.02 * jax.random.normal(keys[6], (2048, 1024), jnp.float32),
        "fc1_b": 0.02 * jax.random.normal(keys[7], (1, 1024), jnp.float32),
        # TODO(synk): the spec declares nn.Linear(1048, num_classes), inconsistent with
        # fc1's 1024-d output (the torch forward would error); implemented with
        # in_features=1024 so the forward is runnable.
        "fc2_w_t": 0.05 * jax.random.normal(keys[8], (1024, num_classes), jnp.float32),
        "fc2_b": 0.05 * jax.random.normal(keys[9], (1, num_classes), jnp.float32),
    }

    prep = prepare_params(params, H, W, num_classes)

    # Default: single grid step (hw_group=16).
    out = inception_aux_forward(x, prep, num_classes=num_classes)
    jax.block_until_ready(out)
    assert out.shape == (N, num_classes)

    # Multi-step reduction path (hw_group=8 -> 2 grid steps) must agree.
    out8 = inception_aux_forward(x, prep, num_classes=num_classes, hw_group=8)
    jax.block_until_ready(out8)
    assert jnp.allclose(out, out8, rtol=2e-2, atol=2e-2), "hw_group=8 vs 16 mismatch"

    # Check 1: same math as the kernel (bf16 weights + bf16 activation casts, f32 acc).
    ref_p = reference_prepared(x, prep, num_classes)
    assert jnp.allclose(out, ref_p, rtol=2e-2, atol=2e-2), "mismatch vs prepared reference"

    # Check 2: original f32 PyTorch-semantics math (bf16 storage/casts cost ~<1%).
    ref_t = reference_torch(x, params)
    assert jnp.allclose(out, ref_t, rtol=5e-2, atol=5e-2), "mismatch vs f32 torch reference"

    print("KERNEL_OK")
</pallas_src>

<mosaic_0001>
module attributes {stable_mosaic.version = 11 : i64} {
  func.func @_fused_aux_kernel(%arg0: i32, %arg1: memref<32x64xf32, #tpu.memory_space<vmem>>, %arg2: memref<64x128xbf16, #tpu.memory_space<vmem>>, %arg3: memref<1x128xf32, #tpu.memory_space<vmem>>, %arg4: memref<16x128x1024xbf16, #tpu.memory_space<vmem>>, %arg5: memref<1x1024xf32, #tpu.memory_space<vmem>>, %arg6: memref<1024x128xbf16, #tpu.memory_space<vmem>>, %arg7: memref<1x128xf32, #tpu.memory_space<vmem>>, %arg8: memref<2x128xf32, #tpu.memory_space<vmem>>, %arg9: memref<2x1024xf32, #tpu.memory_space<vmem>>) attributes {dimension_semantics = [#tpu.dimension_semantics<arbitrary>], iteration_bounds = array<i64: 1>, scalar_prefetch = 0 : i64, scratch_operands = 1 : i64, tpu.core_type = #tpu.core_type<tc>, window_params = [{transform_indices = @transform_0, window_bounds = array<i64: 32, 64>}, {pipeline_mode = #tpu.pipeline_mode<synchronous>, transform_indices = @transform_1, window_bounds = array<i64: 64, 128>}, {pipeline_mode = #tpu.pipeline_mode<synchronous>, transform_indices = @transform_2, window_bounds = array<i64: 1, 128>}, {transform_indices = @transform_3, window_bounds = array<i64: 16, 128, 1024>}, {pipeline_mode = #tpu.pipeline_mode<synchronous>, transform_indices = @transform_4, window_bounds = array<i64: 1, 1024>}, {pipeline_mode = #tpu.pipeline_mode<synchronous>, transform_indices = @transform_5, window_bounds = array<i64: 1024, 128>}, {pipeline_mode = #tpu.pipeline_mode<synchronous>, transform_indices = @transform_6, window_bounds = array<i64: 1, 128>}, {pipeline_mode = #tpu.pipeline_mode<synchronous>, transform_indices = @transform_7, window_bounds = array<i64: 2, 128>}]} {
    %c0 = arith.constant 0 : index
    %c0_0 = arith.constant 0 : index
    %0 = vector.load %arg1[%c0, %c0_0] : memref<32x64xf32, #tpu.memory_space<vmem>>, vector<32x64xf32>
    %1 = arith.truncf %0 : vector<32x64xf32> to vector<32x64xbf16>
    %c0_1 = arith.constant 0 : index
    %c0_2 = arith.constant 0 : index
    %2 = vector.load %arg2[%c0_1, %c0_2] : memref<64x128xbf16, #tpu.memory_space<vmem>>, vector<64x128xbf16>
    %cst = arith.constant dense<0.000000e+00> : vector<32x128xf32>
    %3 = tpu.matmul %1, %2, %cst {dimension_numbers = #tpu.dot_dimension_numbers<[1], [0], [0], [1], [0, 0, 1, 1], [], []>} : vector<32x64xbf16>, vector<64x128xbf16>, vector<32x128xf32> -> vector<32x128xf32>
    %c0_3 = arith.constant 0 : index
    %c0_4 = arith.constant 0 : index
    %4 = vector.load %arg3[%c0_3, %c0_4] : memref<1x128xf32, #tpu.memory_space<vmem>>, vector<1x128xf32>
    %5 = vector.broadcast %4 : vector<1x128xf32> to vector<32x128xf32>
    %6 = arith.addf %3, %5 : vector<32x128xf32>
    %cst_5 = arith.constant 0.000000e+00 : f32
    %7 = vector.broadcast %cst_5 : f32 to vector<32x128xf32>
    %8 = arith.maximumf %6, %7 : vector<32x128xf32>
    %9 = arith.truncf %8 : vector<32x128xf32> to vector<32x128xbf16>
    %cst_6 = arith.constant 0.000000e+00 : f32
    %10 = vector.broadcast %cst_6 : f32 to vector<2x1024xf32>
    %11 = vector.extract_strided_slice %9 {offsets = [0, 0], sizes = [2, 128], strides = [1, 1]} : vector<32x128xbf16> to vector<2x128xbf16>
    %c0_7 = arith.constant 0 : index
    %c0_8 = arith.constant 0 : index
    %c0_9 = arith.constant 0 : index
    %12 = vector.load %arg4[%c0_7, %c0_8, %c0_9] : memref<16x128x1024xbf16, #tpu.memory_space<vmem>>, vector<1x128x1024xbf16>
    %13 = vector.shape_cast %12 : vector<1x128x1024xbf16> to vector<128x1024xbf16>
    %cst_10 = arith.constant dense<0.000000e+00> : vector<2x1024xf32>
    %14 = tpu.matmul %11, %13, %cst_10 {dimension_numbers = #tpu.dot_dimension_numbers<[1], [0], [0], [1], [0, 0, 1, 1], [], []>} : vector<2x128xbf16>, vector<128x1024xbf16>, vector<2x1024xf32> -> vector<2x1024xf32>
    %15 = arith.addf %10, %14 : vector<2x1024xf32>
    %16 = vector.extract_strided_slice %9 {offsets = [2, 0], sizes = [2, 128], strides = [1, 1]} : vector<32x128xbf16> to vector<2x128xbf16>
    %c1 = arith.constant 1 : index
    %c0_11 = arith.constant 0 : index
    %c0_12 = arith.constant 0 : index
    %17 = vector.load %arg4[%c1, %c0_11, %c0_12] : memref<16x128x1024xbf16, #tpu.memory_space<vmem>>, vector<1x128x1024xbf16>
    %18 = vector.shape_cast %17 : vector<1x128x1024xbf16> to vector<128x1024xbf16>
    %cst_13 = arith.constant dense<0.000000e+00> : vector<2x1024xf32>
    %19 = tpu.matmul %16, %18, %cst_13 {dimension_numbers = #tpu.dot_dimension_numbers<[1], [0], [0], [1], [0, 0, 1, 1], [], []>} : vector<2x128xbf16>, vector<128x1024xbf16>, vector<2x1024xf32> -> vector<2x1024xf32>
    %20 = arith.addf %15, %19 : vector<2x1024xf32>
    %21 = vector.extract_strided_slice %9 {offsets = [4, 0], sizes = [2, 128], strides = [1, 1]} : vector<32x128xbf16> to vector<2x128xbf16>
    %c2 = arith.constant 2 : index
    %c0_14 = arith.constant 0 : index
    %c0_15 = arith.constant 0 : index
    %22 = vector.load %arg4[%c2, %c0_14, %c0_15] : memref<16x128x1024xbf16, #tpu.memory_space<vmem>>, vector<1x128x1024xbf16>
    %23 = vector.shape_cast %22 : vector<1x128x1024xbf16> to vector<128x1024xbf16>
    %cst_16 = arith.constant dense<0.000000e+00> : vector<2x1024xf32>
    %24 = tpu.matmul %21, %23, %cst_16 {dimension_numbers = #tpu.dot_dimension_numbers<[1], [0], [0], [1], [0, 0, 1, 1], [], []>} : vector<2x128xbf16>, vector<128x1024xbf16>, vector<2x1024xf32> -> vector<2x1024xf32>
    %25 = arith.addf %20, %24 : vector<2x1024xf32>
    %26 = vector.extract_strided_slice %9 {offsets = [6, 0], sizes = [2, 128], strides = [1, 1]} : vector<32x128xbf16> to vector<2x128xbf16>
    %c3 = arith.constant 3 : index
    %c0_17 = arith.constant 0 : index
    %c0_18 = arith.constant 0 : index
    %27 = vector.load %arg4[%c3, %c0_17, %c0_18] : memref<16x128x1024xbf16, #tpu.memory_space<vmem>>, vector<1x128x1024xbf16>
    %28 = vector.shape_cast %27 : vector<1x128x1024xbf16> to vector<128x1024xbf16>
    %cst_19 = arith.constant dense<0.000000e+00> : vector<2x1024xf32>
    %29 = tpu.matmul %26, %28, %cst_19 {dimension_numbers = #tpu.dot_dimension_numbers<[1], [0], [0], [1], [0, 0, 1, 1], [], []>} : vector<2x128xbf16>, vector<128x1024xbf16>, vector<2x1024xf32> -> vector<2x1024xf32>
    %30 = arith.addf %25, %29 : vector<2x1024xf32>
    %31 = vector.extract_strided_slice %9 {offsets = [8, 0], sizes = [2, 128], strides = [1, 1]} : vector<32x128xbf16> to vector<2x128xbf16>
    %c4 = arith.constant 4 : index
    %c0_20 = arith.constant 0 : index
    %c0_21 = arith.constant 0 : index
    %32 = vector.load %arg4[%c4, %c0_20, %c0_21] : memref<16x128x1024xbf16, #tpu.memory_space<vmem>>, vector<1x128x1024xbf16>
    %33 = vector.shape_cast %32 : vector<1x128x1024xbf16> to vector<128x1024xbf16>
    %cst_22 = arith.constant dense<0.000000e+00> : vector<2x1024xf32>
    %34 = tpu.matmul %31, %33, %cst_22 {dimension_numbers = #tpu.dot_dimension_numbers<[1], [0], [0], [1], [0, 0, 1, 1], [], []>} : vector<2x128xbf16>, vector<128x1024xbf16>, vector<2x1024xf32> -> vector<2x1024xf32>
    %35 = arith.addf %30, %34 : vector<2x1024xf32>
    %36 = vector.extract_strided_slice %9 {offsets = [10, 0], sizes = [2, 128], strides = [1, 1]} : vector<32x128xbf16> to vector<2x128xbf16>
    %c5 = arith.constant 5 : index
    %c0_23 = arith.constant 0 : index
    %c0_24 = arith.constant 0 : index
    %37 = vector.load %arg4[%c5, %c0_23, %c0_24] : memref<16x128x1024xbf16, #tpu.memory_space<vmem>>, vector<1x128x1024xbf16>
    %38 = vector.shape_cast %37 : vector<1x128x1024xbf16> to vector<128x1024xbf16>
    %cst_25 = arith.constant dense<0.000000e+00> : vector<2x1024xf32>
    %39 = tpu.matmul %36, %38, %cst_25 {dimension_numbers = #tpu.dot_dimension_numbers<[1], [0], [0], [1], [0, 0, 1, 1], [], []>} : vector<2x128xbf16>, vector<128x1024xbf16>, vector<2x1024xf32> -> vector<2x1024xf32>
    %40 = arith.addf %35, %39 : vector<2x1024xf32>
    %41 = vector.extract_strided_slice %9 {offsets = [12, 0], sizes = [2, 128], strides = [1, 1]} : vector<32x128xbf16> to vector<2x128xbf16>
    %c6 = arith.constant 6 : index
    %c0_26 = arith.constant 0 : index
    %c0_27 = arith.constant 0 : index
    %42 = vector.load %arg4[%c6, %c0_26, %c0_27] : memref<16x128x1024xbf16, #tpu.memory_space<vmem>>, vector<1x128x1024xbf16>
    %43 = vector.shape_cast %42 : vector<1x128x1024xbf16> to vector<128x1024xbf16>
    %cst_28 = arith.constant dense<0.000000e+00> : vector<2x1024xf32>
    %44 = tpu.matmul %41, %43, %cst_28 {dimension_numbers = #tpu.dot_dimension_numbers<[1], [0], [0], [1], [0, 0, 1, 1], [], []>} : vector<2x128xbf16>, vector<128x1024xbf16>, vector<2x1024xf32> -> vector<2x1024xf32>
    %45 = arith.addf %40, %44 : vector<2x1024xf32>
    %46 = vector.extract_strided_slice %9 {offsets = [14, 0], sizes = [2, 128], strides = [1, 1]} : vector<32x128xbf16> to vector<2x128xbf16>
    %c7 = arith.constant 7 : index
    %c0_29 = arith.constant 0 : index
    %c0_30 = arith.constant 0 : index
    %47 = vector.load %arg4[%c7, %c0_29, %c0_30] : memref<16x128x1024xbf16, #tpu.memory_space<vmem>>, vector<1x128x1024xbf16>
    %48 = vector.shape_cast %47 : vector<1x128x1024xbf16> to vector<128x1024xbf16>
    %cst_31 = arith.constant dense<0.000000e+00> : vector<2x1024xf32>
    %49 = tpu.matmul %46, %48, %cst_31 {dimension_numbers = #tpu.dot_dimension_numbers<[1], [0], [0], [1], [0, 0, 1, 1], [], []>} : vector<2x128xbf16>, vector<128x1024xbf16>, vector<2x1024xf32> -> vector<2x1024xf32>
    %50 = arith.addf %45, %49 : vector<2x1024xf32>
    %51 = vector.extract_strided_slice %9 {offsets = [16, 0], sizes = [2, 128], strides = [1, 1]} : vector<32x128xbf16> to vector<2x128xbf16>
    %c8 = arith.constant 8 : index
    %c0_32 = arith.constant 0 : index
    %c0_33 = arith.constant 0 : index
    %52 = vector.load %arg4[%c8, %c0_32, %c0_33] : memref<16x128x1024xbf16, #tpu.memory_space<vmem>>, vector<1x128x1024xbf16>
    %53 = vector.shape_cast %52 : vector<1x128x1024xbf16> to vector<128x1024xbf16>
    %cst_34 = arith.constant dense<0.000000e+00> : vector<2x1024xf32>
    %54 = tpu.matmul %51, %53, %cst_34 {dimension_numbers = #tpu.dot_dimension_numbers<[1], [0], [0], [1], [0, 0, 1, 1], [], []>} : vector<2x128xbf16>, vector<128x1024xbf16>, vector<2x1024xf32> -> vector<2x1024xf32>
    %55 = arith.addf %50, %54 : vector<2x1024xf32>
    %56 = vector.extract_strided_slice %9 {offsets = [18, 0], sizes = [2, 128], strides = [1, 1]} : vector<32x128xbf16> to vector<2x128xbf16>
    %c9 = arith.constant 9 : index
    %c0_35 = arith.constant 0 : index
    %c0_36 = arith.constant 0 : index
    %57 = vector.load %arg4[%c9, %c0_35, %c0_36] : memref<16x128x1024xbf16, #tpu.memory_space<vmem>>, vector<1x128x1024xbf16>
    %58 = vector.shape_cast %57 : vector<1x128x1024xbf16> to vector<128x1024xbf16>
    %cst_37 = arith.constant dense<0.000000e+00> : vector<2x1024xf32>
    %59 = tpu.matmul %56, %58, %cst_37 {dimension_numbers = #tpu.dot_dimension_numbers<[1], [0], [0], [1], [0, 0, 1, 1], [], []>} : vector<2x128xbf16>, vector<128x1024xbf16>, vector<2x1024xf32> -> vector<2x1024xf32>
    %60 = arith.addf %55, %59 : vector<2x1024xf32>
    %61 = vector.extract_strided_slice %9 {offsets = [20, 0], sizes = [2, 128], strides = [1, 1]} : vector<32x128xbf16> to vector<2x128xbf16>
    %c10 = arith.constant 10 : index
    %c0_38 = arith.constant 0 : index
    %c0_39 = arith.constant 0 : index
    %62 = vector.load %arg4[%c10, %c0_38, %c0_39] : memref<16x128x1024xbf16, #tpu.memory_space<vmem>>, vector<1x128x1024xbf16>
    %63 = vector.shape_cast %62 : vector<1x128x1024xbf16> to vector<128x1024xbf16>
    %cst_40 = arith.constant dense<0.000000e+00> : vector<2x1024xf32>
    %64 = tpu.matmul %61, %63, %cst_40 {dimension_numbers = #tpu.dot_dimension_numbers<[1], [0], [0], [1], [0, 0, 1, 1], [], []>} : vector<2x128xbf16>, vector<128x1024xbf16>, vector<2x1024xf32> -> vector<2x1024xf32>
    %65 = arith.addf %60, %64 : vector<2x1024xf32>
    %66 = vector.extract_strided_slice %9 {offsets = [22, 0], sizes = [2, 128], strides = [1, 1]} : vector<32x128xbf16> to vector<2x128xbf16>
    %c11 = arith.constant 11 : index
    %c0_41 = arith.constant 0 : index
    %c0_42 = arith.constant 0 : index
    %67 = vector.load %arg4[%c11, %c0_41, %c0_42] : memref<16x128x1024xbf16, #tpu.memory_space<vmem>>, vector<1x128x1024xbf16>
    %68 = vector.shape_cast %67 : vector<1x128x1024xbf16> to vector<128x1024xbf16>
    %cst_43 = arith.constant dense<0.000000e+00> : vector<2x1024xf32>
    %69 = tpu.matmul %66, %68, %cst_43 {dimension_numbers = #tpu.dot_dimension_numbers<[1], [0], [0], [1], [0, 0, 1, 1], [], []>} : vector<2x128xbf16>, vector<128x1024xbf16>, vector<2x1024xf32> -> vector<2x1024xf32>
    %70 = arith.addf %65, %69 : vector<2x1024xf32>
    %71 = vector.extract_strided_slice %9 {offsets = [24, 0], sizes = [2, 128], strides = [1, 1]} : vector<32x128xbf16> to vector<2x128xbf16>
    %c12 = arith.constant 12 : index
    %c0_44 = arith.constant 0 : index
    %c0_45 = arith.constant 0 : index
    %72 = vector.load %arg4[%c12, %c0_44, %c0_45] : memref<16x128x1024xbf16, #tpu.memory_space<vmem>>, vector<1x128x1024xbf16>
    %73 = vector.shape_cast %72 : vector<1x128x1024xbf16> to vector<128x1024xbf16>
    %cst_46 = arith.constant dense<0.000000e+00> : vector<2x1024xf32>
    %74 = tpu.matmul %71, %73, %cst_46 {dimension_numbers = #tpu.dot_dimension_numbers<[1], [0], [0], [1], [0, 0, 1, 1], [], []>} : vector<2x128xbf16>, vector<128x1024xbf16>, vector<2x1024xf32> -> vector<2x1024xf32>
    %75 = arith.addf %70, %74 : vector<2x1024xf32>
    %76 = vector.extract_strided_slice %9 {offsets = [26, 0], sizes = [2, 128], strides = [1, 1]} : vector<32x128xbf16> to vector<2x128xbf16>
    %c13 = arith.constant 13 : index
    %c0_47 = arith.constant 0 : index
    %c0_48 = arith.constant 0 : index
    %77 = vector.load %arg4[%c13, %c0_47, %c0_48] : memref<16x128x1024xbf16, #tpu.memory_space<vmem>>, vector<1x128x1024xbf16>
    %78 = vector.shape_cast %77 : vector<1x128x1024xbf16> to vector<128x1024xbf16>
    %cst_49 = arith.constant dense<0.000000e+00> : vector<2x1024xf32>
    %79 = tpu.matmul %76, %78, %cst_49 {dimension_numbers = #tpu.dot_dimension_numbers<[1], [0], [0], [1], [0, 0, 1, 1], [], []>} : vector<2x128xbf16>, vector<128x1024xbf16>, vector<2x1024xf32> -> vector<2x1024xf32>
    %80 = arith.addf %75, %79 : vector<2x1024xf32>
    %81 = vector.extract_strided_slice %9 {offsets = [28, 0], sizes = [2, 128], strides = [1, 1]} : vector<32x128xbf16> to vector<2x128xbf16>
    %c14 = arith.constant 14 : index
    %c0_50 = arith.constant 0 : index
    %c0_51 = arith.constant 0 : index
    %82 = vector.load %arg4[%c14, %c0_50, %c0_51] : memref<16x128x1024xbf16, #tpu.memory_space<vmem>>, vector<1x128x1024xbf16>
    %83 = vector.shape_cast %82 : vector<1x128x1024xbf16> to vector<128x1024xbf16>
    %cst_52 = arith.constant dense<0.000000e+00> : vector<2x1024xf32>
    %84 = tpu.matmul %81, %83, %cst_52 {dimension_numbers = #tpu.dot_dimension_numbers<[1], [0], [0], [1], [0, 0, 1, 1], [], []>} : vector<2x128xbf16>, vector<128x1024xbf16>, vector<2x1024xf32> -> vector<2x1024xf32>
    %85 = arith.addf %80, %84 : vector<2x1024xf32>
    %86 = vector.extract_strided_slice %9 {offsets = [30, 0], sizes = [2, 128], strides = [1, 1]} : vector<32x128xbf16> to vector<2x128xbf16>
    %c15 = arith.constant 15 : index
    %c0_53 = arith.constant 0 : index
    %c0_54 = arith.constant 0 : index
    %87 = vector.load %arg4[%c15, %c0_53, %c0_54] : memref<16x128x1024xbf16, #tpu.memory_space<vmem>>, vector<1x128x1024xbf16>
    %88 = vector.shape_cast %87 : vector<1x128x1024xbf16> to vector<128x1024xbf16>
    %cst_55 = arith.constant dense<0.000000e+00> : vector<2x1024xf32>
    %89 = tpu.matmul %86, %88, %cst_55 {dimension_numbers = #tpu.dot_dimension_numbers<[1], [0], [0], [1], [0, 0, 1, 1], [], []>} : vector<2x128xbf16>, vector<128x1024xbf16>, vector<2x1024xf32> -> vector<2x1024xf32>
    %90 = arith.addf %85, %89 : vector<2x1024xf32>
    %c0_i32 = arith.constant 0 : i32
    %91 = arith.cmpi eq, %arg0, %c0_i32 : i32
    %92 = arith.extui %91 : i1 to i32
    %c0_i32_56 = arith.constant 0 : i32
    %93 = arith.cmpi ne, %92, %c0_i32_56 : i32
    scf.if %93 {
      %c0_61 = arith.constant 0 : index
      %c0_62 = arith.constant 0 : index
      %100 = vector.load %arg9[%c0_61, %c0_62] : memref<2x1024xf32, #tpu.memory_space<vmem>>, vector<2x1024xf32>
      tpu.vector_store %arg9[%c0_61, %c0_62], %90 {strides = array<i32>} : memref<2x1024xf32, #tpu.memory_space<vmem>>, vector<2x1024xf32>,
    } else {
    }
    %c0_i32_57 = arith.constant 0 : i32
    %94 = arith.cmpi sgt, %arg0, %c0_i32_57 : i32
    %95 = arith.extui %94 : i1 to i32
    %c0_i32_58 = arith.constant 0 : i32
    %96 = arith.cmpi ne, %95, %c0_i32_58 : i32
    scf.if %96 {
      %c0_61 = arith.constant 0 : index
      %c0_62 = arith.constant 0 : index
      %100 = vector.load %arg9[%c0_61, %c0_62] : memref<2x1024xf32, #tpu.memory_space<vmem>>, vector<2x1024xf32>
      %101 = arith.addf %100, %90 : vector<2x1024xf32>
      %c0_63 = arith.constant 0 : index
      %c0_64 = arith.constant 0 : index
      %102 = vector.load %arg9[%c0_63, %c0_64] : memref<2x1024xf32, #tpu.memory_space<vmem>>, vector<2x1024xf32>
      tpu.vector_store %arg9[%c0_63, %c0_64], %101 {strides = array<i32>} : memref<2x1024xf32, #tpu.memory_space<vmem>>, vector<2x1024xf32>,
    } else {
    }
    %c0_i32_59 = arith.constant 0 : i32
    %97 = arith.cmpi eq, %arg0, %c0_i32_59 : i32
    %98 = arith.extui %97 : i1 to i32
    %c0_i32_60 = arith.constant 0 : i32
    %99 = arith.cmpi ne, %98, %c0_i32_60 : i32
    scf.if %99 {
      %c0_61 = arith.constant 0 : index
      %c0_62 = arith.constant 0 : index
      %100 = vector.load %arg9[%c0_61, %c0_62] : memref<2x1024xf32, #tpu.memory_space<vmem>>, vector<2x1024xf32>
      %c0_63 = arith.constant 0 : index
      %c0_64 = arith.constant 0 : index
      %101 = vector.load %arg5[%c0_63, %c0_64] : memref<1x1024xf32, #tpu.memory_space<vmem>>, vector<1x1024xf32>
      %102 = vector.broadcast %101 : vector<1x1024xf32> to vector<2x1024xf32>
      %103 = arith.addf %100, %102 : vector<2x1024xf32>
      %cst_65 = arith.constant 0.000000e+00 : f32
      %104 = vector.broadcast %cst_65 : f32 to vector<2x1024xf32>
      %105 = arith.maximumf %103, %104 : vector<2x1024xf32>
      %106 = arith.truncf %105 : vector<2x1024xf32> to vector<2x1024xbf16>
      %c0_66 = arith.constant 0 : index
      %c0_67 = arith.constant 0 : index
      %107 = vector.load %arg6[%c0_66, %c0_67] : memref<1024x128xbf16, #tpu.memory_space<vmem>>, vector<1024x128xbf16>
      %cst_68 = arith.constant dense<0.000000e+00> : vector<2x128xf32>
      %108 = tpu.matmul %106, %107, %cst_68 {dimension_numbers = #tpu.dot_dimension_numbers<[1], [0], [0], [1], [0, 0, 1, 1], [], []>} : vector<2x1024xbf16>, vector<1024x128xbf16>, vector<2x128xf32> -> vector<2x128xf32>
      %c0_69 = arith.constant 0 : index
      %c0_70 = arith.constant 0 : index
      %109 = vector.load %arg7[%c0_69, %c0_70] : memref<1x128xf32, #tpu.memory_space<vmem>>, vector<1x128xf32>
      %110 = vector.broadcast %109 : vector<1x128xf32> to vector<2x128xf32>
      %111 = arith.addf %108, %110 : vector<2x128xf32>
      %c0_71 = arith.constant 0 : index
      %c0_72 = arith.constant 0 : index
      %112 = vector.load %arg8[%c0_71, %c0_72] : memref<2x128xf32, #tpu.memory_space<vmem>>, vector<2x128xf32>
      tpu.vector_store %arg8[%c0_71, %c0_72], %111 {strides = array<i32>} : memref<2x128xf32, #tpu.memory_space<vmem>>, vector<2x128xf32>,
    } else {
    }
    return
  }
  func.func @transform_0(%arg0: i32) -> (i32, i32) {
    %c0_i32 = arith.constant 0 : i32
    %c0_i32_0 = arith.constant 0 : i32
    return %arg0, %c0_i32 : i32, i32
  }
  func.func @transform_1(%arg0: i32) -> (i32, i32) {
    %c0_i32 = arith.constant 0 : i32
    %c0_i32_0 = arith.constant 0 : i32
    %c0_i32_1 = arith.constant 0 : i32
    return %c0_i32, %c0_i32_0 : i32, i32
  }
  func.func @transform_2(%arg0: i32) -> (i32, i32) {
    %c0_i32 = arith.constant 0 : i32
    %c0_i32_0 = arith.constant 0 : i32
    %c0_i32_1 = arith.constant 0 : i32
    return %c0_i32, %c0_i32_0 : i32, i32
  }
  func.func @transform_3(%arg0: i32) -> (i32, i32, i32) {
    %c0_i32 = arith.constant 0 : i32
    %c0_i32_0 = arith.constant 0 : i32
    %c0_i32_1 = arith.constant 0 : i32
    return %arg0, %c0_i32, %c0_i32_0 : i32, i32, i32
  }
  func.func @transform_4(%arg0: i32) -> (i32, i32) {
    %c0_i32 = arith.constant 0 : i32
    %c0_i32_0 = arith.constant 0 : i32
    %c0_i32_1 = arith.constant 0 : i32
    return %c0_i32, %c0_i32_0 : i32, i32
  }
  func.func @transform_5(%arg0: i32) -> (i32, i32) {
    %c0_i32 = arith.constant 0 : i32
    %c0_i32_0 = arith.constant 0 : i32
    %c0_i32_1 = arith.constant 0 : i32
    return %c0_i32, %c0_i32_0 : i32, i32
  }
  func.func @transform_6(%arg0: i32) -> (i32, i32) {
    %c0_i32 = arith.constant 0 : i32
    %c0_i32_0 = arith.constant 0 : i32
    %c0_i32_1 = arith.constant 0 : i32
    return %c0_i32, %c0_i32_0 : i32, i32
  }
  func.func @transform_7(%arg0: i32) -> (i32, i32) {
    %c0_i32 = arith.constant 0 : i32
    %c0_i32_0 = arith.constant 0 : i32
    %c0_i32_1 = arith.constant 0 : i32
    return %c0_i32, %c0_i32_0 : i32, i32
  }
}

</mosaic_0001>

<bundles_post_ra>
// kernel: inception_aux_forward.1
= control target key start
LH: loop header
LB: loop body
LE: loop exit
PB: predicated region body
PF: predicated region fallthrough
CT: control target
= control target key end

     0   :  { %12 = vsyncpa [#allocation4], 0  ;;  %s15249_s0 = inlined_call_operand.vmem [shape: f32[32,64], index: 0, kind: input, shape index: {}]   ;;  %s15250_s1 = inlined_call_operand.hbm [shape: bf16[64,128], index: 1, kind: input, shape index: {}]   ;;  %s15251_s2 = inlined_call_operand.hbm [shape: f32[1,128], index: 2, kind: input, shape index: {}]   ;;  %s15252_s3 = inlined_call_operand.hbm [shape: bf16[16,128,1024], index: 3, kind: input, shape index: {}]   ;;  %s15253_s4 = inlined_call_operand.hbm [shape: f32[1,1024], index: 4, kind: input, shape index: {}]   ;;  %s15254_s5 = inlined_call_operand.hbm [shape: bf16[1024,128], index: 5, kind: input, shape index: {}]   ;;  %s15255_s6 = inlined_call_operand.hbm [shape: f32[1,128], index: 6, kind: input, shape index: {}]   ;;  %s15256_s7 = inlined_call_operand.hbm [shape: f32[2,128], index: 7, kind: output, shape index: {}]  }
   0x1   :  { %13 = vsyncpa [#allocation7], 0 }
   0x2   :  { %14 = vsyncpa [#allocation10], 0 }
   0x3   :  { %15 = vsyncpa [#allocation13], 0  ;;  %s37_s26 = sshll.u32 %s15251_s2, 4  ;;  %s38_s26 = int_to_ptr.hbm [resolvable:$true] %s37_s26 }
   0x4   :  { %16 = vsyncpa [#allocation5], 0  ;;  %s14591_s27 = smov [#allocation6]   ;;  %s61_s8 = sshll.u32 %s15253_s4, 4  ;;  %s62_s8 = int_to_ptr.hbm [resolvable:$true] %s61_s8 }
   0x5   :  { %s39_s28 = sshll.u32 %s14591_s27, 4  ;;  %s14592_s9 = smov [#allocation9]   ;;  %s40_s28 = int_to_ptr.vmem [resolvable:$true] %s39_s28 }
   0x6   :  { %42 = dma.hbm_to_vmem [thread:$0]  %s38_s26, 16, %s40_s28, [#allocation7]  }
   0x7   :  { %s63_s10 = sshll.u32 %s14592_s9, 4  ;;  %s23_s13 = sshll.u32 %s15250_s1, 4  ;;  %s64_s10 = int_to_ptr.vmem [resolvable:$true] %s63_s10  ;;  %s24_s13 = int_to_ptr.hbm [resolvable:$true] %s23_s13 }
   0x8   :  { %66 = dma.hbm_to_vmem [thread:$0]  %s62_s8, 128, %s64_s10, [#allocation10]  }
   0x9   :  { %s14593_s2 = smov [#allocation3]   ;;  %s47_s17 = sshll.u32 %s15252_s3, 4  ;;  %s48_s17 = int_to_ptr.hbm [resolvable:$true] %s47_s17 }
   0xa   :  { %s25_s14 = sshll.u32 %s14593_s2, 4  ;;  %s14594_s18 = smov 64   ;;  %s26_s14 = int_to_ptr.vmem [resolvable:$true] %s25_s14 }
   0xb   :  { %s14595_s4 = smov 4   ;;  %s14596_s19 = smov [#allocation8]  }
   0xc   :  { %31 = dma.hbm_to_vmem [thread:$0]  %s24_s13, 512, %s26_s14, [#allocation4], %s14594_s18, %s14594_s18, %s14595_s4  }
   0xd   :  { %s49_s20 = sshll.u32 %s14596_s19, 4  ;;  %s14597_s21 = smov 512   ;;  %s50_s20 = int_to_ptr.vmem [resolvable:$true] %s49_s20 }
   0xe   :  { %s14598_s22 = smov 32   ;;  %s71_s24 = sshll.u32 %s15254_s5, 4  ;;  %s72_s24 = int_to_ptr.hbm [resolvable:$true] %s71_s24 }
   0xf   :  { %55 = dma.hbm_to_vmem [thread:$0]  %s48_s17, 131072, %s50_s20, [#allocation7], %s14597_s21, %s14597_s21, %s14598_s22  }
  0x10   :  { %s14599_s25 = smov [#allocation11]   ;;  %s85_s28 = sshll.u32 %s15255_s6, 4  ;;  %s86_s28 = int_to_ptr.hbm [resolvable:$true] %s85_s28 }
  0x11   :  { %s73_s26 = sshll.u32 %s14599_s25, 4  ;;  %s14600_s29 = smov [#allocation12]   ;;  %s74_s26 = int_to_ptr.vmem [resolvable:$true] %s73_s26 }
  0x12   :  { %79 = dma.hbm_to_vmem [thread:$0]  %s72_s24, 8192, %s74_s26, [#allocation10], %s14594_s18, %s14594_s18, %s14595_s4  }
  0x13   :  { %s87_s30 = sshll.u32 %s14600_s29, 4  ;;  %s88_s30 = int_to_ptr.vmem [resolvable:$true] %s87_s30 }
  0x14   :  { %90 = dma.hbm_to_vmem [thread:$0]  %s86_s28, 16, %s88_s30, [#allocation13]  }
  0x15   :  { %14581 = dma.done.wait [#allocation4], 512  }
  0x16   :  { %14582 = vsyncadd [#allocation4], 4294966784 }
  0x17   :  { %14583 = dma.done.wait [#allocation7], 131088  }
  0x18   :  { %14584 = vsyncadd [#allocation7], 4294836208 }
  0x19   :  { %14585 = dma.done.wait [#allocation10], 8320  }
  0x1a   :  { %14586 = vsyncadd [#allocation10], 4294958976 }
  0x1b   :  { %14587 = dma.done.wait [#allocation13], 16  }
  0x1c   :  { %14588 = vsyncadd [#allocation13], 4294967280  ;;  %v13308_v0 = vld [vmem:[#allocation3 + $0x18] sm:$0xff]  ;;  %v13307_v1 = vld [vmem:[#allocation3 + $0x10] sm:$0xff]  ;;  %vm158_vm0 = vcmask 523264   ;;  %vm8181_vm1 = vcmask 1041408  }
  0x1d   :  { %169 = vmatpush.bf16.msra.mxu0 %v13308_v0  ;;  %v9179_v2 = vld [vmem:[#allocation8 + $0x3c0] sm:$0xf]  ;;  %v13429_v4 = vld [vmem:[#allocation8 + $0x3c4] sm:$0xf]  ;;  %v9187_v7 = vld [vmem:[#allocation8 + $0x3c8] sm:$0xf] }
  0x1e   :  { %v13433_v3 = vld [vmem:[#allocation8 + $0x3dc] sm:$0xf0]  ;;  %v9181_v6 = vld [vmem:[#allocation8 + $0x3e0] sm:$0xf0]  ;;  %v13434_v8 = vld [vmem:[#allocation8 + $0x3e4] sm:$0xf0] }
  0x1f   :  { %v9180_v5 = vor.u32 %v13433_v3, %v9179_v2  ;;  %v13306_v9 = vld [vmem:[#allocation3 + $0x8] sm:$0xff]  ;;  %v9184_v10 = vor.u32 %v13429_v4, %v9181_v6  ;;  %v9188_v11 = vor.u32 %v13434_v8, %v9187_v7  ;;  %v9147_v12 = vld [vmem:[#allocation8 + $0x380] sm:$0xf]  ;;  %v116_v29 = vld [vmem:[%s15249_s0] sm:$0xff]  ;;  %vm8183_vm2 = vcmask 1045508   ;;  %s8922_s16 = sshll.u32 %s15256_s7, 4  ;;  %s8923_s16 = int_to_ptr.hbm [resolvable:$true] %s8922_s16 }
  0x20   :  { %v13425_v13 = vld [vmem:[#allocation8 + $0x39c] sm:$0xf0]  ;;  %v13421_v14 = vld [vmem:[#allocation8 + $0x384] sm:$0xf]  ;;  %v13430_v16 = vld [vmem:[#allocation8 + $0x3cc] sm:$0xf] }
  0x21   :  { %646 = vmatpush.bf16.msra.mxu1 %v9180_v5  ;;  %v9149_v15 = vld [vmem:[#allocation8 + $0x3a0] sm:$0xf0]  ;;  %170 = vmatpush.bf16.msra.mxu0 %v13307_v1  ;;  %v9148_v17 = vor.u32 %v13425_v13, %v9147_v12  ;;  %v9155_v19 = vld [vmem:[#allocation8 + $0x388] sm:$0xf]  ;;  %v9189_v21 = vld [vmem:[#allocation8 + $0x3e8] sm:$0xf0] }
  0x22   :  { %659 = vmatpush.bf16.msra.mxu2 %v9184_v10  ;;  %v9152_v18 = vor.u32 %v13421_v14, %v9149_v15  ;;  %v13426_v20 = vld [vmem:[#allocation8 + $0x3a4] sm:$0xf0]  ;;  %672 = vmatpush.bf16.msra.mxu3 %v9188_v11  ;;  %v9115_v23 = vld [vmem:[#allocation8 + $0x340] sm:$0xf]  ;;  %v13413_v25 = vld [vmem:[#allocation8 + $0x344] sm:$0xf]  ;;  %v9192_v36 = vor.u32 %v13430_v16, %v9189_v21 }
  0x23   :  { %v9156_v22 = vor.u32 %v13426_v20, %v9155_v19  ;;  %v13417_v24 = vld [vmem:[#allocation8 + $0x35c] sm:$0xf0]  ;;  %v9117_v26 = vld [vmem:[#allocation8 + $0x360] sm:$0xf0]  ;;  %v9123_v27 = vld [vmem:[#allocation8 + $0x348] sm:$0xf] }
  0x24   :  { %v13305_v28 = vld [vmem:[#allocation3] sm:$0xff]  ;;  %v9116_v30 = vor.u32 %v13417_v24, %v9115_v23  ;;  %v13418_v31 = vld [vmem:[#allocation8 + $0x364] sm:$0xf0]  ;;  %v9120_v33 = vor.u32 %v13413_v25, %v9117_v26  ;;  %v13422_v37 = vld [vmem:[#allocation8 + $0x38c] sm:$0xf]  ;;  %vm8185_vm3 = vcmask 1043456  }
  0x25   :  { %647 = vmatpush.bf16.msra.mxu1 %v9148_v17  ;;  %171 = vmatpush.bf16.msra.mxu0 %v13306_v9  ;;  %v117_v32 = vld [vmem:[%s15249_s0 + $0x8] sm:$0xff]  ;;  %v9124_v38 = vor.u32 %v13418_v31, %v9123_v27  ;;  %v9157_v41 = vld [vmem:[#allocation8 + $0x3a8] sm:$0xf0]  ;;  %v9091_v42 = vld [vmem:[#allocation8 + $0x308] sm:$0xf] }
  0x26   :  { %660 = vmatpush.bf16.msra.mxu2 %v9152_v18  ;;  %v9083_v34 = vld [vmem:[#allocation8 + $0x300] sm:$0xf]  ;;  %673 = vmatpush.bf16.msra.mxu3 %v9156_v22  ;;  %v13405_v39 = vld [vmem:[#allocation8 + $0x304] sm:$0xf]  ;;  %v13410_v43 = vld [vmem:[#allocation8 + $0x324] sm:$0xf0]  ;;  %v120_v44 = vpack.c.bf16 %v117_v32, %v116_v29  ;;  %v9160_v49 = vor.u32 %v13422_v37, %v9157_v41 }
  0x27   :  { %v13409_v35 = vld [vmem:[#allocation8 + $0x31c] sm:$0xf0]  ;;  %v9085_v40 = vld [vmem:[#allocation8 + $0x320] sm:$0xf0]  ;;  %v13414_v50 = vld [vmem:[#allocation8 + $0x34c] sm:$0xf]  ;;  %v9092_v51 = vor.u32 %v13410_v43, %v9091_v42 }
  0x28   :  { %v9084_v45 = vor.u32 %v13409_v35, %v9083_v34  ;;  %v9088_v46 = vor.u32 %v13405_v39, %v9085_v40  ;;  %v9051_v47 = vld [vmem:[#allocation8 + $0x2c0] sm:$0xf]  ;;  %v13397_v52 = vld [vmem:[#allocation8 + $0x2c4] sm:$0xf]  ;;  %v9125_v54 = vld [vmem:[#allocation8 + $0x368] sm:$0xf0] }
  0x29   :  { %648 = vmatpush.bf16.msra.mxu1 %v9116_v30  ;;  %172 = vmatpush.bf16.msra.mxu0 %v13305_v28  ;;  %v13401_v48 = vld [vmem:[#allocation8 + $0x2dc] sm:$0xf0]  ;;  %v9053_v53 = vld [vmem:[#allocation8 + $0x2e0] sm:$0xf0]  ;;  %v9059_v55 = vld [vmem:[#allocation8 + $0x2c8] sm:$0xf]  ;;  %v9128_v61 = vor.u32 %v13414_v50, %v9125_v54 }
  0x2a   :  { %661 = vmatpush.bf16.msra.mxu2 %v9120_v33  ;;  %674 = vmatpush.bf16.msra.mxu3 %v9124_v38  ;;  %v13402_v56 = vld [vmem:[#allocation8 + $0x2e4] sm:$0xf0]  ;;  %v9052_v57 = vor.u32 %v13401_v48, %v9051_v47  ;;  %v9056_v58 = vor.u32 %v13397_v52, %v9053_v53  ;;  %v9019_v59 = vld [vmem:[#allocation8 + $0x280] sm:$0xf]  ;;  %v13406_v62 = vld [vmem:[#allocation8 + $0x30c] sm:$0xf] }
  0x2b   :  { %v13393_v60 = vld [vmem:[#allocation8 + $0x29c] sm:$0xf0]  ;;  %v9060_v63 = vor.u32 %v13402_v56, %v9059_v55  ;;  %v13389_v0 = vld [vmem:[#allocation8 + $0x284] sm:$0xf]  ;;  %v9093_v2 = vld [vmem:[#allocation8 + $0x328] sm:$0xf0] }
  0x2c   :  { %8951 = vmatmul.msk.bf16.vlgmr.msra.gmra.mxu0 %vm158_vm0, %v120_v44  ;;  %v9021_v1 = vld [vmem:[#allocation8 + $0x2a0] sm:$0xf0]  ;;  %v9027_v3 = vld [vmem:[#allocation8 + $0x288] sm:$0xf]  ;;  %v9020_v5 = vor.u32 %v13393_v60, %v9019_v59  ;;  %v8987_v7 = vld [vmem:[#allocation8 + $0x240] sm:$0xf]  ;;  %v9096_v9 = vor.u32 %v13406_v62, %v9093_v2 }
  0x2d   :  { %685 = vmatpush.bf16.msrb.mxu0 %v9192_v36  ;;  %649 = vmatpush.bf16.msra.mxu1 %v9084_v45  ;;  %v13394_v4 = vld [vmem:[#allocation8 + $0x2a4] sm:$0xf0]  ;;  %v9024_v6 = vor.u32 %v13389_v0, %v9021_v1  ;;  %v13385_v8 = vld [vmem:[#allocation8 + $0x25c] sm:$0xf0]  ;;  %v13398_v10 = vld [vmem:[#allocation8 + $0x2cc] sm:$0xf] }
  0x2e   :  { %662 = vmatpush.bf16.msra.mxu2 %v9088_v46  ;;  %675 = vmatpush.bf16.msra.mxu3 %v9092_v51  ;;  %v9028_v11 = vor.u32 %v13394_v4, %v9027_v3  ;;  %v13381_v12 = vld [vmem:[#allocation8 + $0x244] sm:$0xf]  ;;  %v9061_v14 = vld [vmem:[#allocation8 + $0x2e8] sm:$0xf0]  ;;  %v8995_v15 = vld [vmem:[#allocation8 + $0x248] sm:$0xf]  ;;  %v8988_v17 = vor.u32 %v13385_v8, %v8987_v7 }
  0x2f   :  { %v8989_v13 = vld [vmem:[#allocation8 + $0x260] sm:$0xf0]  ;;  %v13386_v16 = vld [vmem:[#allocation8 + $0x264] sm:$0xf0]  ;;  %v13390_v18 = vld [vmem:[#allocation8 + $0x28c] sm:$0xf]  ;;  %v9064_v24 = vor.u32 %v13398_v10, %v9061_v14 }
  0x30   :  { %v9029_v19 = vld [vmem:[#allocation8 + $0x2a8] sm:$0xf0]  ;;  %v8992_v20 = vor.u32 %v13381_v12, %v8989_v13  ;;  %v8955_v21 = vld [vmem:[#allocation8 + $0x200] sm:$0xf]  ;;  %v13373_v23 = vld [vmem:[#allocation8 + $0x204] sm:$0xf]  ;;  %v8996_v25 = vor.u32 %v13386_v16, %v8995_v15 }
  0x31   :  { %686 = vmatpush.bf16.msrb.mxu0 %v9160_v49  ;;  %650 = vmatpush.bf16.msra.mxu1 %v9052_v57  ;;  %v13377_v22 = vld [vmem:[#allocation8 + $0x21c] sm:$0xf0]  ;;  %v8957_v26 = vld [vmem:[#allocation8 + $0x220] sm:$0xf0]  ;;  %v9195_v27 = vld [vmem:[#allocation8 + $0x3d0] sm:$0xf]  ;;  %v9032_v39 = vor.u32 %v13390_v18, %v9029_v19 }
  0x32   :  { %663 = vmatpush.bf16.msra.mxu2 %v9056_v58  ;;  %676 = vmatpush.bf16.msra.mxu3 %v9060_v63  ;;  %v13435_v28 = vld [vmem:[#allocation8 + $0x3ec] sm:$0xf0]  ;;  %v8963_v29 = vld [vmem:[#allocation8 + $0x208] sm:$0xf]  ;;  %v13431_v31 = vld [vmem:[#allocation8 + $0x3d4] sm:$0xf]  ;;  %v8956_v32 = vor.u32 %v13377_v22, %v8955_v21  ;;  %v8960_v36 = vor.u32 %v13373_v23, %v8957_v26 }
  0x33   :  { %v13378_v30 = vld [vmem:[#allocation8 + $0x224] sm:$0xf0]  ;;  %v9197_v33 = vld [vmem:[#allocation8 + $0x3f0] sm:$0xf0]  ;;  %v9203_v34 = vld [vmem:[#allocation8 + $0x3d8] sm:$0xf]  ;;  %v9196_v37 = vor.u32 %v13435_v28, %v9195_v27 }
  0x34   :  { %v13436_v35 = vld [vmem:[#allocation8 + $0x3f4] sm:$0xf0]  ;;  %v9163_v38 = vld [vmem:[#allocation8 + $0x390] sm:$0xf]  ;;  %v8964_v40 = vor.u32 %v13378_v30, %v8963_v29  ;;  %v118_v42 = vld [vmem:[%s15249_s0 + $0x10] sm:$0xff]  ;;  %v9200_v46 = vor.u32 %v13431_v31, %v9197_v33 }
  0x35   :  { %687 = vmatpush.bf16.msrb.mxu0 %v9128_v61  ;;  %651 = vmatpush.bf16.msra.mxu1 %v9020_v5  ;;  %v13427_v41 = vld [vmem:[#allocation8 + $0x3ac] sm:$0xf0]  ;;  %v13382_v44 = vld [vmem:[#allocation8 + $0x24c] sm:$0xf]  ;;  %v9204_v47 = vor.u32 %v13436_v35, %v9203_v34  ;;  %v13423_v48 = vld [vmem:[#allocation8 + $0x394] sm:$0xf] }
  0x36   :  { %664 = vmatpush.bf16.msra.mxu2 %v9024_v6  ;;  %677 = vmatpush.bf16.msra.mxu3 %v9028_v11  ;;  %v119_v43 = vld [vmem:[%s15249_s0 + $0x18] sm:$0xff]  ;;  %v9171_v50 = vld [vmem:[#allocation8 + $0x398] sm:$0xf]  ;;  %v9164_v53 = vor.u32 %v13427_v41, %v9163_v38  ;;  %v13432_v59 = vld [vmem:[#allocation8 + $0x3dc] sm:$0xf]  ;;  %s14601_s0 = smov [#allocation14]  }
  0x37   :  { %v8997_v45 = vld [vmem:[#allocation8 + $0x268] sm:$0xf0]  ;;  %v9165_v49 = vld [vmem:[#allocation8 + $0x3b0] sm:$0xf0]  ;;  %v13428_v51 = vld [vmem:[#allocation8 + $0x3b4] sm:$0xf0]  ;;  %v121_v52 = vpack.c.bf16 %v119_v43, %v118_v42 }
  0x38   :  { %v9000_v54 = vor.u32 %v13382_v44, %v8997_v45  ;;  %v9131_v55 = vld [vmem:[#allocation8 + $0x350] sm:$0xf]  ;;  %v13374_v57 = vld [vmem:[#allocation8 + $0x20c] sm:$0xf]  ;;  %v9168_v60 = vor.u32 %v13423_v48, %v9165_v49  ;;  %v9172_v61 = vor.u32 %v13428_v51, %v9171_v50  ;;  %v9205_v62 = vld [vmem:[#allocation8 + $0x3f8] sm:$0xf0] }
  0x39   :  { %688 = vmatpush.bf16.msrb.mxu0 %v9096_v9  ;;  %652 = vmatpush.bf16.msra.mxu1 %v8988_v17  ;;  %v13419_v56 = vld [vmem:[#allocation8 + $0x36c] sm:$0xf0]  ;;  %v8965_v58 = vld [vmem:[#allocation8 + $0x228] sm:$0xf0]  ;;  %v13415_v63 = vld [vmem:[#allocation8 + $0x354] sm:$0xf]  ;;  %v9208_v7 = vor.u32 %v13432_v59, %v9205_v62 }
  0x3a   :  { %665 = vmatpush.bf16.msra.mxu2 %v8992_v20  ;;  %678 = vmatpush.bf16.msra.mxu3 %v8996_v25  ;;  %v9133_v0 = vld [vmem:[#allocation8 + $0x370] sm:$0xf0]  ;;  %v9132_v1 = vor.u32 %v13419_v56, %v9131_v55  ;;  %v9139_v2 = vld [vmem:[#allocation8 + $0x358] sm:$0xf]  ;;  %v8968_v4 = vor.u32 %v13374_v57, %v8965_v58  ;;  %v9099_v5 = vld [vmem:[#allocation8 + $0x310] sm:$0xf] }
  0x3b   :  { %v13420_v3 = vld [vmem:[#allocation8 + $0x374] sm:$0xf0]  ;;  %v13411_v6 = vld [vmem:[#allocation8 + $0x32c] sm:$0xf0]  ;;  %v13424_v8 = vld [vmem:[#allocation8 + $0x39c] sm:$0xf]  ;;  %v9136_v9 = vor.u32 %v13415_v63, %v9133_v0 }
  0x3c   :  { %8952 = vmatmul.msk.bf16.gmra.mxu0 %vm158_vm0, %v121_v52  ;;  %v9173_v10 = vld [vmem:[#allocation8 + $0x3b8] sm:$0xf0]  ;;  %v9140_v11 = vor.u32 %v13420_v3, %v9139_v2  ;;  %v13407_v12 = vld [vmem:[#allocation8 + $0x314] sm:$0xf]  ;;  %v9100_v14 = vor.u32 %v13411_v6, %v9099_v5  ;;  %v9107_v15 = vld [vmem:[#allocation8 + $0x318] sm:$0xf] }
  0x3d   :  { %689 = vmatpush.bf16.msrb.mxu0 %v9064_v24  ;;  %653 = vmatpush.bf16.msra.mxu1 %v8956_v32  ;;  %v9101_v13 = vld [vmem:[#allocation8 + $0x330] sm:$0xf0]  ;;  %v13412_v16 = vld [vmem:[#allocation8 + $0x334] sm:$0xf0]  ;;  %v9176_v17 = vor.u32 %v13424_v8, %v9173_v10  ;;  %v13416_v19 = vld [vmem:[#allocation8 + $0x35c] sm:$0xf] }
  0x3e   :  { %666 = vmatpush.bf16.msra.mxu2 %v8960_v36  ;;  %679 = vmatpush.bf16.msra.mxu3 %v8964_v40  ;;  %v9104_v18 = vor.u32 %v13407_v12, %v9101_v13  ;;  %v9141_v20 = vld [vmem:[#allocation8 + $0x378] sm:$0xf0]  ;;  %v9108_v21 = vor.u32 %v13412_v16, %v9107_v15  ;;  %v9067_v26 = vld [vmem:[#allocation8 + $0x2d0] sm:$0xf]  ;;  %v13399_v28 = vld [vmem:[#allocation8 + $0x2d4] sm:$0xf] }
  0x3f   :  { %v9144_v22 = vor.u32 %v13416_v19, %v9141_v20  ;;  %v13408_v23 = vld [vmem:[#allocation8 + $0x31c] sm:$0xf]  ;;  %v13403_v27 = vld [vmem:[#allocation8 + $0x2ec] sm:$0xf0]  ;;  %v9069_v30 = vld [vmem:[#allocation8 + $0x2f0] sm:$0xf0] }
  0x40   :  { %v9109_v24 = vld [vmem:[#allocation8 + $0x338] sm:$0xf0]  ;;  %v9068_v29 = vor.u32 %v13403_v27, %v9067_v26  ;;  %v9075_v31 = vld [vmem:[#allocation8 + $0x2d8] sm:$0xf]  ;;  %v9072_v33 = vor.u32 %v13399_v28, %v9069_v30  ;;  %v9035_v38 = vld [vmem:[#allocation8 + $0x290] sm:$0xf] }
  0x41   :  { %698 = vmatpush.bf16.msrb.mxu1 %v9196_v37  ;;  %690 = vmatpush.bf16.msrb.mxu0 %v9032_v39  ;;  %v9112_v25 = vor.u32 %v13408_v23, %v9109_v24  ;;  %v13404_v32 = vld [vmem:[#allocation8 + $0x2f4] sm:$0xf0]  ;;  %v13400_v35 = vld [vmem:[#allocation8 + $0x2dc] sm:$0xf]  ;;  %v13395_v39 = vld [vmem:[#allocation8 + $0x2ac] sm:$0xf0] }
  0x42   :  { %711 = vmatpush.bf16.msrb.mxu2 %v9200_v46  ;;  %724 = vmatpush.bf16.msrb.mxu3 %v9204_v47  ;;  %v9076_v34 = vor.u32 %v13404_v32, %v9075_v31  ;;  %v9077_v36 = vld [vmem:[#allocation8 + $0x2f8] sm:$0xf0]  ;;  %v13391_v40 = vld [vmem:[#allocation8 + $0x294] sm:$0xf]  ;;  %v9036_v41 = vor.u32 %v13395_v39, %v9035_v38  ;;  %v9043_v43 = vld [vmem:[#allocation8 + $0x298] sm:$0xf] }
  0x43   :  { %v9080_v37 = vor.u32 %v13400_v35, %v9077_v36  ;;  %v9037_v42 = vld [vmem:[#allocation8 + $0x2b0] sm:$0xf0]  ;;  %v13396_v44 = vld [vmem:[#allocation8 + $0x2b4] sm:$0xf0]  ;;  %v13392_v47 = vld [vmem:[#allocation8 + $0x29c] sm:$0xf] }
  0x44   :  { %v9040_v45 = vor.u32 %v13391_v40, %v9037_v42  ;;  %v9044_v46 = vor.u32 %v13396_v44, %v9043_v43  ;;  %v9045_v48 = vld [vmem:[#allocation8 + $0x2b8] sm:$0xf0]  ;;  %v9003_v50 = vld [vmem:[#allocation8 + $0x250] sm:$0xf]  ;;  %v13383_v52 = vld [vmem:[#allocation8 + $0x254] sm:$0xf] }
  0x45   :  { %699 = vmatpush.bf16.msrb.mxu1 %v9164_v53  ;;  %691 = vmatpush.bf16.msrb.mxu0 %v9000_v54  ;;  %v9048_v49 = vor.u32 %v13392_v47, %v9045_v48  ;;  %v13387_v51 = vld [vmem:[#allocation8 + $0x26c] sm:$0xf0]  ;;  %v9005_v54 = vld [vmem:[#allocation8 + $0x270] sm:$0xf0]  ;;  %v9011_v55 = vld [vmem:[#allocation8 + $0x258] sm:$0xf] }
  0x46   :  { %712 = vmatpush.bf16.msrb.mxu2 %v9168_v60  ;;  %725 = vmatpush.bf16.msrb.mxu3 %v9172_v61  ;;  %v9004_v53 = vor.u32 %v13387_v51, %v9003_v50  ;;  %v13388_v56 = vld [vmem:[#allocation8 + $0x274] sm:$0xf0]  ;;  %v9008_v57 = vor.u32 %v13383_v52, %v9005_v54  ;;  %v13384_v59 = vld [vmem:[#allocation8 + $0x25c] sm:$0xf]  ;;  %v8971_v62 = vld [vmem:[#allocation8 + $0x210] sm:$0xf] }
  0x47   :  { %v9012_v58 = vor.u32 %v13388_v56, %v9011_v55  ;;  %v9013_v60 = vld [vmem:[#allocation8 + $0x278] sm:$0xf0]  ;;  %v13379_v63 = vld [vmem:[#allocation8 + $0x22c] sm:$0xf0]  ;;  %v13375_v0 = vld [vmem:[#allocation8 + $0x214] sm:$0xf] }
  0x48   :  { %v9016_v61 = vor.u32 %v13384_v59, %v9013_v60  ;;  %v8973_v2 = vld [vmem:[#allocation8 + $0x230] sm:$0xf0]  ;;  %v8979_v3 = vld [vmem:[#allocation8 + $0x218] sm:$0xf]  ;;  %v8981_v8 = vld [vmem:[#allocation8 + $0x238] sm:$0xf0] }
  0x49   :  { %700 = vmatpush.bf16.msrb.mxu1 %v9132_v1  ;;  %692 = vmatpush.bf16.msrb.mxu0 %v8968_v4  ;;  %v8972_v1 = vor.u32 %v13379_v63, %v8971_v62  ;;  %v13380_v4 = vld [vmem:[#allocation8 + $0x234] sm:$0xf0]  ;;  %v8976_v5 = vor.u32 %v13375_v0, %v8973_v2  ;;  %v14408_v10 = vld [vmem:[#allocation6] ss:$0 sm:$0xff]  ;;  %v9435_v16 = vld [vmem:[#allocation8 + $0x1c0] sm:$0xf] }
  0x4a   :  { %713 = vmatpush.bf16.msrb.mxu2 %v9136_v9  ;;  %726 = vmatpush.bf16.msrb.mxu3 %v9140_v11  ;;  %v8980_v6 = vor.u32 %v13380_v4, %v8979_v3  ;;  %v9437_v19 = vld [vmem:[#allocation8 + $0x1e0] sm:$0xf0]  ;;  %v9443_v20 = vld [vmem:[#allocation8 + $0x1c8] sm:$0xf]  ;;  %v13366_v23 = vld [vmem:[#allocation8 + $0x1cc] sm:$0xf] }
  0x4b   :  { %v9445_v24 = vld [vmem:[#allocation8 + $0x1e8] sm:$0xf0]  ;;  %v9403_v28 = vld [vmem:[#allocation8 + $0x180] sm:$0xf]  ;;  %v13357_v32 = vld [vmem:[#allocation8 + $0x184] sm:$0xf] }
  0x4c   :  { %v9448_v31 = vor.u32 %v13366_v23, %v9445_v24  ;;  %v13362_v35 = vld [vmem:[#allocation8 + $0x1a4] sm:$0xf0]  ;;  %v13358_v36 = vld [vmem:[#allocation8 + $0x18c] sm:$0xf]  ;;  %v9371_v40 = vld [vmem:[#allocation8 + $0x140] sm:$0xf] }
  0x4d   :  { %737 = vmatpush.bf16.msra.mxu0 %v9208_v7  ;;  %701 = vmatpush.bf16.msrb.mxu1 %v9100_v14  ;;  %v13376_v7 = vld [vmem:[#allocation8 + $0x21c] sm:$0xf]  ;;  %v13349_v44 = vld [vmem:[#allocation8 + $0x144] sm:$0xf]  ;;  %v13354_v47 = vld [vmem:[#allocation8 + $0x164] sm:$0xf0] }
  0x4e   :  { %714 = vmatpush.bf16.msrb.mxu2 %v9104_v18  ;;  %727 = vmatpush.bf16.msrb.mxu3 %v9108_v21  ;;  %v8984_v9 = vor.u32 %v13376_v7, %v8981_v8  ;;  %v13365_v18 = vld [vmem:[#allocation8 + $0x1c4] sm:$0xf]  ;;  %v13350_v48 = vld [vmem:[#allocation8 + $0x14c] sm:$0xf]  ;;  %v9339_v52 = vld [vmem:[#allocation8 + $0x100] sm:$0xf] }
  0x4f   :  { %v9440_v27 = vor.u32 %v13365_v18, %v9437_v19  ;;  %v13341_v56 = vld [vmem:[#allocation8 + $0x104] sm:$0xf]  ;;  %v13346_v59 = vld [vmem:[#allocation8 + $0x124] sm:$0xf0]  ;;  %v13342_v60 = vld [vmem:[#allocation8 + $0x10c] sm:$0xf] }
  0x50   :  { %v9307_v0 = vld [vmem:[#allocation8 + $0xc0] sm:$0xf]  ;;  %v13333_v4 = vld [vmem:[#allocation8 + $0xc4] sm:$0xf]  ;;  %v13338_v7 = vld [vmem:[#allocation8 + $0xe4] sm:$0xf0] }
  0x51   :  { %738 = vmatpush.bf16.msra.mxu0 %v9176_v17  ;;  %702 = vmatpush.bf16.msrb.mxu1 %v9068_v29  ;;  %v13369_v17 = vld [vmem:[#allocation8 + $0x1dc] sm:$0xf0]  ;;  %v13334_v8 = vld [vmem:[#allocation8 + $0xcc] sm:$0xf]  ;;  %v9277_v18 = vld [vmem:[#allocation8 + $0xa0] sm:$0xf0] }
  0x52   :  { %715 = vmatpush.bf16.msrb.mxu2 %v9072_v33  ;;  %728 = vmatpush.bf16.msrb.mxu3 %v9076_v34  ;;  %v9436_v26 = vor.u32 %v13369_v17, %v9435_v16  ;;  %v13361_v29 = vld [vmem:[#allocation8 + $0x19c] sm:$0xf0]  ;;  %v9405_v33 = vld [vmem:[#allocation8 + $0x1a0] sm:$0xf0]  ;;  %v9411_v34 = vld [vmem:[#allocation8 + $0x188] sm:$0xf] }
  0x53   :  { %v9404_v38 = vor.u32 %v13361_v29, %v9403_v28  ;;  %v9408_v39 = vor.u32 %v13357_v32, %v9405_v33  ;;  %v9412_v42 = vor.u32 %v13362_v35, %v9411_v34  ;;  %v13325_v17 = vld [vmem:[#allocation8 + $0x84] sm:$0xf]  ;;  %v9283_v19 = vld [vmem:[#allocation8 + $0x88] sm:$0xf]  ;;  %v9285_v23 = vld [vmem:[#allocation8 + $0xa8] sm:$0xf0] }
  0x54   :  { %v13321_v28 = vld [vmem:[#allocation8 + $0x5c] sm:$0xf0]  ;;  %v9245_v32 = vld [vmem:[#allocation8 + $0x60] sm:$0xf0]  ;;  %v9251_v33 = vld [vmem:[#allocation8 + $0x48] sm:$0xf] }
  0x55   :  { %739 = vmatpush.bf16.msra.mxu0 %v9144_v22  ;;  %703 = vmatpush.bf16.msrb.mxu1 %v9036_v41  ;;  %v13370_v22 = vld [vmem:[#allocation8 + $0x1e4] sm:$0xf0]  ;;  %v13353_v41 = vld [vmem:[#allocation8 + $0x15c] sm:$0xf0]  ;;  %v13318_v35 = vld [vmem:[#allocation8 + $0x4c] sm:$0xf] }
  0x56   :  { %716 = vmatpush.bf16.msrb.mxu2 %v9040_v45  ;;  %729 = vmatpush.bf16.msrb.mxu3 %v9044_v46  ;;  %v9444_v30 = vor.u32 %v13370_v22, %v9443_v20  ;;  %v9373_v45 = vld [vmem:[#allocation8 + $0x160] sm:$0xf0]  ;;  %v9379_v46 = vld [vmem:[#allocation8 + $0x148] sm:$0xf]  ;;  %v9372_v50 = vor.u32 %v13353_v41, %v9371_v40  ;;  %v13326_v22 = vld [vmem:[#allocation8 + $0x8c] sm:$0xf] }
  0x57   :  { %v9376_v51 = vor.u32 %v13349_v44, %v9373_v45  ;;  %v9380_v54 = vor.u32 %v13354_v47, %v9379_v46  ;;  %v13330_v20 = vld [vmem:[#allocation8 + $0xa4] sm:$0xf0]  ;;  %v13309_v40 = vld [vmem:[#allocation8 + $0x4] sm:$0xf]  ;;  %v13310_v46 = vld [vmem:[#allocation8 + $0xc] sm:$0xf] }
  0x58   :  { %v9284_v29 = vor.u32 %v13330_v20, %v9283_v19  ;;  %v13322_v34 = vld [vmem:[#allocation8 + $0x64] sm:$0xf0]  ;;  %v9213_v41 = vld [vmem:[#allocation8 + $0x20] sm:$0xf0]  ;;  %v9221_v47 = vld [vmem:[#allocation8 + $0x28] sm:$0xf0] }
  0x59   :  { %740 = vmatpush.bf16.msra.mxu0 %v9112_v25  ;;  %704 = vmatpush.bf16.msrb.mxu1 %v9004_v53  ;;  %v13345_v53 = vld [vmem:[#allocation8 + $0x11c] sm:$0xf0]  ;;  %v9219_v44 = vld [vmem:[#allocation8 + $0x8] sm:$0xf]  ;;  %v13352_v19 = vld [vmem:[#allocation8 + $0x15c] sm:$0xf] }
  0x5a   :  { %717 = vmatpush.bf16.msrb.mxu2 %v9008_v57  ;;  %730 = vmatpush.bf16.msrb.mxu3 %v9012_v58  ;;  %v9341_v57 = vld [vmem:[#allocation8 + $0x120] sm:$0xf0]  ;;  %v9347_v58 = vld [vmem:[#allocation8 + $0x108] sm:$0xf]  ;;  %v9340_v62 = vor.u32 %v13345_v53, %v9339_v52  ;;  %v9459_v52 = vld [vmem:[#allocation8 + $0x1d8] sm:$0xf] }
  0x5b   :  { %v9344_v63 = vor.u32 %v13341_v56, %v9341_v57  ;;  %v9348_v2 = vor.u32 %v13346_v59, %v9347_v58  ;;  %v13314_v45 = vld [vmem:[#allocation8 + $0x24] sm:$0xf0]  ;;  %v13368_v56 = vld [vmem:[#allocation8 + $0x1dc] sm:$0xf]  ;;  %v9224_v59 = vor.u32 %v13310_v46, %v9221_v47  ;;  %s8920_s2 = sshll.u32 %s14601_s0, 4  ;;  %s8921_s2 = int_to_ptr.vmem [resolvable:$true] %s8920_s2 }
  0x5c   :  { %v9461_v57 = vld [vmem:[#allocation8 + $0x1f8] sm:$0xf0]  ;;  %v9220_v58 = vor.u32 %v13314_v45, %v9219_v44 }
  0x5d   :  { %741 = vmatpush.bf16.msra.mxu0 %v9080_v37  ;;  %705 = vmatpush.bf16.msrb.mxu1 %v8972_v1  ;;  %v9413_v37 = vld [vmem:[#allocation8 + $0x1a8] sm:$0xf0]  ;;  %v13337_v1 = vld [vmem:[#allocation8 + $0xdc] sm:$0xf0]  ;;  %v9397_v20 = vld [vmem:[#allocation8 + $0x178] sm:$0xf0] }
  0x5e   :  { %718 = vmatpush.bf16.msrb.mxu2 %v8976_v5  ;;  %731 = vmatpush.bf16.msrb.mxu3 %v8980_v6  ;;  %v9416_v43 = vor.u32 %v13358_v36, %v9413_v37  ;;  %v9309_v5 = vld [vmem:[#allocation8 + $0xe0] sm:$0xf0]  ;;  %v9315_v6 = vld [vmem:[#allocation8 + $0xc8] sm:$0xf]  ;;  %v9253_v36 = vld [vmem:[#allocation8 + $0x68] sm:$0xf0] }
  0x5f   :  { %v9211_v37 = vld [vmem:[#allocation8] sm:$0xf]  ;;  %v13336_v44 = vld [vmem:[#allocation8 + $0xdc] sm:$0xf] }
  0x60   :  { %v9333_v45 = vld [vmem:[#allocation8 + $0xf8] sm:$0xf0] }
  0x61   :  { %742 = vmatpush.bf16.msra.mxu0 %v9048_v49  ;;  %v9381_v49 = vld [vmem:[#allocation8 + $0x168] sm:$0xf0] }
  0x62   :  { %v9384_v55 = vor.u32 %v13350_v48, %v9381_v49  ;;  %v9451_v48 = vld [vmem:[#allocation8 + $0x1d0] sm:$0xf] }
  0x63   :  { %v13371_v49 = vld [vmem:[#allocation8 + $0x1ec] sm:$0xf0] }
  0x65   :  { %743 = vmatpush.bf16.msra.mxu0 %v9016_v61  ;;  %v9349_v61 = vld [vmem:[#allocation8 + $0x128] sm:$0xf0] }
  0x66   :  { %v9352_v3 = vor.u32 %v13342_v60, %v9349_v61  ;;  %v9452_v60 = vor.u32 %v13371_v49, %v9451_v48  ;;  %v9291_v48 = vld [vmem:[#allocation8 + $0x90] sm:$0xf] }
  0x67   :  { %v13331_v49 = vld [vmem:[#allocation8 + $0xac] sm:$0xf0] }
  0x69   :  { %744 = vmatpush.bf16.msra.mxu0 %v8984_v9  ;;  %v9317_v9 = vld [vmem:[#allocation8 + $0xe8] sm:$0xf0] }
  0x6a   :  { %v9320_v16 = vor.u32 %v13334_v8, %v9317_v9 }
  0xa9   :  { %v174_v11 = vpop.f32.mrf.mxu0 }
  0xaa   :  { %v175_v12 = vadd.f32 %v14408_v10, %v174_v11  ;;  %v9308_v10 = vor.u32 %v13337_v1, %v9307_v0  ;;  %v9312_v11 = vor.u32 %v13333_v4, %v9309_v5  ;;  %v9464_v1 = vor.u32 %v13368_v56, %v9461_v57  ;;  %v9427_v4 = vld [vmem:[#allocation8 + $0x198] sm:$0xf]  ;;  %v13328_v56 = vld [vmem:[#allocation8 + $0x9c] sm:$0xf] }
  0xab   :  { %v13364_v5 = vld [vmem:[#allocation8 + $0x1b4] sm:$0xf0]  ;;  %v9301_v57 = vld [vmem:[#allocation8 + $0xb8] sm:$0xf0] }
  0xac   :  { %v184_v13 = vmax.f32 %v175_v12, 0.0  ;;  %v9275_v12 = vld [vmem:[#allocation8 + $0x80] sm:$0xf] }
  0xae   :  { %v14674_v14 = vpack.c.bf16 %v184_v13, %v184_v13  ;;  %v13329_v13 = vld [vmem:[#allocation8 + $0x9c] sm:$0xf0] }
  0xaf   :  { %v9276_v24 = vor.u32 %v13329_v13, %v9275_v12  ;;  %v9428_v12 = vor.u32 %v13364_v5, %v9427_v4  ;;  %v13320_v4 = vld [vmem:[#allocation8 + $0x5c] sm:$0xf] }
  0xb0   :  { %v322_v15 = vunpack.c.l.b16 %v14674_v14  ;;  %v9269_v5 = vld [vmem:[#allocation8 + $0x78] sm:$0xf0] }
  0xb2   :  { %v14677_v21 = vpack.c.b16 %v322_v15, %v322_v15  ;;  %v9316_v15 = vor.u32 %v13338_v7, %v9315_v6  ;;  %v13360_v6 = vld [vmem:[#allocation8 + $0x19c] sm:$0xf] }
  0xb3   :  { %v9429_v7 = vld [vmem:[#allocation8 + $0x1b8] sm:$0xf0] }
  0xb4   :  { %v14680_v25 = vrot.slane %v14677_v21, 1  ;;  %v9432_v13 = vor.u32 %v13360_v6, %v9429_v7  ;;  %v9227_v6 = vld [vmem:[#allocation8 + $0x10] sm:$0xf] }
  0xb6   :  { %654 = vmatmul.bf16.vlgmr.msra.gmra.mxu1 %v14680_v25  ;;  %667 = vmatmul.bf16.vlgmr.msra.gmra.mxu2 %v14680_v25 }
  0xb7   :  { %680 = vmatmul.bf16.vlgmr.msra.gmra.mxu3 %v14680_v25  ;;  %693 = vmatmul.bf16.vlgmr.msrb.gmra.mxu0 %v14680_v25 }
  0xb8   :  { %1070 = vmatpush.bf16.msra.mxu1 %v9436_v26  ;;  %1083 = vmatpush.bf16.msra.mxu2 %v9440_v27  ;;  %v9280_v26 = vor.u32 %v13325_v17, %v9277_v18  ;;  %v9243_v27 = vld [vmem:[#allocation8 + $0x40] sm:$0xf]  ;;  %v9395_v17 = vld [vmem:[#allocation8 + $0x158] sm:$0xf] }
  0xb9   :  { %1096 = vmatpush.bf16.msra.mxu3 %v9444_v30  ;;  %1109 = vmatpush.bf16.msrb.mxu0 %v9448_v31  ;;  %v9288_v30 = vor.u32 %v13326_v22, %v9285_v23  ;;  %v13317_v31 = vld [vmem:[#allocation8 + $0x44] sm:$0xf]  ;;  %v13356_v18 = vld [vmem:[#allocation8 + $0x174] sm:$0xf0] }
  0xbc   :  { %1071 = vmatpush.bf16.msra.mxu1 %v9404_v38  ;;  %1084 = vmatpush.bf16.msra.mxu2 %v9408_v39  ;;  %v9248_v38 = vor.u32 %v13317_v31, %v9245_v32  ;;  %v13313_v39 = vld [vmem:[#allocation8 + $0x1c] sm:$0xf0]  ;;  %v9363_v31 = vld [vmem:[#allocation8 + $0x118] sm:$0xf] }
  0xbd   :  { %1097 = vmatpush.bf16.msra.mxu3 %v9412_v42  ;;  %1110 = vmatpush.bf16.msrb.mxu0 %v9416_v43  ;;  %v9252_v42 = vor.u32 %v13322_v34, %v9251_v33  ;;  %v9256_v43 = vor.u32 %v13318_v35, %v9253_v36  ;;  %v9212_v53 = vor.u32 %v13313_v39, %v9211_v37  ;;  %v13348_v32 = vld [vmem:[#allocation8 + $0x134] sm:$0xf0]  ;;  %v13344_v33 = vld [vmem:[#allocation8 + $0x11c] sm:$0xf]  ;;  %v9323_v37 = vld [vmem:[#allocation8 + $0xd0] sm:$0xf] }
  0xbe   :  { %v9365_v34 = vld [vmem:[#allocation8 + $0x138] sm:$0xf0] }
  0xbf   :  { %v9368_v39 = vor.u32 %v13344_v33, %v9365_v34 }
  0xc0   :  { %1072 = vmatpush.bf16.msra.mxu1 %v9372_v50  ;;  %1085 = vmatpush.bf16.msra.mxu2 %v9376_v51  ;;  %v13367_v50 = vld [vmem:[#allocation8 + $0x1d4] sm:$0xf] }
  0xc1   :  { %1098 = vmatpush.bf16.msra.mxu3 %v9380_v54  ;;  %1111 = vmatpush.bf16.msrb.mxu0 %v9384_v55  ;;  %v9453_v51 = vld [vmem:[#allocation8 + $0x1f0] sm:$0xf0]  ;;  %v9216_v54 = vor.u32 %v13309_v40, %v9213_v41  ;;  %v13372_v55 = vld [vmem:[#allocation8 + $0x1f4] sm:$0xf0] }
  0xc2   :  { %v9456_v61 = vor.u32 %v13367_v50, %v9453_v51  ;;  %v9460_v0 = vor.u32 %v13372_v55, %v9459_v52  ;;  %v13335_v40 = vld [vmem:[#allocation8 + $0xd4] sm:$0xf]  ;;  %v9336_v51 = vor.u32 %v13336_v44, %v9333_v45  ;;  %v13332_v55 = vld [vmem:[#allocation8 + $0xb4] sm:$0xf0] }
  0xc3   :  { %v9325_v41 = vld [vmem:[#allocation8 + $0xf0] sm:$0xf0] }
  0xc4   :  { %1073 = vmatpush.bf16.msra.mxu1 %v9340_v62  ;;  %1086 = vmatpush.bf16.msra.mxu2 %v9344_v63  ;;  %v9419_v62 = vld [vmem:[#allocation8 + $0x190] sm:$0xf]  ;;  %v9328_v47 = vor.u32 %v13335_v40, %v9325_v41  ;;  %v13327_v52 = vld [vmem:[#allocation8 + $0x94] sm:$0xf]  ;;  %v9667_v40 = vld [vmem:[#allocation8 + $0x588] sm:$0xf] }
  0xc5   :  { %1099 = vmatpush.bf16.msra.mxu3 %v9348_v2  ;;  %1112 = vmatpush.bf16.msrb.mxu0 %v9352_v3  ;;  %v13363_v63 = vld [vmem:[#allocation8 + $0x1ac] sm:$0xf0]  ;;  %v13359_v2 = vld [vmem:[#allocation8 + $0x194] sm:$0xf]  ;;  %v13490_v41 = vld [vmem:[#allocation8 + $0x5a4] sm:$0xf0] }
  0xc6   :  { %706 = vmatmul.bf16.vlgmr.msrb.gmra.mxu1 %v14680_v25  ;;  %719 = vmatmul.bf16.vlgmr.msrb.gmra.mxu2 %v14680_v25  ;;  %v9421_v3 = vld [vmem:[#allocation8 + $0x1b0] sm:$0xf0]  ;;  %v9420_v8 = vor.u32 %v13363_v63, %v9419_v62  ;;  %v9304_v63 = vor.u32 %v13328_v56, %v9301_v57 }
  0xc7   :  { %732 = vmatmul.bf16.vlgmr.msrb.gmra.mxu3 %v14680_v25  ;;  %745 = vmatmul.bf16.vlgmr.msra.gmra.mxu0 %v14680_v25  ;;  %v9244_v25 = vor.u32 %v13321_v28, %v9243_v27  ;;  %v9424_v9 = vor.u32 %v13359_v2, %v9421_v3  ;;  %v9396_v27 = vor.u32 %v13356_v18, %v9395_v17  ;;  %v9267_v2 = vld [vmem:[#allocation8 + $0x58] sm:$0xf]  ;;  %v13312_v17 = vld [vmem:[#allocation8 + $0x1c] sm:$0xf] }
  0xc8   :  { %1074 = vmatpush.bf16.msra.mxu1 %v9308_v10  ;;  %1087 = vmatpush.bf16.msra.mxu2 %v9312_v11  ;;  %v9387_v10 = vld [vmem:[#allocation8 + $0x150] sm:$0xf]  ;;  %v9400_v28 = vor.u32 %v13352_v19, %v9397_v20  ;;  %v13324_v3 = vld [vmem:[#allocation8 + $0x74] sm:$0xf0]  ;;  %v9237_v18 = vld [vmem:[#allocation8 + $0x38] sm:$0xf0] }
  0xc9   :  { %1100 = vmatpush.bf16.msra.mxu3 %v9316_v15  ;;  %1113 = vmatpush.bf16.msrb.mxu0 %v9320_v16  ;;  %v13355_v11 = vld [vmem:[#allocation8 + $0x16c] sm:$0xf0]  ;;  %v13351_v15 = vld [vmem:[#allocation8 + $0x154] sm:$0xf]  ;;  %v9691_v19 = vld [vmem:[#allocation8 + $0x5c0] sm:$0xf] }
  0xca   :  { %v9389_v16 = vld [vmem:[#allocation8 + $0x170] sm:$0xf0]  ;;  %v9388_v22 = vor.u32 %v13355_v11, %v9387_v10  ;;  %v13497_v20 = vld [vmem:[#allocation8 + $0x5dc] sm:$0xf0] }
  0xcb   :  { %v9392_v23 = vor.u32 %v13351_v15, %v9389_v16  ;;  %v13311_v10 = vld [vmem:[#allocation8 + $0x14] sm:$0xf]  ;;  %v9235_v15 = vld [vmem:[#allocation8 + $0x18] sm:$0xf]  ;;  %v9692_v33 = vor.u32 %v13497_v20, %v9691_v19  ;;  %v13457_v19 = vld [vmem:[#allocation8 + $0x49c] sm:$0xf0] }
  0xcc   :  { %1075 = vmatpush.bf16.msra.mxu1 %v9276_v24  ;;  %1088 = vmatpush.bf16.msra.mxu2 %v9280_v26  ;;  %v9355_v24 = vld [vmem:[#allocation8 + $0x110] sm:$0xf]  ;;  %v9229_v11 = vld [vmem:[#allocation8 + $0x30] sm:$0xf0]  ;;  %v13316_v16 = vld [vmem:[#allocation8 + $0x34] sm:$0xf0] }
  0xcd   :  { %1101 = vmatpush.bf16.msra.mxu3 %v9284_v29  ;;  %1114 = vmatpush.bf16.msrb.mxu0 %v9288_v30  ;;  %v13347_v26 = vld [vmem:[#allocation8 + $0x12c] sm:$0xf0]  ;;  %v13343_v29 = vld [vmem:[#allocation8 + $0x114] sm:$0xf] }
  0xce   :  { %v9357_v30 = vld [vmem:[#allocation8 + $0x130] sm:$0xf0]  ;;  %v9356_v35 = vor.u32 %v13347_v26, %v9355_v24  ;;  %v9699_v24 = vld [vmem:[#allocation8 + $0x5c8] sm:$0xf] }
  0xcf   :  { %v9360_v36 = vor.u32 %v13343_v29, %v9357_v30  ;;  %v13494_v29 = vld [vmem:[#allocation8 + $0x5cc] sm:$0xf] }
  0xd0   :  { %1076 = vmatpush.bf16.msra.mxu1 %v9244_v25  ;;  %1089 = vmatpush.bf16.msra.mxu2 %v9248_v38  ;;  %v13339_v25 = vld [vmem:[#allocation8 + $0xec] sm:$0xf0]  ;;  %v9364_v38 = vor.u32 %v13348_v32, %v9363_v31  ;;  %v9701_v30 = vld [vmem:[#allocation8 + $0x5e8] sm:$0xf0]  ;;  %v9236_v31 = vor.u32 %v13316_v16, %v9235_v15  ;;  %v9240_v32 = vor.u32 %v13312_v17, %v9237_v18  ;;  %v9531_v18 = vld [vmem:[#allocation8 + $0x480] sm:$0xf] }
  0xd1   :  { %1102 = vmatpush.bf16.msra.mxu3 %v9252_v42  ;;  %1115 = vmatpush.bf16.msrb.mxu0 %v9256_v43  ;;  %v9331_v42 = vld [vmem:[#allocation8 + $0xd8] sm:$0xf]  ;;  %v9324_v46 = vor.u32 %v13339_v25, %v9323_v37  ;;  %v9704_v25 = vor.u32 %v13494_v29, %v9701_v30  ;;  %v9573_v15 = vld [vmem:[#allocation8 + $0x4e8] sm:$0xf0]  ;;  %v9532_v30 = vor.u32 %v13457_v19, %v9531_v18 }
  0xd2   :  { %v13340_v43 = vld [vmem:[#allocation8 + $0xf4] sm:$0xf0]  ;;  %v9541_v29 = vld [vmem:[#allocation8 + $0x4a8] sm:$0xf0] }
  0xd3   :  { %v9332_v50 = vor.u32 %v13340_v43, %v9331_v42  ;;  %v13486_v42 = vld [vmem:[#allocation8 + $0x58c] sm:$0xf] }
  0xd4   :  { %1077 = vmatpush.bf16.msra.mxu1 %v9212_v53  ;;  %1090 = vmatpush.bf16.msra.mxu2 %v9216_v54  ;;  %v9293_v53 = vld [vmem:[#allocation8 + $0xb0] sm:$0xf0]  ;;  %v9299_v54 = vld [vmem:[#allocation8 + $0x98] sm:$0xf]  ;;  %v9669_v43 = vld [vmem:[#allocation8 + $0x5a8] sm:$0xf0] }
  0xd5   :  { %1103 = vmatpush.bf16.msra.mxu3 %v9220_v58  ;;  %1116 = vmatpush.bf16.msrb.mxu0 %v9224_v59  ;;  %v9292_v58 = vor.u32 %v13331_v49, %v9291_v48  ;;  %v9296_v59 = vor.u32 %v13327_v52, %v9293_v53  ;;  %v9300_v62 = vor.u32 %v13332_v55, %v9299_v54  ;;  %v9635_v52 = vld [vmem:[#allocation8 + $0x548] sm:$0xf]  ;;  %v13478_v54 = vld [vmem:[#allocation8 + $0x54c] sm:$0xf] }
  0xd6   :  { %v9668_v48 = vor.u32 %v13490_v41, %v9667_v40  ;;  %v9672_v49 = vor.u32 %v13486_v42, %v9669_v43  ;;  %v13482_v53 = vld [vmem:[#allocation8 + $0x564] sm:$0xf0]  ;;  %v9637_v55 = vld [vmem:[#allocation8 + $0x568] sm:$0xf0]  ;;  %v9467_v41 = vld [vmem:[#allocation8 + $0x400] sm:$0xf] }
  0xd7   :  { %1078 = vmatmul.bf16.vlgmr.msra.gmra.mxu1 %v14674_v14  ;;  %1091 = vmatmul.bf16.vlgmr.msra.gmra.mxu2 %v14674_v14  ;;  %v9509_v40 = vld [vmem:[#allocation8 + $0x468] sm:$0xf0] }
  0xd8   :  { %1122 = vmatpush.bf16.msrb.mxu1 %v9452_v60  ;;  %1135 = vmatpush.bf16.msrb.mxu2 %v9456_v61  ;;  %v9259_v60 = vld [vmem:[#allocation8 + $0x50] sm:$0xf] }
  0xd9   :  { %1148 = vmatpush.bf16.msrb.mxu3 %v9460_v0  ;;  %1161 = vmatpush.bf16.msra.mxu0 %v9464_v1  ;;  %v13323_v61 = vld [vmem:[#allocation8 + $0x6c] sm:$0xf0]  ;;  %v13319_v0 = vld [vmem:[#allocation8 + $0x54] sm:$0xf] }
  0xda   :  { %1104 = vmatmul.bf16.vlgmr.msra.gmra.mxu3 %v14674_v14  ;;  %1117 = vmatmul.bf16.vlgmr.msrb.gmra.mxu0 %v14674_v14  ;;  %v9261_v1 = vld [vmem:[#allocation8 + $0x70] sm:$0xf0]  ;;  %v9260_v7 = vor.u32 %v13323_v61, %v9259_v60  ;;  %v9636_v60 = vor.u32 %v13482_v53, %v9635_v52  ;;  %v9640_v61 = vor.u32 %v13478_v54, %v9637_v55  ;;  %v9477_v52 = vld [vmem:[#allocation8 + $0x428] sm:$0xf0]  ;;  %v9707_v53 = vld [vmem:[#allocation8 + $0x5d0] sm:$0xf] }
  0xdb   :  { %v13499_v54 = vld [vmem:[#allocation8 + $0x5ec] sm:$0xf0]  ;;  %v13495_v55 = vld [vmem:[#allocation8 + $0x5d4] sm:$0xf] }
  0xdc   :  { %1123 = vmatpush.bf16.msrb.mxu1 %v9420_v8  ;;  %1136 = vmatpush.bf16.msrb.mxu2 %v9424_v9  ;;  %v9264_v8 = vor.u32 %v13319_v0, %v9261_v1  ;;  %v13315_v9 = vld [vmem:[#allocation8 + $0x2c] sm:$0xf0]  ;;  %v9603_v0 = vld [vmem:[#allocation8 + $0x508] sm:$0xf] }
  0xdd   :  { %1149 = vmatpush.bf16.msrb.mxu3 %v9428_v12  ;;  %1162 = vmatpush.bf16.msra.mxu0 %v9432_v13  ;;  %v9268_v12 = vor.u32 %v13324_v3, %v9267_v2  ;;  %v9272_v13 = vor.u32 %v13320_v4, %v9269_v5  ;;  %v9228_v26 = vor.u32 %v13315_v9, %v9227_v6  ;;  %v13474_v1 = vld [vmem:[#allocation8 + $0x524] sm:$0xf0]  ;;  %v13470_v2 = vld [vmem:[#allocation8 + $0x50c] sm:$0xf]  ;;  %v9563_v5 = vld [vmem:[#allocation8 + $0x4c0] sm:$0xf] }
  0xde   :  { %v9605_v3 = vld [vmem:[#allocation8 + $0x528] sm:$0xf0]  ;;  %v13465_v6 = vld [vmem:[#allocation8 + $0x4dc] sm:$0xf0]  ;;  %v13461_v9 = vld [vmem:[#allocation8 + $0x4c4] sm:$0xf] }
  0xdf   :  { %v9564_v16 = vor.u32 %v13465_v6, %v9563_v5  ;;  %v13487_v6 = vld [vmem:[#allocation8 + $0x594] sm:$0xf] }
  0xe0   :  { %1124 = vmatpush.bf16.msrb.mxu1 %v9388_v22  ;;  %1137 = vmatpush.bf16.msrb.mxu2 %v9392_v23  ;;  %v13493_v22 = vld [vmem:[#allocation8 + $0x5c4] sm:$0xf] }
  0xe1   :  { %1150 = vmatpush.bf16.msrb.mxu3 %v9396_v27  ;;  %1163 = vmatpush.bf16.msra.mxu0 %v9400_v28  ;;  %v9693_v23 = vld [vmem:[#allocation8 + $0x5e0] sm:$0xf0]  ;;  %v9232_v27 = vor.u32 %v13311_v10, %v9229_v11  ;;  %v13498_v28 = vld [vmem:[#allocation8 + $0x5e4] sm:$0xf0] }
  0xe2   :  { %v9696_v34 = vor.u32 %v13493_v22, %v9693_v23  ;;  %v9700_v37 = vor.u32 %v13498_v28, %v9699_v24  ;;  %v9565_v10 = vld [vmem:[#allocation8 + $0x4e0] sm:$0xf0]  ;;  %v9571_v11 = vld [vmem:[#allocation8 + $0x4c8] sm:$0xf]  ;;  %v13454_v28 = vld [vmem:[#allocation8 + $0x48c] sm:$0xf] }
  0xe3   :  { %v9568_v17 = vor.u32 %v13461_v9, %v9565_v10  ;;  %v13453_v23 = vld [vmem:[#allocation8 + $0x484] sm:$0xf]  ;;  %v13492_v9 = vld [vmem:[#allocation8 + $0x5b4] sm:$0xf0]  ;;  %v13488_v10 = vld [vmem:[#allocation8 + $0x59c] sm:$0xf] }
  0xe4   :  { %1125 = vmatpush.bf16.msrb.mxu1 %v9356_v35  ;;  %1138 = vmatpush.bf16.msrb.mxu2 %v9360_v36  ;;  %v9659_v35 = vld [vmem:[#allocation8 + $0x580] sm:$0xf]  ;;  %v9533_v24 = vld [vmem:[#allocation8 + $0x4a0] sm:$0xf0] }
  0xe5   :  { %1151 = vmatpush.bf16.msrb.mxu3 %v9364_v38  ;;  %1164 = vmatpush.bf16.msra.mxu0 %v9368_v39  ;;  %v13489_v36 = vld [vmem:[#allocation8 + $0x59c] sm:$0xf0]  ;;  %v13485_v38 = vld [vmem:[#allocation8 + $0x584] sm:$0xf] }
  0xe6   :  { %v9661_v39 = vld [vmem:[#allocation8 + $0x5a0] sm:$0xf0]  ;;  %v9660_v44 = vor.u32 %v13489_v36, %v9659_v35  ;;  %v9544_v35 = vor.u32 %v13454_v28, %v9541_v29 }
  0xe7   :  { %v9664_v45 = vor.u32 %v13485_v38, %v9661_v39  ;;  %v13445_v36 = vld [vmem:[#allocation8 + $0x444] sm:$0xf]  ;;  %v13450_v38 = vld [vmem:[#allocation8 + $0x464] sm:$0xf0]  ;;  %v13446_v39 = vld [vmem:[#allocation8 + $0x44c] sm:$0xf] }
  0xe8   :  { %1126 = vmatpush.bf16.msrb.mxu1 %v9324_v46  ;;  %1139 = vmatpush.bf16.msrb.mxu2 %v9328_v47  ;;  %v9627_v46 = vld [vmem:[#allocation8 + $0x540] sm:$0xf] }
  0xe9   :  { %1152 = vmatpush.bf16.msrb.mxu3 %v9332_v50  ;;  %1165 = vmatpush.bf16.msra.mxu0 %v9336_v51  ;;  %v13481_v47 = vld [vmem:[#allocation8 + $0x55c] sm:$0xf0]  ;;  %v13477_v50 = vld [vmem:[#allocation8 + $0x544] sm:$0xf] }
  0xea   :  { %v9629_v51 = vld [vmem:[#allocation8 + $0x560] sm:$0xf0]  ;;  %v9628_v56 = vor.u32 %v13481_v47, %v9627_v46 }
  0xeb   :  { %v9632_v57 = vor.u32 %v13477_v50, %v9629_v51  ;;  %v9469_v46 = vld [vmem:[#allocation8 + $0x420] sm:$0xf0]  ;;  %v13442_v50 = vld [vmem:[#allocation8 + $0x424] sm:$0xf0]  ;;  %v13438_v51 = vld [vmem:[#allocation8 + $0x40c] sm:$0xf] }
  0xec   :  { %1127 = vmatpush.bf16.msrb.mxu1 %v9292_v58  ;;  %1140 = vmatpush.bf16.msrb.mxu2 %v9296_v59  ;;  %v9595_v58 = vld [vmem:[#allocation8 + $0x500] sm:$0xf] }
  0xed   :  { %1153 = vmatpush.bf16.msrb.mxu3 %v9300_v62  ;;  %1166 = vmatpush.bf16.msra.mxu0 %v9304_v63  ;;  %v13473_v59 = vld [vmem:[#allocation8 + $0x51c] sm:$0xf0]  ;;  %v13469_v62 = vld [vmem:[#allocation8 + $0x504] sm:$0xf] }
  0xee   :  { %v9597_v63 = vld [vmem:[#allocation8 + $0x520] sm:$0xf0]  ;;  %v9596_v4 = vor.u32 %v13473_v59, %v9595_v58 }
  0xf0   :  { %1128 = vmatpush.bf16.msrb.mxu1 %v9260_v7  ;;  %1141 = vmatpush.bf16.msrb.mxu2 %v9264_v8  ;;  %v9604_v7 = vor.u32 %v13474_v1, %v9603_v0  ;;  %v9608_v8 = vor.u32 %v13470_v2, %v9605_v3  ;;  %v9480_v0 = vor.u32 %v13438_v51, %v9477_v52  ;;  %v9675_v3 = vld [vmem:[#allocation8 + $0x590] sm:$0xf]  ;;  %v9589_v51 = vld [vmem:[#allocation8 + $0x4f8] sm:$0xf0] }
  0xf1   :  { %1154 = vmatpush.bf16.msrb.mxu3 %v9268_v12  ;;  %1167 = vmatpush.bf16.msra.mxu0 %v9272_v13  ;;  %v13466_v12 = vld [vmem:[#allocation8 + $0x4e4] sm:$0xf0]  ;;  %v13462_v13 = vld [vmem:[#allocation8 + $0x4cc] sm:$0xf]  ;;  %v9708_v1 = vor.u32 %v13499_v54, %v9707_v53  ;;  %v9547_v54 = vld [vmem:[#allocation8 + $0x490] sm:$0xf] }
  0xf2   :  { %v9572_v20 = vor.u32 %v13466_v12, %v9571_v11  ;;  %v9576_v22 = vor.u32 %v13462_v13, %v9573_v15  ;;  %v9685_v11 = vld [vmem:[#allocation8 + $0x5b8] sm:$0xf0]  ;;  %v14699_v12 = vrot.slane %v14677_v21, 2 }
  0xf3   :  { %v9688_v19 = vor.u32 %v13488_v10, %v9685_v11  ;;  %v13448_v10 = vld [vmem:[#allocation8 + $0x45c] sm:$0xf] }
  0xf4   :  { %1129 = vmatpush.bf16.msrb.mxu1 %v9228_v26  ;;  %1142 = vmatpush.bf16.msrb.mxu2 %v9232_v27  ;;  %v9539_v26 = vld [vmem:[#allocation8 + $0x488] sm:$0xf]  ;;  %v9525_v11 = vld [vmem:[#allocation8 + $0x478] sm:$0xf0] }
  0xf5   :  { %1155 = vmatpush.bf16.msrb.mxu3 %v9236_v31  ;;  %1168 = vmatpush.bf16.msra.mxu0 %v9240_v32  ;;  %v13458_v27 = vld [vmem:[#allocation8 + $0x4a4] sm:$0xf0]  ;;  %v9536_v31 = vor.u32 %v13453_v23, %v9533_v24  ;;  %v9499_v32 = vld [vmem:[#allocation8 + $0x440] sm:$0xf]  ;;  %v9651_v23 = vld [vmem:[#allocation8 + $0x558] sm:$0xf] }
  0xf6   :  { %v13484_v24 = vld [vmem:[#allocation8 + $0x574] sm:$0xf0] }
  0xf7   :  { %1130 = vmatmul.bf16.vlgmr.msrb.gmra.mxu1 %v14674_v14  ;;  %1143 = vmatmul.bf16.vlgmr.msrb.gmra.mxu2 %v14674_v14 }
  0xf8   :  { %1561 = vmatpush.bf16.msra.mxu1 %v9692_v33  ;;  %1574 = vmatpush.bf16.msra.mxu2 %v9696_v34  ;;  %v13449_v33 = vld [vmem:[#allocation8 + $0x45c] sm:$0xf0]  ;;  %v9540_v34 = vor.u32 %v13458_v27, %v9539_v26  ;;  %v13480_v26 = vld [vmem:[#allocation8 + $0x55c] sm:$0xf] }
  0xf9   :  { %1587 = vmatpush.bf16.msra.mxu3 %v9700_v37  ;;  %1600 = vmatpush.bf16.msrb.mxu0 %v9704_v25  ;;  %v9501_v37 = vld [vmem:[#allocation8 + $0x460] sm:$0xf0]  ;;  %v9507_v25 = vld [vmem:[#allocation8 + $0x448] sm:$0xf]  ;;  %v9500_v42 = vor.u32 %v13449_v33, %v9499_v32  ;;  %v9653_v27 = vld [vmem:[#allocation8 + $0x578] sm:$0xf0]  ;;  %v9652_v32 = vor.u32 %v13484_v24, %v9651_v23 }
  0xfa   :  { %1156 = vmatmul.bf16.vlgmr.msrb.gmra.mxu3 %v14674_v14  ;;  %1169 = vmatmul.bf16.vlgmr.msra.gmra.mxu0 %v14674_v14  ;;  %v9600_v14 = vor.u32 %v13469_v62, %v9597_v63  ;;  %v9504_v43 = vor.u32 %v13445_v36, %v9501_v37  ;;  %v9508_v47 = vor.u32 %v13450_v38, %v9507_v25  ;;  %v9717_v62 = vld [vmem:[#allocation8 + $0x5f8] sm:$0xf0]  ;;  %v9619_v36 = vld [vmem:[#allocation8 + $0x518] sm:$0xf] }
  0xfb   :  { %v9656_v33 = vor.u32 %v13480_v26, %v9653_v27  ;;  %v13476_v37 = vld [vmem:[#allocation8 + $0x534] sm:$0xf0]  ;;  %v13472_v25 = vld [vmem:[#allocation8 + $0x51c] sm:$0xf] }
  0xfc   :  { %1562 = vmatpush.bf16.msra.mxu1 %v9660_v44  ;;  %1575 = vmatpush.bf16.msra.mxu2 %v9664_v45  ;;  %v13441_v44 = vld [vmem:[#allocation8 + $0x41c] sm:$0xf0]  ;;  %v13437_v45 = vld [vmem:[#allocation8 + $0x404] sm:$0xf]  ;;  %v9621_v38 = vld [vmem:[#allocation8 + $0x538] sm:$0xf0] }
  0xfd   :  { %1588 = vmatpush.bf16.msra.mxu3 %v9668_v48  ;;  %1601 = vmatpush.bf16.msrb.mxu0 %v9672_v49  ;;  %v9512_v48 = vor.u32 %v13446_v39, %v9509_v40  ;;  %v9475_v49 = vld [vmem:[#allocation8 + $0x408] sm:$0xf]  ;;  %v9468_v58 = vor.u32 %v13441_v44, %v9467_v41  ;;  %v9472_v59 = vor.u32 %v13437_v45, %v9469_v46  ;;  %v14705_v39 = vpop.f32.mrf.mxu0  ;;  %v13463_v46 = vld [vmem:[#allocation8 + $0x4d4] sm:$0xf]  ;;  %v9491_v23 = vld [vmem:[#allocation8 + $0x418] sm:$0xf] }
  0xfe   :  { %v9476_v63 = vor.u32 %v13442_v50, %v9475_v49  ;;  %v9620_v44 = vor.u32 %v13476_v37, %v9619_v36  ;;  %v9624_v45 = vor.u32 %v13472_v25, %v9621_v38  ;;  %v13468_v49 = vld [vmem:[#allocation8 + $0x4f4] sm:$0xf0]  ;;  %v13464_v50 = vld [vmem:[#allocation8 + $0x4dc] sm:$0xf]  ;;  %v13558_v36 = vld [vmem:[#allocation8 + $0x7cc] sm:$0xf] }
  0xff   :  { %v13444_v24 = vld [vmem:[#allocation8 + $0x434] sm:$0xf0]  ;;  %v13440_v26 = vld [vmem:[#allocation8 + $0x41c] sm:$0xf]  ;;  %v9957_v37 = vld [vmem:[#allocation8 + $0x7e8] sm:$0xf0] }
 0x100   :  { %1563 = vmatpush.bf16.msra.mxu1 %v9628_v56  ;;  %1576 = vmatpush.bf16.msra.mxu2 %v9632_v57  ;;  %v9709_v56 = vld [vmem:[#allocation8 + $0x5f0] sm:$0xf0]  ;;  %v9715_v57 = vld [vmem:[#allocation8 + $0x5d8] sm:$0xf]  ;;  %v9493_v27 = vld [vmem:[#allocation8 + $0x438] sm:$0xf0]  ;;  %v9492_v25 = vor.u32 %v13444_v24, %v9491_v23 }
 0x101   :  { %1589 = vmatpush.bf16.msra.mxu3 %v9636_v60  ;;  %1602 = vmatpush.bf16.msrb.mxu0 %v9640_v61  ;;  %v13500_v60 = vld [vmem:[#allocation8 + $0x5f4] sm:$0xf0]  ;;  %v13496_v61 = vld [vmem:[#allocation8 + $0x5dc] sm:$0xf]  ;;  %v9712_v2 = vor.u32 %v13495_v55, %v9709_v56  ;;  %v13459_v55 = vld [vmem:[#allocation8 + $0x4ac] sm:$0xf0]  ;;  %v9496_v38 = vor.u32 %v13440_v26, %v9493_v27 }
 0x102   :  { %v9720_v5 = vor.u32 %v13496_v61, %v9717_v62  ;;  %v13460_v61 = vld [vmem:[#allocation8 + $0x4b4] sm:$0xf0]  ;;  %v13456_v62 = vld [vmem:[#allocation8 + $0x49c] sm:$0xf]  ;;  %v13525_v24 = vld [vmem:[#allocation8 + $0x6c4] sm:$0xf] }
 0x103   :  { %v9821_v26 = vld [vmem:[#allocation8 + $0x6e0] sm:$0xf0]  ;;  %v9827_v27 = vld [vmem:[#allocation8 + $0x6c8] sm:$0xf] }
 0x104   :  { %1564 = vmatpush.bf16.msra.mxu1 %v9596_v4  ;;  %1577 = vmatpush.bf16.msra.mxu2 %v9600_v14  ;;  %v13491_v4 = vld [vmem:[#allocation8 + $0x5ac] sm:$0xf0]  ;;  %v9716_v14 = vor.u32 %v13500_v60, %v9715_v57  ;;  %v9592_v57 = vor.u32 %v13464_v50, %v9589_v51  ;;  %v9555_v60 = vld [vmem:[#allocation8 + $0x498] sm:$0xf]  ;;  %v13554_v50 = vld [vmem:[#allocation8 + $0x7a4] sm:$0xf0] }
 0x105   :  { %1590 = vmatpush.bf16.msra.mxu3 %v9604_v7  ;;  %1603 = vmatpush.bf16.msrb.mxu0 %v9608_v8  ;;  %v9677_v7 = vld [vmem:[#allocation8 + $0x5b0] sm:$0xf0]  ;;  %v9683_v8 = vld [vmem:[#allocation8 + $0x598] sm:$0xf]  ;;  %v9676_v13 = vor.u32 %v13491_v4, %v9675_v3  ;;  %v9515_v3 = vld [vmem:[#allocation8 + $0x450] sm:$0xf] }
 0x106   :  { %v9680_v15 = vor.u32 %v13487_v6, %v9677_v7  ;;  %v9684_v18 = vor.u32 %v13492_v9, %v9683_v8  ;;  %v13451_v4 = vld [vmem:[#allocation8 + $0x46c] sm:$0xf0]  ;;  %v13447_v6 = vld [vmem:[#allocation8 + $0x454] sm:$0xf]  ;;  %v9523_v8 = vld [vmem:[#allocation8 + $0x458] sm:$0xf] }
 0x107   :  { %v9517_v7 = vld [vmem:[#allocation8 + $0x470] sm:$0xf0]  ;;  %v13452_v9 = vld [vmem:[#allocation8 + $0x474] sm:$0xf0]  ;;  %v13550_v51 = vld [vmem:[#allocation8 + $0x78c] sm:$0xf] }
 0x108   :  { %1565 = vmatpush.bf16.msra.mxu1 %v9564_v16  ;;  %1578 = vmatpush.bf16.msra.mxu2 %v9568_v17  ;;  %v9643_v16 = vld [vmem:[#allocation8 + $0x550] sm:$0xf] }
 0x109   :  { %1591 = vmatpush.bf16.msra.mxu3 %v9572_v20  ;;  %1604 = vmatpush.bf16.msrb.mxu0 %v9576_v22  ;;  %v13483_v17 = vld [vmem:[#allocation8 + $0x56c] sm:$0xf0]  ;;  %v13479_v20 = vld [vmem:[#allocation8 + $0x554] sm:$0xf] }
 0x10a   :  { %v9645_v22 = vld [vmem:[#allocation8 + $0x570] sm:$0xf0]  ;;  %v9644_v28 = vor.u32 %v13483_v17, %v9643_v16  ;;  %v9520_v16 = vor.u32 %v13447_v6, %v9517_v7  ;;  %v13443_v17 = vld [vmem:[#allocation8 + $0x42c] sm:$0xf0]  ;;  %v13537_v6 = vld [vmem:[#allocation8 + $0x71c] sm:$0xf0] }
 0x10b   :  { %v9648_v29 = vor.u32 %v13479_v20, %v9645_v22  ;;  %v9524_v20 = vor.u32 %v13452_v9, %v9523_v8  ;;  %v9528_v22 = vor.u32 %v13448_v10, %v9525_v11  ;;  %v13533_v9 = vld [vmem:[#allocation8 + $0x704] sm:$0xf]  ;;  %v9859_v11 = vld [vmem:[#allocation8 + $0x708] sm:$0xf] }
 0x10c   :  { %1566 = vmatpush.bf16.msra.mxu1 %v9532_v30  ;;  %1579 = vmatpush.bf16.msra.mxu2 %v9536_v31  ;;  %v9611_v30 = vld [vmem:[#allocation8 + $0x510] sm:$0xf]  ;;  %v9853_v10 = vld [vmem:[#allocation8 + $0x720] sm:$0xf0] }
 0x10d   :  { %1592 = vmatpush.bf16.msra.mxu3 %v9540_v34  ;;  %1605 = vmatpush.bf16.msrb.mxu0 %v9544_v35  ;;  %v13475_v31 = vld [vmem:[#allocation8 + $0x52c] sm:$0xf0]  ;;  %v13471_v34 = vld [vmem:[#allocation8 + $0x514] sm:$0xf] }
 0x10e   :  { %v9613_v35 = vld [vmem:[#allocation8 + $0x530] sm:$0xf0]  ;;  %v9612_v40 = vor.u32 %v13475_v31, %v9611_v30  ;;  %v13557_v30 = vld [vmem:[#allocation8 + $0x7c4] sm:$0xf] }
 0x10f   :  { %v9616_v41 = vor.u32 %v13471_v34, %v9613_v35  ;;  %v9949_v31 = vld [vmem:[#allocation8 + $0x7e0] sm:$0xf0]  ;;  %v13562_v35 = vld [vmem:[#allocation8 + $0x7e4] sm:$0xf0] }
 0x110   :  { %1567 = vmatpush.bf16.msra.mxu1 %v9500_v42  ;;  %1580 = vmatpush.bf16.msra.mxu2 %v9504_v43  ;;  %v9579_v42 = vld [vmem:[#allocation8 + $0x4d0] sm:$0xf] }
 0x111   :  { %1593 = vmatpush.bf16.msra.mxu3 %v9508_v47  ;;  %1606 = vmatpush.bf16.msrb.mxu0 %v9512_v48  ;;  %v13467_v43 = vld [vmem:[#allocation8 + $0x4ec] sm:$0xf0]  ;;  %v9581_v47 = vld [vmem:[#allocation8 + $0x4f0] sm:$0xf0]  ;;  %v9587_v48 = vld [vmem:[#allocation8 + $0x4d8] sm:$0xf] }
 0x112   :  { %v9580_v52 = vor.u32 %v13467_v43, %v9579_v42  ;;  %v9584_v53 = vor.u32 %v13463_v46, %v9581_v47  ;;  %v9588_v56 = vor.u32 %v13468_v49, %v9587_v48  ;;  %v9952_v42 = vor.u32 %v13557_v30, %v9949_v31  ;;  %v9915_v43 = vld [vmem:[#allocation8 + $0x780] sm:$0xf]  ;;  %v13549_v47 = vld [vmem:[#allocation8 + $0x784] sm:$0xf]  ;;  %v9923_v49 = vld [vmem:[#allocation8 + $0x788] sm:$0xf] }
 0x113   :  { %v9960_v46 = vor.u32 %v13558_v36, %v9957_v37  ;;  %v9917_v48 = vld [vmem:[#allocation8 + $0x7a0] sm:$0xf0]  ;;  %v13526_v30 = vld [vmem:[#allocation8 + $0x6cc] sm:$0xf]  ;;  %v9787_v36 = vld [vmem:[#allocation8 + $0x680] sm:$0xf] }
 0x114   :  { %1568 = vmatpush.bf16.msra.mxu1 %v9468_v58  ;;  %1581 = vmatpush.bf16.msra.mxu2 %v9472_v59  ;;  %v13455_v58 = vld [vmem:[#allocation8 + $0x494] sm:$0xf]  ;;  %v9829_v31 = vld [vmem:[#allocation8 + $0x6e8] sm:$0xf0]  ;;  %v13521_v37 = vld [vmem:[#allocation8 + $0x69c] sm:$0xf0] }
 0x115   :  { %1594 = vmatpush.bf16.msra.mxu3 %v9476_v63  ;;  %1607 = vmatpush.bf16.msrb.mxu0 %v9480_v0  ;;  %v9549_v59 = vld [vmem:[#allocation8 + $0x4b0] sm:$0xf0]  ;;  %v9557_v63 = vld [vmem:[#allocation8 + $0x4b8] sm:$0xf0]  ;;  %v14707_v0 = vpop.f32.mrf.mxu0 }
 0x117   :  { %1569 = vmatmul.bf16.vlgmr.msra.gmra.mxu1 %v14699_v12  ;;  %1582 = vmatmul.bf16.vlgmr.msra.gmra.mxu2 %v14699_v12 }
 0x118   :  { %1613 = vmatpush.bf16.msrb.mxu1 %v9708_v1  ;;  %1626 = vmatpush.bf16.msrb.mxu2 %v9712_v2  ;;  %v9548_v1 = vor.u32 %v13459_v55, %v9547_v54  ;;  %v9552_v2 = vor.u32 %v13455_v58, %v9549_v59  ;;  %v9920_v54 = vor.u32 %v13549_v47, %v9917_v48  ;;  %v9883_v55 = vld [vmem:[#allocation8 + $0x740] sm:$0xf]  ;;  %v13541_v59 = vld [vmem:[#allocation8 + $0x744] sm:$0xf] }
 0x119   :  { %1639 = vmatpush.bf16.msrb.mxu3 %v9716_v14  ;;  %1652 = vmatpush.bf16.msra.mxu0 %v9720_v5  ;;  %v9556_v14 = vor.u32 %v13460_v61, %v9555_v60  ;;  %v9560_v5 = vor.u32 %v13456_v62, %v9557_v63  ;;  %v9885_v60 = vld [vmem:[#allocation8 + $0x760] sm:$0xf0]  ;;  %v9891_v61 = vld [vmem:[#allocation8 + $0x748] sm:$0xf]  ;;  %v13542_v63 = vld [vmem:[#allocation8 + $0x74c] sm:$0xf]  ;;  %v9788_v47 = vor.u32 %v13521_v37, %v9787_v36 }
 0x11a   :  { %1595 = vmatmul.bf16.vlgmr.msra.gmra.mxu3 %v14699_v12  ;;  %1608 = vmatmul.bf16.vlgmr.msrb.gmra.mxu0 %v14699_v12  ;;  %v13546_v62 = vld [vmem:[#allocation8 + $0x764] sm:$0xf0] }
 0x11b   :  { %v9892_v7 = vor.u32 %v13546_v62, %v9891_v61  ;;  %v9723_v62 = vld [vmem:[#allocation8 + $0x600] sm:$0xf] }
 0x11c   :  { %1614 = vmatpush.bf16.msrb.mxu1 %v9676_v13  ;;  %1627 = vmatpush.bf16.msrb.mxu2 %v9680_v15  ;;  %v9483_v13 = vld [vmem:[#allocation8 + $0x410] sm:$0xf]  ;;  %v9516_v15 = vor.u32 %v13451_v4, %v9515_v3  ;;  %v9888_v4 = vor.u32 %v13541_v59, %v9885_v60  ;;  %v13510_v59 = vld [vmem:[#allocation8 + $0x64c] sm:$0xf] }
 0x11d   :  { %1640 = vmatpush.bf16.msrb.mxu3 %v9684_v18  ;;  %1653 = vmatpush.bf16.msra.mxu0 %v9688_v19  ;;  %v13439_v18 = vld [vmem:[#allocation8 + $0x414] sm:$0xf]  ;;  %v9765_v60 = vld [vmem:[#allocation8 + $0x668] sm:$0xf0] }
 0x11e   :  { %v9485_v19 = vld [vmem:[#allocation8 + $0x430] sm:$0xf0] }
 0x11f   :  { %v9488_v34 = vor.u32 %v13439_v18, %v9485_v19  ;;  %v9819_v18 = vld [vmem:[#allocation8 + $0x6c0] sm:$0xf] }
 0x120   :  { %1615 = vmatpush.bf16.msrb.mxu1 %v9644_v28  ;;  %1628 = vmatpush.bf16.msrb.mxu2 %v9648_v29  ;;  %v9947_v28 = vld [vmem:[#allocation8 + $0x7c0] sm:$0xf] }
 0x121   :  { %1641 = vmatpush.bf16.msrb.mxu3 %v9652_v32  ;;  %1654 = vmatpush.bf16.msra.mxu0 %v9656_v33  ;;  %v13561_v29 = vld [vmem:[#allocation8 + $0x7dc] sm:$0xf0]  ;;  %v9955_v32 = vld [vmem:[#allocation8 + $0x7c8] sm:$0xf]  ;;  %v9484_v33 = vor.u32 %v13443_v17, %v9483_v13  ;;  %v9856_v17 = vor.u32 %v13533_v9, %v9853_v10 }
 0x122   :  { %v13538_v13 = vld [vmem:[#allocation8 + $0x724] sm:$0xf0]  ;;  %v13529_v19 = vld [vmem:[#allocation8 + $0x6dc] sm:$0xf0] }
 0x123   :  { %v9731_v9 = vld [vmem:[#allocation8 + $0x608] sm:$0xf] }
 0x124   :  { %1616 = vmatpush.bf16.msrb.mxu1 %v9612_v40  ;;  %1629 = vmatpush.bf16.msrb.mxu2 %v9616_v41  ;;  %v14709_v40 = vpop.f32.mrf.mxu0  ;;  %v9948_v41 = vor.u32 %v13561_v29, %v9947_v28  ;;  %v13530_v29 = vld [vmem:[#allocation8 + $0x6e4] sm:$0xf0] }
 0x125   :  { %1642 = vmatpush.bf16.msrb.mxu3 %v9620_v44  ;;  %1655 = vmatpush.bf16.msra.mxu0 %v9624_v45  ;;  %v13553_v44 = vld [vmem:[#allocation8 + $0x79c] sm:$0xf0]  ;;  %v9956_v45 = vor.u32 %v13562_v35, %v9955_v32  ;;  %v13506_v10 = vld [vmem:[#allocation8 + $0x624] sm:$0xf0] }
 0x128   :  { %1617 = vmatpush.bf16.msrb.mxu1 %v9580_v52  ;;  %1630 = vmatpush.bf16.msrb.mxu2 %v9584_v53  ;;  %v9925_v52 = vld [vmem:[#allocation8 + $0x7a8] sm:$0xf0]  ;;  %v9916_v53 = vor.u32 %v13553_v44, %v9915_v43  ;;  %v9795_v43 = vld [vmem:[#allocation8 + $0x688] sm:$0xf] }
 0x129   :  { %1643 = vmatpush.bf16.msrb.mxu3 %v9588_v56  ;;  %1656 = vmatpush.bf16.msra.mxu0 %v9592_v57  ;;  %v13545_v56 = vld [vmem:[#allocation8 + $0x75c] sm:$0xf0]  ;;  %v9924_v57 = vor.u32 %v13554_v50, %v9923_v49  ;;  %v9928_v58 = vor.u32 %v13550_v51, %v9925_v52  ;;  %v13522_v44 = vld [vmem:[#allocation8 + $0x6a4] sm:$0xf0] }
 0x12a   :  { %v9884_v3 = vor.u32 %v13545_v56, %v9883_v55  ;;  %v9755_v49 = vld [vmem:[#allocation8 + $0x640] sm:$0xf]  ;;  %v9796_v51 = vor.u32 %v13522_v44, %v9795_v43  ;;  %v9757_v55 = vld [vmem:[#allocation8 + $0x660] sm:$0xf0]  ;;  %v9763_v56 = vld [vmem:[#allocation8 + $0x648] sm:$0xf] }
 0x12b   :  { %v13513_v50 = vld [vmem:[#allocation8 + $0x65c] sm:$0xf0]  ;;  %v13556_v44 = vld [vmem:[#allocation8 + $0x7b4] sm:$0xf0] }
 0x12c   :  { %1618 = vmatpush.bf16.msrb.mxu1 %v9548_v1  ;;  %1631 = vmatpush.bf16.msrb.mxu2 %v9552_v2  ;;  %v9893_v1 = vld [vmem:[#allocation8 + $0x768] sm:$0xf0] }
 0x12d   :  { %1644 = vmatpush.bf16.msrb.mxu3 %v9556_v14  ;;  %1657 = vmatpush.bf16.msra.mxu0 %v9560_v5  ;;  %v9851_v5 = vld [vmem:[#allocation8 + $0x700] sm:$0xf]  ;;  %v9896_v8 = vor.u32 %v13542_v63, %v9893_v1  ;;  %v9756_v63 = vor.u32 %v13513_v50, %v9755_v49  ;;  %v9899_v50 = vld [vmem:[#allocation8 + $0x750] sm:$0xf] }
 0x130   :  { %1619 = vmatpush.bf16.msrb.mxu1 %v9516_v15  ;;  %1632 = vmatpush.bf16.msrb.mxu2 %v9520_v16  ;;  %v13534_v15 = vld [vmem:[#allocation8 + $0x70c] sm:$0xf]  ;;  %v9852_v16 = vor.u32 %v13537_v6, %v9851_v5  ;;  %v13501_v5 = vld [vmem:[#allocation8 + $0x604] sm:$0xf] }
 0x131   :  { %1645 = vmatpush.bf16.msrb.mxu3 %v9524_v20  ;;  %1658 = vmatpush.bf16.msra.mxu0 %v9528_v22  ;;  %v9860_v20 = vor.u32 %v13538_v13, %v9859_v11  ;;  %v9725_v6 = vld [vmem:[#allocation8 + $0x620] sm:$0xf0]  ;;  %v13502_v11 = vld [vmem:[#allocation8 + $0x60c] sm:$0xf] }
 0x132   :  { %v9733_v13 = vld [vmem:[#allocation8 + $0x628] sm:$0xf0] }
 0x133   :  { %v14715_v2 = vpop.f32.mrf.mxu1 }
 0x134   :  { %1620 = vmatpush.bf16.msrb.mxu1 %v9484_v33  ;;  %1633 = vmatpush.bf16.msrb.mxu2 %v9488_v34  ;;  %v14717_v14 = vpop.f32.mrf.mxu0  ;;  %v9820_v33 = vor.u32 %v13529_v19, %v9819_v18  ;;  %v9824_v34 = vor.u32 %v13525_v24, %v9821_v26  ;;  %v9971_v18 = vld [vmem:[#allocation8 + $0x7d8] sm:$0xf]  ;;  %v13560_v24 = vld [vmem:[#allocation8 + $0x7dc] sm:$0xf] }
 0x135   :  { %1646 = vmatpush.bf16.msrb.mxu3 %v9492_v25  ;;  %1659 = vmatpush.bf16.msra.mxu0 %v9496_v38  ;;  %v9828_v25 = vor.u32 %v13530_v29, %v9827_v27  ;;  %v9832_v38 = vor.u32 %v13526_v30, %v9829_v31  ;;  %v9973_v26 = vld [vmem:[#allocation8 + $0x7f8] sm:$0xf0]  ;;  %v9732_v27 = vor.u32 %v13506_v10, %v9731_v9  ;;  %v9875_v9 = vld [vmem:[#allocation8 + $0x718] sm:$0xf] }
 0x136   :  { %v9736_v29 = vor.u32 %v13502_v11, %v9733_v13  ;;  %v9976_v37 = vor.u32 %v13560_v24, %v9973_v26  ;;  %v13540_v10 = vld [vmem:[#allocation8 + $0x734] sm:$0xf0]  ;;  %v13536_v11 = vld [vmem:[#allocation8 + $0x71c] sm:$0xf] }
 0x137   :  { %1621 = vmatmul.bf16.vlgmr.msrb.gmra.mxu1 %v14699_v12  ;;  %1634 = vmatmul.bf16.vlgmr.msrb.gmra.mxu2 %v14699_v12  ;;  %v9877_v13 = vld [vmem:[#allocation8 + $0x738] sm:$0xf0]  ;;  %v9876_v24 = vor.u32 %v13540_v10, %v9875_v9 }
 0x138   :  { %2060 = vmatpush.bf16.msra.mxu1 %v9948_v41  ;;  %2073 = vmatpush.bf16.msra.mxu2 %v9952_v42  ;;  %v13517_v41 = vld [vmem:[#allocation8 + $0x684] sm:$0xf]  ;;  %v9880_v26 = vor.u32 %v13536_v11, %v9877_v13  ;;  %v9747_v13 = vld [vmem:[#allocation8 + $0x618] sm:$0xf] }
 0x139   :  { %2086 = vmatpush.bf16.msra.mxu3 %v9956_v45  ;;  %2099 = vmatpush.bf16.msrb.mxu0 %v9960_v46  ;;  %v14719_v23 = vpop.f32.mrf.mxu2  ;;  %v9789_v42 = vld [vmem:[#allocation8 + $0x6a0] sm:$0xf0]  ;;  %v13518_v45 = vld [vmem:[#allocation8 + $0x68c] sm:$0xf] }
 0x13a   :  { %1647 = vmatmul.bf16.vlgmr.msrb.gmra.mxu3 %v14699_v12  ;;  %1660 = vmatmul.bf16.vlgmr.msra.gmra.mxu0 %v14699_v12  ;;  %v9861_v12 = vld [vmem:[#allocation8 + $0x728] sm:$0xf0]  ;;  %v14721_v28 = vpop.f32.mrf.mxu3  ;;  %v9792_v48 = vor.u32 %v13517_v41, %v9789_v42  ;;  %v9933_v41 = vld [vmem:[#allocation8 + $0x7b0] sm:$0xf0]  ;;  %v9939_v42 = vld [vmem:[#allocation8 + $0x798] sm:$0xf] }
 0x13b   :  { %v9864_v22 = vor.u32 %v13534_v15, %v9861_v12  ;;  %v657_v32 = vpop.f32.mrf.mxu1  ;;  %v9797_v46 = vld [vmem:[#allocation8 + $0x6a8] sm:$0xf0]  ;;  %v9963_v15 = vld [vmem:[#allocation8 + $0x7d0] sm:$0xf] }
 0x13c   :  { %2061 = vmatpush.bf16.msra.mxu1 %v9916_v53  ;;  %2074 = vmatpush.bf16.msra.mxu2 %v9920_v54  ;;  %v696_v35 = vpop.f32.mrf.mxu0  ;;  %v9800_v52 = vor.u32 %v13518_v45, %v9797_v46  ;;  %v13509_v54 = vld [vmem:[#allocation8 + $0x644] sm:$0xf]  ;;  %v13563_v12 = vld [vmem:[#allocation8 + $0x7ec] sm:$0xf0]  ;;  %v13552_v45 = vld [vmem:[#allocation8 + $0x79c] sm:$0xf] }
 0x13d   :  { %2087 = vmatpush.bf16.msra.mxu3 %v9924_v57  ;;  %2100 = vmatpush.bf16.msrb.mxu0 %v9928_v58  ;;  %v13514_v58 = vld [vmem:[#allocation8 + $0x664] sm:$0xf0]  ;;  %v9760_v1 = vor.u32 %v13509_v54, %v9757_v55  ;;  %v9964_v31 = vor.u32 %v13563_v12, %v9963_v15  ;;  %v13555_v35 = vld [vmem:[#allocation8 + $0x7ac] sm:$0xf0]  ;;  %v9941_v46 = vld [vmem:[#allocation8 + $0x7b8] sm:$0xf0] }
 0x13e   :  { %v13543_v54 = vld [vmem:[#allocation8 + $0x754] sm:$0xf] }
 0x13f   :  { %v9901_v55 = vld [vmem:[#allocation8 + $0x770] sm:$0xf0] }
 0x140   :  { %2062 = vmatpush.bf16.msra.mxu1 %v9884_v3  ;;  %2075 = vmatpush.bf16.msra.mxu2 %v9888_v4  ;;  %v13505_v4 = vld [vmem:[#allocation8 + $0x61c] sm:$0xf0] }
 0x141   :  { %2088 = vmatpush.bf16.msra.mxu3 %v9892_v7  ;;  %2101 = vmatpush.bf16.msrb.mxu0 %v9896_v8  ;;  %v670_v53 = vpop.f32.mrf.mxu2  ;;  %v9764_v7 = vor.u32 %v13514_v58, %v9763_v56  ;;  %v9768_v8 = vor.u32 %v13510_v59, %v9765_v60  ;;  %v9724_v19 = vor.u32 %v13505_v4, %v9723_v62  ;;  %v9907_v56 = vld [vmem:[#allocation8 + $0x758] sm:$0xf]  ;;  %v13544_v58 = vld [vmem:[#allocation8 + $0x75c] sm:$0xf]  ;;  %v13539_v4 = vld [vmem:[#allocation8 + $0x72c] sm:$0xf0] }
 0x142   :  { %v683_v57 = vpop.f32.mrf.mxu3  ;;  %v9944_v53 = vor.u32 %v13552_v45, %v9941_v46  ;;  %v9909_v59 = vld [vmem:[#allocation8 + $0x778] sm:$0xf0]  ;;  %v9904_v62 = vor.u32 %v13543_v54, %v9901_v55 }
 0x143   :  { %v14723_v61 = vpop.f32.mrf.mxu1  ;;  %v13548_v57 = vld [vmem:[#allocation8 + $0x774] sm:$0xf0] }
 0x144   :  { %2063 = vmatpush.bf16.msra.mxu1 %v9852_v16  ;;  %2076 = vmatpush.bf16.msra.mxu2 %v9856_v17  ;;  %v14725_v3 = vpop.f32.mrf.mxu0  ;;  %v13559_v16 = vld [vmem:[#allocation8 + $0x7d4] sm:$0xf] }
 0x145   :  { %2089 = vmatpush.bf16.msra.mxu3 %v9860_v20  ;;  %2102 = vmatpush.bf16.msrb.mxu0 %v9864_v22  ;;  %v9965_v17 = vld [vmem:[#allocation8 + $0x7f0] sm:$0xf0]  ;;  %v9728_v20 = vor.u32 %v13501_v5, %v9725_v6  ;;  %v13564_v22 = vld [vmem:[#allocation8 + $0x7f4] sm:$0xf0]  ;;  %v9908_v5 = vor.u32 %v13548_v57, %v9907_v56  ;;  %v9912_v6 = vor.u32 %v13544_v58, %v9909_v59  ;;  %v9771_v56 = vld [vmem:[#allocation8 + $0x650] sm:$0xf] }
 0x146   :  { %v9968_v32 = vor.u32 %v13559_v16, %v9965_v17  ;;  %v9972_v36 = vor.u32 %v13564_v22, %v9971_v18  ;;  %v13515_v57 = vld [vmem:[#allocation8 + $0x66c] sm:$0xf0]  ;;  %v13511_v59 = vld [vmem:[#allocation8 + $0x654] sm:$0xf] }
 0x148   :  { %2064 = vmatpush.bf16.msra.mxu1 %v9820_v33  ;;  %2077 = vmatpush.bf16.msra.mxu2 %v9824_v34  ;;  %v9931_v34 = vld [vmem:[#allocation8 + $0x790] sm:$0xf] }
 0x149   :  { %2090 = vmatpush.bf16.msra.mxu3 %v9828_v25  ;;  %2103 = vmatpush.bf16.msrb.mxu0 %v9832_v38  ;;  %v14727_v30 = vpop.f32.mrf.mxu2  ;;  %v13551_v38 = vld [vmem:[#allocation8 + $0x794] sm:$0xf] }
 0x14a   :  { %v14729_v33 = vpop.f32.mrf.mxu3  ;;  %v9936_v49 = vor.u32 %v13551_v38, %v9933_v41 }
 0x14b   :  { %v709_v25 = vpop.f32.mrf.mxu1 }
 0x14c   :  { %2065 = vmatpush.bf16.msra.mxu1 %v9788_v47  ;;  %2078 = vmatpush.bf16.msra.mxu2 %v9792_v48  ;;  %v748_v43 = vpop.f32.mrf.mxu0  ;;  %v14732_v47 = vrot.slane %v14677_v21, 3  ;;  %v9932_v48 = vor.u32 %v13555_v35, %v9931_v34  ;;  %v13528_v34 = vld [vmem:[#allocation8 + $0x6dc] sm:$0xf]  ;;  %v13523_v25 = vld [vmem:[#allocation8 + $0x6ac] sm:$0xf0] }
 0x14d   :  { %2091 = vmatpush.bf16.msra.mxu3 %v9796_v51  ;;  %2104 = vmatpush.bf16.msrb.mxu0 %v9800_v52  ;;  %v13547_v51 = vld [vmem:[#allocation8 + $0x76c] sm:$0xf0]  ;;  %v9940_v52 = vor.u32 %v13556_v44, %v9939_v42  ;;  %v9845_v35 = vld [vmem:[#allocation8 + $0x6f8] sm:$0xf0]  ;;  %v13519_v42 = vld [vmem:[#allocation8 + $0x694] sm:$0xf] }
 0x14e   :  { %v9900_v60 = vor.u32 %v13547_v51, %v9899_v50  ;;  %v9848_v41 = vor.u32 %v13528_v34, %v9845_v35  ;;  %v9805_v43 = vld [vmem:[#allocation8 + $0x6b0] sm:$0xf0]  ;;  %v9811_v44 = vld [vmem:[#allocation8 + $0x698] sm:$0xf]  ;;  %v9813_v50 = vld [vmem:[#allocation8 + $0x6b8] sm:$0xf0] }
 0x14f   :  { %v9808_v55 = vor.u32 %v13519_v42, %v9805_v43  ;;  %v13622_v34 = vld [vmem:[#allocation8 + $0x9cc] sm:$0xf]  ;;  %v13613_v43 = vld [vmem:[#allocation8 + $0x984] sm:$0xf] }
 0x150   :  { %2066 = vmatpush.bf16.msra.mxu1 %v9756_v63  ;;  %2079 = vmatpush.bf16.msra.mxu2 %v9760_v1  ;;  %v9867_v1 = vld [vmem:[#allocation8 + $0x710] sm:$0xf]  ;;  %v10213_v35 = vld [vmem:[#allocation8 + $0x9e8] sm:$0xf0] }
 0x151   :  { %2092 = vmatpush.bf16.msra.mxu3 %v9764_v7  ;;  %2105 = vmatpush.bf16.msrb.mxu0 %v9768_v8  ;;  %v722_v21 = vpop.f32.mrf.mxu2  ;;  %v13535_v7 = vld [vmem:[#allocation8 + $0x714] sm:$0xf]  ;;  %v9868_v17 = vor.u32 %v13539_v4, %v9867_v1  ;;  %v9781_v1 = vld [vmem:[#allocation8 + $0x678] sm:$0xf0]  ;;  %v9772_v4 = vor.u32 %v13515_v57, %v9771_v56  ;;  %v10216_v42 = vor.u32 %v13622_v34, %v10213_v35  ;;  %v13594_v34 = vld [vmem:[#allocation8 + $0x8e4] sm:$0xf0] }
 0x152   :  { %v735_v63 = vpop.f32.mrf.mxu3  ;;  %v9869_v8 = vld [vmem:[#allocation8 + $0x730] sm:$0xf0]  ;;  %v13590_v35 = vld [vmem:[#allocation8 + $0x8cc] sm:$0xf] }
 0x153   :  { %v9872_v18 = vor.u32 %v13535_v7, %v9869_v8  ;;  %v9773_v21 = vld [vmem:[#allocation8 + $0x670] sm:$0xf0]  ;;  %v13512_v63 = vld [vmem:[#allocation8 + $0x65c] sm:$0xf] }
 0x154   :  { %2067 = vmatpush.bf16.msra.mxu1 %v9724_v19  ;;  %2080 = vmatpush.bf16.msra.mxu2 %v9728_v20  ;;  %v1079_v15 = vpop.f32.mrf.mxu1  ;;  %v9835_v19 = vld [vmem:[#allocation8 + $0x6d0] sm:$0xf]  ;;  %v13503_v7 = vld [vmem:[#allocation8 + $0x614] sm:$0xf]  ;;  %v9784_v10 = vor.u32 %v13512_v63, %v9781_v1 }
 0x155   :  { %2093 = vmatpush.bf16.msra.mxu3 %v9732_v27  ;;  %2106 = vmatpush.bf16.msrb.mxu0 %v9736_v29  ;;  %v14739_v12 = vadd.f32 %v1079_v15, %v14715_v2  ;;  %v13531_v20 = vld [vmem:[#allocation8 + $0x6ec] sm:$0xf0]  ;;  %v13527_v27 = vld [vmem:[#allocation8 + $0x6d4] sm:$0xf]  ;;  %v13508_v15 = vld [vmem:[#allocation8 + $0x634] sm:$0xf0] }
 0x156   :  { %v9837_v29 = vld [vmem:[#allocation8 + $0x6f0] sm:$0xf0]  ;;  %v9836_v2 = vor.u32 %v13531_v20, %v9835_v19  ;;  %v10203_v19 = vld [vmem:[#allocation8 + $0x9c0] sm:$0xf] }
 0x157   :  { %2068 = vmatmul.bf16.vlgmr.msra.gmra.mxu1 %v14732_v47  ;;  %2081 = vmatmul.bf16.vlgmr.msra.gmra.mxu2 %v14732_v47  ;;  %v1118_v16 = vpop.f32.mrf.mxu0  ;;  %v9741_v8 = vld [vmem:[#allocation8 + $0x630] sm:$0xf0]  ;;  %v13625_v20 = vld [vmem:[#allocation8 + $0x9dc] sm:$0xf0] }
 0x158   :  { %2112 = vmatpush.bf16.msrb.mxu1 %v9964_v31  ;;  %2125 = vmatpush.bf16.msrb.mxu2 %v9968_v32  ;;  %v14742_v22 = vadd.f32 %v1118_v16, %v14717_v14  ;;  %v9843_v31 = vld [vmem:[#allocation8 + $0x6d8] sm:$0xf]  ;;  %v13504_v16 = vld [vmem:[#allocation8 + $0x61c] sm:$0xf] }
 0x159   :  { %2138 = vmatpush.bf16.msrb.mxu3 %v9972_v36  ;;  %2151 = vmatpush.bf16.msra.mxu0 %v9976_v37  ;;  %v13532_v32 = vld [vmem:[#allocation8 + $0x6f4] sm:$0xf0]  ;;  %v9840_v36 = vor.u32 %v13527_v27, %v9837_v29  ;;  %v9803_v37 = vld [vmem:[#allocation8 + $0x690] sm:$0xf]  ;;  %v10211_v27 = vld [vmem:[#allocation8 + $0x9c8] sm:$0xf] }
 0x15a   :  { %2094 = vmatmul.bf16.vlgmr.msra.gmra.mxu3 %v14732_v47  ;;  %2107 = vmatmul.bf16.vlgmr.msrb.gmra.mxu0 %v14732_v47  ;;  %v9844_v38 = vor.u32 %v13532_v32, %v9843_v31  ;;  %v1092_v14 = vpop.f32.mrf.mxu2  ;;  %v9804_v54 = vor.u32 %v13523_v25, %v9803_v37  ;;  %v9744_v31 = vor.u32 %v13503_v7, %v9741_v8  ;;  %v13626_v32 = vld [vmem:[#allocation8 + $0x9e4] sm:$0xf0]  ;;  %v13597_v7 = vld [vmem:[#allocation8 + $0x904] sm:$0xf] }
 0x15b   :  { %v14745_v45 = vadd.f32 %v1092_v14, %v14719_v23  ;;  %v10204_v37 = vor.u32 %v13625_v20, %v10203_v19  ;;  %v10212_v14 = vor.u32 %v13626_v32, %v10211_v27  ;;  %v10109_v8 = vld [vmem:[#allocation8 + $0x920] sm:$0xf0]  ;;  %v10075_v19 = vld [vmem:[#allocation8 + $0x8c0] sm:$0xf]  ;;  %v10083_v32 = vld [vmem:[#allocation8 + $0x8c8] sm:$0xf] }
 0x15c   :  { %2113 = vmatpush.bf16.msrb.mxu1 %v9932_v48  ;;  %2126 = vmatpush.bf16.msrb.mxu2 %v9936_v49  ;;  %v13524_v48 = vld [vmem:[#allocation8 + $0x6b4] sm:$0xf0]  ;;  %v13520_v49 = vld [vmem:[#allocation8 + $0x69c] sm:$0xf]  ;;  %v13593_v20 = vld [vmem:[#allocation8 + $0x8dc] sm:$0xf0] }
 0x15d   :  { %2139 = vmatpush.bf16.msrb.mxu3 %v9940_v52  ;;  %2152 = vmatpush.bf16.msra.mxu0 %v9944_v53  ;;  %v1105_v46 = vpop.f32.mrf.mxu3  ;;  %v1081_v52 = vpop.f32.mrf.mxu1  ;;  %v9812_v58 = vor.u32 %v13524_v48, %v9811_v44  ;;  %v9816_v23 = vor.u32 %v13520_v49, %v9813_v50  ;;  %v10173_v44 = vld [vmem:[#allocation8 + $0x9a0] sm:$0xf0]  ;;  %v13618_v48 = vld [vmem:[#allocation8 + $0x9a4] sm:$0xf0]  ;;  %v13614_v49 = vld [vmem:[#allocation8 + $0x98c] sm:$0xf] }
 0x15e   :  { %v14748_v51 = vadd.f32 %v1105_v46, %v14721_v28  ;;  %v9739_v28 = vld [vmem:[#allocation8 + $0x610] sm:$0xf]  ;;  %v10179_v46 = vld [vmem:[#allocation8 + $0x988] sm:$0xf]  ;;  %v10181_v50 = vld [vmem:[#allocation8 + $0x9a8] sm:$0xf0] }
 0x15f   :  { %v1120_v53 = vpop.f32.mrf.mxu0  ;;  %v10180_v56 = vor.u32 %v13618_v48, %v10179_v46  ;;  %v10184_v57 = vor.u32 %v13614_v49, %v10181_v50  ;;  %v13586_v48 = vld [vmem:[#allocation8 + $0x8a4] sm:$0xf0]  ;;  %v13582_v49 = vld [vmem:[#allocation8 + $0x88c] sm:$0xf] }
 0x160   :  { %2114 = vmatpush.bf16.msrb.mxu1 %v9900_v60  ;;  %2127 = vmatpush.bf16.msrb.mxu2 %v9904_v62  ;;  %v9779_v60 = vld [vmem:[#allocation8 + $0x658] sm:$0xf]  ;;  %v10176_v53 = vor.u32 %v13613_v43, %v10173_v44  ;;  %v10051_v43 = vld [vmem:[#allocation8 + $0x888] sm:$0xf]  ;;  %v10053_v50 = vld [vmem:[#allocation8 + $0x8a8] sm:$0xf0] }
 0x161   :  { %2140 = vmatpush.bf16.msrb.mxu3 %v9908_v5  ;;  %2153 = vmatpush.bf16.msra.mxu0 %v9912_v6  ;;  %v13516_v62 = vld [vmem:[#allocation8 + $0x674] sm:$0xf0]  ;;  %v9776_v5 = vor.u32 %v13511_v59, %v9773_v21  ;;  %v13507_v6 = vld [vmem:[#allocation8 + $0x62c] sm:$0xf0]  ;;  %v10147_v59 = vld [vmem:[#allocation8 + $0x948] sm:$0xf] }
 0x162   :  { %v9780_v9 = vor.u32 %v13516_v62, %v9779_v60  ;;  %v1094_v11 = vpop.f32.mrf.mxu2  ;;  %v9740_v29 = vor.u32 %v13507_v6, %v9739_v28  ;;  %v13610_v21 = vld [vmem:[#allocation8 + $0x964] sm:$0xf0]  ;;  %v13606_v60 = vld [vmem:[#allocation8 + $0x94c] sm:$0xf]  ;;  %v10107_v28 = vld [vmem:[#allocation8 + $0x900] sm:$0xf] }
 0x163   :  { %v10149_v62 = vld [vmem:[#allocation8 + $0x968] sm:$0xf0] }
 0x164   :  { %2115 = vmatpush.bf16.msrb.mxu1 %v9868_v17  ;;  %2128 = vmatpush.bf16.msrb.mxu2 %v9872_v18  ;;  %v9749_v18 = vld [vmem:[#allocation8 + $0x638] sm:$0xf0]  ;;  %v10152_v6 = vor.u32 %v13606_v60, %v10149_v62  ;;  %v13598_v11 = vld [vmem:[#allocation8 + $0x90c] sm:$0xf]  ;;  %v10019_v60 = vld [vmem:[#allocation8 + $0x848] sm:$0xf] }
 0x165   :  { %2141 = vmatpush.bf16.msrb.mxu3 %v9876_v24  ;;  %2154 = vmatpush.bf16.msra.mxu0 %v9880_v26  ;;  %v1107_v17 = vpop.f32.mrf.mxu3  ;;  %v13621_v24 = vld [vmem:[#allocation8 + $0x9c4] sm:$0xf]  ;;  %v13578_v62 = vld [vmem:[#allocation8 + $0x864] sm:$0xf0] }
 0x166   :  { %v10205_v26 = vld [vmem:[#allocation8 + $0x9e0] sm:$0xf0] }
 0x167   :  { %v10208_v25 = vor.u32 %v13621_v24, %v10205_v26 }
 0x168   :  { %2116 = vmatpush.bf16.msrb.mxu1 %v9836_v2  ;;  %2129 = vmatpush.bf16.msrb.mxu2 %v9840_v36  ;;  %v9748_v2 = vor.u32 %v13508_v15, %v9747_v13  ;;  %v9752_v36 = vor.u32 %v13504_v16, %v9749_v18  ;;  %v10117_v13 = vld [vmem:[#allocation8 + $0x928] sm:$0xf0]  ;;  %v10112_v18 = vor.u32 %v13597_v7, %v10109_v8  ;;  %v9981_v7 = vld [vmem:[#allocation8 + $0x820] sm:$0xf0] }
 0x169   :  { %2142 = vmatpush.bf16.msrb.mxu3 %v9844_v38  ;;  %2155 = vmatpush.bf16.msra.mxu0 %v9848_v41  ;;  %v10171_v38 = vld [vmem:[#allocation8 + $0x980] sm:$0xf]  ;;  %v10120_v27 = vor.u32 %v13598_v11, %v10117_v13  ;;  %v10020_v8 = vor.u32 %v13578_v62, %v10019_v60  ;;  %v9987_v11 = vld [vmem:[#allocation8 + $0x808] sm:$0xf]  ;;  %v10163_v60 = vld [vmem:[#allocation8 + $0x958] sm:$0xf] }
 0x16a   :  { %v13617_v41 = vld [vmem:[#allocation8 + $0x99c] sm:$0xf0]  ;;  %v13570_v13 = vld [vmem:[#allocation8 + $0x824] sm:$0xf0]  ;;  %v13612_v62 = vld [vmem:[#allocation8 + $0x974] sm:$0xf0] }
 0x16b   :  { %v10172_v52 = vor.u32 %v13617_v41, %v10171_v38  ;;  %v10084_v38 = vor.u32 %v13594_v34, %v10083_v32 }
 0x16c   :  { %2117 = vmatpush.bf16.msrb.mxu1 %v9804_v54  ;;  %2130 = vmatpush.bf16.msrb.mxu2 %v9808_v55  ;;  %v10139_v54 = vld [vmem:[#allocation8 + $0x940] sm:$0xf] }
 0x16d   :  { %2143 = vmatpush.bf16.msrb.mxu3 %v9812_v58  ;;  %2156 = vmatpush.bf16.msra.mxu0 %v9816_v23  ;;  %v13609_v55 = vld [vmem:[#allocation8 + $0x95c] sm:$0xf0]  ;;  %v13605_v58 = vld [vmem:[#allocation8 + $0x944] sm:$0xf] }
 0x16e   :  { %v10141_v23 = vld [vmem:[#allocation8 + $0x960] sm:$0xf0]  ;;  %v10140_v63 = vor.u32 %v13609_v55, %v10139_v54 }
 0x16f   :  { %v10144_v1 = vor.u32 %v13605_v58, %v10141_v23  ;;  %v13577_v58 = vld [vmem:[#allocation8 + $0x85c] sm:$0xf0]  ;;  %v10052_v23 = vor.u32 %v13586_v48, %v10051_v43  ;;  %v13615_v43 = vld [vmem:[#allocation8 + $0x994] sm:$0xf]  ;;  %v10195_v48 = vld [vmem:[#allocation8 + $0x998] sm:$0xf] }
 0x170   :  { %2118 = vmatpush.bf16.msrb.mxu1 %v9772_v4  ;;  %2131 = vmatpush.bf16.msrb.mxu2 %v9776_v5  ;;  %v13601_v4 = vld [vmem:[#allocation8 + $0x91c] sm:$0xf0]  ;;  %v10148_v5 = vor.u32 %v13610_v21, %v10147_v59  ;;  %v13573_v59 = vld [vmem:[#allocation8 + $0x844] sm:$0xf] }
 0x171   :  { %2144 = vmatpush.bf16.msrb.mxu3 %v9780_v9  ;;  %2157 = vmatpush.bf16.msra.mxu0 %v9784_v10  ;;  %v10115_v9 = vld [vmem:[#allocation8 + $0x908] sm:$0xf]  ;;  %v10108_v17 = vor.u32 %v13601_v4, %v10107_v28  ;;  %v10013_v21 = vld [vmem:[#allocation8 + $0x860] sm:$0xf0] }
 0x172   :  { %v13602_v10 = vld [vmem:[#allocation8 + $0x924] sm:$0xf0]  ;;  %v10016_v4 = vor.u32 %v13573_v59, %v10013_v21  ;;  %v13607_v59 = vld [vmem:[#allocation8 + $0x954] sm:$0xf] }
 0x173   :  { %v10116_v26 = vor.u32 %v13602_v10, %v10115_v9  ;;  %v10157_v21 = vld [vmem:[#allocation8 + $0x970] sm:$0xf0] }
 0x174   :  { %2119 = vmatpush.bf16.msrb.mxu1 %v9740_v29  ;;  %2132 = vmatpush.bf16.msrb.mxu2 %v9744_v31  ;;  %v1131_v15 = vpop.f32.mrf.mxu1  ;;  %v13589_v29 = vld [vmem:[#allocation8 + $0x8c4] sm:$0xf] }
 0x175   :  { %2145 = vmatpush.bf16.msrb.mxu3 %v9748_v2  ;;  %2158 = vmatpush.bf16.msra.mxu0 %v9752_v36  ;;  %v10077_v31 = vld [vmem:[#allocation8 + $0x8e0] sm:$0xf0]  ;;  %v10085_v2 = vld [vmem:[#allocation8 + $0x8e8] sm:$0xf0] }
 0x176   :  { %v10080_v36 = vor.u32 %v13589_v29, %v10077_v31  ;;  %v10088_v41 = vor.u32 %v13590_v35, %v10085_v2  ;;  %v10221_v29 = vld [vmem:[#allocation8 + $0x9f0] sm:$0xf0]  ;;  %v10227_v31 = vld [vmem:[#allocation8 + $0x9d8] sm:$0xf]  ;;  %v13624_v2 = vld [vmem:[#allocation8 + $0x9dc] sm:$0xf] }
 0x177   :  { %2120 = vmatmul.bf16.vlgmr.msrb.gmra.mxu1 %v14732_v47  ;;  %2133 = vmatmul.bf16.vlgmr.msrb.gmra.mxu2 %v14732_v47  ;;  %v1170_v16 = vpop.f32.mrf.mxu0  ;;  %v13628_v35 = vld [vmem:[#allocation8 + $0x9f4] sm:$0xf0] }
 0x178   :  { %2557 = vmatpush.bf16.msra.mxu1 %v10204_v37  ;;  %2570 = vmatpush.bf16.msra.mxu2 %v10208_v25  ;;  %v14758_v24 = vadd.f32 %v1170_v16, %v14725_v3  ;;  %v10043_v37 = vld [vmem:[#allocation8 + $0x880] sm:$0xf]  ;;  %v14410_v16 = vld [vmem:[#allocation6] ss:$0 sm:$0xff] }
 0x179   :  { %2583 = vmatpush.bf16.msra.mxu3 %v10212_v14  ;;  %2596 = vmatpush.bf16.msrb.mxu0 %v10216_v42  ;;  %v13585_v25 = vld [vmem:[#allocation8 + $0x89c] sm:$0xf0]  ;;  %v13581_v14 = vld [vmem:[#allocation8 + $0x884] sm:$0xf] }
 0x17a   :  { %2146 = vmatmul.bf16.vlgmr.msrb.gmra.mxu3 %v14732_v47  ;;  %2159 = vmatmul.bf16.vlgmr.msra.gmra.mxu0 %v14732_v47  ;;  %v14755_v47 = vadd.f32 %v1131_v15, %v14723_v61  ;;  %v10076_v61 = vor.u32 %v13593_v20, %v10075_v19  ;;  %v1144_v3 = vpop.f32.mrf.mxu2  ;;  %v10045_v42 = vld [vmem:[#allocation8 + $0x8a0] sm:$0xf0]  ;;  %v10044_v55 = vor.u32 %v13585_v25, %v10043_v37  ;;  %v13566_v15 = vld [vmem:[#allocation8 + $0x80c] sm:$0xf]  ;;  %v10219_v20 = vld [vmem:[#allocation8 + $0x9d0] sm:$0xf] }
 0x17b   :  { %v14761_v44 = vadd.f32 %v1144_v3, %v14727_v30  ;;  %v10056_v30 = vor.u32 %v13582_v49, %v10053_v50  ;;  %v9989_v19 = vld [vmem:[#allocation8 + $0x828] sm:$0xf0]  ;;  %v13619_v3 = vld [vmem:[#allocation8 + $0x9ac] sm:$0xf0]  ;;  %v13620_v49 = vld [vmem:[#allocation8 + $0x9b4] sm:$0xf0] }
 0x17c   :  { %2558 = vmatpush.bf16.msra.mxu1 %v10172_v52  ;;  %2571 = vmatpush.bf16.msra.mxu2 %v10176_v53  ;;  %v1133_v53 = vpop.f32.mrf.mxu1  ;;  %v9992_v37 = vor.u32 %v13566_v15, %v9989_v19  ;;  %v13616_v50 = vld [vmem:[#allocation8 + $0x99c] sm:$0xf] }
 0x17d   :  { %2584 = vmatpush.bf16.msra.mxu3 %v10180_v56  ;;  %2597 = vmatpush.bf16.msrb.mxu0 %v10184_v57  ;;  %v1157_v46 = vpop.f32.mrf.mxu3  ;;  %v10048_v56 = vor.u32 %v13581_v14, %v10045_v42  ;;  %v10011_v57 = vld [vmem:[#allocation8 + $0x840] sm:$0xf]  ;;  %v10228_v14 = vor.u32 %v13628_v35, %v10227_v31  ;;  %v10197_v53 = vld [vmem:[#allocation8 + $0x9b8] sm:$0xf0]  ;;  %v10093_v35 = vld [vmem:[#allocation8 + $0x8f0] sm:$0xf0] }
 0x17e   :  { %v14764_v52 = vadd.f32 %v1157_v46, %v14729_v33  ;;  %v9979_v33 = vld [vmem:[#allocation8 + $0x800] sm:$0xf]  ;;  %v10012_v28 = vor.u32 %v13577_v58, %v10011_v57  ;;  %v10189_v46 = vld [vmem:[#allocation8 + $0x9b0] sm:$0xf0]  ;;  %v10155_v57 = vld [vmem:[#allocation8 + $0x950] sm:$0xf] }
 0x17f   :  { %v1172_v54 = vpop.f32.mrf.mxu0  ;;  %v13611_v58 = vld [vmem:[#allocation8 + $0x96c] sm:$0xf0]  ;;  %v10133_v15 = vld [vmem:[#allocation8 + $0x938] sm:$0xf0] }
 0x180   :  { %2559 = vmatpush.bf16.msra.mxu1 %v10140_v63  ;;  %2572 = vmatpush.bf16.msra.mxu2 %v10144_v1  ;;  %v13574_v63 = vld [vmem:[#allocation8 + $0x84c] sm:$0xf] }
 0x181   :  { %2585 = vmatpush.bf16.msra.mxu3 %v10148_v5  ;;  %2598 = vmatpush.bf16.msrb.mxu0 %v10152_v6  ;;  %v10021_v1 = vld [vmem:[#allocation8 + $0x868] sm:$0xf0]  ;;  %v13569_v5 = vld [vmem:[#allocation8 + $0x81c] sm:$0xf0]  ;;  %v13565_v6 = vld [vmem:[#allocation8 + $0x804] sm:$0xf] }
 0x182   :  { %v10024_v9 = vor.u32 %v13574_v63, %v10021_v1  ;;  %v1146_v10 = vpop.f32.mrf.mxu2  ;;  %v9980_v32 = vor.u32 %v13569_v5, %v9979_v33  ;;  %v9984_v34 = vor.u32 %v13565_v6, %v9981_v7  ;;  %v13608_v63 = vld [vmem:[#allocation8 + $0x95c] sm:$0xf]  ;;  %v10156_v33 = vor.u32 %v13611_v58, %v10155_v57  ;;  %v13603_v5 = vld [vmem:[#allocation8 + $0x92c] sm:$0xf0] }
 0x183   :  { %v10165_v1 = vld [vmem:[#allocation8 + $0x978] sm:$0xf0]  ;;  %v10164_v6 = vor.u32 %v13612_v62, %v10163_v60  ;;  %v10131_v10 = vld [vmem:[#allocation8 + $0x918] sm:$0xf]  ;;  %v13575_v60 = vld [vmem:[#allocation8 + $0x854] sm:$0xf] }
 0x184   :  { %2560 = vmatpush.bf16.msra.mxu1 %v10108_v17  ;;  %2573 = vmatpush.bf16.msra.mxu2 %v10112_v18  ;;  %v177_v17 = vadd.f32 %v14410_v16, %v14705_v39  ;;  %v10168_v7 = vor.u32 %v13608_v63, %v10165_v1  ;;  %v10029_v62 = vld [vmem:[#allocation8 + $0x870] sm:$0xf0]  ;;  %v10035_v63 = vld [vmem:[#allocation8 + $0x858] sm:$0xf] }
 0x185   :  { %2586 = vmatpush.bf16.msra.mxu3 %v10116_v26  ;;  %2599 = vmatpush.bf16.msrb.mxu0 %v10120_v27  ;;  %v1159_v18 = vpop.f32.mrf.mxu3  ;;  %v13627_v26 = vld [vmem:[#allocation8 + $0x9ec] sm:$0xf0]  ;;  %v13623_v27 = vld [vmem:[#allocation8 + $0x9d4] sm:$0xf]  ;;  %v13580_v1 = vld [vmem:[#allocation8 + $0x874] sm:$0xf0] }
 0x186   :  { %v185_v25 = vmax.f32 %v177_v17, 0.0  ;;  %v10220_v39 = vor.u32 %v13627_v26, %v10219_v20  ;;  %v10091_v26 = vld [vmem:[#allocation8 + $0x8d0] sm:$0xf] }
 0x188   :  { %2561 = vmatpush.bf16.msra.mxu1 %v10076_v61  ;;  %2574 = vmatpush.bf16.msra.mxu2 %v10080_v36  ;;  %v10229_v61 = vld [vmem:[#allocation8 + $0x9f8] sm:$0xf0]  ;;  %v9988_v36 = vor.u32 %v13570_v13, %v9987_v11  ;;  %v14767_v54 = vpack.c.bf16 %v185_v25, %v185_v25  ;;  %v13604_v11 = vld [vmem:[#allocation8 + $0x934] sm:$0xf0] }
 0x189   :  { %2587 = vmatpush.bf16.msra.mxu3 %v10084_v38  ;;  %2600 = vmatpush.bf16.msrb.mxu0 %v10088_v41  ;;  %v10224_v38 = vor.u32 %v13623_v27, %v10221_v29  ;;  %v10187_v41 = vld [vmem:[#allocation8 + $0x990] sm:$0xf]  ;;  %v10232_v42 = vor.u32 %v13624_v2, %v10229_v61  ;;  %v13600_v13 = vld [vmem:[#allocation8 + $0x91c] sm:$0xf]  ;;  %v10132_v31 = vor.u32 %v13604_v11, %v10131_v10  ;;  %v10099_v2 = vld [vmem:[#allocation8 + $0x8d8] sm:$0xf] }
 0x18a   :  { %v13595_v27 = vld [vmem:[#allocation8 + $0x8ec] sm:$0xf0]  ;;  %v13596_v61 = vld [vmem:[#allocation8 + $0x8f4] sm:$0xf0] }
 0x18c   :  { %2562 = vmatpush.bf16.msra.mxu1 %v10044_v55  ;;  %2575 = vmatpush.bf16.msra.mxu2 %v10048_v56  ;;  %v10188_v55 = vor.u32 %v13619_v3, %v10187_v41  ;;  %v10192_v56 = vor.u32 %v13615_v43, %v10189_v46  ;;  %v10100_v41 = vor.u32 %v13596_v61, %v10099_v2  ;;  %v10067_v43 = vld [vmem:[#allocation8 + $0x898] sm:$0xf]  ;;  %v13690_v2 = vld [vmem:[#allocation8 + $0xbe4] sm:$0xf0]  ;;  %v13686_v61 = vld [vmem:[#allocation8 + $0xbcc] sm:$0xf] }
 0x18d   :  { %2588 = vmatpush.bf16.msra.mxu3 %v10052_v23  ;;  %2601 = vmatpush.bf16.msrb.mxu0 %v10056_v30  ;;  %v10196_v23 = vor.u32 %v13620_v49, %v10195_v48  ;;  %v10200_v30 = vor.u32 %v13616_v50, %v10197_v53  ;;  %v13588_v49 = vld [vmem:[#allocation8 + $0x8b4] sm:$0xf0]  ;;  %v13584_v50 = vld [vmem:[#allocation8 + $0x89c] sm:$0xf] }
 0x18e   :  { %v10069_v53 = vld [vmem:[#allocation8 + $0x8b8] sm:$0xf0] }
 0x190   :  { %2563 = vmatpush.bf16.msra.mxu1 %v10012_v28  ;;  %2576 = vmatpush.bf16.msra.mxu2 %v10016_v4  ;;  %v10160_v28 = vor.u32 %v13607_v59, %v10157_v21  ;;  %v10123_v4 = vld [vmem:[#allocation8 + $0x910] sm:$0xf]  ;;  %v10068_v21 = vor.u32 %v13588_v49, %v10067_v43  ;;  %v10435_v43 = vld [vmem:[#allocation8 + $0xb88] sm:$0xf]  ;;  %v13678_v49 = vld [vmem:[#allocation8 + $0xb8c] sm:$0xf] }
 0x191   :  { %2589 = vmatpush.bf16.msra.mxu3 %v10020_v8  ;;  %2602 = vmatpush.bf16.msrb.mxu0 %v10024_v9  ;;  %v13599_v8 = vld [vmem:[#allocation8 + $0x914] sm:$0xf]  ;;  %v10124_v19 = vor.u32 %v13603_v5, %v10123_v4  ;;  %v13579_v59 = vld [vmem:[#allocation8 + $0x86c] sm:$0xf0]  ;;  %v10032_v5 = vor.u32 %v13575_v60, %v10029_v62  ;;  %v13674_v60 = vld [vmem:[#allocation8 + $0xb64] sm:$0xf0] }
 0x192   :  { %v10125_v9 = vld [vmem:[#allocation8 + $0x930] sm:$0xf0]  ;;  %v13670_v62 = vld [vmem:[#allocation8 + $0xb4c] sm:$0xf] }
 0x193   :  { %v10128_v20 = vor.u32 %v13599_v8, %v10125_v9  ;;  %v9997_v8 = vld [vmem:[#allocation8 + $0x830] sm:$0xf0]  ;;  %v10036_v9 = vor.u32 %v13580_v1, %v10035_v63  ;;  %v10405_v63 = vld [vmem:[#allocation8 + $0xb68] sm:$0xf0] }
 0x194   :  { %2564 = vmatpush.bf16.msra.mxu1 %v9980_v32  ;;  %2577 = vmatpush.bf16.msra.mxu2 %v9984_v34  ;;  %v1570_v16 = vpop.f32.mrf.mxu1  ;;  %v10136_v32 = vor.u32 %v13600_v13, %v10133_v15  ;;  %v13591_v34 = vld [vmem:[#allocation8 + $0x8d4] sm:$0xf]  ;;  %v10003_v13 = vld [vmem:[#allocation8 + $0x818] sm:$0xf] }
 0x195   :  { %2590 = vmatpush.bf16.msra.mxu3 %v9988_v36  ;;  %2603 = vmatpush.bf16.msrb.mxu0 %v9992_v37  ;;  %v14774_v17 = vadd.f32 %v1570_v16, %v14739_v12  ;;  %v13592_v36 = vld [vmem:[#allocation8 + $0x8dc] sm:$0xf]  ;;  %v10092_v12 = vor.u32 %v13595_v27, %v10091_v26  ;;  %v10096_v25 = vor.u32 %v13591_v34, %v10093_v35  ;;  %v13572_v15 = vld [vmem:[#allocation8 + $0x834] sm:$0xf0]  ;;  %v13689_v26 = vld [vmem:[#allocation8 + $0xbdc] sm:$0xf0] }
 0x196   :  { %v10101_v37 = vld [vmem:[#allocation8 + $0x8f8] sm:$0xf0]  ;;  %v13685_v27 = vld [vmem:[#allocation8 + $0xbc4] sm:$0xf] }
 0x197   :  { %2565 = vmatmul.bf16.vlgmr.msra.gmra.mxu1 %v14767_v54  ;;  %2578 = vmatmul.bf16.vlgmr.msra.gmra.mxu2 %v14767_v54  ;;  %v1609_v18 = vpop.f32.mrf.mxu0  ;;  %v10104_v3 = vor.u32 %v13592_v36, %v10101_v37  ;;  %v13568_v16 = vld [vmem:[#allocation8 + $0x81c] sm:$0xf]  ;;  %v10469_v36 = vld [vmem:[#allocation8 + $0xbe8] sm:$0xf0]  ;;  %v10004_v37 = vor.u32 %v13572_v15, %v10003_v13 }
 0x198   :  { %2609 = vmatpush.bf16.msrb.mxu1 %v10220_v39  ;;  %2622 = vmatpush.bf16.msrb.mxu2 %v10224_v38  ;;  %v14777_v29 = vadd.f32 %v1609_v18, %v14742_v22  ;;  %v10059_v39 = vld [vmem:[#allocation8 + $0x890] sm:$0xf] }
 0x199   :  { %2635 = vmatpush.bf16.msrb.mxu3 %v10228_v14  ;;  %2648 = vmatpush.bf16.msra.mxu0 %v10232_v42  ;;  %v13587_v38 = vld [vmem:[#allocation8 + $0x8ac] sm:$0xf0]  ;;  %v13583_v14 = vld [vmem:[#allocation8 + $0x894] sm:$0xf] }
 0x19a   :  { %2591 = vmatmul.bf16.vlgmr.msra.gmra.mxu3 %v14767_v54  ;;  %2604 = vmatmul.bf16.vlgmr.msrb.gmra.mxu0 %v14767_v54  ;;  %v1583_v22 = vpop.f32.mrf.mxu2  ;;  %v10061_v42 = vld [vmem:[#allocation8 + $0x8b0] sm:$0xf0]  ;;  %v10060_v58 = vor.u32 %v13587_v38, %v10059_v39  ;;  %v10427_v38 = vld [vmem:[#allocation8 + $0xb80] sm:$0xf] }
 0x19b   :  { %v14780_v46 = vadd.f32 %v1583_v22, %v14745_v45  ;;  %v10072_v45 = vor.u32 %v13584_v50, %v10069_v53  ;;  %v10472_v22 = vor.u32 %v13686_v61, %v10469_v36  ;;  %v10437_v50 = vld [vmem:[#allocation8 + $0xba8] sm:$0xf0]  ;;  %v13658_v61 = vld [vmem:[#allocation8 + $0xae4] sm:$0xf0] }
 0x19c   :  { %2610 = vmatpush.bf16.msrb.mxu1 %v10188_v55  ;;  %2623 = vmatpush.bf16.msrb.mxu2 %v10192_v56  ;;  %v1572_v56 = vpop.f32.mrf.mxu1  ;;  %v13654_v36 = vld [vmem:[#allocation8 + $0xacc] sm:$0xf] }
 0x19d   :  { %2636 = vmatpush.bf16.msrb.mxu3 %v10196_v23  ;;  %2649 = vmatpush.bf16.msra.mxu0 %v10200_v30  ;;  %v1596_v48 = vpop.f32.mrf.mxu3  ;;  %v10064_v23 = vor.u32 %v13583_v14, %v10061_v42  ;;  %v10027_v30 = vld [vmem:[#allocation8 + $0x850] sm:$0xf]  ;;  %v13677_v14 = vld [vmem:[#allocation8 + $0xb84] sm:$0xf] }
 0x19e   :  { %v14783_v55 = vadd.f32 %v1596_v48, %v14748_v51  ;;  %v9995_v51 = vld [vmem:[#allocation8 + $0x810] sm:$0xf]  ;;  %v10028_v4 = vor.u32 %v13579_v59, %v10027_v30  ;;  %v10429_v42 = vld [vmem:[#allocation8 + $0xba0] sm:$0xf0]  ;;  %v13682_v48 = vld [vmem:[#allocation8 + $0xba4] sm:$0xf0]  ;;  %v10440_v30 = vor.u32 %v13678_v49, %v10437_v50 }
 0x19f   :  { %v1611_v57 = vpop.f32.mrf.mxu0  ;;  %v10432_v56 = vor.u32 %v13677_v14, %v10429_v42  ;;  %v13669_v59 = vld [vmem:[#allocation8 + $0xb44] sm:$0xf]  ;;  %v10307_v14 = vld [vmem:[#allocation8 + $0xa88] sm:$0xf]  ;;  %v13646_v49 = vld [vmem:[#allocation8 + $0xa8c] sm:$0xf] }
 0x1a0   :  { %2611 = vmatpush.bf16.msrb.mxu1 %v10156_v33  ;;  %2624 = vmatpush.bf16.msrb.mxu2 %v10160_v28  ;;  %v13576_v33 = vld [vmem:[#allocation8 + $0x85c] sm:$0xf]  ;;  %v10395_v57 = vld [vmem:[#allocation8 + $0xb40] sm:$0xf]  ;;  %v10309_v50 = vld [vmem:[#allocation8 + $0xaa8] sm:$0xf0] }
 0x1a1   :  { %2637 = vmatpush.bf16.msrb.mxu3 %v10164_v6  ;;  %2650 = vmatpush.bf16.msra.mxu0 %v10168_v7  ;;  %v10037_v28 = vld [vmem:[#allocation8 + $0x878] sm:$0xf0]  ;;  %v13571_v6 = vld [vmem:[#allocation8 + $0x82c] sm:$0xf0]  ;;  %v13567_v7 = vld [vmem:[#allocation8 + $0x814] sm:$0xf] }
 0x1a2   :  { %v10040_v10 = vor.u32 %v13576_v33, %v10037_v28  ;;  %v1585_v11 = vpop.f32.mrf.mxu2  ;;  %v9996_v34 = vor.u32 %v13571_v6, %v9995_v51  ;;  %v10000_v35 = vor.u32 %v13567_v7, %v9997_v8  ;;  %v10363_v28 = vld [vmem:[#allocation8 + $0xb00] sm:$0xf]  ;;  %v13661_v6 = vld [vmem:[#allocation8 + $0xb04] sm:$0xf]  ;;  %v10371_v8 = vld [vmem:[#allocation8 + $0xb08] sm:$0xf] }
 0x1a3   :  { %v13665_v51 = vld [vmem:[#allocation8 + $0xb1c] sm:$0xf0]  ;;  %v10365_v7 = vld [vmem:[#allocation8 + $0xb20] sm:$0xf0]  ;;  %v10373_v11 = vld [vmem:[#allocation8 + $0xb28] sm:$0xf0] }
 0x1a4   :  { %2612 = vmatpush.bf16.msrb.mxu1 %v10124_v19  ;;  %2625 = vmatpush.bf16.msrb.mxu2 %v10128_v20  ;;  %v10005_v19 = vld [vmem:[#allocation8 + $0x838] sm:$0xf0]  ;;  %v10459_v20 = vld [vmem:[#allocation8 + $0xbc0] sm:$0xf] }
 0x1a5   :  { %2638 = vmatpush.bf16.msrb.mxu3 %v10132_v31  ;;  %2651 = vmatpush.bf16.msra.mxu0 %v10136_v32  ;;  %v1598_v18 = vpop.f32.mrf.mxu3  ;;  %v10461_v31 = vld [vmem:[#allocation8 + $0xbe0] sm:$0xf0]  ;;  %v10467_v32 = vld [vmem:[#allocation8 + $0xbc8] sm:$0xf] }
 0x1a6   :  { %v10464_v39 = vor.u32 %v13685_v27, %v10461_v31  ;;  %v10364_v18 = vor.u32 %v13665_v51, %v10363_v28 }
 0x1a8   :  { %2613 = vmatpush.bf16.msrb.mxu1 %v10092_v12  ;;  %2626 = vmatpush.bf16.msrb.mxu2 %v10096_v25  ;;  %v10008_v12 = vor.u32 %v13568_v16, %v10005_v19  ;;  %v10460_v25 = vor.u32 %v13689_v26, %v10459_v20  ;;  %v10368_v19 = vor.u32 %v13661_v6, %v10365_v7  ;;  %v10331_v20 = vld [vmem:[#allocation8 + $0xac0] sm:$0xf]  ;;  %v10237_v6 = vld [vmem:[#allocation8 + $0xa20] sm:$0xf0] }
 0x1a9   :  { %2639 = vmatpush.bf16.msrb.mxu3 %v10100_v41  ;;  %2652 = vmatpush.bf16.msra.mxu0 %v10104_v3  ;;  %v13681_v41 = vld [vmem:[#allocation8 + $0xb9c] sm:$0xf0]  ;;  %v10468_v3 = vor.u32 %v13690_v2, %v10467_v32  ;;  %v10339_v2 = vld [vmem:[#allocation8 + $0xac8] sm:$0xf] }
 0x1aa   :  { %v10428_v53 = vor.u32 %v13681_v41, %v10427_v38  ;;  %v13657_v26 = vld [vmem:[#allocation8 + $0xadc] sm:$0xf0]  ;;  %v10340_v38 = vor.u32 %v13658_v61, %v10339_v2  ;;  %v13692_v61 = vld [vmem:[#allocation8 + $0xbf4] sm:$0xf0] }
 0x1ac   :  { %2614 = vmatpush.bf16.msrb.mxu1 %v10060_v58  ;;  %2627 = vmatpush.bf16.msrb.mxu2 %v10064_v23  ;;  %v13673_v58 = vld [vmem:[#allocation8 + $0xb5c] sm:$0xf0]  ;;  %v10436_v23 = vor.u32 %v13682_v48, %v10435_v43  ;;  %v13650_v48 = vld [vmem:[#allocation8 + $0xaa4] sm:$0xf0] }
 0x1ad   :  { %2640 = vmatpush.bf16.msrb.mxu3 %v10068_v21  ;;  %2653 = vmatpush.bf16.msra.mxu0 %v10072_v45  ;;  %v10397_v21 = vld [vmem:[#allocation8 + $0xb60] sm:$0xf0]  ;;  %v10403_v45 = vld [vmem:[#allocation8 + $0xb48] sm:$0xf]  ;;  %v10396_v1 = vor.u32 %v13673_v58, %v10395_v57 }
 0x1ae   :  { %v10400_v33 = vor.u32 %v13669_v59, %v10397_v21  ;;  %v13641_v59 = vld [vmem:[#allocation8 + $0xa5c] sm:$0xf0]  ;;  %v10308_v21 = vor.u32 %v13650_v48, %v10307_v14  ;;  %v10445_v14 = vld [vmem:[#allocation8 + $0xbb0] sm:$0xf0]  ;;  %v13684_v48 = vld [vmem:[#allocation8 + $0xbb4] sm:$0xf0] }
 0x1b0   :  { %2615 = vmatpush.bf16.msrb.mxu1 %v10028_v4  ;;  %2628 = vmatpush.bf16.msrb.mxu2 %v10032_v5  ;;  %v10404_v4 = vor.u32 %v13674_v60, %v10403_v45  ;;  %v10408_v5 = vor.u32 %v13670_v62, %v10405_v63  ;;  %v13637_v45 = vld [vmem:[#allocation8 + $0xa44] sm:$0xf]  ;;  %v10275_v62 = vld [vmem:[#allocation8 + $0xa48] sm:$0xf] }
 0x1b1   :  { %2641 = vmatpush.bf16.msrb.mxu3 %v10036_v9  ;;  %2654 = vmatpush.bf16.msra.mxu0 %v10040_v10  ;;  %v13666_v9 = vld [vmem:[#allocation8 + $0xb24] sm:$0xf0]  ;;  %v13662_v10 = vld [vmem:[#allocation8 + $0xb0c] sm:$0xf]  ;;  %v10269_v60 = vld [vmem:[#allocation8 + $0xa60] sm:$0xf0] }
 0x1b2   :  { %v10372_v31 = vor.u32 %v13666_v9, %v10371_v8  ;;  %v10376_v32 = vor.u32 %v13662_v10, %v10373_v11  ;;  %v13642_v63 = vld [vmem:[#allocation8 + $0xa64] sm:$0xf0]  ;;  %v10272_v51 = vor.u32 %v13637_v45, %v10269_v60  ;;  %v10413_v45 = vld [vmem:[#allocation8 + $0xb70] sm:$0xf0]  ;;  %v10419_v60 = vld [vmem:[#allocation8 + $0xb58] sm:$0xf] }
 0x1b3   :  { %v10276_v7 = vor.u32 %v13642_v63, %v10275_v62  ;;  %v10243_v10 = vld [vmem:[#allocation8 + $0xa08] sm:$0xf]  ;;  %v13676_v62 = vld [vmem:[#allocation8 + $0xb74] sm:$0xf0]  ;;  %v13672_v63 = vld [vmem:[#allocation8 + $0xb5c] sm:$0xf] }
 0x1b4   :  { %2616 = vmatpush.bf16.msrb.mxu1 %v9996_v34  ;;  %2629 = vmatpush.bf16.msrb.mxu2 %v10000_v35  ;;  %v1622_v13 = vpop.f32.mrf.mxu1  ;;  %v13653_v34 = vld [vmem:[#allocation8 + $0xac4] sm:$0xf]  ;;  %v13634_v11 = vld [vmem:[#allocation8 + $0xa24] sm:$0xf0] }
 0x1b5   :  { %2642 = vmatpush.bf16.msrb.mxu3 %v10004_v37  ;;  %2655 = vmatpush.bf16.msra.mxu0 %v10008_v12  ;;  %v14790_v15 = vadd.f32 %v1622_v13, %v14755_v47  ;;  %v10333_v35 = vld [vmem:[#allocation8 + $0xae0] sm:$0xf0]  ;;  %v10341_v37 = vld [vmem:[#allocation8 + $0xae8] sm:$0xf0]  ;;  %v10332_v47 = vor.u32 %v13657_v26, %v10331_v20  ;;  %v13691_v20 = vld [vmem:[#allocation8 + $0xbec] sm:$0xf0]  ;;  %v2735_v26 = vunpack.c.l.b16 %v14767_v54 }
 0x1b6   :  { %v10336_v12 = vor.u32 %v13653_v34, %v10333_v35  ;;  %v10344_v41 = vor.u32 %v13654_v36, %v10341_v37  ;;  %v13630_v13 = vld [vmem:[#allocation8 + $0xa0c] sm:$0xf]  ;;  %v10483_v34 = vld [vmem:[#allocation8 + $0xbd8] sm:$0xf]  ;;  %v13688_v36 = vld [vmem:[#allocation8 + $0xbdc] sm:$0xf] }
 0x1b7   :  { %2617 = vmatmul.bf16.vlgmr.msrb.gmra.mxu1 %v14767_v54  ;;  %2630 = vmatmul.bf16.vlgmr.msrb.gmra.mxu2 %v14767_v54  ;;  %v1661_v16 = vpop.f32.mrf.mxu0  ;;  %v10485_v37 = vld [vmem:[#allocation8 + $0xbf8] sm:$0xf0] }
 0x1b8   :  { %3059 = vmatpush.bf16.msra.mxu1 %v10460_v25  ;;  %3072 = vmatpush.bf16.msra.mxu2 %v10464_v39  ;;  %v14793_v27 = vadd.f32 %v1661_v16, %v14758_v24  ;;  %v10299_v25 = vld [vmem:[#allocation8 + $0xa80] sm:$0xf] }
 0x1b9   :  { %3085 = vmatpush.bf16.msra.mxu3 %v10468_v3  ;;  %3098 = vmatpush.bf16.msrb.mxu0 %v10472_v22  ;;  %v13649_v39 = vld [vmem:[#allocation8 + $0xa9c] sm:$0xf0]  ;;  %v13645_v3 = vld [vmem:[#allocation8 + $0xa84] sm:$0xf] }
 0x1ba   :  { %2643 = vmatmul.bf16.vlgmr.msrb.gmra.mxu3 %v14767_v54  ;;  %2656 = vmatmul.bf16.vlgmr.msra.gmra.mxu0 %v14767_v54  ;;  %v1635_v24 = vpop.f32.mrf.mxu2  ;;  %v10301_v22 = vld [vmem:[#allocation8 + $0xaa0] sm:$0xf0]  ;;  %v10300_v58 = vor.u32 %v13649_v39, %v10299_v25  ;;  %v13683_v54 = vld [vmem:[#allocation8 + $0xbac] sm:$0xf0] }
 0x1bb   :  { %v14796_v42 = vadd.f32 %v1635_v24, %v14761_v44  ;;  %v10312_v44 = vor.u32 %v13646_v49, %v10309_v50  ;;  %v10484_v24 = vor.u32 %v13692_v61, %v10483_v34  ;;  %v13680_v49 = vld [vmem:[#allocation8 + $0xb9c] sm:$0xf]  ;;  %v10349_v61 = vld [vmem:[#allocation8 + $0xaf0] sm:$0xf0] }
 0x1bc   :  { %3060 = vmatpush.bf16.msra.mxu1 %v10428_v53  ;;  %3073 = vmatpush.bf16.msra.mxu2 %v10432_v56  ;;  %v1624_v56 = vpop.f32.mrf.mxu1  ;;  %v10453_v50 = vld [vmem:[#allocation8 + $0xbb8] sm:$0xf0] }
 0x1bd   :  { %3086 = vmatpush.bf16.msra.mxu3 %v10436_v23  ;;  %3099 = vmatpush.bf16.msrb.mxu0 %v10440_v30  ;;  %v1648_v43 = vpop.f32.mrf.mxu3  ;;  %v10304_v23 = vor.u32 %v13645_v3, %v10301_v22  ;;  %v10267_v30 = vld [vmem:[#allocation8 + $0xa40] sm:$0xf]  ;;  %v10488_v3 = vor.u32 %v13688_v36, %v10485_v37  ;;  %v13679_v22 = vld [vmem:[#allocation8 + $0xb94] sm:$0xf]  ;;  %v10355_v36 = vld [vmem:[#allocation8 + $0xad8] sm:$0xf] }
 0x1be   :  { %v14799_v53 = vadd.f32 %v1648_v43, %v14764_v52  ;;  %v10235_v52 = vld [vmem:[#allocation8 + $0xa00] sm:$0xf]  ;;  %v10268_v28 = vor.u32 %v13641_v59, %v10267_v30  ;;  %v10451_v43 = vld [vmem:[#allocation8 + $0xb98] sm:$0xf]  ;;  %v13675_v30 = vld [vmem:[#allocation8 + $0xb6c] sm:$0xf0] }
 0x1bf   :  { %v1663_v57 = vpop.f32.mrf.mxu0  ;;  %v10452_v59 = vor.u32 %v13684_v48, %v10451_v43  ;;  %v13660_v37 = vld [vmem:[#allocation8 + $0xaf4] sm:$0xf0] }
 0x1c0   :  { %3061 = vmatpush.bf16.msra.mxu1 %v10396_v1  ;;  %3074 = vmatpush.bf16.msra.mxu2 %v10400_v33  ;;  %v13638_v1 = vld [vmem:[#allocation8 + $0xa4c] sm:$0xf] }
 0x1c1   :  { %3087 = vmatpush.bf16.msra.mxu3 %v10404_v4  ;;  %3100 = vmatpush.bf16.msrb.mxu0 %v10408_v5  ;;  %v10277_v33 = vld [vmem:[#allocation8 + $0xa68] sm:$0xf0]  ;;  %v13633_v4 = vld [vmem:[#allocation8 + $0xa1c] sm:$0xf0]  ;;  %v13629_v5 = vld [vmem:[#allocation8 + $0xa04] sm:$0xf] }
 0x1c2   :  { %v10280_v8 = vor.u32 %v13638_v1, %v10277_v33  ;;  %v1637_v9 = vpop.f32.mrf.mxu2  ;;  %v10236_v35 = vor.u32 %v13633_v4, %v10235_v52  ;;  %v10240_v2 = vor.u32 %v13629_v5, %v10237_v6  ;;  %v10421_v1 = vld [vmem:[#allocation8 + $0xb78] sm:$0xf0]  ;;  %v10420_v4 = vor.u32 %v13676_v62, %v10419_v60  ;;  %v13663_v6 = vld [vmem:[#allocation8 + $0xb14] sm:$0xf] }
 0x1c3   :  { %v10424_v5 = vor.u32 %v13672_v63, %v10421_v1  ;;  %v13668_v9 = vld [vmem:[#allocation8 + $0xb34] sm:$0xf0]  ;;  %v13639_v62 = vld [vmem:[#allocation8 + $0xa54] sm:$0xf] }
 0x1c4   :  { %3062 = vmatpush.bf16.msra.mxu1 %v10364_v18  ;;  %3075 = vmatpush.bf16.msra.mxu2 %v10368_v19  ;;  %v10245_v18 = vld [vmem:[#allocation8 + $0xa28] sm:$0xf0]  ;;  %v10475_v19 = vld [vmem:[#allocation8 + $0xbd0] sm:$0xf]  ;;  %v10285_v63 = vld [vmem:[#allocation8 + $0xa70] sm:$0xf0] }
 0x1c5   :  { %3088 = vmatpush.bf16.msra.mxu3 %v10372_v31  ;;  %3101 = vmatpush.bf16.msrb.mxu0 %v10376_v32  ;;  %v1650_v16 = vpop.f32.mrf.mxu3  ;;  %v13687_v31 = vld [vmem:[#allocation8 + $0xbd4] sm:$0xf]  ;;  %v10476_v25 = vor.u32 %v13691_v20, %v10475_v19  ;;  %v10291_v1 = vld [vmem:[#allocation8 + $0xa58] sm:$0xf] }
 0x1c6   :  { %v10477_v32 = vld [vmem:[#allocation8 + $0xbf0] sm:$0xf0] }
 0x1c7   :  { %v10480_v39 = vor.u32 %v13687_v31, %v10477_v32  ;;  %v13659_v31 = vld [vmem:[#allocation8 + $0xaec] sm:$0xf0] }
 0x1c8   :  { %3063 = vmatpush.bf16.msra.mxu1 %v10332_v47  ;;  %3076 = vmatpush.bf16.msra.mxu2 %v10336_v12  ;;  %v10244_v47 = vor.u32 %v13634_v11, %v10243_v10  ;;  %v10248_v12 = vor.u32 %v13630_v13, %v10245_v18  ;;  %v13664_v10 = vld [vmem:[#allocation8 + $0xb1c] sm:$0xf] }
 0x1c9   :  { %3089 = vmatpush.bf16.msra.mxu3 %v10340_v38  ;;  %3102 = vmatpush.bf16.msrb.mxu0 %v10344_v41  ;;  %v14802_v38 = vpack.c.b16 %v2735_v26, %v2735_v26  ;;  %v10443_v41 = vld [vmem:[#allocation8 + $0xb90] sm:$0xf]  ;;  %v10389_v11 = vld [vmem:[#allocation8 + $0xb38] sm:$0xf0] }
 0x1ca   :  { %v10444_v57 = vor.u32 %v13683_v54, %v10443_v41  ;;  %v10347_v26 = vld [vmem:[#allocation8 + $0xad0] sm:$0xf]  ;;  %v10356_v54 = vor.u32 %v13660_v37, %v10355_v36  ;;  %v13754_v37 = vld [vmem:[#allocation8 + $0xde4] sm:$0xf0] }
 0x1cb   :  { %v14805_v56 = vrot.slane %v14802_v38, 1  ;;  %v13651_v41 = vld [vmem:[#allocation8 + $0xaac] sm:$0xf0] }
 0x1cc   :  { %3064 = vmatpush.bf16.msra.mxu1 %v10300_v58  ;;  %3077 = vmatpush.bf16.msra.mxu2 %v10304_v23  ;;  %v10448_v58 = vor.u32 %v13679_v22, %v10445_v14  ;;  %v10411_v23 = vld [vmem:[#allocation8 + $0xb50] sm:$0xf]  ;;  %v10317_v22 = vld [vmem:[#allocation8 + $0xab0] sm:$0xf0]  ;;  %v10323_v14 = vld [vmem:[#allocation8 + $0xa98] sm:$0xf] }
 0x1cd   :  { %3090 = vmatpush.bf16.msra.mxu3 %v10308_v21  ;;  %3103 = vmatpush.bf16.msrb.mxu0 %v10312_v44  ;;  %v10456_v21 = vor.u32 %v13680_v49, %v10453_v50  ;;  %v13671_v44 = vld [vmem:[#allocation8 + $0xb54] sm:$0xf]  ;;  %v10412_v33 = vor.u32 %v13675_v30, %v10411_v23  ;;  %v13652_v49 = vld [vmem:[#allocation8 + $0xab4] sm:$0xf0]  ;;  %v13648_v50 = vld [vmem:[#allocation8 + $0xa9c] sm:$0xf] }
 0x1ce   :  { %v10416_v52 = vor.u32 %v13671_v44, %v10413_v45  ;;  %v10283_v44 = vld [vmem:[#allocation8 + $0xa50] sm:$0xf]  ;;  %v10324_v60 = vor.u32 %v13652_v49, %v10323_v14  ;;  %v10685_v14 = vld [vmem:[#allocation8 + $0xda0] sm:$0xf0]  ;;  %v13746_v49 = vld [vmem:[#allocation8 + $0xda4] sm:$0xf0] }
 0x1cf   :  { %v13643_v45 = vld [vmem:[#allocation8 + $0xa6c] sm:$0xf0] }
 0x1d0   :  { %3065 = vmatpush.bf16.msra.mxu1 %v10268_v28  ;;  %3078 = vmatpush.bf16.msra.mxu2 %v10272_v51  ;;  %v10379_v28 = vld [vmem:[#allocation8 + $0xb10] sm:$0xf] }
 0x1d1   :  { %3091 = vmatpush.bf16.msra.mxu3 %v10276_v7  ;;  %3104 = vmatpush.bf16.msrb.mxu0 %v10280_v8  ;;  %v13667_v51 = vld [vmem:[#allocation8 + $0xb2c] sm:$0xf0]  ;;  %v10381_v7 = vld [vmem:[#allocation8 + $0xb30] sm:$0xf0]  ;;  %v10387_v8 = vld [vmem:[#allocation8 + $0xb18] sm:$0xf] }
 0x1d2   :  { %v10380_v19 = vor.u32 %v13667_v51, %v10379_v28  ;;  %v10384_v20 = vor.u32 %v13663_v6, %v10381_v7  ;;  %v10388_v34 = vor.u32 %v13668_v9, %v10387_v8  ;;  %v10293_v28 = vld [vmem:[#allocation8 + $0xa78] sm:$0xf0]  ;;  %v10284_v51 = vor.u32 %v13643_v45, %v10283_v44  ;;  %v13631_v6 = vld [vmem:[#allocation8 + $0xa14] sm:$0xf] }
 0x1d3   :  { %v10253_v7 = vld [vmem:[#allocation8 + $0xa30] sm:$0xf0] }
 0x1d4   :  { %3066 = vmatpush.bf16.msra.mxu1 %v10236_v35  ;;  %3079 = vmatpush.bf16.msra.mxu2 %v10240_v2  ;;  %v2069_v13 = vpop.f32.mrf.mxu1  ;;  %v10392_v35 = vor.u32 %v13664_v10, %v10389_v11  ;;  %v13655_v2 = vld [vmem:[#allocation8 + $0xad4] sm:$0xf]  ;;  %v10259_v11 = vld [vmem:[#allocation8 + $0xa18] sm:$0xf]  ;;  %v10256_v36 = vor.u32 %v13631_v6, %v10253_v7  ;;  %v13725_v6 = vld [vmem:[#allocation8 + $0xd04] sm:$0xf] }
 0x1d5   :  { %3092 = vmatpush.bf16.msra.mxu3 %v10244_v47  ;;  %3105 = vmatpush.bf16.msrb.mxu0 %v10248_v12  ;;  %v14812_v16 = vadd.f32 %v2069_v13, %v14774_v17  ;;  %v13656_v47 = vld [vmem:[#allocation8 + $0xadc] sm:$0xf]  ;;  %v10348_v17 = vor.u32 %v13659_v31, %v10347_v26  ;;  %v13636_v13 = vld [vmem:[#allocation8 + $0xa34] sm:$0xf0]  ;;  %v10715_v26 = vld [vmem:[#allocation8 + $0xdc0] sm:$0xf] }
 0x1d6   :  { %v10357_v12 = vld [vmem:[#allocation8 + $0xaf8] sm:$0xf0]  ;;  %v13753_v31 = vld [vmem:[#allocation8 + $0xddc] sm:$0xf0]  ;;  %v10621_v7 = vld [vmem:[#allocation8 + $0xd20] sm:$0xf0] }
 0x1d7   :  { %3067 = vmatmul.bf16.vlgmr.msra.gmra.mxu1 %v14805_v56  ;;  %3080 = vmatmul.bf16.vlgmr.msra.gmra.mxu2 %v14805_v56  ;;  %v2108_v18 = vpop.f32.mrf.mxu0 }
 0x1d8   :  { %3111 = vmatpush.bf16.msrb.mxu1 %v10476_v25  ;;  %3124 = vmatpush.bf16.msrb.mxu2 %v10480_v39  ;;  %v14815_v32 = vadd.f32 %v2108_v18, %v14777_v29  ;;  %v10352_v25 = vor.u32 %v13655_v2, %v10349_v61  ;;  %v10315_v39 = vld [vmem:[#allocation8 + $0xa90] sm:$0xf]  ;;  %v13632_v18 = vld [vmem:[#allocation8 + $0xa1c] sm:$0xf]  ;;  %v10723_v2 = vld [vmem:[#allocation8 + $0xdc8] sm:$0xf] }
 0x1d9   :  { %3137 = vmatpush.bf16.msrb.mxu3 %v10484_v24  ;;  %3150 = vmatpush.bf16.msra.mxu0 %v10488_v3  ;;  %v10360_v24 = vor.u32 %v13656_v47, %v10357_v12  ;;  %v13647_v3 = vld [vmem:[#allocation8 + $0xa94] sm:$0xf]  ;;  %v13750_v47 = vld [vmem:[#allocation8 + $0xdcc] sm:$0xf] }
 0x1da   :  { %3093 = vmatmul.bf16.vlgmr.msra.gmra.mxu3 %v14805_v56  ;;  %3106 = vmatmul.bf16.vlgmr.msrb.gmra.mxu0 %v14805_v56  ;;  %v2082_v29 = vpop.f32.mrf.mxu2  ;;  %v10725_v12 = vld [vmem:[#allocation8 + $0xde8] sm:$0xf0] }
 0x1db   :  { %v14818_v43 = vadd.f32 %v2082_v29, %v14780_v46  ;;  %v10724_v29 = vor.u32 %v13754_v37, %v10723_v2  ;;  %v10595_v37 = vld [vmem:[#allocation8 + $0xcc8] sm:$0xf] }
 0x1dc   :  { %3112 = vmatpush.bf16.msrb.mxu1 %v10444_v57  ;;  %3125 = vmatpush.bf16.msrb.mxu2 %v10448_v58  ;;  %v10325_v57 = vld [vmem:[#allocation8 + $0xab8] sm:$0xf0]  ;;  %v2071_v23 = vpop.f32.mrf.mxu1 }
 0x1dd   :  { %3138 = vmatpush.bf16.msrb.mxu3 %v10452_v59  ;;  %3151 = vmatpush.bf16.msra.mxu0 %v10456_v21  ;;  %v2095_v48 = vpop.f32.mrf.mxu3  ;;  %v10316_v59 = vor.u32 %v13651_v41, %v10315_v39  ;;  %v10320_v21 = vor.u32 %v13647_v3, %v10317_v22  ;;  %v10328_v46 = vor.u32 %v13648_v50, %v10325_v57  ;;  %v13741_v22 = vld [vmem:[#allocation8 + $0xd84] sm:$0xf]  ;;  %v13742_v50 = vld [vmem:[#allocation8 + $0xd8c] sm:$0xf] }
 0x1de   :  { %v14821_v58 = vadd.f32 %v2095_v48, %v14783_v55  ;;  %v10251_v55 = vld [vmem:[#allocation8 + $0xa10] sm:$0xf]  ;;  %v10716_v39 = vor.u32 %v13753_v31, %v10715_v26  ;;  %v10728_v3 = vor.u32 %v13750_v47, %v10725_v12  ;;  %v10691_v48 = vld [vmem:[#allocation8 + $0xd88] sm:$0xf]  ;;  %v10693_v57 = vld [vmem:[#allocation8 + $0xda8] sm:$0xf0] }
 0x1df   :  { %v2110_v30 = vpop.f32.mrf.mxu0  ;;  %v10692_v44 = vor.u32 %v13746_v49, %v10691_v48  ;;  %v10696_v45 = vor.u32 %v13742_v50, %v10693_v57  ;;  %v10587_v26 = vld [vmem:[#allocation8 + $0xcc0] sm:$0xf]  ;;  %v13722_v47 = vld [vmem:[#allocation8 + $0xce4] sm:$0xf0]  ;;  %v13718_v12 = vld [vmem:[#allocation8 + $0xccc] sm:$0xf] }
 0x1e0   :  { %3113 = vmatpush.bf16.msrb.mxu1 %v10412_v33  ;;  %3126 = vmatpush.bf16.msrb.mxu2 %v10416_v52  ;;  %v13644_v33 = vld [vmem:[#allocation8 + $0xa74] sm:$0xf0]  ;;  %v13640_v52 = vld [vmem:[#allocation8 + $0xa5c] sm:$0xf]  ;;  %v10688_v30 = vor.u32 %v13741_v22, %v10685_v14  ;;  %v13721_v31 = vld [vmem:[#allocation8 + $0xcdc] sm:$0xf0] }
 0x1e1   :  { %3139 = vmatpush.bf16.msrb.mxu3 %v10420_v4  ;;  %3152 = vmatpush.bf16.msra.mxu0 %v10424_v5  ;;  %v10288_v4 = vor.u32 %v13639_v62, %v10285_v63  ;;  %v13635_v5 = vld [vmem:[#allocation8 + $0xa2c] sm:$0xf0]  ;;  %v10292_v8 = vor.u32 %v13644_v33, %v10291_v1  ;;  %v10296_v9 = vor.u32 %v13640_v52, %v10293_v28  ;;  %v10659_v62 = vld [vmem:[#allocation8 + $0xd48] sm:$0xf]  ;;  %v13734_v1 = vld [vmem:[#allocation8 + $0xd4c] sm:$0xf] }
 0x1e2   :  { %v2084_v10 = vpop.f32.mrf.mxu2  ;;  %v10252_v61 = vor.u32 %v13635_v5, %v10251_v55  ;;  %v13738_v63 = vld [vmem:[#allocation8 + $0xd64] sm:$0xf0]  ;;  %v10661_v33 = vld [vmem:[#allocation8 + $0xd68] sm:$0xf0]  ;;  %v10619_v55 = vld [vmem:[#allocation8 + $0xd00] sm:$0xf] }
 0x1e3   :  { %v10664_v5 = vor.u32 %v13734_v1, %v10661_v33  ;;  %v13726_v10 = vld [vmem:[#allocation8 + $0xd0c] sm:$0xf]  ;;  %v10563_v22 = vld [vmem:[#allocation8 + $0xc88] sm:$0xf] }
 0x1e4   :  { %3114 = vmatpush.bf16.msrb.mxu1 %v10380_v19  ;;  %3127 = vmatpush.bf16.msrb.mxu2 %v10384_v20  ;;  %v10261_v20 = vld [vmem:[#allocation8 + $0xa38] sm:$0xf0]  ;;  %v13714_v49 = vld [vmem:[#allocation8 + $0xca4] sm:$0xf0]  ;;  %v13710_v50 = vld [vmem:[#allocation8 + $0xc8c] sm:$0xf] }
 0x1e5   :  { %3140 = vmatpush.bf16.msrb.mxu3 %v10388_v34  ;;  %3153 = vmatpush.bf16.msra.mxu0 %v10392_v35  ;;  %v2097_v19 = vpop.f32.mrf.mxu3  ;;  %v13749_v34 = vld [vmem:[#allocation8 + $0xdc4] sm:$0xf]  ;;  %v10565_v57 = vld [vmem:[#allocation8 + $0xca8] sm:$0xf0]  ;;  %v10531_v1 = vld [vmem:[#allocation8 + $0xc48] sm:$0xf] }
 0x1e6   :  { %v10717_v35 = vld [vmem:[#allocation8 + $0xde0] sm:$0xf0]  ;;  %v13706_v33 = vld [vmem:[#allocation8 + $0xc64] sm:$0xf0] }
 0x1e7   :  { %v10720_v41 = vor.u32 %v13749_v34, %v10717_v35 }
 0x1e8   :  { %3115 = vmatpush.bf16.msrb.mxu1 %v10348_v17  ;;  %3128 = vmatpush.bf16.msrb.mxu2 %v10352_v25  ;;  %v10260_v17 = vor.u32 %v13636_v13, %v10259_v11  ;;  %v10264_v25 = vor.u32 %v13632_v18, %v10261_v20  ;;  %v10629_v11 = vld [vmem:[#allocation8 + $0xd28] sm:$0xf0]  ;;  %v10624_v20 = vor.u32 %v13725_v6, %v10621_v7  ;;  %v10493_v6 = vld [vmem:[#allocation8 + $0xc20] sm:$0xf0] }
 0x1e9   :  { %3141 = vmatpush.bf16.msrb.mxu3 %v10356_v54  ;;  %3154 = vmatpush.bf16.msra.mxu0 %v10360_v24  ;;  %v10683_v54 = vld [vmem:[#allocation8 + $0xd80] sm:$0xf]  ;;  %v10632_v2 = vor.u32 %v13726_v10, %v10629_v11  ;;  %v10532_v7 = vor.u32 %v13706_v33, %v10531_v1  ;;  %v10499_v10 = vld [vmem:[#allocation8 + $0xc08] sm:$0xf]  ;;  %v13736_v1 = vld [vmem:[#allocation8 + $0xd5c] sm:$0xf] }
 0x1ea   :  { %v13745_v24 = vld [vmem:[#allocation8 + $0xd9c] sm:$0xf0]  ;;  %v13698_v11 = vld [vmem:[#allocation8 + $0xc24] sm:$0xf0]  ;;  %v10677_v33 = vld [vmem:[#allocation8 + $0xd78] sm:$0xf0] }
 0x1eb   :  { %v10684_v23 = vor.u32 %v13745_v24, %v10683_v54  ;;  %v10596_v54 = vor.u32 %v13722_v47, %v10595_v37  ;;  %v13756_v37 = vld [vmem:[#allocation8 + $0xdf4] sm:$0xf0]  ;;  %v13752_v47 = vld [vmem:[#allocation8 + $0xddc] sm:$0xf] }
 0x1ec   :  { %3116 = vmatpush.bf16.msrb.mxu1 %v10316_v59  ;;  %3129 = vmatpush.bf16.msrb.mxu2 %v10320_v21  ;;  %v10651_v59 = vld [vmem:[#allocation8 + $0xd40] sm:$0xf] }
 0x1ed   :  { %3142 = vmatpush.bf16.msrb.mxu3 %v10324_v60  ;;  %3155 = vmatpush.bf16.msra.mxu0 %v10328_v46  ;;  %v13737_v21 = vld [vmem:[#allocation8 + $0xd5c] sm:$0xf0]  ;;  %v13733_v60 = vld [vmem:[#allocation8 + $0xd44] sm:$0xf] }
 0x1ee   :  { %v10653_v46 = vld [vmem:[#allocation8 + $0xd60] sm:$0xf0]  ;;  %v10652_v52 = vor.u32 %v13737_v21, %v10651_v59 }
 0x1ef   :  { %v10656_v28 = vor.u32 %v13733_v60, %v10653_v46  ;;  %v13705_v60 = vld [vmem:[#allocation8 + $0xc5c] sm:$0xf0]  ;;  %v10564_v46 = vor.u32 %v13714_v49, %v10563_v22  ;;  %v10707_v22 = vld [vmem:[#allocation8 + $0xd98] sm:$0xf]  ;;  %v13744_v49 = vld [vmem:[#allocation8 + $0xd9c] sm:$0xf] }
 0x1f0   :  { %3117 = vmatpush.bf16.msrb.mxu1 %v10284_v51  ;;  %3130 = vmatpush.bf16.msrb.mxu2 %v10288_v4  ;;  %v13729_v51 = vld [vmem:[#allocation8 + $0xd1c] sm:$0xf0]  ;;  %v10660_v4 = vor.u32 %v13738_v63, %v10659_v62  ;;  %v13701_v62 = vld [vmem:[#allocation8 + $0xc44] sm:$0xf] }
 0x1f1   :  { %3143 = vmatpush.bf16.msrb.mxu3 %v10292_v8  ;;  %3156 = vmatpush.bf16.msra.mxu0 %v10296_v9  ;;  %v10627_v8 = vld [vmem:[#allocation8 + $0xd08] sm:$0xf]  ;;  %v10620_v19 = vor.u32 %v13729_v51, %v10619_v55  ;;  %v10525_v63 = vld [vmem:[#allocation8 + $0xc60] sm:$0xf0] }
 0x1f2   :  { %v13730_v9 = vld [vmem:[#allocation8 + $0xd24] sm:$0xf0]  ;;  %v10528_v51 = vor.u32 %v13701_v62, %v10525_v63  ;;  %v10675_v62 = vld [vmem:[#allocation8 + $0xd58] sm:$0xf] }
 0x1f3   :  { %v10628_v35 = vor.u32 %v13730_v9, %v10627_v8  ;;  %v13740_v63 = vld [vmem:[#allocation8 + $0xd74] sm:$0xf0] }
 0x1f4   :  { %3118 = vmatpush.bf16.msrb.mxu1 %v10252_v61  ;;  %3131 = vmatpush.bf16.msrb.mxu2 %v10256_v36  ;;  %v2121_v13 = vpop.f32.mrf.mxu1  ;;  %v13717_v61 = vld [vmem:[#allocation8 + $0xcc4] sm:$0xf] }
 0x1f5   :  { %3144 = vmatpush.bf16.msrb.mxu3 %v10260_v17  ;;  %3157 = vmatpush.bf16.msra.mxu0 %v10264_v25  ;;  %v10589_v36 = vld [vmem:[#allocation8 + $0xce0] sm:$0xf0]  ;;  %v10597_v17 = vld [vmem:[#allocation8 + $0xce8] sm:$0xf0] }
 0x1f6   :  { %v10592_v25 = vor.u32 %v13717_v61, %v10589_v36  ;;  %v10600_v24 = vor.u32 %v13718_v12, %v10597_v17  ;;  %v10741_v12 = vld [vmem:[#allocation8 + $0xdf8] sm:$0xf0]  ;;  %v10500_v17 = vor.u32 %v13698_v11, %v10499_v10 }
 0x1f7   :  { %3119 = vmatmul.bf16.vlgmr.msrb.gmra.mxu1 %v14805_v56  ;;  %3132 = vmatmul.bf16.vlgmr.msrb.gmra.mxu2 %v14805_v56  ;;  %v2160_v18 = vpop.f32.mrf.mxu0  ;;  %v10645_v10 = vld [vmem:[#allocation8 + $0xd38] sm:$0xf0] }
 0x1f8   :  { %3558 = vmatpush.bf16.msra.mxu1 %v10716_v39  ;;  %3571 = vmatpush.bf16.msra.mxu2 %v10720_v41  ;;  %v14831_v34 = vadd.f32 %v2160_v18, %v14793_v27  ;;  %v10555_v39 = vld [vmem:[#allocation8 + $0xc80] sm:$0xf] }
 0x1f9   :  { %3584 = vmatpush.bf16.msra.mxu3 %v10724_v29  ;;  %3597 = vmatpush.bf16.msrb.mxu0 %v10728_v3  ;;  %v13713_v41 = vld [vmem:[#allocation8 + $0xc9c] sm:$0xf0]  ;;  %v13709_v29 = vld [vmem:[#allocation8 + $0xc84] sm:$0xf] }
 0x1fa   :  { %3145 = vmatmul.bf16.vlgmr.msrb.gmra.mxu3 %v14805_v56  ;;  %3158 = vmatmul.bf16.vlgmr.msra.gmra.mxu0 %v14805_v56  ;;  %v14828_v56 = vadd.f32 %v2121_v13, %v14790_v15  ;;  %v10588_v15 = vor.u32 %v13721_v31, %v10587_v26  ;;  %v2134_v27 = vpop.f32.mrf.mxu2  ;;  %v10557_v3 = vld [vmem:[#allocation8 + $0xca0] sm:$0xf0]  ;;  %v10556_v21 = vor.u32 %v13713_v41, %v10555_v39  ;;  %v13694_v13 = vld [vmem:[#allocation8 + $0xc0c] sm:$0xf]  ;;  %v13755_v26 = vld [vmem:[#allocation8 + $0xdec] sm:$0xf0] }
 0x1fb   :  { %v14834_v14 = vadd.f32 %v2134_v27, %v14796_v42  ;;  %v10568_v42 = vor.u32 %v13710_v50, %v10565_v57  ;;  %v13751_v31 = vld [vmem:[#allocation8 + $0xdd4] sm:$0xf]  ;;  %v10699_v41 = vld [vmem:[#allocation8 + $0xd90] sm:$0xf]  ;;  %v10744_v27 = vor.u32 %v13752_v47, %v10741_v12  ;;  %v10709_v50 = vld [vmem:[#allocation8 + $0xdb8] sm:$0xf0] }
 0x1fc   :  { %3559 = vmatpush.bf16.msra.mxu1 %v10684_v23  ;;  %3572 = vmatpush.bf16.msra.mxu2 %v10688_v30  ;;  %v2123_v30 = vpop.f32.mrf.mxu1  ;;  %v14840_v57 = vrot.slane %v14802_v38, 2  ;;  %v10611_v47 = vld [vmem:[#allocation8 + $0xcd8] sm:$0xf] }
 0x1fd   :  { %3585 = vmatpush.bf16.msra.mxu3 %v10692_v44  ;;  %3598 = vmatpush.bf16.msrb.mxu0 %v10696_v45  ;;  %v2147_v48 = vpop.f32.mrf.mxu3  ;;  %v10560_v44 = vor.u32 %v13709_v29, %v10557_v3  ;;  %v10523_v45 = vld [vmem:[#allocation8 + $0xc40] sm:$0xf]  ;;  %v13743_v29 = vld [vmem:[#allocation8 + $0xd94] sm:$0xf]  ;;  %v13724_v12 = vld [vmem:[#allocation8 + $0xcf4] sm:$0xf0] }
 0x1fe   :  { %v14837_v23 = vadd.f32 %v2147_v48, %v14799_v53  ;;  %v10491_v53 = vld [vmem:[#allocation8 + $0xc00] sm:$0xf]  ;;  %v10524_v55 = vor.u32 %v13705_v60, %v10523_v45  ;;  %v10701_v3 = vld [vmem:[#allocation8 + $0xdb0] sm:$0xf0]  ;;  %v13748_v48 = vld [vmem:[#allocation8 + $0xdb4] sm:$0xf0]  ;;  %v10712_v60 = vor.u32 %v13744_v49, %v10709_v50 }
 0x1ff   :  { %v2162_v59 = vpop.f32.mrf.mxu0  ;;  %v10708_v45 = vor.u32 %v13748_v48, %v10707_v22  ;;  %v13716_v49 = vld [vmem:[#allocation8 + $0xcb4] sm:$0xf0]  ;;  %v13712_v50 = vld [vmem:[#allocation8 + $0xc9c] sm:$0xf] }
 0x200   :  { %3560 = vmatpush.bf16.msra.mxu1 %v10652_v52  ;;  %3573 = vmatpush.bf16.msra.mxu2 %v10656_v28  ;;  %v13702_v52 = vld [vmem:[#allocation8 + $0xc4c] sm:$0xf]  ;;  %v10704_v59 = vor.u32 %v13743_v29, %v10701_v3  ;;  %v10573_v29 = vld [vmem:[#allocation8 + $0xcb0] sm:$0xf0]  ;;  %v10579_v3 = vld [vmem:[#allocation8 + $0xc98] sm:$0xf] }
 0x201   :  { %3586 = vmatpush.bf16.msra.mxu3 %v10660_v4  ;;  %3599 = vmatpush.bf16.msrb.mxu0 %v10664_v5  ;;  %v10533_v28 = vld [vmem:[#allocation8 + $0xc68] sm:$0xf0]  ;;  %v13697_v4 = vld [vmem:[#allocation8 + $0xc1c] sm:$0xf0]  ;;  %v13693_v5 = vld [vmem:[#allocation8 + $0xc04] sm:$0xf] }
 0x202   :  { %v10536_v8 = vor.u32 %v13702_v52, %v10533_v28  ;;  %v2136_v9 = vpop.f32.mrf.mxu2  ;;  %v10492_v61 = vor.u32 %v13697_v4, %v10491_v53  ;;  %v10496_v36 = vor.u32 %v13693_v5, %v10493_v6  ;;  %v10635_v53 = vld [vmem:[#allocation8 + $0xd10] sm:$0xf]  ;;  %v10680_v4 = vor.u32 %v13736_v1, %v10677_v33  ;;  %v13727_v5 = vld [vmem:[#allocation8 + $0xd14] sm:$0xf]  ;;  %v10547_v33 = vld [vmem:[#allocation8 + $0xc58] sm:$0xf] }
 0x203   :  { %v10637_v6 = vld [vmem:[#allocation8 + $0xd30] sm:$0xf0]  ;;  %v13728_v9 = vld [vmem:[#allocation8 + $0xd1c] sm:$0xf] }
 0x204   :  { %3561 = vmatpush.bf16.msra.mxu1 %v10620_v19  ;;  %3574 = vmatpush.bf16.msra.mxu2 %v10624_v20  ;;  %v10501_v19 = vld [vmem:[#allocation8 + $0xc28] sm:$0xf0]  ;;  %v10731_v20 = vld [vmem:[#allocation8 + $0xdd0] sm:$0xf]  ;;  %v10541_v1 = vld [vmem:[#allocation8 + $0xc70] sm:$0xf0] }
 0x205   :  { %3587 = vmatpush.bf16.msra.mxu3 %v10628_v35  ;;  %3600 = vmatpush.bf16.msrb.mxu0 %v10632_v2  ;;  %v2149_v18 = vpop.f32.mrf.mxu3  ;;  %v10733_v35 = vld [vmem:[#allocation8 + $0xdf0] sm:$0xf0]  ;;  %v10739_v2 = vld [vmem:[#allocation8 + $0xdd8] sm:$0xf] }
 0x206   :  { %v10736_v39 = vor.u32 %v13751_v31, %v10733_v35  ;;  %v13723_v31 = vld [vmem:[#allocation8 + $0xcec] sm:$0xf0] }
 0x208   :  { %3562 = vmatpush.bf16.msra.mxu1 %v10588_v15  ;;  %3575 = vmatpush.bf16.msra.mxu2 %v10592_v25  ;;  %v10504_v15 = vor.u32 %v13694_v13, %v10501_v19  ;;  %v10732_v25 = vor.u32 %v13755_v26, %v10731_v20  ;;  %v10640_v20 = vor.u32 %v13727_v5, %v10637_v6  ;;  %v10603_v26 = vld [vmem:[#allocation8 + $0xcd0] sm:$0xf]  ;;  %v13695_v5 = vld [vmem:[#allocation8 + $0xc14] sm:$0xf] }
 0x209   :  { %3588 = vmatpush.bf16.msra.mxu3 %v10596_v54  ;;  %3601 = vmatpush.bf16.msrb.mxu0 %v10600_v24  ;;  %v13747_v54 = vld [vmem:[#allocation8 + $0xdac] sm:$0xf0]  ;;  %v10740_v24 = vor.u32 %v13756_v37, %v10739_v2  ;;  %v10605_v37 = vld [vmem:[#allocation8 + $0xcf0] sm:$0xf0] }
 0x20a   :  { %v10700_v30 = vor.u32 %v13747_v54, %v10699_v41  ;;  %v13715_v41 = vld [vmem:[#allocation8 + $0xcac] sm:$0xf0]  ;;  %v10612_v54 = vor.u32 %v13724_v12, %v10611_v47  ;;  %v10509_v6 = vld [vmem:[#allocation8 + $0xc30] sm:$0xf0]  ;;  %v13818_v12 = vld [vmem:[#allocation8 + $0xfe4] sm:$0xf0] }
 0x20b   :  { %v10512_v47 = vor.u32 %v13695_v5, %v10509_v6  ;;  %v13789_v5 = vld [vmem:[#allocation8 + $0xf04] sm:$0xf] }
 0x20c   :  { %3563 = vmatpush.bf16.msra.mxu1 %v10556_v21  ;;  %3576 = vmatpush.bf16.msra.mxu2 %v10560_v44  ;;  %v10667_v21 = vld [vmem:[#allocation8 + $0xd50] sm:$0xf]  ;;  %v10877_v6 = vld [vmem:[#allocation8 + $0xf20] sm:$0xf0] }
 0x20d   :  { %3589 = vmatpush.bf16.msra.mxu3 %v10564_v46  ;;  %3602 = vmatpush.bf16.msrb.mxu0 %v10568_v42  ;;  %v13739_v44 = vld [vmem:[#allocation8 + $0xd6c] sm:$0xf0]  ;;  %v13735_v46 = vld [vmem:[#allocation8 + $0xd54] sm:$0xf] }
 0x20e   :  { %v10669_v42 = vld [vmem:[#allocation8 + $0xd70] sm:$0xf0]  ;;  %v10668_v52 = vor.u32 %v13739_v44, %v10667_v21 }
 0x20f   :  { %v10672_v28 = vor.u32 %v13735_v46, %v10669_v42  ;;  %v10539_v46 = vld [vmem:[#allocation8 + $0xc50] sm:$0xf] }
 0x210   :  { %3564 = vmatpush.bf16.msra.mxu1 %v10524_v55  ;;  %3577 = vmatpush.bf16.msra.mxu2 %v10528_v51  ;;  %v13731_v55 = vld [vmem:[#allocation8 + $0xd2c] sm:$0xf0]  ;;  %v10676_v51 = vor.u32 %v13740_v63, %v10675_v62  ;;  %v10580_v62 = vor.u32 %v13716_v49, %v10579_v3  ;;  %v13703_v63 = vld [vmem:[#allocation8 + $0xc54] sm:$0xf]  ;;  %v10941_v3 = vld [vmem:[#allocation8 + $0xfa0] sm:$0xf0] }
 0x211   :  { %3590 = vmatpush.bf16.msra.mxu3 %v10532_v7  ;;  %3603 = vmatpush.bf16.msrb.mxu0 %v10536_v8  ;;  %v10643_v7 = vld [vmem:[#allocation8 + $0xd18] sm:$0xf]  ;;  %v10636_v19 = vor.u32 %v13731_v55, %v10635_v53  ;;  %v13707_v42 = vld [vmem:[#allocation8 + $0xc6c] sm:$0xf0]  ;;  %v10549_v53 = vld [vmem:[#allocation8 + $0xc78] sm:$0xf0] }
 0x212   :  { %v13732_v8 = vld [vmem:[#allocation8 + $0xd34] sm:$0xf0]  ;;  %v10540_v55 = vor.u32 %v13707_v42, %v10539_v46  ;;  %v13810_v49 = vld [vmem:[#allocation8 + $0xfa4] sm:$0xf0] }
 0x213   :  { %v10644_v2 = vor.u32 %v13732_v8, %v10643_v7 }
 0x214   :  { %3565 = vmatpush.bf16.msra.mxu1 %v10492_v61  ;;  %3578 = vmatpush.bf16.msra.mxu2 %v10496_v36  ;;  %v2566_v11 = vpop.f32.mrf.mxu1  ;;  %v10648_v61 = vor.u32 %v13728_v9, %v10645_v10  ;;  %v13719_v36 = vld [vmem:[#allocation8 + $0xcd4] sm:$0xf]  ;;  %v10515_v10 = vld [vmem:[#allocation8 + $0xc18] sm:$0xf] }
 0x215   :  { %3591 = vmatpush.bf16.msra.mxu3 %v10500_v17  ;;  %3604 = vmatpush.bf16.msrb.mxu0 %v10504_v15  ;;  %v14847_v13 = vadd.f32 %v2566_v11, %v14812_v16  ;;  %v13720_v17 = vld [vmem:[#allocation8 + $0xcdc] sm:$0xf]  ;;  %v10604_v16 = vor.u32 %v13723_v31, %v10603_v26  ;;  %v13700_v11 = vld [vmem:[#allocation8 + $0xc34] sm:$0xf0]  ;;  %v10971_v26 = vld [vmem:[#allocation8 + $0xfc0] sm:$0xf] }
 0x216   :  { %v10613_v15 = vld [vmem:[#allocation8 + $0xcf8] sm:$0xf0]  ;;  %v13817_v31 = vld [vmem:[#allocation8 + $0xfdc] sm:$0xf0] }
 0x217   :  { %3566 = vmatmul.bf16.vlgmr.msra.gmra.mxu1 %v14840_v57  ;;  %3579 = vmatmul.bf16.vlgmr.msra.gmra.mxu2 %v14840_v57  ;;  %v2605_v18 = vpop.f32.mrf.mxu0 }
 0x218   :  { %3610 = vmatpush.bf16.msrb.mxu1 %v10732_v25  ;;  %3623 = vmatpush.bf16.msrb.mxu2 %v10736_v39  ;;  %v14850_v35 = vadd.f32 %v2605_v18, %v14815_v32  ;;  %v10608_v25 = vor.u32 %v13719_v36, %v10605_v37  ;;  %v10571_v39 = vld [vmem:[#allocation8 + $0xc90] sm:$0xf]  ;;  %v13696_v18 = vld [vmem:[#allocation8 + $0xc1c] sm:$0xf]  ;;  %v10979_v36 = vld [vmem:[#allocation8 + $0xfc8] sm:$0xf] }
 0x219   :  { %3636 = vmatpush.bf16.msrb.mxu3 %v10740_v24  ;;  %3649 = vmatpush.bf16.msra.mxu0 %v10744_v27  ;;  %v10616_v24 = vor.u32 %v13720_v17, %v10613_v15  ;;  %v13711_v27 = vld [vmem:[#allocation8 + $0xc94] sm:$0xf]  ;;  %v13814_v17 = vld [vmem:[#allocation8 + $0xfcc] sm:$0xf] }
 0x21a   :  { %3592 = vmatmul.bf16.vlgmr.msra.gmra.mxu3 %v14840_v57  ;;  %3605 = vmatmul.bf16.vlgmr.msrb.gmra.mxu0 %v14840_v57  ;;  %v2579_v32 = vpop.f32.mrf.mxu2  ;;  %v10981_v15 = vld [vmem:[#allocation8 + $0xfe8] sm:$0xf0] }
 0x21b   :  { %v14853_v22 = vadd.f32 %v2579_v32, %v14818_v43  ;;  %v10980_v32 = vor.u32 %v13818_v12, %v10979_v36  ;;  %v10851_v12 = vld [vmem:[#allocation8 + $0xec8] sm:$0xf] }
 0x21c   :  { %3611 = vmatpush.bf16.msrb.mxu1 %v10700_v30  ;;  %3624 = vmatpush.bf16.msrb.mxu2 %v10704_v59  ;;  %v10581_v30 = vld [vmem:[#allocation8 + $0xcb8] sm:$0xf0]  ;;  %v2568_v21 = vpop.f32.mrf.mxu1 }
 0x21d   :  { %3637 = vmatpush.bf16.msrb.mxu3 %v10708_v45  ;;  %3650 = vmatpush.bf16.msra.mxu0 %v10712_v60  ;;  %v2592_v48 = vpop.f32.mrf.mxu3  ;;  %v10572_v45 = vor.u32 %v13715_v41, %v10571_v39  ;;  %v10576_v60 = vor.u32 %v13711_v27, %v10573_v29  ;;  %v10584_v43 = vor.u32 %v13712_v50, %v10581_v30  ;;  %v13805_v29 = vld [vmem:[#allocation8 + $0xf84] sm:$0xf]  ;;  %v13806_v50 = vld [vmem:[#allocation8 + $0xf8c] sm:$0xf] }
 0x21e   :  { %v14856_v59 = vadd.f32 %v2592_v48, %v14821_v58  ;;  %v10507_v58 = vld [vmem:[#allocation8 + $0xc10] sm:$0xf]  ;;  %v10972_v39 = vor.u32 %v13817_v31, %v10971_v26  ;;  %v10984_v27 = vor.u32 %v13814_v17, %v10981_v15  ;;  %v10947_v48 = vld [vmem:[#allocation8 + $0xf88] sm:$0xf]  ;;  %v10949_v30 = vld [vmem:[#allocation8 + $0xfa8] sm:$0xf0] }
 0x21f   :  { %v2607_v44 = vpop.f32.mrf.mxu0  ;;  %v10948_v46 = vor.u32 %v13810_v49, %v10947_v48  ;;  %v10952_v42 = vor.u32 %v13806_v50, %v10949_v30  ;;  %v10843_v26 = vld [vmem:[#allocation8 + $0xec0] sm:$0xf]  ;;  %v13786_v17 = vld [vmem:[#allocation8 + $0xee4] sm:$0xf0]  ;;  %v13782_v15 = vld [vmem:[#allocation8 + $0xecc] sm:$0xf] }
 0x220   :  { %3612 = vmatpush.bf16.msrb.mxu1 %v10668_v52  ;;  %3625 = vmatpush.bf16.msrb.mxu2 %v10672_v28  ;;  %v13708_v52 = vld [vmem:[#allocation8 + $0xc74] sm:$0xf0]  ;;  %v13704_v28 = vld [vmem:[#allocation8 + $0xc5c] sm:$0xf]  ;;  %v10944_v44 = vor.u32 %v13805_v29, %v10941_v3  ;;  %v13785_v31 = vld [vmem:[#allocation8 + $0xedc] sm:$0xf0] }
 0x221   :  { %3638 = vmatpush.bf16.msrb.mxu3 %v10676_v51  ;;  %3651 = vmatpush.bf16.msra.mxu0 %v10680_v4  ;;  %v10544_v51 = vor.u32 %v13703_v63, %v10541_v1  ;;  %v13699_v4 = vld [vmem:[#allocation8 + $0xc2c] sm:$0xf0]  ;;  %v10548_v7 = vor.u32 %v13708_v52, %v10547_v33  ;;  %v10552_v8 = vor.u32 %v13704_v28, %v10549_v53  ;;  %v10915_v63 = vld [vmem:[#allocation8 + $0xf48] sm:$0xf]  ;;  %v13798_v33 = vld [vmem:[#allocation8 + $0xf4c] sm:$0xf] }
 0x222   :  { %v2581_v9 = vpop.f32.mrf.mxu2  ;;  %v10508_v37 = vor.u32 %v13699_v4, %v10507_v58  ;;  %v13802_v1 = vld [vmem:[#allocation8 + $0xf64] sm:$0xf0]  ;;  %v10917_v52 = vld [vmem:[#allocation8 + $0xf68] sm:$0xf0]  ;;  %v10875_v58 = vld [vmem:[#allocation8 + $0xf00] sm:$0xf] }
 0x223   :  { %v10920_v4 = vor.u32 %v13798_v33, %v10917_v52  ;;  %v13790_v9 = vld [vmem:[#allocation8 + $0xf0c] sm:$0xf]  ;;  %v10819_v29 = vld [vmem:[#allocation8 + $0xe88] sm:$0xf] }
 0x224   :  { %3613 = vmatpush.bf16.msrb.mxu1 %v10636_v19  ;;  %3626 = vmatpush.bf16.msrb.mxu2 %v10640_v20  ;;  %v10517_v20 = vld [vmem:[#allocation8 + $0xc38] sm:$0xf0]  ;;  %v13778_v49 = vld [vmem:[#allocation8 + $0xea4] sm:$0xf0]  ;;  %v13774_v50 = vld [vmem:[#allocation8 + $0xe8c] sm:$0xf] }
 0x225   :  { %3639 = vmatpush.bf16.msrb.mxu3 %v10644_v2  ;;  %3652 = vmatpush.bf16.msra.mxu0 %v10648_v61  ;;  %v2594_v19 = vpop.f32.mrf.mxu3  ;;  %v13813_v2 = vld [vmem:[#allocation8 + $0xfc4] sm:$0xf]  ;;  %v10821_v30 = vld [vmem:[#allocation8 + $0xea8] sm:$0xf0]  ;;  %v10787_v33 = vld [vmem:[#allocation8 + $0xe48] sm:$0xf] }
 0x226   :  { %v10973_v61 = vld [vmem:[#allocation8 + $0xfe0] sm:$0xf0]  ;;  %v13770_v52 = vld [vmem:[#allocation8 + $0xe64] sm:$0xf0] }
 0x227   :  { %v10976_v41 = vor.u32 %v13813_v2, %v10973_v61 }
 0x228   :  { %3614 = vmatpush.bf16.msrb.mxu1 %v10604_v16  ;;  %3627 = vmatpush.bf16.msrb.mxu2 %v10608_v25  ;;  %v10516_v16 = vor.u32 %v13700_v11, %v10515_v10  ;;  %v10520_v25 = vor.u32 %v13696_v18, %v10517_v20  ;;  %v10885_v10 = vld [vmem:[#allocation8 + $0xf28] sm:$0xf0]  ;;  %v10880_v20 = vor.u32 %v13789_v5, %v10877_v6  ;;  %v10749_v5 = vld [vmem:[#allocation8 + $0xe20] sm:$0xf0] }
 0x229   :  { %3640 = vmatpush.bf16.msrb.mxu3 %v10612_v54  ;;  %3653 = vmatpush.bf16.msra.mxu0 %v10616_v24  ;;  %v10939_v54 = vld [vmem:[#allocation8 + $0xf80] sm:$0xf]  ;;  %v10888_v36 = vor.u32 %v13790_v9, %v10885_v10  ;;  %v10788_v6 = vor.u32 %v13770_v52, %v10787_v33  ;;  %v10755_v9 = vld [vmem:[#allocation8 + $0xe08] sm:$0xf]  ;;  %v13800_v33 = vld [vmem:[#allocation8 + $0xf5c] sm:$0xf] }
 0x22a   :  { %v13809_v24 = vld [vmem:[#allocation8 + $0xf9c] sm:$0xf0]  ;;  %v13762_v10 = vld [vmem:[#allocation8 + $0xe24] sm:$0xf0]  ;;  %v10933_v52 = vld [vmem:[#allocation8 + $0xf78] sm:$0xf0] }
 0x22b   :  { %v10940_v21 = vor.u32 %v13809_v24, %v10939_v54  ;;  %v10852_v54 = vor.u32 %v13786_v17, %v10851_v12  ;;  %v13820_v12 = vld [vmem:[#allocation8 + $0xff4] sm:$0xf0]  ;;  %v13816_v17 = vld [vmem:[#allocation8 + $0xfdc] sm:$0xf] }
 0x22c   :  { %3615 = vmatpush.bf16.msrb.mxu1 %v10572_v45  ;;  %3628 = vmatpush.bf16.msrb.mxu2 %v10576_v60  ;;  %v10907_v45 = vld [vmem:[#allocation8 + $0xf40] sm:$0xf] }
 0x22d   :  { %3641 = vmatpush.bf16.msrb.mxu3 %v10580_v62  ;;  %3654 = vmatpush.bf16.msra.mxu0 %v10584_v43  ;;  %v13801_v60 = vld [vmem:[#allocation8 + $0xf5c] sm:$0xf0]  ;;  %v13797_v62 = vld [vmem:[#allocation8 + $0xf44] sm:$0xf] }
 0x22e   :  { %v10909_v43 = vld [vmem:[#allocation8 + $0xf60] sm:$0xf0]  ;;  %v10908_v28 = vor.u32 %v13801_v60, %v10907_v45 }
 0x22f   :  { %v10912_v53 = vor.u32 %v13797_v62, %v10909_v43  ;;  %v13769_v62 = vld [vmem:[#allocation8 + $0xe5c] sm:$0xf0]  ;;  %v10820_v43 = vor.u32 %v13778_v49, %v10819_v29  ;;  %v10963_v29 = vld [vmem:[#allocation8 + $0xf98] sm:$0xf]  ;;  %v13808_v49 = vld [vmem:[#allocation8 + $0xf9c] sm:$0xf] }
 0x230   :  { %3616 = vmatpush.bf16.msrb.mxu1 %v10540_v55  ;;  %3629 = vmatpush.bf16.msrb.mxu2 %v10544_v51  ;;  %v13793_v55 = vld [vmem:[#allocation8 + $0xf1c] sm:$0xf0]  ;;  %v10916_v51 = vor.u32 %v13802_v1, %v10915_v63  ;;  %v13765_v63 = vld [vmem:[#allocation8 + $0xe44] sm:$0xf] }
 0x231   :  { %3642 = vmatpush.bf16.msrb.mxu3 %v10548_v7  ;;  %3655 = vmatpush.bf16.msra.mxu0 %v10552_v8  ;;  %v10883_v7 = vld [vmem:[#allocation8 + $0xf08] sm:$0xf]  ;;  %v10876_v19 = vor.u32 %v13793_v55, %v10875_v58  ;;  %v10781_v1 = vld [vmem:[#allocation8 + $0xe60] sm:$0xf0] }
 0x232   :  { %v13794_v8 = vld [vmem:[#allocation8 + $0xf24] sm:$0xf0]  ;;  %v10784_v55 = vor.u32 %v13765_v63, %v10781_v1  ;;  %v10931_v63 = vld [vmem:[#allocation8 + $0xf58] sm:$0xf] }
 0x233   :  { %v10884_v61 = vor.u32 %v13794_v8, %v10883_v7  ;;  %v13804_v1 = vld [vmem:[#allocation8 + $0xf74] sm:$0xf0] }
 0x234   :  { %3617 = vmatpush.bf16.msrb.mxu1 %v10508_v37  ;;  %3630 = vmatpush.bf16.msrb.mxu2 %v10512_v47  ;;  %v2618_v11 = vpop.f32.mrf.mxu1  ;;  %v13781_v37 = vld [vmem:[#allocation8 + $0xec4] sm:$0xf] }
 0x235   :  { %3643 = vmatpush.bf16.msrb.mxu3 %v10516_v16  ;;  %3656 = vmatpush.bf16.msra.mxu0 %v10520_v25  ;;  %v10845_v47 = vld [vmem:[#allocation8 + $0xee0] sm:$0xf0]  ;;  %v10853_v16 = vld [vmem:[#allocation8 + $0xee8] sm:$0xf0] }
 0x236   :  { %v10848_v25 = vor.u32 %v13781_v37, %v10845_v47  ;;  %v10856_v24 = vor.u32 %v13782_v15, %v10853_v16  ;;  %v10997_v15 = vld [vmem:[#allocation8 + $0xff8] sm:$0xf0]  ;;  %v10756_v16 = vor.u32 %v13762_v10, %v10755_v9 }
 0x237   :  { %3618 = vmatmul.bf16.vlgmr.msrb.gmra.mxu1 %v14840_v57  ;;  %3631 = vmatmul.bf16.vlgmr.msrb.gmra.mxu2 %v14840_v57  ;;  %v2657_v18 = vpop.f32.mrf.mxu0 }
 0x238   :  { %4057 = vmatpush.bf16.msra.mxu1 %v10972_v39  ;;  %4070 = vmatpush.bf16.msra.mxu2 %v10976_v41  ;;  %v14866_v2 = vadd.f32 %v2657_v18, %v14831_v34  ;;  %v10811_v39 = vld [vmem:[#allocation8 + $0xe80] sm:$0xf] }
 0x239   :  { %4083 = vmatpush.bf16.msra.mxu3 %v10980_v32  ;;  %4096 = vmatpush.bf16.msrb.mxu0 %v10984_v27  ;;  %v13777_v41 = vld [vmem:[#allocation8 + $0xe9c] sm:$0xf0]  ;;  %v13773_v32 = vld [vmem:[#allocation8 + $0xe84] sm:$0xf] }
 0x23a   :  { %3644 = vmatmul.bf16.vlgmr.msrb.gmra.mxu3 %v14840_v57  ;;  %3657 = vmatmul.bf16.vlgmr.msra.gmra.mxu0 %v14840_v57  ;;  %v14863_v57 = vadd.f32 %v2618_v11, %v14828_v56  ;;  %v10844_v56 = vor.u32 %v13785_v31, %v10843_v26  ;;  %v2631_v34 = vpop.f32.mrf.mxu2  ;;  %v10813_v27 = vld [vmem:[#allocation8 + $0xea0] sm:$0xf0]  ;;  %v10812_v60 = vor.u32 %v13777_v41, %v10811_v39  ;;  %v13758_v11 = vld [vmem:[#allocation8 + $0xe0c] sm:$0xf]  ;;  %v13819_v26 = vld [vmem:[#allocation8 + $0xfec] sm:$0xf0] }
 0x23b   :  { %v14869_v3 = vadd.f32 %v2631_v34, %v14834_v14  ;;  %v10824_v14 = vor.u32 %v13774_v50, %v10821_v30  ;;  %v13815_v31 = vld [vmem:[#allocation8 + $0xfd4] sm:$0xf]  ;;  %v10955_v41 = vld [vmem:[#allocation8 + $0xf90] sm:$0xf]  ;;  %v11000_v34 = vor.u32 %v13816_v17, %v10997_v15  ;;  %v10965_v50 = vld [vmem:[#allocation8 + $0xfb8] sm:$0xf0] }
 0x23c   :  { %4058 = vmatpush.bf16.msra.mxu1 %v10940_v21  ;;  %4071 = vmatpush.bf16.msra.mxu2 %v10944_v44  ;;  %v2620_v44 = vpop.f32.mrf.mxu1  ;;  %v14875_v30 = vrot.slane %v14802_v38, 3  ;;  %v13788_v17 = vld [vmem:[#allocation8 + $0xef4] sm:$0xf0]  ;;  %v13784_v15 = vld [vmem:[#allocation8 + $0xedc] sm:$0xf] }
 0x23d   :  { %4084 = vmatpush.bf16.msra.mxu3 %v10948_v46  ;;  %4097 = vmatpush.bf16.msrb.mxu0 %v10952_v42  ;;  %v2644_v48 = vpop.f32.mrf.mxu3  ;;  %v10816_v46 = vor.u32 %v13773_v32, %v10813_v27  ;;  %v10779_v42 = vld [vmem:[#allocation8 + $0xe40] sm:$0xf]  ;;  %v13807_v32 = vld [vmem:[#allocation8 + $0xf94] sm:$0xf] }
 0x23e   :  { %v14872_v21 = vadd.f32 %v2644_v48, %v14837_v23  ;;  %v10747_v23 = vld [vmem:[#allocation8 + $0xe00] sm:$0xf]  ;;  %v10780_v58 = vor.u32 %v13769_v62, %v10779_v42  ;;  %v10957_v27 = vld [vmem:[#allocation8 + $0xfb0] sm:$0xf0]  ;;  %v13812_v48 = vld [vmem:[#allocation8 + $0xfb4] sm:$0xf0]  ;;  %v10968_v62 = vor.u32 %v13808_v49, %v10965_v50 }
 0x23f   :  { %v2659_v45 = vpop.f32.mrf.mxu0  ;;  %v10964_v42 = vor.u32 %v13812_v48, %v10963_v29  ;;  %v13780_v48 = vld [vmem:[#allocation8 + $0xeb4] sm:$0xf0]  ;;  %v13776_v49 = vld [vmem:[#allocation8 + $0xe9c] sm:$0xf] }
 0x240   :  { %4059 = vmatpush.bf16.msra.mxu1 %v10908_v28  ;;  %4072 = vmatpush.bf16.msra.mxu2 %v10912_v53  ;;  %v13766_v28 = vld [vmem:[#allocation8 + $0xe4c] sm:$0xf]  ;;  %v10960_v45 = vor.u32 %v13807_v32, %v10957_v27  ;;  %v10835_v32 = vld [vmem:[#allocation8 + $0xe98] sm:$0xf]  ;;  %v10837_v50 = vld [vmem:[#allocation8 + $0xeb8] sm:$0xf0] }
 0x241   :  { %4085 = vmatpush.bf16.msra.mxu3 %v10916_v51  ;;  %4098 = vmatpush.bf16.msrb.mxu0 %v10920_v4  ;;  %v10789_v53 = vld [vmem:[#allocation8 + $0xe68] sm:$0xf0]  ;;  %v13761_v51 = vld [vmem:[#allocation8 + $0xe1c] sm:$0xf0]  ;;  %v13757_v4 = vld [vmem:[#allocation8 + $0xe04] sm:$0xf] }
 0x242   :  { %v10792_v7 = vor.u32 %v13766_v28, %v10789_v53  ;;  %v2633_v8 = vpop.f32.mrf.mxu2  ;;  %v10748_v37 = vor.u32 %v13761_v51, %v10747_v23  ;;  %v10752_v47 = vor.u32 %v13757_v4, %v10749_v5  ;;  %v10891_v53 = vld [vmem:[#allocation8 + $0xf10] sm:$0xf]  ;;  %v13791_v51 = vld [vmem:[#allocation8 + $0xf14] sm:$0xf]  ;;  %v10899_v5 = vld [vmem:[#allocation8 + $0xf18] sm:$0xf] }
 0x243   :  { %v13795_v23 = vld [vmem:[#allocation8 + $0xf2c] sm:$0xf0]  ;;  %v10893_v4 = vld [vmem:[#allocation8 + $0xf30] sm:$0xf0]  ;;  %v10901_v8 = vld [vmem:[#allocation8 + $0xf38] sm:$0xf0] }
 0x244   :  { %4060 = vmatpush.bf16.msra.mxu1 %v10876_v19  ;;  %4073 = vmatpush.bf16.msra.mxu2 %v10880_v20  ;;  %v10757_v19 = vld [vmem:[#allocation8 + $0xe28] sm:$0xf0]  ;;  %v10987_v20 = vld [vmem:[#allocation8 + $0xfd0] sm:$0xf] }
 0x245   :  { %4086 = vmatpush.bf16.msra.mxu3 %v10884_v61  ;;  %4099 = vmatpush.bf16.msrb.mxu0 %v10888_v36  ;;  %v2646_v18 = vpop.f32.mrf.mxu3  ;;  %v10989_v61 = vld [vmem:[#allocation8 + $0xff0] sm:$0xf0]  ;;  %v10995_v36 = vld [vmem:[#allocation8 + $0xfd8] sm:$0xf] }
 0x246   :  { %v10992_v39 = vor.u32 %v13815_v31, %v10989_v61  ;;  %v10892_v18 = vor.u32 %v13795_v23, %v10891_v53 }
 0x248   :  { %4061 = vmatpush.bf16.msra.mxu1 %v10844_v56  ;;  %4074 = vmatpush.bf16.msra.mxu2 %v10848_v25  ;;  %v10760_v56 = vor.u32 %v13758_v11, %v10757_v19  ;;  %v10988_v25 = vor.u32 %v13819_v26, %v10987_v20  ;;  %v10896_v19 = vor.u32 %v13791_v51, %v10893_v4  ;;  %v10859_v20 = vld [vmem:[#allocation8 + $0xed0] sm:$0xf]  ;;  %v10765_v51 = vld [vmem:[#allocation8 + $0xe30] sm:$0xf0] }
 0x249   :  { %4087 = vmatpush.bf16.msra.mxu3 %v10852_v54  ;;  %4100 = vmatpush.bf16.msrb.mxu0 %v10856_v24  ;;  %v13811_v54 = vld [vmem:[#allocation8 + $0xfac] sm:$0xf0]  ;;  %v10996_v24 = vor.u32 %v13820_v12, %v10995_v36  ;;  %v10867_v12 = vld [vmem:[#allocation8 + $0xed8] sm:$0xf] }
 0x24a   :  { %v10956_v44 = vor.u32 %v13811_v54, %v10955_v41  ;;  %v13787_v26 = vld [vmem:[#allocation8 + $0xeec] sm:$0xf0]  ;;  %v10868_v41 = vor.u32 %v13788_v17, %v10867_v12  ;;  %v13882_v12 = vld [vmem:[#allocation8 + $0x11e4] sm:$0xf0]  ;;  %v13878_v17 = vld [vmem:[#allocation8 + $0x11cc] sm:$0xf] }
 0x24c   :  { %4062 = vmatpush.bf16.msra.mxu1 %v10812_v60  ;;  %4075 = vmatpush.bf16.msra.mxu2 %v10816_v46  ;;  %v10923_v60 = vld [vmem:[#allocation8 + $0xf50] sm:$0xf] }
 0x24d   :  { %4088 = vmatpush.bf16.msra.mxu3 %v10820_v43  ;;  %4101 = vmatpush.bf16.msrb.mxu0 %v10824_v14  ;;  %v13803_v46 = vld [vmem:[#allocation8 + $0xf6c] sm:$0xf0]  ;;  %v13799_v43 = vld [vmem:[#allocation8 + $0xf54] sm:$0xf] }
 0x24e   :  { %v10925_v14 = vld [vmem:[#allocation8 + $0xf70] sm:$0xf0]  ;;  %v10924_v38 = vor.u32 %v13803_v46, %v10923_v60 }
 0x24f   :  { %v10928_v28 = vor.u32 %v13799_v43, %v10925_v14  ;;  %v13771_v43 = vld [vmem:[#allocation8 + $0xe6c] sm:$0xf0]  ;;  %v10836_v14 = vor.u32 %v13780_v48, %v10835_v32  ;;  %v11203_v32 = vld [vmem:[#allocation8 + $0x1188] sm:$0xf]  ;;  %v13870_v48 = vld [vmem:[#allocation8 + $0x118c] sm:$0xf] }
 0x250   :  { %4063 = vmatpush.bf16.msra.mxu1 %v10780_v58  ;;  %4076 = vmatpush.bf16.msra.mxu2 %v10784_v55  ;;  %v10932_v58 = vor.u32 %v13804_v1, %v10931_v63  ;;  %v10936_v55 = vor.u32 %v13800_v33, %v10933_v52  ;;  %v13767_v63 = vld [vmem:[#allocation8 + $0xe54] sm:$0xf]  ;;  %v10803_v33 = vld [vmem:[#allocation8 + $0xe58] sm:$0xf] }
 0x251   :  { %4089 = vmatpush.bf16.msra.mxu3 %v10788_v6  ;;  %4102 = vmatpush.bf16.msrb.mxu0 %v10792_v7  ;;  %v13796_v6 = vld [vmem:[#allocation8 + $0xf34] sm:$0xf0]  ;;  %v13792_v7 = vld [vmem:[#allocation8 + $0xf1c] sm:$0xf]  ;;  %v10797_v1 = vld [vmem:[#allocation8 + $0xe70] sm:$0xf0] }
 0x252   :  { %v10900_v61 = vor.u32 %v13796_v6, %v10899_v5  ;;  %v10904_v36 = vor.u32 %v13792_v7, %v10901_v8  ;;  %v13772_v52 = vld [vmem:[#allocation8 + $0xe74] sm:$0xf0]  ;;  %v10800_v23 = vor.u32 %v13767_v63, %v10797_v1  ;;  %v13866_v63 = vld [vmem:[#allocation8 + $0x1164] sm:$0xf0]  ;;  %v13862_v1 = vld [vmem:[#allocation8 + $0x114c] sm:$0xf] }
 0x253   :  { %v10804_v4 = vor.u32 %v13772_v52, %v10803_v33  ;;  %v10771_v7 = vld [vmem:[#allocation8 + $0xe18] sm:$0xf]  ;;  %v11173_v33 = vld [vmem:[#allocation8 + $0x1168] sm:$0xf0] }
 0x254   :  { %4064 = vmatpush.bf16.msra.mxu1 %v10748_v37  ;;  %4077 = vmatpush.bf16.msra.mxu2 %v10752_v47  ;;  %v3068_v9 = vpop.f32.mrf.mxu1  ;;  %v13783_v37 = vld [vmem:[#allocation8 + $0xed4] sm:$0xf]  ;;  %v13764_v8 = vld [vmem:[#allocation8 + $0xe34] sm:$0xf0] }
 0x255   :  { %4090 = vmatpush.bf16.msra.mxu3 %v10756_v16  ;;  %4103 = vmatpush.bf16.msrb.mxu0 %v10760_v56  ;;  %v14882_v10 = vadd.f32 %v3068_v9, %v14847_v13  ;;  %v10861_v47 = vld [vmem:[#allocation8 + $0xef0] sm:$0xf0]  ;;  %v10869_v16 = vld [vmem:[#allocation8 + $0xef8] sm:$0xf0]  ;;  %v10860_v13 = vor.u32 %v13787_v26, %v10859_v20  ;;  %v13881_v20 = vld [vmem:[#allocation8 + $0x11dc] sm:$0xf0] }
 0x256   :  { %v10864_v56 = vor.u32 %v13783_v37, %v10861_v47  ;;  %v10872_v54 = vor.u32 %v13784_v15, %v10869_v16  ;;  %v13760_v9 = vld [vmem:[#allocation8 + $0xe1c] sm:$0xf]  ;;  %v13877_v26 = vld [vmem:[#allocation8 + $0x11c4] sm:$0xf]  ;;  %v11237_v15 = vld [vmem:[#allocation8 + $0x11e8] sm:$0xf0]  ;;  %v10772_v16 = vor.u32 %v13764_v8, %v10771_v7 }
 0x257   :  { %4065 = vmatmul.bf16.vlgmr.msra.gmra.mxu1 %v14875_v30  ;;  %4078 = vmatmul.bf16.vlgmr.msra.gmra.mxu2 %v14875_v30  ;;  %v3107_v11 = vpop.f32.mrf.mxu0 }
 0x258   :  { %4109 = vmatpush.bf16.msrb.mxu1 %v10988_v25  ;;  %4122 = vmatpush.bf16.msrb.mxu2 %v10992_v39  ;;  %v14885_v31 = vadd.f32 %v3107_v11, %v14850_v35  ;;  %v10827_v25 = vld [vmem:[#allocation8 + $0xe90] sm:$0xf] }
 0x259   :  { %4135 = vmatpush.bf16.msrb.mxu3 %v10996_v24  ;;  %4148 = vmatpush.bf16.msra.mxu0 %v11000_v34  ;;  %v13779_v39 = vld [vmem:[#allocation8 + $0xeac] sm:$0xf0]  ;;  %v13775_v24 = vld [vmem:[#allocation8 + $0xe94] sm:$0xf] }
 0x25a   :  { %4091 = vmatmul.bf16.vlgmr.msra.gmra.mxu3 %v14875_v30  ;;  %4104 = vmatmul.bf16.vlgmr.msrb.gmra.mxu0 %v14875_v30  ;;  %v3081_v35 = vpop.f32.mrf.mxu2  ;;  %v10829_v34 = vld [vmem:[#allocation8 + $0xeb0] sm:$0xf0]  ;;  %v10828_v46 = vor.u32 %v13779_v39, %v10827_v25  ;;  %v11195_v39 = vld [vmem:[#allocation8 + $0x1180] sm:$0xf] }
 0x25b   :  { %v14888_v27 = vadd.f32 %v3081_v35, %v14853_v22  ;;  %v10840_v22 = vor.u32 %v13776_v49, %v10837_v50  ;;  %v11240_v35 = vor.u32 %v13878_v17, %v11237_v15  ;;  %v11205_v49 = vld [vmem:[#allocation8 + $0x11a8] sm:$0xf0] }
 0x25c   :  { %4110 = vmatpush.bf16.msrb.mxu1 %v10956_v44  ;;  %4123 = vmatpush.bf16.msrb.mxu2 %v10960_v45  ;;  %v3070_v45 = vpop.f32.mrf.mxu1  ;;  %v13846_v17 = vld [vmem:[#allocation8 + $0x10cc] sm:$0xf] }
 0x25d   :  { %4136 = vmatpush.bf16.msrb.mxu3 %v10964_v42  ;;  %4149 = vmatpush.bf16.msra.mxu0 %v10968_v62  ;;  %v3094_v29 = vpop.f32.mrf.mxu3  ;;  %v10832_v42 = vor.u32 %v13775_v24, %v10829_v34  ;;  %v10795_v62 = vld [vmem:[#allocation8 + $0xe50] sm:$0xf]  ;;  %v13869_v24 = vld [vmem:[#allocation8 + $0x1184] sm:$0xf]  ;;  %v11109_v15 = vld [vmem:[#allocation8 + $0x10e8] sm:$0xf0] }
 0x25e   :  { %v14891_v44 = vadd.f32 %v3094_v29, %v14856_v59  ;;  %v10763_v59 = vld [vmem:[#allocation8 + $0xe10] sm:$0xf]  ;;  %v10796_v53 = vor.u32 %v13771_v43, %v10795_v62  ;;  %v11197_v34 = vld [vmem:[#allocation8 + $0x11a0] sm:$0xf0]  ;;  %v13874_v29 = vld [vmem:[#allocation8 + $0x11a4] sm:$0xf0]  ;;  %v11208_v62 = vor.u32 %v13870_v48, %v11205_v49 }
 0x25f   :  { %v3109_v60 = vpop.f32.mrf.mxu0  ;;  %v11200_v45 = vor.u32 %v13869_v24, %v11197_v34  ;;  %v13861_v43 = vld [vmem:[#allocation8 + $0x1144] sm:$0xf]  ;;  %v11077_v48 = vld [vmem:[#allocation8 + $0x10a8] sm:$0xf0] }
 0x260   :  { %4111 = vmatpush.bf16.msrb.mxu1 %v10924_v38  ;;  %4124 = vmatpush.bf16.msrb.mxu2 %v10928_v28  ;;  %v13768_v38 = vld [vmem:[#allocation8 + $0xe5c] sm:$0xf]  ;;  %v11163_v60 = vld [vmem:[#allocation8 + $0x1140] sm:$0xf] }
 0x261   :  { %4137 = vmatpush.bf16.msrb.mxu3 %v10932_v58  ;;  %4150 = vmatpush.bf16.msra.mxu0 %v10936_v55  ;;  %v10805_v28 = vld [vmem:[#allocation8 + $0xe78] sm:$0xf0]  ;;  %v13763_v58 = vld [vmem:[#allocation8 + $0xe2c] sm:$0xf0]  ;;  %v13759_v55 = vld [vmem:[#allocation8 + $0xe14] sm:$0xf] }
 0x262   :  { %v10808_v5 = vor.u32 %v13768_v38, %v10805_v28  ;;  %v3083_v6 = vpop.f32.mrf.mxu2  ;;  %v10764_v37 = vor.u32 %v13763_v58, %v10763_v59  ;;  %v10768_v47 = vor.u32 %v13759_v55, %v10765_v51  ;;  %v11131_v28 = vld [vmem:[#allocation8 + $0x1100] sm:$0xf]  ;;  %v13853_v58 = vld [vmem:[#allocation8 + $0x1104] sm:$0xf]  ;;  %v11139_v51 = vld [vmem:[#allocation8 + $0x1108] sm:$0xf] }
 0x263   :  { %v13857_v59 = vld [vmem:[#allocation8 + $0x111c] sm:$0xf0]  ;;  %v11133_v55 = vld [vmem:[#allocation8 + $0x1120] sm:$0xf0]  ;;  %v11141_v6 = vld [vmem:[#allocation8 + $0x1128] sm:$0xf0] }
 0x264   :  { %4112 = vmatpush.bf16.msrb.mxu1 %v10892_v18  ;;  %4125 = vmatpush.bf16.msrb.mxu2 %v10896_v19  ;;  %v10773_v18 = vld [vmem:[#allocation8 + $0xe38] sm:$0xf0]  ;;  %v11227_v19 = vld [vmem:[#allocation8 + $0x11c0] sm:$0xf] }
 0x265   :  { %4138 = vmatpush.bf16.msrb.mxu3 %v10900_v61  ;;  %4151 = vmatpush.bf16.msra.mxu0 %v10904_v36  ;;  %v3096_v11 = vpop.f32.mrf.mxu3  ;;  %v11229_v61 = vld [vmem:[#allocation8 + $0x11e0] sm:$0xf0]  ;;  %v11235_v36 = vld [vmem:[#allocation8 + $0x11c8] sm:$0xf] }
 0x266   :  { %v11232_v25 = vor.u32 %v13877_v26, %v11229_v61  ;;  %v11136_v11 = vor.u32 %v13853_v58, %v11133_v55 }
 0x268   :  { %4113 = vmatpush.bf16.msrb.mxu1 %v10860_v13  ;;  %4126 = vmatpush.bf16.msrb.mxu2 %v10864_v56  ;;  %v10776_v13 = vor.u32 %v13760_v9, %v10773_v18  ;;  %v11228_v56 = vor.u32 %v13881_v20, %v11227_v19  ;;  %v11132_v9 = vor.u32 %v13857_v59, %v11131_v28  ;;  %v11099_v18 = vld [vmem:[#allocation8 + $0x10c0] sm:$0xf] }
 0x269   :  { %4139 = vmatpush.bf16.msrb.mxu3 %v10868_v41  ;;  %4152 = vmatpush.bf16.msra.mxu0 %v10872_v54  ;;  %v13873_v41 = vld [vmem:[#allocation8 + $0x119c] sm:$0xf0]  ;;  %v11236_v54 = vor.u32 %v13882_v12, %v11235_v36  ;;  %v13845_v36 = vld [vmem:[#allocation8 + $0x10c4] sm:$0xf]  ;;  %v13850_v12 = vld [vmem:[#allocation8 + $0x10e4] sm:$0xf0] }
 0x26a   :  { %v11196_v50 = vor.u32 %v13873_v41, %v11195_v39  ;;  %v13849_v19 = vld [vmem:[#allocation8 + $0x10dc] sm:$0xf0]  ;;  %v11112_v39 = vor.u32 %v13846_v17, %v11109_v15  ;;  %v13837_v41 = vld [vmem:[#allocation8 + $0x1084] sm:$0xf]  ;;  %v13880_v17 = vld [vmem:[#allocation8 + $0x11dc] sm:$0xf] }
 0x26b   :  { %v13825_v59 = vld [vmem:[#allocation8 + $0x101c] sm:$0xf0]  ;;  %v11253_v15 = vld [vmem:[#allocation8 + $0x11f8] sm:$0xf0] }
 0x26c   :  { %4114 = vmatpush.bf16.msrb.mxu1 %v10828_v46  ;;  %4127 = vmatpush.bf16.msrb.mxu2 %v10832_v42  ;;  %v13865_v46 = vld [vmem:[#allocation8 + $0x115c] sm:$0xf0]  ;;  %v11204_v42 = vor.u32 %v13874_v29, %v11203_v32  ;;  %v13842_v32 = vld [vmem:[#allocation8 + $0x10a4] sm:$0xf0]  ;;  %v13838_v29 = vld [vmem:[#allocation8 + $0x108c] sm:$0xf] }
 0x26d   :  { %4140 = vmatpush.bf16.msrb.mxu3 %v10836_v14  ;;  %4153 = vmatpush.bf16.msra.mxu0 %v10840_v22  ;;  %v11165_v14 = vld [vmem:[#allocation8 + $0x1160] sm:$0xf0]  ;;  %v11171_v22 = vld [vmem:[#allocation8 + $0x1148] sm:$0xf]  ;;  %v11164_v52 = vor.u32 %v13865_v46, %v11163_v60 }
 0x26e   :  { %v11168_v38 = vor.u32 %v13861_v43, %v11165_v14  ;;  %v13829_v14 = vld [vmem:[#allocation8 + $0x1044] sm:$0xf] }
 0x270   :  { %4115 = vmatpush.bf16.msrb.mxu1 %v10796_v53  ;;  %4128 = vmatpush.bf16.msrb.mxu2 %v10800_v23  ;;  %v11172_v53 = vor.u32 %v13866_v63, %v11171_v22  ;;  %v11176_v23 = vor.u32 %v13862_v1, %v11173_v33  ;;  %v11037_v22 = vld [vmem:[#allocation8 + $0x1060] sm:$0xf0]  ;;  %v11043_v63 = vld [vmem:[#allocation8 + $0x1048] sm:$0xf]  ;;  %v13830_v33 = vld [vmem:[#allocation8 + $0x104c] sm:$0xf] }
 0x271   :  { %4141 = vmatpush.bf16.msrb.mxu3 %v10804_v4  ;;  %4154 = vmatpush.bf16.msra.mxu0 %v10808_v5  ;;  %v13858_v4 = vld [vmem:[#allocation8 + $0x1124] sm:$0xf0]  ;;  %v13854_v5 = vld [vmem:[#allocation8 + $0x110c] sm:$0xf]  ;;  %v11040_v28 = vor.u32 %v13829_v14, %v11037_v22  ;;  %v11181_v14 = vld [vmem:[#allocation8 + $0x1170] sm:$0xf0] }
 0x272   :  { %v11140_v26 = vor.u32 %v13858_v4, %v11139_v51  ;;  %v11144_v61 = vor.u32 %v13854_v5, %v11141_v6  ;;  %v13834_v1 = vld [vmem:[#allocation8 + $0x1064] sm:$0xf0]  ;;  %v13822_v6 = vld [vmem:[#allocation8 + $0x100c] sm:$0xf]  ;;  %v11187_v22 = vld [vmem:[#allocation8 + $0x1158] sm:$0xf] }
 0x273   :  { %v11044_v58 = vor.u32 %v13834_v1, %v11043_v63  ;;  %v11011_v4 = vld [vmem:[#allocation8 + $0x1008] sm:$0xf]  ;;  %v13868_v63 = vld [vmem:[#allocation8 + $0x1174] sm:$0xf0]  ;;  %v13864_v1 = vld [vmem:[#allocation8 + $0x115c] sm:$0xf] }
 0x274   :  { %4116 = vmatpush.bf16.msrb.mxu1 %v10764_v37  ;;  %4129 = vmatpush.bf16.msrb.mxu2 %v10768_v47  ;;  %v3120_v7 = vpop.f32.mrf.mxu1  ;;  %v11101_v37 = vld [vmem:[#allocation8 + $0x10e0] sm:$0xf0]  ;;  %v11107_v47 = vld [vmem:[#allocation8 + $0x10c8] sm:$0xf] }
 0x275   :  { %4142 = vmatpush.bf16.msrb.mxu3 %v10772_v16  ;;  %4155 = vmatpush.bf16.msra.mxu0 %v10776_v13  ;;  %v11104_v16 = vor.u32 %v13845_v36, %v11101_v37  ;;  %v11067_v13 = vld [vmem:[#allocation8 + $0x1080] sm:$0xf]  ;;  %v13826_v5 = vld [vmem:[#allocation8 + $0x1024] sm:$0xf0]  ;;  %v11251_v36 = vld [vmem:[#allocation8 + $0x11d8] sm:$0xf] }
 0x277   :  { %4117 = vmatmul.bf16.vlgmr.msrb.gmra.mxu1 %v14875_v30  ;;  %4130 = vmatmul.bf16.vlgmr.msrb.gmra.mxu2 %v14875_v30  ;;  %v3159_v8 = vpop.f32.mrf.mxu0 }
 0x278   :  { %4554 = vmatpush.bf16.msra.mxu1 %v11228_v56  ;;  %4567 = vmatpush.bf16.msra.mxu2 %v11232_v25  ;;  %v14901_v20 = vadd.f32 %v3159_v8, %v14866_v2  ;;  %v13841_v56 = vld [vmem:[#allocation8 + $0x109c] sm:$0xf0]  ;;  %v11108_v25 = vor.u32 %v13850_v12, %v11107_v47  ;;  %v13884_v12 = vld [vmem:[#allocation8 + $0x11f4] sm:$0xf0] }
 0x279   :  { %4580 = vmatpush.bf16.msra.mxu3 %v11236_v54  ;;  %4593 = vmatpush.bf16.msrb.mxu0 %v11240_v35  ;;  %v11069_v54 = vld [vmem:[#allocation8 + $0x10a0] sm:$0xf0]  ;;  %v11075_v35 = vld [vmem:[#allocation8 + $0x1088] sm:$0xf]  ;;  %v11068_v60 = vor.u32 %v13841_v56, %v11067_v13 }
 0x27a   :  { %4143 = vmatmul.bf16.vlgmr.msrb.gmra.mxu3 %v14875_v30  ;;  %4156 = vmatmul.bf16.vlgmr.msra.gmra.mxu0 %v14875_v30  ;;  %v14898_v30 = vadd.f32 %v3120_v7, %v14863_v57  ;;  %v11100_v57 = vor.u32 %v13849_v19, %v11099_v18  ;;  %v3133_v2 = vpop.f32.mrf.mxu2  ;;  %v11072_v46 = vor.u32 %v13837_v41, %v11069_v54  ;;  %v14411_v7 = vld [vmem:[#allocation6] ss:$0 sm:$0xff]  ;;  %v11243_v18 = vld [vmem:[#allocation8 + $0x11d0] sm:$0xf]  ;;  %v13871_v54 = vld [vmem:[#allocation8 + $0x1194] sm:$0xf] }
 0x27b   :  { %v14904_v24 = vadd.f32 %v3133_v2, %v14869_v3  ;;  %v11076_v43 = vor.u32 %v13842_v32, %v11075_v35  ;;  %v11080_v3 = vor.u32 %v13838_v29, %v11077_v48  ;;  %v180_v8 = vadd.f32 %v14411_v7, %v14707_v0  ;;  %v13883_v19 = vld [vmem:[#allocation8 + $0x11ec] sm:$0xf0]  ;;  %v11213_v35 = vld [vmem:[#allocation8 + $0x11b0] sm:$0xf0]  ;;  %v13876_v32 = vld [vmem:[#allocation8 + $0x11b4] sm:$0xf0] }
 0x27c   :  { %4555 = vmatpush.bf16.msra.mxu1 %v11196_v50  ;;  %4568 = vmatpush.bf16.msra.mxu2 %v11200_v45  ;;  %v3122_v50 = vpop.f32.mrf.mxu1  ;;  %v11244_v0 = vor.u32 %v13883_v19, %v11243_v18  ;;  %v11252_v2 = vor.u32 %v13884_v12, %v11251_v36  ;;  %v11256_v41 = vor.u32 %v13880_v17, %v11253_v15  ;;  %v13872_v29 = vld [vmem:[#allocation8 + $0x119c] sm:$0xf]  ;;  %v11115_v18 = vld [vmem:[#allocation8 + $0x10d0] sm:$0xf]  ;;  %v11123_v12 = vld [vmem:[#allocation8 + $0x10d8] sm:$0xf] }
 0x27d   :  { %4581 = vmatpush.bf16.msra.mxu3 %v11204_v42  ;;  %4594 = vmatpush.bf16.msrb.mxu0 %v11208_v62  ;;  %v3146_v34 = vpop.f32.mrf.mxu3  ;;  %v11035_v42 = vld [vmem:[#allocation8 + $0x1040] sm:$0xf]  ;;  %v186_v13 = vmax.f32 %v180_v8, 0.0  ;;  %v11221_v48 = vld [vmem:[#allocation8 + $0x11b8] sm:$0xf0] }
 0x27e   :  { %v14907_v49 = vadd.f32 %v3146_v34, %v14872_v21  ;;  %v13833_v62 = vld [vmem:[#allocation8 + $0x105c] sm:$0xf0]  ;;  %v11219_v34 = vld [vmem:[#allocation8 + $0x1198] sm:$0xf]  ;;  %v13851_v19 = vld [vmem:[#allocation8 + $0x10ec] sm:$0xf0] }
 0x27f   :  { %v3161_v45 = vpop.f32.mrf.mxu0  ;;  %v11003_v21 = vld [vmem:[#allocation8 + $0x1000] sm:$0xf]  ;;  %v14910_v50 = vpack.c.bf16 %v186_v13, %v186_v13  ;;  %v13852_v17 = vld [vmem:[#allocation8 + $0x10f4] sm:$0xf0]  ;;  %v13848_v15 = vld [vmem:[#allocation8 + $0x10dc] sm:$0xf] }
 0x280   :  { %4556 = vmatpush.bf16.msra.mxu1 %v11164_v52  ;;  %4569 = vmatpush.bf16.msra.mxu2 %v11168_v38  ;;  %v11045_v52 = vld [vmem:[#allocation8 + $0x1068] sm:$0xf0]  ;;  %v11036_v38 = vor.u32 %v13833_v62, %v11035_v42  ;;  %v11004_v37 = vor.u32 %v13825_v59, %v11003_v21  ;;  %v13867_v42 = vld [vmem:[#allocation8 + $0x116c] sm:$0xf0]  ;;  %v11220_v62 = vor.u32 %v13876_v32, %v11219_v34  ;;  %v13844_v34 = vld [vmem:[#allocation8 + $0x10b4] sm:$0xf0] }
 0x281   :  { %4582 = vmatpush.bf16.msra.mxu3 %v11172_v53  ;;  %4595 = vmatpush.bf16.msrb.mxu0 %v11176_v23  ;;  %v13821_v53 = vld [vmem:[#allocation8 + $0x1004] sm:$0xf]  ;;  %v11048_v55 = vor.u32 %v13830_v33, %v11045_v52  ;;  %v11189_v33 = vld [vmem:[#allocation8 + $0x1178] sm:$0xf0]  ;;  %v11188_v59 = vor.u32 %v13868_v63, %v11187_v22  ;;  %v11083_v13 = vld [vmem:[#allocation8 + $0x1090] sm:$0xf] }
 0x282   :  { %v11005_v23 = vld [vmem:[#allocation8 + $0x1020] sm:$0xf0]  ;;  %v3135_v51 = vpop.f32.mrf.mxu2  ;;  %v13840_v32 = vld [vmem:[#allocation8 + $0x109c] sm:$0xf]  ;;  %v11053_v22 = vld [vmem:[#allocation8 + $0x1070] sm:$0xf0] }
 0x283   :  { %v11008_v47 = vor.u32 %v13821_v53, %v11005_v23  ;;  %v11192_v53 = vor.u32 %v13864_v1, %v11189_v33  ;;  %v13855_v23 = vld [vmem:[#allocation8 + $0x1114] sm:$0xf]  ;;  %v13860_v51 = vld [vmem:[#allocation8 + $0x1134] sm:$0xf0]  ;;  %v13832_v33 = vld [vmem:[#allocation8 + $0x105c] sm:$0xf] }
 0x284   :  { %4557 = vmatpush.bf16.msra.mxu1 %v11132_v9  ;;  %4570 = vmatpush.bf16.msra.mxu2 %v11136_v11  ;;  %v11013_v11 = vld [vmem:[#allocation8 + $0x1028] sm:$0xf0]  ;;  %v11059_v63 = vld [vmem:[#allocation8 + $0x1058] sm:$0xf] }
 0x285   :  { %4583 = vmatpush.bf16.msra.mxu3 %v11140_v26  ;;  %4596 = vmatpush.bf16.msrb.mxu0 %v11144_v61  ;;  %v3148_v9 = vpop.f32.mrf.mxu3  ;;  %v13879_v26 = vld [vmem:[#allocation8 + $0x11d4] sm:$0xf]  ;;  %v13836_v1 = vld [vmem:[#allocation8 + $0x1074] sm:$0xf0] }
 0x286   :  { %v11245_v61 = vld [vmem:[#allocation8 + $0x11f0] sm:$0xf0] }
 0x287   :  { %v11248_v56 = vor.u32 %v13879_v26, %v11245_v61 }
 0x288   :  { %4558 = vmatpush.bf16.msra.mxu1 %v11100_v57  ;;  %4571 = vmatpush.bf16.msra.mxu2 %v11104_v16  ;;  %v11012_v57 = vor.u32 %v13826_v5, %v11011_v4  ;;  %v11016_v16 = vor.u32 %v13822_v6, %v11013_v11  ;;  %v13856_v4 = vld [vmem:[#allocation8 + $0x111c] sm:$0xf] }
 0x289   :  { %4584 = vmatpush.bf16.msra.mxu3 %v11108_v25  ;;  %4597 = vmatpush.bf16.msrb.mxu0 %v11112_v39  ;;  %v11211_v25 = vld [vmem:[#allocation8 + $0x1190] sm:$0xf]  ;;  %v11157_v5 = vld [vmem:[#allocation8 + $0x1138] sm:$0xf0] }
 0x28a   :  { %v13875_v39 = vld [vmem:[#allocation8 + $0x11ac] sm:$0xf0]  ;;  %v11160_v36 = vor.u32 %v13856_v4, %v11157_v5  ;;  %v13828_v4 = vld [vmem:[#allocation8 + $0x1034] sm:$0xf0]  ;;  %v13824_v5 = vld [vmem:[#allocation8 + $0x101c] sm:$0xf] }
 0x28b   :  { %v11212_v45 = vor.u32 %v13875_v39, %v11211_v25  ;;  %v13839_v39 = vld [vmem:[#allocation8 + $0x1094] sm:$0xf] }
 0x28c   :  { %4559 = vmatpush.bf16.msra.mxu1 %v11068_v60  ;;  %4572 = vmatpush.bf16.msra.mxu2 %v11072_v46  ;;  %v11216_v60 = vor.u32 %v13871_v54, %v11213_v35  ;;  %v11179_v46 = vld [vmem:[#allocation8 + $0x1150] sm:$0xf] }
 0x28d   :  { %4585 = vmatpush.bf16.msra.mxu3 %v11076_v43  ;;  %4598 = vmatpush.bf16.msrb.mxu0 %v11080_v3  ;;  %v11224_v43 = vor.u32 %v13872_v29, %v11221_v48  ;;  %v13863_v3 = vld [vmem:[#allocation8 + $0x1154] sm:$0xf]  ;;  %v11180_v52 = vor.u32 %v13867_v42, %v11179_v46  ;;  %v11093_v29 = vld [vmem:[#allocation8 + $0x10b8] sm:$0xf0] }
 0x28e   :  { %v11184_v21 = vor.u32 %v13863_v3, %v11181_v14  ;;  %v13831_v14 = vld [vmem:[#allocation8 + $0x1054] sm:$0xf] }
 0x290   :  { %4560 = vmatpush.bf16.msra.mxu1 %v11036_v38  ;;  %4573 = vmatpush.bf16.msra.mxu2 %v11040_v28  ;;  %v11147_v38 = vld [vmem:[#allocation8 + $0x1110] sm:$0xf] }
 0x291   :  { %4586 = vmatpush.bf16.msra.mxu3 %v11044_v58  ;;  %4599 = vmatpush.bf16.msrb.mxu0 %v11048_v55  ;;  %v13859_v28 = vld [vmem:[#allocation8 + $0x112c] sm:$0xf0]  ;;  %v11149_v58 = vld [vmem:[#allocation8 + $0x1130] sm:$0xf0]  ;;  %v11155_v55 = vld [vmem:[#allocation8 + $0x1118] sm:$0xf] }
 0x292   :  { %v11148_v9 = vor.u32 %v13859_v28, %v11147_v38  ;;  %v11152_v11 = vor.u32 %v13855_v23, %v11149_v58  ;;  %v11156_v61 = vor.u32 %v13860_v51, %v11155_v55  ;;  %v11056_v38 = vor.u32 %v13831_v14, %v11053_v22  ;;  %v13827_v28 = vld [vmem:[#allocation8 + $0x102c] sm:$0xf0]  ;;  %v11027_v51 = vld [vmem:[#allocation8 + $0x1018] sm:$0xf]  ;;  %v13926_v14 = vld [vmem:[#allocation8 + $0x134c] sm:$0xf] }
 0x293   :  { %v11060_v23 = vor.u32 %v13836_v1, %v11059_v63  ;;  %v11429_v22 = vld [vmem:[#allocation8 + $0x1368] sm:$0xf0] }
 0x294   :  { %4561 = vmatpush.bf16.msra.mxu1 %v11004_v37  ;;  %4574 = vmatpush.bf16.msra.mxu2 %v11008_v47  ;;  %v3567_v6 = vpop.f32.mrf.mxu1  ;;  %v13847_v37 = vld [vmem:[#allocation8 + $0x10d4] sm:$0xf] }
 0x295   :  { %4587 = vmatpush.bf16.msra.mxu3 %v11012_v57  ;;  %4600 = vmatpush.bf16.msrb.mxu0 %v11016_v16  ;;  %v14917_v7 = vadd.f32 %v3567_v6, %v14882_v10  ;;  %v11117_v47 = vld [vmem:[#allocation8 + $0x10f0] sm:$0xf0]  ;;  %v11125_v57 = vld [vmem:[#allocation8 + $0x10f8] sm:$0xf0]  ;;  %v11116_v10 = vor.u32 %v13851_v19, %v11115_v18  ;;  %v13941_v18 = vld [vmem:[#allocation8 + $0x13c4] sm:$0xf] }
 0x296   :  { %v11120_v16 = vor.u32 %v13847_v37, %v11117_v47  ;;  %v11128_v25 = vor.u32 %v13848_v15, %v11125_v57  ;;  %v11485_v19 = vld [vmem:[#allocation8 + $0x13e0] sm:$0xf0]  ;;  %v13946_v47 = vld [vmem:[#allocation8 + $0x13e4] sm:$0xf0]  ;;  %v11028_v15 = vor.u32 %v13828_v4, %v11027_v51 }
 0x297   :  { %4562 = vmatmul.bf16.vlgmr.msra.gmra.mxu1 %v14910_v50  ;;  %4575 = vmatmul.bf16.vlgmr.msra.gmra.mxu2 %v14910_v50  ;;  %v3606_v8 = vpop.f32.mrf.mxu0 }
 0x298   :  { %4606 = vmatpush.bf16.msrb.mxu1 %v11244_v0  ;;  %4619 = vmatpush.bf16.msrb.mxu2 %v11248_v56  ;;  %v14920_v26 = vadd.f32 %v3606_v8, %v14885_v31  ;;  %v13843_v0 = vld [vmem:[#allocation8 + $0x10ac] sm:$0xf0]  ;;  %v11124_v56 = vor.u32 %v13852_v17, %v11123_v12  ;;  %v11029_v8 = vld [vmem:[#allocation8 + $0x1038] sm:$0xf0]  ;;  %v13942_v12 = vld [vmem:[#allocation8 + $0x13cc] sm:$0xf] }
 0x299   :  { %4632 = vmatpush.bf16.msrb.mxu3 %v11252_v2  ;;  %4645 = vmatpush.bf16.msra.mxu0 %v11256_v41  ;;  %v11085_v2 = vld [vmem:[#allocation8 + $0x10b0] sm:$0xf0]  ;;  %v11091_v41 = vld [vmem:[#allocation8 + $0x1098] sm:$0xf]  ;;  %v11084_v46 = vor.u32 %v13843_v0, %v11083_v13  ;;  %v11493_v17 = vld [vmem:[#allocation8 + $0x13e8] sm:$0xf0]  ;;  %v11032_v57 = vor.u32 %v13824_v5, %v11029_v8 }
 0x29a   :  { %4588 = vmatmul.bf16.vlgmr.msra.gmra.mxu3 %v14910_v50  ;;  %4601 = vmatmul.bf16.vlgmr.msrb.gmra.mxu0 %v14910_v50  ;;  %v3580_v31 = vpop.f32.mrf.mxu2  ;;  %v11088_v42 = vor.u32 %v13839_v39, %v11085_v2  ;;  %v11092_v3 = vor.u32 %v13844_v34, %v11091_v41  ;;  %v11451_v13 = vld [vmem:[#allocation8 + $0x1380] sm:$0xf]  ;;  %v11453_v39 = vld [vmem:[#allocation8 + $0x13a0] sm:$0xf0]  ;;  %v11459_v2 = vld [vmem:[#allocation8 + $0x1388] sm:$0xf] }
 0x29b   :  { %v14923_v54 = vadd.f32 %v3580_v31, %v14888_v27  ;;  %v11096_v27 = vor.u32 %v13840_v32, %v11093_v29  ;;  %v13937_v0 = vld [vmem:[#allocation8 + $0x139c] sm:$0xf0]  ;;  %v13933_v31 = vld [vmem:[#allocation8 + $0x1384] sm:$0xf]  ;;  %v13938_v41 = vld [vmem:[#allocation8 + $0x13a4] sm:$0xf0] }
 0x29c   :  { %4607 = vmatpush.bf16.msrb.mxu1 %v11212_v45  ;;  %4620 = vmatpush.bf16.msrb.mxu2 %v11216_v60  ;;  %v3569_v45 = vpop.f32.mrf.mxu1  ;;  %v11461_v34 = vld [vmem:[#allocation8 + $0x13a8] sm:$0xf0]  ;;  %v11452_v32 = vor.u32 %v13937_v0, %v11451_v13  ;;  %v11456_v29 = vor.u32 %v13933_v31, %v11453_v39  ;;  %v11355_v8 = vld [vmem:[#allocation8 + $0x12c0] sm:$0xf]  ;;  %v13901_v0 = vld [vmem:[#allocation8 + $0x1284] sm:$0xf] }
 0x29d   :  { %4633 = vmatpush.bf16.msrb.mxu3 %v11220_v62  ;;  %4646 = vmatpush.bf16.msra.mxu0 %v11224_v43  ;;  %v3593_v35 = vpop.f32.mrf.mxu3  ;;  %v11051_v62 = vld [vmem:[#allocation8 + $0x1050] sm:$0xf]  ;;  %v11419_v45 = vld [vmem:[#allocation8 + $0x1340] sm:$0xf] }
 0x29e   :  { %v14926_v48 = vadd.f32 %v3593_v35, %v14891_v44  ;;  %v13835_v43 = vld [vmem:[#allocation8 + $0x106c] sm:$0xf0]  ;;  %v13934_v35 = vld [vmem:[#allocation8 + $0x138c] sm:$0xf] }
 0x29f   :  { %v3608_v60 = vpop.f32.mrf.mxu0  ;;  %v11019_v44 = vld [vmem:[#allocation8 + $0x1010] sm:$0xf] }
 0x2a0   :  { %4608 = vmatpush.bf16.msrb.mxu1 %v11180_v52  ;;  %4621 = vmatpush.bf16.msrb.mxu2 %v11184_v21  ;;  %v11061_v52 = vld [vmem:[#allocation8 + $0x1078] sm:$0xf0]  ;;  %v11052_v21 = vor.u32 %v13835_v43, %v11051_v62  ;;  %v13929_v60 = vld [vmem:[#allocation8 + $0x135c] sm:$0xf0]  ;;  %v13925_v62 = vld [vmem:[#allocation8 + $0x1344] sm:$0xf] }
 0x2a1   :  { %4634 = vmatpush.bf16.msrb.mxu3 %v11188_v59  ;;  %4647 = vmatpush.bf16.msra.mxu0 %v11192_v53  ;;  %v13823_v59 = vld [vmem:[#allocation8 + $0x1014] sm:$0xf]  ;;  %v11064_v58 = vor.u32 %v13832_v33, %v11061_v52  ;;  %v11421_v43 = vld [vmem:[#allocation8 + $0x1360] sm:$0xf0]  ;;  %v11420_v63 = vor.u32 %v13929_v60, %v11419_v45  ;;  %v11387_v33 = vld [vmem:[#allocation8 + $0x1300] sm:$0xf] }
 0x2a2   :  { %v11021_v53 = vld [vmem:[#allocation8 + $0x1030] sm:$0xf0]  ;;  %v3582_v55 = vpop.f32.mrf.mxu2  ;;  %v11424_v1 = vor.u32 %v13925_v62, %v11421_v43  ;;  %v13921_v52 = vld [vmem:[#allocation8 + $0x131c] sm:$0xf0]  ;;  %v13893_v43 = vld [vmem:[#allocation8 + $0x1244] sm:$0xf] }
 0x2a3   :  { %v11024_v37 = vor.u32 %v13823_v59, %v11021_v53  ;;  %v11395_v59 = vld [vmem:[#allocation8 + $0x1308] sm:$0xf]  ;;  %v11388_v5 = vor.u32 %v13921_v52, %v11387_v33  ;;  %v13889_v52 = vld [vmem:[#allocation8 + $0x121c] sm:$0xf0] }
 0x2a4   :  { %4609 = vmatpush.bf16.msrb.mxu1 %v11148_v9  ;;  %4622 = vmatpush.bf16.msrb.mxu2 %v11152_v11  ;;  %v11483_v9 = vld [vmem:[#allocation8 + $0x13c0] sm:$0xf]  ;;  %v13922_v53 = vld [vmem:[#allocation8 + $0x1324] sm:$0xf0] }
 0x2a5   :  { %4635 = vmatpush.bf16.msrb.mxu3 %v11156_v61  ;;  %4648 = vmatpush.bf16.msra.mxu0 %v11160_v36  ;;  %v3595_v6 = vpop.f32.mrf.mxu3  ;;  %v13945_v11 = vld [vmem:[#allocation8 + $0x13dc] sm:$0xf0]  ;;  %v11491_v61 = vld [vmem:[#allocation8 + $0x13c8] sm:$0xf]  ;;  %v11020_v36 = vor.u32 %v13827_v28, %v11019_v44  ;;  %v11389_v28 = vld [vmem:[#allocation8 + $0x1320] sm:$0xf0] }
 0x2a8   :  { %4610 = vmatpush.bf16.msrb.mxu1 %v11116_v10  ;;  %4623 = vmatpush.bf16.msrb.mxu2 %v11120_v16  ;;  %v11484_v10 = vor.u32 %v13945_v11, %v11483_v9  ;;  %v11488_v16 = vor.u32 %v13941_v18, %v11485_v19  ;;  %v13913_v9 = vld [vmem:[#allocation8 + $0x12dc] sm:$0xf0]  ;;  %v11396_v18 = vor.u32 %v13922_v53, %v11395_v59  ;;  %v11267_v53 = vld [vmem:[#allocation8 + $0x1208] sm:$0xf] }
 0x2a9   :  { %4636 = vmatpush.bf16.msrb.mxu3 %v11124_v56  ;;  %4649 = vmatpush.bf16.msra.mxu0 %v11128_v25  ;;  %v11492_v56 = vor.u32 %v13946_v47, %v11491_v61  ;;  %v11496_v25 = vor.u32 %v13942_v12, %v11493_v17  ;;  %v13909_v61 = vld [vmem:[#allocation8 + $0x12c4] sm:$0xf]  ;;  %v13914_v47 = vld [vmem:[#allocation8 + $0x12e4] sm:$0xf0]  ;;  %v13910_v12 = vld [vmem:[#allocation8 + $0x12cc] sm:$0xf] }
 0x2aa   :  { %v11365_v17 = vld [vmem:[#allocation8 + $0x12e8] sm:$0xf0] }
 0x2ab   :  { %v11368_v13 = vor.u32 %v13910_v12, %v11365_v17  ;;  %v11509_v12 = vld [vmem:[#allocation8 + $0x13f8] sm:$0xf0] }
 0x2ac   :  { %4611 = vmatpush.bf16.msrb.mxu1 %v11084_v46  ;;  %4624 = vmatpush.bf16.msrb.mxu2 %v11088_v42  ;;  %v11460_v46 = vor.u32 %v13938_v41, %v11459_v2  ;;  %v11464_v42 = vor.u32 %v13934_v35, %v11461_v34  ;;  %v13906_v2 = vld [vmem:[#allocation8 + $0x12a4] sm:$0xf0]  ;;  %v13902_v41 = vld [vmem:[#allocation8 + $0x128c] sm:$0xf] }
 0x2ad   :  { %4637 = vmatpush.bf16.msrb.mxu3 %v11092_v3  ;;  %4650 = vmatpush.bf16.msra.mxu0 %v11096_v27  ;;  %v11427_v3 = vld [vmem:[#allocation8 + $0x1348] sm:$0xf]  ;;  %v11333_v35 = vld [vmem:[#allocation8 + $0x12a8] sm:$0xf0] }
 0x2ae   :  { %v13930_v27 = vld [vmem:[#allocation8 + $0x1364] sm:$0xf0] }
 0x2af   :  { %v11428_v44 = vor.u32 %v13930_v27, %v11427_v3  ;;  %v11293_v3 = vld [vmem:[#allocation8 + $0x1260] sm:$0xf0]  ;;  %v11299_v27 = vld [vmem:[#allocation8 + $0x1248] sm:$0xf] }
 0x2b0   :  { %4612 = vmatpush.bf16.msrb.mxu1 %v11052_v21  ;;  %4625 = vmatpush.bf16.msrb.mxu2 %v11056_v38  ;;  %v11432_v21 = vor.u32 %v13926_v14, %v11429_v22  ;;  %v13917_v38 = vld [vmem:[#allocation8 + $0x1304] sm:$0xf]  ;;  %v13898_v14 = vld [vmem:[#allocation8 + $0x1264] sm:$0xf0]  ;;  %v13894_v22 = vld [vmem:[#allocation8 + $0x124c] sm:$0xf]  ;;  %v11296_v33 = vor.u32 %v13893_v43, %v11293_v3 }
 0x2b1   :  { %4638 = vmatpush.bf16.msrb.mxu3 %v11060_v23  ;;  %4651 = vmatpush.bf16.msra.mxu0 %v11064_v58  ;;  %v13918_v23 = vld [vmem:[#allocation8 + $0x130c] sm:$0xf]  ;;  %v11392_v6 = vor.u32 %v13917_v38, %v11389_v28  ;;  %v11300_v38 = vor.u32 %v13898_v14, %v11299_v27  ;;  %v11443_v43 = vld [vmem:[#allocation8 + $0x1358] sm:$0xf]  ;;  %v13928_v27 = vld [vmem:[#allocation8 + $0x135c] sm:$0xf] }
 0x2b2   :  { %v11397_v58 = vld [vmem:[#allocation8 + $0x1328] sm:$0xf0]  ;;  %v13932_v3 = vld [vmem:[#allocation8 + $0x1374] sm:$0xf0]  ;;  %v11445_v14 = vld [vmem:[#allocation8 + $0x1378] sm:$0xf0] }
 0x2b3   :  { %v11400_v19 = vor.u32 %v13918_v23, %v11397_v58  ;;  %v13890_v23 = vld [vmem:[#allocation8 + $0x1224] sm:$0xf0]  ;;  %v13886_v58 = vld [vmem:[#allocation8 + $0x120c] sm:$0xf] }
 0x2b4   :  { %4613 = vmatpush.bf16.msrb.mxu1 %v11020_v36  ;;  %4626 = vmatpush.bf16.msrb.mxu2 %v11024_v37  ;;  %v3619_v55 = vpop.f32.mrf.mxu1  ;;  %v11357_v36 = vld [vmem:[#allocation8 + $0x12e0] sm:$0xf0]  ;;  %v11363_v37 = vld [vmem:[#allocation8 + $0x12c8] sm:$0xf]  ;;  %v11268_v17 = vor.u32 %v13890_v23, %v11267_v53  ;;  %v11413_v53 = vld [vmem:[#allocation8 + $0x1338] sm:$0xf0] }
 0x2b5   :  { %4639 = vmatpush.bf16.msrb.mxu3 %v11028_v15  ;;  %4652 = vmatpush.bf16.msra.mxu0 %v11032_v57  ;;  %v14933_v51 = vadd.f32 %v3619_v55, %v14898_v30  ;;  %v11356_v30 = vor.u32 %v13913_v9, %v11355_v8  ;;  %v11360_v15 = vor.u32 %v13909_v61, %v11357_v36  ;;  %v11323_v57 = vld [vmem:[#allocation8 + $0x1280] sm:$0xf]  ;;  %v4732_v8 = vunpack.c.l.b16 %v14910_v50  ;;  %v13943_v9 = vld [vmem:[#allocation8 + $0x13d4] sm:$0xf] }
 0x2b7   :  { %4614 = vmatmul.bf16.vlgmr.msrb.gmra.mxu1 %v14910_v50  ;;  %4627 = vmatmul.bf16.vlgmr.msrb.gmra.mxu2 %v14910_v50  ;;  %v3658_v4 = vpop.f32.mrf.mxu0 }
 0x2b8   :  { %5056 = vmatpush.bf16.msra.mxu1 %v11484_v10  ;;  %5069 = vmatpush.bf16.msra.mxu2 %v11488_v16  ;;  %v14936_v11 = vadd.f32 %v3658_v4, %v14901_v20  ;;  %v13905_v10 = vld [vmem:[#allocation8 + $0x129c] sm:$0xf0]  ;;  %v11364_v16 = vor.u32 %v13914_v47, %v11363_v37  ;;  %v11269_v4 = vld [vmem:[#allocation8 + $0x1228] sm:$0xf0]  ;;  %v13948_v37 = vld [vmem:[#allocation8 + $0x13f4] sm:$0xf0] }
 0x2b9   :  { %5082 = vmatpush.bf16.msra.mxu3 %v11492_v56  ;;  %5095 = vmatpush.bf16.msrb.mxu0 %v11496_v25  ;;  %v11325_v56 = vld [vmem:[#allocation8 + $0x12a0] sm:$0xf0]  ;;  %v11331_v25 = vld [vmem:[#allocation8 + $0x1288] sm:$0xf]  ;;  %v11324_v45 = vor.u32 %v13905_v10, %v11323_v57  ;;  %v13944_v47 = vld [vmem:[#allocation8 + $0x13dc] sm:$0xf]  ;;  %v14945_v10 = vpack.c.b16 %v4732_v8, %v4732_v8 }
 0x2ba   :  { %4640 = vmatmul.bf16.vlgmr.msrb.gmra.mxu3 %v14910_v50  ;;  %4653 = vmatmul.bf16.vlgmr.msra.gmra.mxu0 %v14910_v50  ;;  %v3632_v20 = vpop.f32.mrf.mxu2  ;;  %v11328_v60 = vor.u32 %v13901_v0, %v11325_v56  ;;  %v11332_v62 = vor.u32 %v13906_v2, %v11331_v25  ;;  %v13939_v50 = vld [vmem:[#allocation8 + $0x13ac] sm:$0xf0]  ;;  %v13935_v0 = vld [vmem:[#allocation8 + $0x1394] sm:$0xf]  ;;  %v11475_v25 = vld [vmem:[#allocation8 + $0x1398] sm:$0xf] }
 0x2bb   :  { %v14939_v31 = vadd.f32 %v3632_v20, %v14904_v24  ;;  %v11336_v24 = vor.u32 %v13902_v41, %v11333_v35  ;;  %v11512_v20 = vor.u32 %v13944_v47, %v11509_v12  ;;  %v11469_v56 = vld [vmem:[#allocation8 + $0x13b0] sm:$0xf0]  ;;  %v13936_v2 = vld [vmem:[#allocation8 + $0x139c] sm:$0xf]  ;;  %v14948_v35 = vrot.slane %v14945_v10, 1 }
 0x2bc   :  { %5057 = vmatpush.bf16.msra.mxu1 %v11452_v32  ;;  %5070 = vmatpush.bf16.msra.mxu2 %v11456_v29  ;;  %v3621_v32 = vpop.f32.mrf.mxu1  ;;  %v11477_v41 = vld [vmem:[#allocation8 + $0x13b8] sm:$0xf0]  ;;  %v13915_v8 = vld [vmem:[#allocation8 + $0x12ec] sm:$0xf0]  ;;  %v13916_v47 = vld [vmem:[#allocation8 + $0x12f4] sm:$0xf0] }
 0x2bd   :  { %5083 = vmatpush.bf16.msra.mxu3 %v11460_v46  ;;  %5096 = vmatpush.bf16.msrb.mxu0 %v11464_v42  ;;  %v3645_v39 = vpop.f32.mrf.mxu3  ;;  %v11291_v46 = vld [vmem:[#allocation8 + $0x1240] sm:$0xf]  ;;  %v13912_v12 = vld [vmem:[#allocation8 + $0x12dc] sm:$0xf] }
 0x2be   :  { %v14942_v34 = vadd.f32 %v3645_v39, %v14907_v49  ;;  %v13897_v42 = vld [vmem:[#allocation8 + $0x125c] sm:$0xf0]  ;;  %v13940_v39 = vld [vmem:[#allocation8 + $0x13b4] sm:$0xf0] }
 0x2bf   :  { %v3660_v29 = vpop.f32.mrf.mxu0  ;;  %v11259_v49 = vld [vmem:[#allocation8 + $0x1200] sm:$0xf] }
 0x2c0   :  { %5058 = vmatpush.bf16.msra.mxu1 %v11420_v63  ;;  %5071 = vmatpush.bf16.msra.mxu2 %v11424_v1  ;;  %v11301_v63 = vld [vmem:[#allocation8 + $0x1268] sm:$0xf0]  ;;  %v11292_v1 = vor.u32 %v13897_v42, %v11291_v46  ;;  %v11260_v61 = vor.u32 %v13889_v52, %v11259_v49  ;;  %v11472_v29 = vor.u32 %v13935_v0, %v11469_v56  ;;  %v11403_v49 = vld [vmem:[#allocation8 + $0x1310] sm:$0xf]  ;;  %v11347_v0 = vld [vmem:[#allocation8 + $0x1298] sm:$0xf] }
 0x2c1   :  { %5084 = vmatpush.bf16.msra.mxu3 %v11428_v44  ;;  %5097 = vmatpush.bf16.msrb.mxu0 %v11432_v21  ;;  %v13885_v44 = vld [vmem:[#allocation8 + $0x1204] sm:$0xf]  ;;  %v11304_v28 = vor.u32 %v13894_v22, %v11301_v63  ;;  %v11476_v46 = vor.u32 %v13940_v39, %v11475_v25  ;;  %v11480_v42 = vor.u32 %v13936_v2, %v11477_v41  ;;  %v13908_v39 = vld [vmem:[#allocation8 + $0x12b4] sm:$0xf0]  ;;  %v13904_v2 = vld [vmem:[#allocation8 + $0x129c] sm:$0xf] }
 0x2c2   :  { %v11261_v21 = vld [vmem:[#allocation8 + $0x1220] sm:$0xf0]  ;;  %v3634_v59 = vpop.f32.mrf.mxu2  ;;  %v11448_v52 = vor.u32 %v13928_v27, %v11445_v14  ;;  %v11349_v41 = vld [vmem:[#allocation8 + $0x12b8] sm:$0xf0]  ;;  %v11315_v27 = vld [vmem:[#allocation8 + $0x1258] sm:$0xf] }
 0x2c3   :  { %v11264_v36 = vor.u32 %v13885_v44, %v11261_v21  ;;  %v13919_v44 = vld [vmem:[#allocation8 + $0x1314] sm:$0xf]  ;;  %v13920_v59 = vld [vmem:[#allocation8 + $0x131c] sm:$0xf]  ;;  %v13900_v14 = vld [vmem:[#allocation8 + $0x1274] sm:$0xf0] }
 0x2c4   :  { %5059 = vmatpush.bf16.msra.mxu1 %v11388_v5  ;;  %5072 = vmatpush.bf16.msra.mxu2 %v11392_v6  ;;  %v11499_v5 = vld [vmem:[#allocation8 + $0x13d0] sm:$0xf]  ;;  %v11405_v21 = vld [vmem:[#allocation8 + $0x1330] sm:$0xf0] }
 0x2c5   :  { %5085 = vmatpush.bf16.msra.mxu3 %v11396_v18  ;;  %5098 = vmatpush.bf16.msrb.mxu0 %v11400_v19  ;;  %v3647_v55 = vpop.f32.mrf.mxu3  ;;  %v13947_v6 = vld [vmem:[#allocation8 + $0x13ec] sm:$0xf0]  ;;  %v11501_v18 = vld [vmem:[#allocation8 + $0x13f0] sm:$0xf0]  ;;  %v11507_v19 = vld [vmem:[#allocation8 + $0x13d8] sm:$0xf] }
 0x2c6   :  { %v11504_v57 = vor.u32 %v13943_v9, %v11501_v18 }
 0x2c8   :  { %5060 = vmatpush.bf16.msra.mxu1 %v11356_v30  ;;  %5073 = vmatpush.bf16.msra.mxu2 %v11360_v15  ;;  %v11272_v30 = vor.u32 %v13886_v58, %v11269_v4  ;;  %v11500_v15 = vor.u32 %v13947_v6, %v11499_v5  ;;  %v11408_v5 = vor.u32 %v13919_v44, %v11405_v21  ;;  %v11371_v6 = vld [vmem:[#allocation8 + $0x12d0] sm:$0xf]  ;;  %v11277_v44 = vld [vmem:[#allocation8 + $0x1230] sm:$0xf0] }
 0x2c9   :  { %5086 = vmatpush.bf16.msra.mxu3 %v11364_v16  ;;  %5099 = vmatpush.bf16.msrb.mxu0 %v11368_v13  ;;  %v11467_v16 = vld [vmem:[#allocation8 + $0x1390] sm:$0xf]  ;;  %v11508_v13 = vor.u32 %v13948_v37, %v11507_v19  ;;  %v11416_v19 = vor.u32 %v13920_v59, %v11413_v53  ;;  %v11379_v37 = vld [vmem:[#allocation8 + $0x12d8] sm:$0xf]  ;;  %v11316_v21 = vor.u32 %v13900_v14, %v11315_v27  ;;  %v11685_v27 = vld [vmem:[#allocation8 + $0x1568] sm:$0xf0] }
 0x2ca   :  { %v11468_v32 = vor.u32 %v13939_v50, %v11467_v16  ;;  %v11380_v16 = vor.u32 %v13916_v47, %v11379_v37  ;;  %v11283_v59 = vld [vmem:[#allocation8 + $0x1218] sm:$0xf]  ;;  %v14010_v37 = vld [vmem:[#allocation8 + $0x15e4] sm:$0xf0]  ;;  %v14006_v47 = vld [vmem:[#allocation8 + $0x15cc] sm:$0xf] }
 0x2cb   :  { %v13892_v53 = vld [vmem:[#allocation8 + $0x1234] sm:$0xf0] }
 0x2cc   :  { %5061 = vmatpush.bf16.msra.mxu1 %v11324_v45  ;;  %5074 = vmatpush.bf16.msra.mxu2 %v11328_v60  ;;  %v11435_v45 = vld [vmem:[#allocation8 + $0x1350] sm:$0xf] }
 0x2cd   :  { %5087 = vmatpush.bf16.msra.mxu3 %v11332_v62  ;;  %5100 = vmatpush.bf16.msrb.mxu0 %v11336_v24  ;;  %v13931_v60 = vld [vmem:[#allocation8 + $0x136c] sm:$0xf0]  ;;  %v13927_v62 = vld [vmem:[#allocation8 + $0x1354] sm:$0xf] }
 0x2ce   :  { %v11437_v24 = vld [vmem:[#allocation8 + $0x1370] sm:$0xf0]  ;;  %v11436_v22 = vor.u32 %v13931_v60, %v11435_v45 }
 0x2cf   :  { %v11440_v63 = vor.u32 %v13927_v62, %v11437_v24  ;;  %v13899_v62 = vld [vmem:[#allocation8 + $0x126c] sm:$0xf0]  ;;  %v11348_v24 = vor.u32 %v13908_v39, %v11347_v0  ;;  %v11715_v0 = vld [vmem:[#allocation8 + $0x1588] sm:$0xf]  ;;  %v13998_v39 = vld [vmem:[#allocation8 + $0x158c] sm:$0xf] }
 0x2d0   :  { %5062 = vmatpush.bf16.msra.mxu1 %v11292_v1  ;;  %5075 = vmatpush.bf16.msra.mxu2 %v11296_v33  ;;  %v13923_v1 = vld [vmem:[#allocation8 + $0x132c] sm:$0xf0]  ;;  %v11444_v33 = vor.u32 %v13932_v3, %v11443_v43  ;;  %v13895_v43 = vld [vmem:[#allocation8 + $0x1254] sm:$0xf] }
 0x2d1   :  { %5088 = vmatpush.bf16.msra.mxu3 %v11300_v38  ;;  %5101 = vmatpush.bf16.msrb.mxu0 %v11304_v28  ;;  %v11411_v38 = vld [vmem:[#allocation8 + $0x1318] sm:$0xf]  ;;  %v11404_v4 = vor.u32 %v13923_v1, %v11403_v49  ;;  %v11309_v3 = vld [vmem:[#allocation8 + $0x1270] sm:$0xf0] }
 0x2d2   :  { %v13924_v28 = vld [vmem:[#allocation8 + $0x1334] sm:$0xf0]  ;;  %v11312_v1 = vor.u32 %v13895_v43, %v11309_v3  ;;  %v13994_v43 = vld [vmem:[#allocation8 + $0x1564] sm:$0xf0]  ;;  %v13990_v3 = vld [vmem:[#allocation8 + $0x154c] sm:$0xf] }
 0x2d3   :  { %v11412_v18 = vor.u32 %v13924_v28, %v11411_v38 }
 0x2d4   :  { %5063 = vmatpush.bf16.msra.mxu1 %v11260_v61  ;;  %5076 = vmatpush.bf16.msra.mxu2 %v11264_v36  ;;  %v4066_v23 = vpop.f32.mrf.mxu1  ;;  %v13911_v61 = vld [vmem:[#allocation8 + $0x12d4] sm:$0xf] }
 0x2d5   :  { %5089 = vmatpush.bf16.msra.mxu3 %v11268_v17  ;;  %5102 = vmatpush.bf16.msrb.mxu0 %v11272_v30  ;;  %v14955_v58 = vadd.f32 %v4066_v23, %v14917_v7  ;;  %v11373_v36 = vld [vmem:[#allocation8 + $0x12f0] sm:$0xf0]  ;;  %v11381_v17 = vld [vmem:[#allocation8 + $0x12f8] sm:$0xf0]  ;;  %v11372_v7 = vor.u32 %v13915_v8, %v11371_v6  ;;  %v14009_v6 = vld [vmem:[#allocation8 + $0x15dc] sm:$0xf0] }
 0x2d6   :  { %v11376_v30 = vor.u32 %v13911_v61, %v11373_v36  ;;  %v11384_v50 = vor.u32 %v13912_v12, %v11381_v17  ;;  %v13888_v23 = vld [vmem:[#allocation8 + $0x121c] sm:$0xf]  ;;  %v14005_v8 = vld [vmem:[#allocation8 + $0x15c4] sm:$0xf]  ;;  %v11749_v12 = vld [vmem:[#allocation8 + $0x15e8] sm:$0xf0]  ;;  %v11284_v17 = vor.u32 %v13892_v53, %v11283_v59 }
 0x2d7   :  { %5064 = vmatmul.bf16.vlgmr.msra.gmra.mxu1 %v14948_v35  ;;  %5077 = vmatmul.bf16.vlgmr.msra.gmra.mxu2 %v14948_v35  ;;  %v4105_v55 = vpop.f32.mrf.mxu0 }
 0x2d8   :  { %5108 = vmatpush.bf16.msrb.mxu1 %v11500_v15  ;;  %5121 = vmatpush.bf16.msrb.mxu2 %v11504_v57  ;;  %v14958_v9 = vadd.f32 %v4105_v55, %v14920_v26  ;;  %v11339_v15 = vld [vmem:[#allocation8 + $0x1290] sm:$0xf] }
 0x2d9   :  { %5134 = vmatpush.bf16.msrb.mxu3 %v11508_v13  ;;  %5147 = vmatpush.bf16.msra.mxu0 %v11512_v20  ;;  %v13907_v57 = vld [vmem:[#allocation8 + $0x12ac] sm:$0xf0]  ;;  %v13903_v13 = vld [vmem:[#allocation8 + $0x1294] sm:$0xf] }
 0x2da   :  { %5090 = vmatmul.bf16.vlgmr.msra.gmra.mxu3 %v14948_v35  ;;  %5103 = vmatmul.bf16.vlgmr.msrb.gmra.mxu0 %v14948_v35  ;;  %v4079_v26 = vpop.f32.mrf.mxu2  ;;  %v11341_v20 = vld [vmem:[#allocation8 + $0x12b0] sm:$0xf0]  ;;  %v11340_v60 = vor.u32 %v13907_v57, %v11339_v15  ;;  %v11707_v57 = vld [vmem:[#allocation8 + $0x1580] sm:$0xf] }
 0x2db   :  { %v14961_v56 = vadd.f32 %v4079_v26, %v14923_v54  ;;  %v11352_v54 = vor.u32 %v13904_v2, %v11349_v41  ;;  %v11752_v26 = vor.u32 %v14006_v47, %v11749_v12  ;;  %v11717_v2 = vld [vmem:[#allocation8 + $0x15a8] sm:$0xf0] }
 0x2dc   :  { %5109 = vmatpush.bf16.msrb.mxu1 %v11468_v32  ;;  %5122 = vmatpush.bf16.msrb.mxu2 %v11472_v29  ;;  %v4068_v29 = vpop.f32.mrf.mxu1  ;;  %v13974_v47 = vld [vmem:[#allocation8 + $0x14cc] sm:$0xf] }
 0x2dd   :  { %5135 = vmatpush.bf16.msrb.mxu3 %v11476_v46  ;;  %5148 = vmatpush.bf16.msra.mxu0 %v11480_v42  ;;  %v4092_v25 = vpop.f32.mrf.mxu3  ;;  %v11344_v46 = vor.u32 %v13903_v13, %v11341_v20  ;;  %v11307_v42 = vld [vmem:[#allocation8 + $0x1250] sm:$0xf]  ;;  %v13997_v13 = vld [vmem:[#allocation8 + $0x1584] sm:$0xf]  ;;  %v11621_v12 = vld [vmem:[#allocation8 + $0x14e8] sm:$0xf0] }
 0x2de   :  { %v14964_v32 = vadd.f32 %v4092_v25, %v14926_v48  ;;  %v11275_v48 = vld [vmem:[#allocation8 + $0x1210] sm:$0xf]  ;;  %v11308_v49 = vor.u32 %v13899_v62, %v11307_v42  ;;  %v11709_v20 = vld [vmem:[#allocation8 + $0x15a0] sm:$0xf0]  ;;  %v14002_v25 = vld [vmem:[#allocation8 + $0x15a4] sm:$0xf0]  ;;  %v11720_v42 = vor.u32 %v13998_v39, %v11717_v2 }
 0x2df   :  { %v4107_v45 = vpop.f32.mrf.mxu0  ;;  %v11712_v29 = vor.u32 %v13997_v13, %v11709_v20  ;;  %v13989_v62 = vld [vmem:[#allocation8 + $0x1544] sm:$0xf]  ;;  %v11589_v39 = vld [vmem:[#allocation8 + $0x14a8] sm:$0xf0] }
 0x2e0   :  { %5110 = vmatpush.bf16.msrb.mxu1 %v11436_v22  ;;  %5123 = vmatpush.bf16.msrb.mxu2 %v11440_v63  ;;  %v13896_v22 = vld [vmem:[#allocation8 + $0x125c] sm:$0xf]  ;;  %v11675_v45 = vld [vmem:[#allocation8 + $0x1540] sm:$0xf] }
 0x2e1   :  { %5136 = vmatpush.bf16.msrb.mxu3 %v11444_v33  ;;  %5149 = vmatpush.bf16.msra.mxu0 %v11448_v52  ;;  %v11317_v63 = vld [vmem:[#allocation8 + $0x1278] sm:$0xf0]  ;;  %v13891_v33 = vld [vmem:[#allocation8 + $0x122c] sm:$0xf0]  ;;  %v13887_v52 = vld [vmem:[#allocation8 + $0x1214] sm:$0xf] }
 0x2e2   :  { %v11320_v38 = vor.u32 %v13896_v22, %v11317_v63  ;;  %v4081_v28 = vpop.f32.mrf.mxu2  ;;  %v11276_v61 = vor.u32 %v13891_v33, %v11275_v48  ;;  %v11280_v36 = vor.u32 %v13887_v52, %v11277_v44  ;;  %v11643_v63 = vld [vmem:[#allocation8 + $0x1500] sm:$0xf]  ;;  %v13981_v33 = vld [vmem:[#allocation8 + $0x1504] sm:$0xf]  ;;  %v11651_v44 = vld [vmem:[#allocation8 + $0x1508] sm:$0xf] }
 0x2e3   :  { %v13985_v48 = vld [vmem:[#allocation8 + $0x151c] sm:$0xf0]  ;;  %v11645_v52 = vld [vmem:[#allocation8 + $0x1520] sm:$0xf0]  ;;  %v11653_v28 = vld [vmem:[#allocation8 + $0x1528] sm:$0xf0] }
 0x2e4   :  { %5111 = vmatpush.bf16.msrb.mxu1 %v11404_v4  ;;  %5124 = vmatpush.bf16.msrb.mxu2 %v11408_v5  ;;  %v11285_v4 = vld [vmem:[#allocation8 + $0x1238] sm:$0xf0]  ;;  %v11739_v5 = vld [vmem:[#allocation8 + $0x15c0] sm:$0xf] }
 0x2e5   :  { %5137 = vmatpush.bf16.msrb.mxu3 %v11412_v18  ;;  %5150 = vmatpush.bf16.msra.mxu0 %v11416_v19  ;;  %v4094_v55 = vpop.f32.mrf.mxu3  ;;  %v11741_v18 = vld [vmem:[#allocation8 + $0x15e0] sm:$0xf0]  ;;  %v11747_v19 = vld [vmem:[#allocation8 + $0x15c8] sm:$0xf] }
 0x2e6   :  { %v11744_v15 = vor.u32 %v14005_v8, %v11741_v18  ;;  %v11648_v55 = vor.u32 %v13981_v33, %v11645_v52 }
 0x2e8   :  { %5112 = vmatpush.bf16.msrb.mxu1 %v11372_v7  ;;  %5125 = vmatpush.bf16.msrb.mxu2 %v11376_v30  ;;  %v11288_v7 = vor.u32 %v13888_v23, %v11285_v4  ;;  %v11740_v30 = vor.u32 %v14009_v6, %v11739_v5  ;;  %v11644_v23 = vor.u32 %v13985_v48, %v11643_v63  ;;  %v11611_v4 = vld [vmem:[#allocation8 + $0x14c0] sm:$0xf] }
 0x2e9   :  { %5138 = vmatpush.bf16.msrb.mxu3 %v11380_v16  ;;  %5151 = vmatpush.bf16.msra.mxu0 %v11384_v50  ;;  %v14001_v16 = vld [vmem:[#allocation8 + $0x159c] sm:$0xf0]  ;;  %v11748_v50 = vor.u32 %v14010_v37, %v11747_v19  ;;  %v13973_v19 = vld [vmem:[#allocation8 + $0x14c4] sm:$0xf]  ;;  %v13978_v37 = vld [vmem:[#allocation8 + $0x14e4] sm:$0xf0] }
 0x2ea   :  { %v11708_v41 = vor.u32 %v14001_v16, %v11707_v57  ;;  %v13977_v5 = vld [vmem:[#allocation8 + $0x14dc] sm:$0xf0]  ;;  %v11624_v57 = vor.u32 %v13974_v47, %v11621_v12  ;;  %v13965_v16 = vld [vmem:[#allocation8 + $0x1484] sm:$0xf] }
 0x2eb   :  { %v13953_v48 = vld [vmem:[#allocation8 + $0x141c] sm:$0xf0] }
 0x2ec   :  { %5113 = vmatpush.bf16.msrb.mxu1 %v11340_v60  ;;  %5126 = vmatpush.bf16.msrb.mxu2 %v11344_v46  ;;  %v13993_v60 = vld [vmem:[#allocation8 + $0x155c] sm:$0xf0]  ;;  %v11716_v46 = vor.u32 %v14002_v25, %v11715_v0  ;;  %v13970_v0 = vld [vmem:[#allocation8 + $0x14a4] sm:$0xf0]  ;;  %v13966_v25 = vld [vmem:[#allocation8 + $0x148c] sm:$0xf] }
 0x2ed   :  { %5139 = vmatpush.bf16.msrb.mxu3 %v11348_v24  ;;  %5152 = vmatpush.bf16.msra.mxu0 %v11352_v54  ;;  %v11677_v24 = vld [vmem:[#allocation8 + $0x1560] sm:$0xf0]  ;;  %v11683_v54 = vld [vmem:[#allocation8 + $0x1548] sm:$0xf]  ;;  %v11676_v14 = vor.u32 %v13993_v60, %v11675_v45 }
 0x2ee   :  { %v11680_v22 = vor.u32 %v13989_v62, %v11677_v24  ;;  %v13957_v24 = vld [vmem:[#allocation8 + $0x1444] sm:$0xf] }
 0x2f0   :  { %5114 = vmatpush.bf16.msrb.mxu1 %v11308_v49  ;;  %5127 = vmatpush.bf16.msrb.mxu2 %v11312_v1  ;;  %v11684_v49 = vor.u32 %v13994_v43, %v11683_v54  ;;  %v11688_v1 = vor.u32 %v13990_v3, %v11685_v27  ;;  %v11549_v54 = vld [vmem:[#allocation8 + $0x1460] sm:$0xf0]  ;;  %v11555_v43 = vld [vmem:[#allocation8 + $0x1448] sm:$0xf]  ;;  %v13958_v27 = vld [vmem:[#allocation8 + $0x144c] sm:$0xf] }
 0x2f1   :  { %5140 = vmatpush.bf16.msrb.mxu3 %v11316_v21  ;;  %5153 = vmatpush.bf16.msra.mxu0 %v11320_v38  ;;  %v13986_v21 = vld [vmem:[#allocation8 + $0x1524] sm:$0xf0]  ;;  %v13982_v38 = vld [vmem:[#allocation8 + $0x150c] sm:$0xf]  ;;  %v11552_v63 = vor.u32 %v13957_v24, %v11549_v54  ;;  %v13996_v24 = vld [vmem:[#allocation8 + $0x1574] sm:$0xf0] }
 0x2f2   :  { %v11652_v8 = vor.u32 %v13986_v21, %v11651_v44  ;;  %v11656_v18 = vor.u32 %v13982_v38, %v11653_v28  ;;  %v13962_v3 = vld [vmem:[#allocation8 + $0x1464] sm:$0xf0]  ;;  %v13950_v28 = vld [vmem:[#allocation8 + $0x140c] sm:$0xf]  ;;  %v13992_v54 = vld [vmem:[#allocation8 + $0x155c] sm:$0xf] }
 0x2f3   :  { %v11556_v33 = vor.u32 %v13962_v3, %v11555_v43  ;;  %v11523_v21 = vld [vmem:[#allocation8 + $0x1408] sm:$0xf]  ;;  %v11701_v43 = vld [vmem:[#allocation8 + $0x1578] sm:$0xf0] }
 0x2f4   :  { %5115 = vmatpush.bf16.msrb.mxu1 %v11276_v61  ;;  %5128 = vmatpush.bf16.msrb.mxu2 %v11280_v36  ;;  %v4118_v59 = vpop.f32.mrf.mxu1  ;;  %v11613_v61 = vld [vmem:[#allocation8 + $0x14e0] sm:$0xf0]  ;;  %v11619_v36 = vld [vmem:[#allocation8 + $0x14c8] sm:$0xf] }
 0x2f5   :  { %5141 = vmatpush.bf16.msrb.mxu3 %v11284_v17  ;;  %5154 = vmatpush.bf16.msra.mxu0 %v11288_v7  ;;  %v11616_v17 = vor.u32 %v13973_v19, %v11613_v61  ;;  %v11579_v7 = vld [vmem:[#allocation8 + $0x1480] sm:$0xf]  ;;  %v13954_v38 = vld [vmem:[#allocation8 + $0x1424] sm:$0xf0]  ;;  %v14012_v61 = vld [vmem:[#allocation8 + $0x15f4] sm:$0xf0] }
 0x2f6   :  { %v11524_v47 = vor.u32 %v13954_v38, %v11523_v21 }
 0x2f7   :  { %5116 = vmatmul.bf16.vlgmr.msrb.gmra.mxu1 %v14948_v35  ;;  %5129 = vmatmul.bf16.vlgmr.msrb.gmra.mxu2 %v14948_v35  ;;  %v4157_v53 = vpop.f32.mrf.mxu0 }
 0x2f8   :  { %5555 = vmatpush.bf16.msra.mxu1 %v11740_v30  ;;  %5568 = vmatpush.bf16.msra.mxu2 %v11744_v15  ;;  %v14974_v6 = vadd.f32 %v4157_v53, %v14936_v11  ;;  %v13969_v30 = vld [vmem:[#allocation8 + $0x149c] sm:$0xf0]  ;;  %v11620_v15 = vor.u32 %v13978_v37, %v11619_v36  ;;  %v11525_v53 = vld [vmem:[#allocation8 + $0x1428] sm:$0xf0]  ;;  %v14008_v36 = vld [vmem:[#allocation8 + $0x15dc] sm:$0xf] }
 0x2f9   :  { %5581 = vmatpush.bf16.msra.mxu3 %v11748_v50  ;;  %5594 = vmatpush.bf16.msrb.mxu0 %v11752_v26  ;;  %v11581_v50 = vld [vmem:[#allocation8 + $0x14a0] sm:$0xf0]  ;;  %v11587_v26 = vld [vmem:[#allocation8 + $0x1488] sm:$0xf]  ;;  %v11580_v45 = vor.u32 %v13969_v30, %v11579_v7  ;;  %v11765_v37 = vld [vmem:[#allocation8 + $0x15f8] sm:$0xf0]  ;;  %v11528_v12 = vor.u32 %v13950_v28, %v11525_v53 }
 0x2fa   :  { %5142 = vmatmul.bf16.vlgmr.msrb.gmra.mxu3 %v14948_v35  ;;  %5155 = vmatmul.bf16.vlgmr.msra.gmra.mxu0 %v14948_v35  ;;  %v14971_v35 = vadd.f32 %v4118_v59, %v14933_v51  ;;  %v11612_v51 = vor.u32 %v13977_v5, %v11611_v4  ;;  %v4131_v11 = vpop.f32.mrf.mxu2  ;;  %v11584_v60 = vor.u32 %v13965_v16, %v11581_v50  ;;  %v14007_v4 = vld [vmem:[#allocation8 + $0x15d4] sm:$0xf]  ;;  %v11723_v7 = vld [vmem:[#allocation8 + $0x1590] sm:$0xf]  ;;  %v11731_v50 = vld [vmem:[#allocation8 + $0x1598] sm:$0xf] }
 0x2fb   :  { %v14977_v13 = vadd.f32 %v4131_v11, %v14939_v31  ;;  %v11588_v62 = vor.u32 %v13970_v0, %v11587_v26  ;;  %v11592_v31 = vor.u32 %v13966_v25, %v11589_v39  ;;  %v11757_v5 = vld [vmem:[#allocation8 + $0x15f0] sm:$0xf0]  ;;  %v14003_v30 = vld [vmem:[#allocation8 + $0x15ac] sm:$0xf0]  ;;  %v14004_v26 = vld [vmem:[#allocation8 + $0x15b4] sm:$0xf0] }
 0x2fc   :  { %5556 = vmatpush.bf16.msra.mxu1 %v11708_v41  ;;  %5569 = vmatpush.bf16.msra.mxu2 %v11712_v29  ;;  %v4120_v41 = vpop.f32.mrf.mxu1  ;;  %v13999_v11 = vld [vmem:[#allocation8 + $0x1594] sm:$0xf]  ;;  %v11733_v0 = vld [vmem:[#allocation8 + $0x15b8] sm:$0xf0]  ;;  %v14983_v25 = vrot.slane %v14945_v10, 2  ;;  %v11724_v39 = vor.u32 %v14003_v30, %v11723_v7 }
 0x2fd   :  { %5582 = vmatpush.bf16.msra.mxu3 %v11716_v46  ;;  %5595 = vmatpush.bf16.msrb.mxu0 %v11720_v42  ;;  %v4144_v20 = vpop.f32.mrf.mxu3  ;;  %v11547_v46 = vld [vmem:[#allocation8 + $0x1440] sm:$0xf]  ;;  %v11725_v16 = vld [vmem:[#allocation8 + $0x15b0] sm:$0xf0] }
 0x2fe   :  { %v14980_v2 = vadd.f32 %v4144_v20, %v14942_v34  ;;  %v13961_v42 = vld [vmem:[#allocation8 + $0x145c] sm:$0xf0]  ;;  %v14000_v20 = vld [vmem:[#allocation8 + $0x159c] sm:$0xf]  ;;  %v11728_v41 = vor.u32 %v13999_v11, %v11725_v16  ;;  %v11603_v11 = vld [vmem:[#allocation8 + $0x1498] sm:$0xf] }
 0x2ff   :  { %v4159_v29 = vpop.f32.mrf.mxu0  ;;  %v11515_v34 = vld [vmem:[#allocation8 + $0x1400] sm:$0xf] }
 0x300   :  { %5557 = vmatpush.bf16.msra.mxu1 %v11676_v14  ;;  %5570 = vmatpush.bf16.msra.mxu2 %v11680_v22  ;;  %v11557_v14 = vld [vmem:[#allocation8 + $0x1468] sm:$0xf0]  ;;  %v11548_v22 = vor.u32 %v13961_v42, %v11547_v46  ;;  %v11691_v29 = vld [vmem:[#allocation8 + $0x1550] sm:$0xf]  ;;  %v11736_v46 = vor.u32 %v14000_v20, %v11733_v0  ;;  %v13991_v42 = vld [vmem:[#allocation8 + $0x1554] sm:$0xf] }
 0x301   :  { %5583 = vmatpush.bf16.msra.mxu3 %v11684_v49  ;;  %5596 = vmatpush.bf16.msrb.mxu0 %v11688_v1  ;;  %v13949_v49 = vld [vmem:[#allocation8 + $0x1404] sm:$0xf]  ;;  %v11560_v52 = vor.u32 %v13958_v27, %v11557_v14  ;;  %v11659_v14 = vld [vmem:[#allocation8 + $0x1510] sm:$0xf]  ;;  %v13968_v20 = vld [vmem:[#allocation8 + $0x149c] sm:$0xf] }
 0x302   :  { %v11517_v1 = vld [vmem:[#allocation8 + $0x1420] sm:$0xf0]  ;;  %v4133_v44 = vpop.f32.mrf.mxu2  ;;  %v11605_v0 = vld [vmem:[#allocation8 + $0x14b8] sm:$0xf0] }
 0x303   :  { %v11520_v19 = vor.u32 %v13949_v49, %v11517_v1  ;;  %v11661_v49 = vld [vmem:[#allocation8 + $0x1530] sm:$0xf0]  ;;  %v11667_v1 = vld [vmem:[#allocation8 + $0x1518] sm:$0xf]  ;;  %v11669_v44 = vld [vmem:[#allocation8 + $0x1538] sm:$0xf0] }
 0x304   :  { %5558 = vmatpush.bf16.msra.mxu1 %v11644_v23  ;;  %5571 = vmatpush.bf16.msra.mxu2 %v11648_v55  ;;  %v11755_v23 = vld [vmem:[#allocation8 + $0x15d0] sm:$0xf] }
 0x305   :  { %5584 = vmatpush.bf16.msra.mxu3 %v11652_v8  ;;  %5597 = vmatpush.bf16.msrb.mxu0 %v11656_v18  ;;  %v4146_v59 = vpop.f32.mrf.mxu3  ;;  %v14011_v55 = vld [vmem:[#allocation8 + $0x15ec] sm:$0xf0]  ;;  %v11763_v8 = vld [vmem:[#allocation8 + $0x15d8] sm:$0xf]  ;;  %v11516_v18 = vor.u32 %v13953_v48, %v11515_v34  ;;  %v13983_v48 = vld [vmem:[#allocation8 + $0x1514] sm:$0xf] }
 0x306   :  { %v13987_v34 = vld [vmem:[#allocation8 + $0x152c] sm:$0xf0]  ;;  %v11664_v53 = vor.u32 %v13983_v48, %v11661_v49  ;;  %v11533_v48 = vld [vmem:[#allocation8 + $0x1430] sm:$0xf0] }
 0x307   :  { %v11660_v59 = vor.u32 %v13987_v34, %v11659_v14 }
 0x308   :  { %5559 = vmatpush.bf16.msra.mxu1 %v11612_v51  ;;  %5572 = vmatpush.bf16.msra.mxu2 %v11616_v17  ;;  %v11756_v51 = vor.u32 %v14011_v55, %v11755_v23  ;;  %v11760_v17 = vor.u32 %v14007_v4, %v11757_v5  ;;  %v11627_v23 = vld [vmem:[#allocation8 + $0x14d0] sm:$0xf] }
 0x309   :  { %5585 = vmatpush.bf16.msra.mxu3 %v11620_v15  ;;  %5598 = vmatpush.bf16.msrb.mxu0 %v11624_v57  ;;  %v11764_v15 = vor.u32 %v14012_v61, %v11763_v8  ;;  %v11768_v57 = vor.u32 %v14008_v36, %v11765_v37  ;;  %v13979_v55 = vld [vmem:[#allocation8 + $0x14ec] sm:$0xf0]  ;;  %v11635_v61 = vld [vmem:[#allocation8 + $0x14d8] sm:$0xf]  ;;  %v13976_v37 = vld [vmem:[#allocation8 + $0x14dc] sm:$0xf] }
 0x30a   :  { %v13980_v36 = vld [vmem:[#allocation8 + $0x14f4] sm:$0xf0] }
 0x30b   :  { %v11636_v7 = vor.u32 %v13980_v36, %v11635_v61  ;;  %v14074_v61 = vld [vmem:[#allocation8 + $0x17e4] sm:$0xf0]  ;;  %v14070_v36 = vld [vmem:[#allocation8 + $0x17cc] sm:$0xf] }
 0x30c   :  { %5560 = vmatpush.bf16.msra.mxu1 %v11580_v45  ;;  %5573 = vmatpush.bf16.msra.mxu2 %v11584_v60  ;;  %v13995_v45 = vld [vmem:[#allocation8 + $0x156c] sm:$0xf0]  ;;  %v11732_v60 = vor.u32 %v14004_v26, %v11731_v50  ;;  %v13972_v26 = vld [vmem:[#allocation8 + $0x14b4] sm:$0xf0] }
 0x30d   :  { %5586 = vmatpush.bf16.msra.mxu3 %v11588_v62  ;;  %5599 = vmatpush.bf16.msrb.mxu0 %v11592_v31  ;;  %v11693_v62 = vld [vmem:[#allocation8 + $0x1570] sm:$0xf0]  ;;  %v11699_v31 = vld [vmem:[#allocation8 + $0x1558] sm:$0xf]  ;;  %v11692_v3 = vor.u32 %v13995_v45, %v11691_v29 }
 0x30e   :  { %v11696_v27 = vor.u32 %v13991_v42, %v11693_v62  ;;  %v13963_v42 = vld [vmem:[#allocation8 + $0x146c] sm:$0xf0]  ;;  %v11604_v62 = vor.u32 %v13972_v26, %v11603_v11  ;;  %v11971_v11 = vld [vmem:[#allocation8 + $0x1788] sm:$0xf]  ;;  %v14062_v26 = vld [vmem:[#allocation8 + $0x178c] sm:$0xf] }
 0x310   :  { %5561 = vmatpush.bf16.msra.mxu1 %v11548_v22  ;;  %5574 = vmatpush.bf16.msra.mxu2 %v11552_v63  ;;  %v11700_v22 = vor.u32 %v13996_v24, %v11699_v31  ;;  %v11704_v63 = vor.u32 %v13992_v54, %v11701_v43  ;;  %v13959_v31 = vld [vmem:[#allocation8 + $0x1454] sm:$0xf]  ;;  %v11571_v54 = vld [vmem:[#allocation8 + $0x1458] sm:$0xf] }
 0x311   :  { %5587 = vmatpush.bf16.msra.mxu3 %v11556_v33  ;;  %5600 = vmatpush.bf16.msrb.mxu0 %v11560_v52  ;;  %v13988_v33 = vld [vmem:[#allocation8 + $0x1534] sm:$0xf0]  ;;  %v13984_v52 = vld [vmem:[#allocation8 + $0x151c] sm:$0xf]  ;;  %v11565_v24 = vld [vmem:[#allocation8 + $0x1470] sm:$0xf0] }
 0x312   :  { %v11668_v5 = vor.u32 %v13988_v33, %v11667_v1  ;;  %v11672_v8 = vor.u32 %v13984_v52, %v11669_v44  ;;  %v13964_v43 = vld [vmem:[#allocation8 + $0x1474] sm:$0xf0]  ;;  %v11568_v34 = vor.u32 %v13959_v31, %v11565_v24  ;;  %v14058_v31 = vld [vmem:[#allocation8 + $0x1764] sm:$0xf0]  ;;  %v14054_v24 = vld [vmem:[#allocation8 + $0x174c] sm:$0xf] }
 0x313   :  { %v11572_v49 = vor.u32 %v13964_v43, %v11571_v54  ;;  %v11539_v52 = vld [vmem:[#allocation8 + $0x1418] sm:$0xf]  ;;  %v11941_v54 = vld [vmem:[#allocation8 + $0x1768] sm:$0xf0] }
 0x314   :  { %5562 = vmatpush.bf16.msra.mxu1 %v11516_v18  ;;  %5575 = vmatpush.bf16.msra.mxu2 %v11520_v19  ;;  %v4563_v21 = vpop.f32.mrf.mxu1  ;;  %v13975_v18 = vld [vmem:[#allocation8 + $0x14d4] sm:$0xf]  ;;  %v13956_v44 = vld [vmem:[#allocation8 + $0x1434] sm:$0xf0] }
 0x315   :  { %5588 = vmatpush.bf16.msra.mxu3 %v11524_v47  ;;  %5601 = vmatpush.bf16.msrb.mxu0 %v11528_v12  ;;  %v14990_v38 = vadd.f32 %v4563_v21, %v14955_v58  ;;  %v11629_v19 = vld [vmem:[#allocation8 + $0x14f0] sm:$0xf0]  ;;  %v11637_v47 = vld [vmem:[#allocation8 + $0x14f8] sm:$0xf0]  ;;  %v11628_v58 = vor.u32 %v13979_v55, %v11627_v23  ;;  %v14073_v23 = vld [vmem:[#allocation8 + $0x17dc] sm:$0xf0] }
 0x316   :  { %v11632_v12 = vor.u32 %v13975_v18, %v11629_v19  ;;  %v11640_v30 = vor.u32 %v13976_v37, %v11637_v47  ;;  %v13952_v21 = vld [vmem:[#allocation8 + $0x141c] sm:$0xf]  ;;  %v14069_v55 = vld [vmem:[#allocation8 + $0x17c4] sm:$0xf]  ;;  %v12005_v37 = vld [vmem:[#allocation8 + $0x17e8] sm:$0xf0]  ;;  %v11540_v47 = vor.u32 %v13956_v44, %v11539_v52 }
 0x317   :  { %5563 = vmatmul.bf16.vlgmr.msra.gmra.mxu1 %v14983_v25  ;;  %5576 = vmatmul.bf16.vlgmr.msra.gmra.mxu2 %v14983_v25  ;;  %v4602_v28 = vpop.f32.mrf.mxu0 }
 0x318   :  { %5607 = vmatpush.bf16.msrb.mxu1 %v11756_v51  ;;  %5620 = vmatpush.bf16.msrb.mxu2 %v11760_v17  ;;  %v14993_v4 = vadd.f32 %v4602_v28, %v14958_v9  ;;  %v11595_v51 = vld [vmem:[#allocation8 + $0x1490] sm:$0xf] }
 0x319   :  { %5633 = vmatpush.bf16.msrb.mxu3 %v11764_v15  ;;  %5646 = vmatpush.bf16.msra.mxu0 %v11768_v57  ;;  %v13971_v17 = vld [vmem:[#allocation8 + $0x14ac] sm:$0xf0]  ;;  %v13967_v15 = vld [vmem:[#allocation8 + $0x1494] sm:$0xf] }
 0x31a   :  { %5589 = vmatmul.bf16.vlgmr.msra.gmra.mxu3 %v14983_v25  ;;  %5602 = vmatmul.bf16.vlgmr.msrb.gmra.mxu0 %v14983_v25  ;;  %v4576_v9 = vpop.f32.mrf.mxu2  ;;  %v11597_v57 = vld [vmem:[#allocation8 + $0x14b0] sm:$0xf0]  ;;  %v11596_v45 = vor.u32 %v13971_v17, %v11595_v51  ;;  %v11963_v17 = vld [vmem:[#allocation8 + $0x1780] sm:$0xf] }
 0x31b   :  { %v14996_v16 = vadd.f32 %v4576_v9, %v14961_v56  ;;  %v11608_v56 = vor.u32 %v13968_v20, %v11605_v0  ;;  %v12008_v9 = vor.u32 %v14070_v36, %v12005_v37  ;;  %v11973_v20 = vld [vmem:[#allocation8 + $0x17a8] sm:$0xf0] }
 0x31c   :  { %5608 = vmatpush.bf16.msrb.mxu1 %v11724_v39  ;;  %5621 = vmatpush.bf16.msrb.mxu2 %v11728_v41  ;;  %v4565_v41 = vpop.f32.mrf.mxu1  ;;  %v14038_v36 = vld [vmem:[#allocation8 + $0x16cc] sm:$0xf] }
 0x31d   :  { %5634 = vmatpush.bf16.msrb.mxu3 %v11732_v60  ;;  %5647 = vmatpush.bf16.msra.mxu0 %v11736_v46  ;;  %v4589_v50 = vpop.f32.mrf.mxu3  ;;  %v11600_v60 = vor.u32 %v13967_v15, %v11597_v57  ;;  %v11563_v46 = vld [vmem:[#allocation8 + $0x1450] sm:$0xf]  ;;  %v14061_v15 = vld [vmem:[#allocation8 + $0x1784] sm:$0xf]  ;;  %v11877_v37 = vld [vmem:[#allocation8 + $0x16e8] sm:$0xf0] }
 0x31e   :  { %v14999_v39 = vadd.f32 %v4589_v50, %v14964_v32  ;;  %v11531_v32 = vld [vmem:[#allocation8 + $0x1410] sm:$0xf]  ;;  %v11564_v14 = vor.u32 %v13963_v42, %v11563_v46  ;;  %v11965_v57 = vld [vmem:[#allocation8 + $0x17a0] sm:$0xf0]  ;;  %v14066_v50 = vld [vmem:[#allocation8 + $0x17a4] sm:$0xf0]  ;;  %v11976_v46 = vor.u32 %v14062_v26, %v11973_v20 }
 0x31f   :  { %v4604_v29 = vpop.f32.mrf.mxu0  ;;  %v11968_v41 = vor.u32 %v14061_v15, %v11965_v57  ;;  %v14053_v42 = vld [vmem:[#allocation8 + $0x1744] sm:$0xf]  ;;  %v11845_v26 = vld [vmem:[#allocation8 + $0x16a8] sm:$0xf0] }
 0x320   :  { %5609 = vmatpush.bf16.msrb.mxu1 %v11692_v3  ;;  %5622 = vmatpush.bf16.msrb.mxu2 %v11696_v27  ;;  %v13960_v3 = vld [vmem:[#allocation8 + $0x145c] sm:$0xf]  ;;  %v11931_v29 = vld [vmem:[#allocation8 + $0x1740] sm:$0xf] }
 0x321   :  { %5635 = vmatpush.bf16.msrb.mxu3 %v11700_v22  ;;  %5648 = vmatpush.bf16.msra.mxu0 %v11704_v63  ;;  %v11573_v27 = vld [vmem:[#allocation8 + $0x1478] sm:$0xf0]  ;;  %v13955_v22 = vld [vmem:[#allocation8 + $0x142c] sm:$0xf0]  ;;  %v13951_v63 = vld [vmem:[#allocation8 + $0x1414] sm:$0xf] }
 0x322   :  { %v11576_v1 = vor.u32 %v13960_v3, %v11573_v27  ;;  %v4578_v33 = vpop.f32.mrf.mxu2  ;;  %v11532_v18 = vor.u32 %v13955_v22, %v11531_v32  ;;  %v11536_v19 = vor.u32 %v13951_v63, %v11533_v48  ;;  %v11899_v27 = vld [vmem:[#allocation8 + $0x1700] sm:$0xf]  ;;  %v14045_v22 = vld [vmem:[#allocation8 + $0x1704] sm:$0xf]  ;;  %v11907_v48 = vld [vmem:[#allocation8 + $0x1708] sm:$0xf] }
 0x323   :  { %v14049_v32 = vld [vmem:[#allocation8 + $0x171c] sm:$0xf0]  ;;  %v11901_v63 = vld [vmem:[#allocation8 + $0x1720] sm:$0xf0]  ;;  %v11909_v33 = vld [vmem:[#allocation8 + $0x1728] sm:$0xf0] }
 0x324   :  { %5610 = vmatpush.bf16.msrb.mxu1 %v11660_v59  ;;  %5623 = vmatpush.bf16.msrb.mxu2 %v11664_v53  ;;  %v11541_v59 = vld [vmem:[#allocation8 + $0x1438] sm:$0xf0]  ;;  %v11995_v53 = vld [vmem:[#allocation8 + $0x17c0] sm:$0xf] }
 0x325   :  { %5636 = vmatpush.bf16.msrb.mxu3 %v11668_v5  ;;  %5649 = vmatpush.bf16.msra.mxu0 %v11672_v8  ;;  %v4591_v28 = vpop.f32.mrf.mxu3  ;;  %v11997_v5 = vld [vmem:[#allocation8 + $0x17e0] sm:$0xf0]  ;;  %v12003_v8 = vld [vmem:[#allocation8 + $0x17c8] sm:$0xf] }
 0x326   :  { %v12000_v51 = vor.u32 %v14069_v55, %v11997_v5  ;;  %v11904_v28 = vor.u32 %v14045_v22, %v11901_v63 }
 0x328   :  { %5611 = vmatpush.bf16.msrb.mxu1 %v11628_v58  ;;  %5624 = vmatpush.bf16.msrb.mxu2 %v11632_v12  ;;  %v11544_v58 = vor.u32 %v13952_v21, %v11541_v59  ;;  %v11996_v12 = vor.u32 %v14073_v23, %v11995_v53  ;;  %v11900_v21 = vor.u32 %v14049_v32, %v11899_v27  ;;  %v11867_v59 = vld [vmem:[#allocation8 + $0x16c0] sm:$0xf] }
 0x329   :  { %5637 = vmatpush.bf16.msrb.mxu3 %v11636_v7  ;;  %5650 = vmatpush.bf16.msra.mxu0 %v11640_v30  ;;  %v14065_v7 = vld [vmem:[#allocation8 + $0x179c] sm:$0xf0]  ;;  %v12004_v30 = vor.u32 %v14074_v61, %v12003_v8  ;;  %v14037_v8 = vld [vmem:[#allocation8 + $0x16c4] sm:$0xf]  ;;  %v14042_v61 = vld [vmem:[#allocation8 + $0x16e4] sm:$0xf0] }
 0x32a   :  { %v11964_v0 = vor.u32 %v14065_v7, %v11963_v17  ;;  %v14041_v53 = vld [vmem:[#allocation8 + $0x16dc] sm:$0xf0]  ;;  %v11880_v17 = vor.u32 %v14038_v36, %v11877_v37  ;;  %v14029_v7 = vld [vmem:[#allocation8 + $0x1684] sm:$0xf] }
 0x32b   :  { %v14017_v32 = vld [vmem:[#allocation8 + $0x161c] sm:$0xf0] }
 0x32c   :  { %5612 = vmatpush.bf16.msrb.mxu1 %v11596_v45  ;;  %5625 = vmatpush.bf16.msrb.mxu2 %v11600_v60  ;;  %v14057_v45 = vld [vmem:[#allocation8 + $0x175c] sm:$0xf0]  ;;  %v11972_v60 = vor.u32 %v14066_v50, %v11971_v11  ;;  %v14034_v11 = vld [vmem:[#allocation8 + $0x16a4] sm:$0xf0]  ;;  %v14030_v50 = vld [vmem:[#allocation8 + $0x168c] sm:$0xf] }
 0x32d   :  { %5638 = vmatpush.bf16.msrb.mxu3 %v11604_v62  ;;  %5651 = vmatpush.bf16.msra.mxu0 %v11608_v56  ;;  %v11933_v62 = vld [vmem:[#allocation8 + $0x1760] sm:$0xf0]  ;;  %v11939_v56 = vld [vmem:[#allocation8 + $0x1748] sm:$0xf]  ;;  %v11932_v43 = vor.u32 %v14057_v45, %v11931_v29 }
 0x32e   :  { %v11936_v3 = vor.u32 %v14053_v42, %v11933_v62  ;;  %v14021_v62 = vld [vmem:[#allocation8 + $0x1644] sm:$0xf] }
 0x330   :  { %5613 = vmatpush.bf16.msrb.mxu1 %v11564_v14  ;;  %5626 = vmatpush.bf16.msrb.mxu2 %v11568_v34  ;;  %v11940_v14 = vor.u32 %v14058_v31, %v11939_v56  ;;  %v11944_v34 = vor.u32 %v14054_v24, %v11941_v54  ;;  %v11805_v56 = vld [vmem:[#allocation8 + $0x1660] sm:$0xf0]  ;;  %v11811_v31 = vld [vmem:[#allocation8 + $0x1648] sm:$0xf]  ;;  %v14022_v54 = vld [vmem:[#allocation8 + $0x164c] sm:$0xf] }
 0x331   :  { %5639 = vmatpush.bf16.msrb.mxu3 %v11572_v49  ;;  %5652 = vmatpush.bf16.msra.mxu0 %v11576_v1  ;;  %v14050_v49 = vld [vmem:[#allocation8 + $0x1724] sm:$0xf0]  ;;  %v14046_v1 = vld [vmem:[#allocation8 + $0x170c] sm:$0xf]  ;;  %v11808_v27 = vor.u32 %v14021_v62, %v11805_v56  ;;  %v14060_v62 = vld [vmem:[#allocation8 + $0x1774] sm:$0xf0] }
 0x332   :  { %v11908_v55 = vor.u32 %v14050_v49, %v11907_v48  ;;  %v11912_v5 = vor.u32 %v14046_v1, %v11909_v33  ;;  %v14026_v24 = vld [vmem:[#allocation8 + $0x1664] sm:$0xf0]  ;;  %v14014_v33 = vld [vmem:[#allocation8 + $0x160c] sm:$0xf]  ;;  %v14056_v56 = vld [vmem:[#allocation8 + $0x175c] sm:$0xf] }
 0x333   :  { %v11812_v22 = vor.u32 %v14026_v24, %v11811_v31  ;;  %v11779_v49 = vld [vmem:[#allocation8 + $0x1608] sm:$0xf]  ;;  %v11957_v31 = vld [vmem:[#allocation8 + $0x1778] sm:$0xf0] }
 0x334   :  { %5614 = vmatpush.bf16.msrb.mxu1 %v11532_v18  ;;  %5627 = vmatpush.bf16.msrb.mxu2 %v11536_v19  ;;  %v4615_v52 = vpop.f32.mrf.mxu1  ;;  %v11869_v18 = vld [vmem:[#allocation8 + $0x16e0] sm:$0xf0]  ;;  %v11875_v19 = vld [vmem:[#allocation8 + $0x16c8] sm:$0xf] }
 0x335   :  { %5640 = vmatpush.bf16.msrb.mxu3 %v11540_v47  ;;  %5653 = vmatpush.bf16.msra.mxu0 %v11544_v58  ;;  %v11872_v47 = vor.u32 %v14037_v8, %v11869_v18  ;;  %v11835_v58 = vld [vmem:[#allocation8 + $0x1680] sm:$0xf]  ;;  %v14018_v1 = vld [vmem:[#allocation8 + $0x1624] sm:$0xf0]  ;;  %v14076_v18 = vld [vmem:[#allocation8 + $0x17f4] sm:$0xf0] }
 0x336   :  { %v11780_v36 = vor.u32 %v14018_v1, %v11779_v49 }
 0x337   :  { %5615 = vmatmul.bf16.vlgmr.msrb.gmra.mxu1 %v14983_v25  ;;  %5628 = vmatmul.bf16.vlgmr.msrb.gmra.mxu2 %v14983_v25  ;;  %v4654_v44 = vpop.f32.mrf.mxu0 }
 0x338   :  { %6054 = vmatpush.bf16.msra.mxu1 %v11996_v12  ;;  %6067 = vmatpush.bf16.msra.mxu2 %v12000_v51  ;;  %v15009_v23 = vadd.f32 %v4654_v44, %v14974_v6  ;;  %v14033_v12 = vld [vmem:[#allocation8 + $0x169c] sm:$0xf0]  ;;  %v11876_v51 = vor.u32 %v14042_v61, %v11875_v19  ;;  %v11781_v44 = vld [vmem:[#allocation8 + $0x1628] sm:$0xf0]  ;;  %v14072_v19 = vld [vmem:[#allocation8 + $0x17dc] sm:$0xf] }
 0x339   :  { %6080 = vmatpush.bf16.msra.mxu3 %v12004_v30  ;;  %6093 = vmatpush.bf16.msrb.mxu0 %v12008_v9  ;;  %v11837_v30 = vld [vmem:[#allocation8 + $0x16a0] sm:$0xf0]  ;;  %v11843_v9 = vld [vmem:[#allocation8 + $0x1688] sm:$0xf]  ;;  %v11836_v29 = vor.u32 %v14033_v12, %v11835_v58  ;;  %v12021_v61 = vld [vmem:[#allocation8 + $0x17f8] sm:$0xf0]  ;;  %v11784_v37 = vor.u32 %v14014_v33, %v11781_v44 }
 0x33a   :  { %5641 = vmatmul.bf16.vlgmr.msrb.gmra.mxu3 %v14983_v25  ;;  %5654 = vmatmul.bf16.vlgmr.msra.gmra.mxu0 %v14983_v25  ;;  %v15006_v25 = vadd.f32 %v4615_v52, %v14971_v35  ;;  %v11868_v35 = vor.u32 %v14041_v53, %v11867_v59  ;;  %v4628_v6 = vpop.f32.mrf.mxu2  ;;  %v11840_v45 = vor.u32 %v14029_v7, %v11837_v30  ;;  %v14071_v59 = vld [vmem:[#allocation8 + $0x17d4] sm:$0xf]  ;;  %v11979_v58 = vld [vmem:[#allocation8 + $0x1790] sm:$0xf]  ;;  %v11987_v30 = vld [vmem:[#allocation8 + $0x1798] sm:$0xf] }
 0x33b   :  { %v15012_v15 = vadd.f32 %v4628_v6, %v14977_v13  ;;  %v11844_v42 = vor.u32 %v14034_v11, %v11843_v9  ;;  %v11848_v13 = vor.u32 %v14030_v50, %v11845_v26  ;;  %v12013_v53 = vld [vmem:[#allocation8 + $0x17f0] sm:$0xf0]  ;;  %v14067_v12 = vld [vmem:[#allocation8 + $0x17ac] sm:$0xf0]  ;;  %v14068_v9 = vld [vmem:[#allocation8 + $0x17b4] sm:$0xf0] }
 0x33c   :  { %6055 = vmatpush.bf16.msra.mxu1 %v11964_v0  ;;  %6068 = vmatpush.bf16.msra.mxu2 %v11968_v41  ;;  %v4617_v0 = vpop.f32.mrf.mxu1  ;;  %v14063_v6 = vld [vmem:[#allocation8 + $0x1794] sm:$0xf]  ;;  %v11989_v11 = vld [vmem:[#allocation8 + $0x17b8] sm:$0xf0]  ;;  %v15018_v50 = vrot.slane %v14945_v10, 3  ;;  %v11980_v26 = vor.u32 %v14067_v12, %v11979_v58 }
 0x33d   :  { %6081 = vmatpush.bf16.msra.mxu3 %v11972_v60  ;;  %6094 = vmatpush.bf16.msrb.mxu0 %v11976_v46  ;;  %v4641_v57 = vpop.f32.mrf.mxu3  ;;  %v11803_v60 = vld [vmem:[#allocation8 + $0x1640] sm:$0xf]  ;;  %v11981_v7 = vld [vmem:[#allocation8 + $0x17b0] sm:$0xf0]  ;;  %v11883_v44 = vld [vmem:[#allocation8 + $0x16d0] sm:$0xf] }
 0x33e   :  { %v15015_v20 = vadd.f32 %v4641_v57, %v14980_v2  ;;  %v14025_v46 = vld [vmem:[#allocation8 + $0x165c] sm:$0xf0]  ;;  %v14064_v57 = vld [vmem:[#allocation8 + $0x179c] sm:$0xf]  ;;  %v11984_v0 = vor.u32 %v14063_v6, %v11981_v7  ;;  %v14031_v12 = vld [vmem:[#allocation8 + $0x1694] sm:$0xf] }
 0x33f   :  { %v4656_v41 = vpop.f32.mrf.mxu0  ;;  %v11771_v2 = vld [vmem:[#allocation8 + $0x1600] sm:$0xf] }
 0x340   :  { %6056 = vmatpush.bf16.msra.mxu1 %v11932_v43  ;;  %6069 = vmatpush.bf16.msra.mxu2 %v11936_v3  ;;  %v11813_v43 = vld [vmem:[#allocation8 + $0x1668] sm:$0xf0]  ;;  %v11804_v3 = vor.u32 %v14025_v46, %v11803_v60  ;;  %v11947_v41 = vld [vmem:[#allocation8 + $0x1750] sm:$0xf]  ;;  %v11992_v60 = vor.u32 %v14064_v57, %v11989_v11  ;;  %v14055_v46 = vld [vmem:[#allocation8 + $0x1754] sm:$0xf] }
 0x341   :  { %6082 = vmatpush.bf16.msra.mxu3 %v11940_v14  ;;  %6095 = vmatpush.bf16.msrb.mxu0 %v11944_v34  ;;  %v14013_v14 = vld [vmem:[#allocation8 + $0x1604] sm:$0xf]  ;;  %v11816_v63 = vor.u32 %v14022_v54, %v11813_v43  ;;  %v11915_v54 = vld [vmem:[#allocation8 + $0x1710] sm:$0xf]  ;;  %v11861_v57 = vld [vmem:[#allocation8 + $0x16b8] sm:$0xf0] }
 0x342   :  { %v11773_v34 = vld [vmem:[#allocation8 + $0x1620] sm:$0xf0]  ;;  %v4630_v48 = vpop.f32.mrf.mxu2  ;;  %v14051_v43 = vld [vmem:[#allocation8 + $0x172c] sm:$0xf0] }
 0x343   :  { %v11776_v8 = vor.u32 %v14013_v14, %v11773_v34  ;;  %v11923_v14 = vld [vmem:[#allocation8 + $0x1718] sm:$0xf]  ;;  %v11916_v33 = vor.u32 %v14051_v43, %v11915_v54  ;;  %v14019_v43 = vld [vmem:[#allocation8 + $0x162c] sm:$0xf0] }
 0x344   :  { %6057 = vmatpush.bf16.msra.mxu1 %v11900_v21  ;;  %6070 = vmatpush.bf16.msra.mxu2 %v11904_v28  ;;  %v12011_v21 = vld [vmem:[#allocation8 + $0x17d0] sm:$0xf]  ;;  %v14052_v34 = vld [vmem:[#allocation8 + $0x1734] sm:$0xf0] }
 0x345   :  { %6083 = vmatpush.bf16.msra.mxu3 %v11908_v55  ;;  %6096 = vmatpush.bf16.msrb.mxu0 %v11912_v5  ;;  %v4643_v52 = vpop.f32.mrf.mxu3  ;;  %v14075_v28 = vld [vmem:[#allocation8 + $0x17ec] sm:$0xf0]  ;;  %v12019_v55 = vld [vmem:[#allocation8 + $0x17d8] sm:$0xf]  ;;  %v11772_v5 = vor.u32 %v14017_v32, %v11771_v2  ;;  %v11917_v32 = vld [vmem:[#allocation8 + $0x1730] sm:$0xf0] }
 0x348   :  { %6058 = vmatpush.bf16.msra.mxu1 %v11868_v35  ;;  %6071 = vmatpush.bf16.msra.mxu2 %v11872_v47  ;;  %v12012_v35 = vor.u32 %v14075_v28, %v12011_v21  ;;  %v12016_v47 = vor.u32 %v14071_v59, %v12013_v53  ;;  %v14043_v21 = vld [vmem:[#allocation8 + $0x16ec] sm:$0xf0]  ;;  %v11924_v59 = vor.u32 %v14052_v34, %v11923_v14  ;;  %v11795_v34 = vld [vmem:[#allocation8 + $0x1618] sm:$0xf] }
 0x349   :  { %6084 = vmatpush.bf16.msra.mxu3 %v11876_v51  ;;  %6097 = vmatpush.bf16.msrb.mxu0 %v11880_v17  ;;  %v12020_v51 = vor.u32 %v14076_v18, %v12019_v55  ;;  %v12024_v17 = vor.u32 %v14072_v19, %v12021_v61  ;;  %v14039_v55 = vld [vmem:[#allocation8 + $0x16d4] sm:$0xf]  ;;  %v14044_v18 = vld [vmem:[#allocation8 + $0x16f4] sm:$0xf0]  ;;  %v14040_v19 = vld [vmem:[#allocation8 + $0x16dc] sm:$0xf] }
 0x34a   :  { %v11893_v61 = vld [vmem:[#allocation8 + $0x16f8] sm:$0xf0] }
 0x34b   :  { %v11896_v58 = vor.u32 %v14040_v19, %v11893_v61 }
 0x34c   :  { %6059 = vmatpush.bf16.msra.mxu1 %v11836_v29  ;;  %6072 = vmatpush.bf16.msra.mxu2 %v11840_v45  ;;  %v14059_v29 = vld [vmem:[#allocation8 + $0x176c] sm:$0xf0]  ;;  %v11988_v45 = vor.u32 %v14068_v9, %v11987_v30  ;;  %v14036_v30 = vld [vmem:[#allocation8 + $0x16b4] sm:$0xf0]  ;;  %v14032_v9 = vld [vmem:[#allocation8 + $0x169c] sm:$0xf] }
 0x34d   :  { %6085 = vmatpush.bf16.msra.mxu3 %v11844_v42  ;;  %6098 = vmatpush.bf16.msrb.mxu0 %v11848_v13  ;;  %v11949_v42 = vld [vmem:[#allocation8 + $0x1770] sm:$0xf0]  ;;  %v11955_v13 = vld [vmem:[#allocation8 + $0x1758] sm:$0xf]  ;;  %v11948_v10 = vor.u32 %v14059_v29, %v11947_v41 }
 0x34e   :  { %v11952_v24 = vor.u32 %v14055_v46, %v11949_v42  ;;  %v11956_v2 = vor.u32 %v14060_v62, %v11955_v13  ;;  %v14023_v42 = vld [vmem:[#allocation8 + $0x1654] sm:$0xf]  ;;  %v11827_v62 = vld [vmem:[#allocation8 + $0x1658] sm:$0xf] }
 0x34f   :  { %v11821_v13 = vld [vmem:[#allocation8 + $0x1670] sm:$0xf0] }
 0x350   :  { %6060 = vmatpush.bf16.msra.mxu1 %v11804_v3  ;;  %6073 = vmatpush.bf16.msra.mxu2 %v11808_v27  ;;  %v11960_v3 = vor.u32 %v14056_v56, %v11957_v31  ;;  %v14047_v27 = vld [vmem:[#allocation8 + $0x1714] sm:$0xf]  ;;  %v14028_v56 = vld [vmem:[#allocation8 + $0x1674] sm:$0xf0]  ;;  %v14024_v31 = vld [vmem:[#allocation8 + $0x165c] sm:$0xf]  ;;  %v11824_v54 = vor.u32 %v14023_v42, %v11821_v13 }
 0x351   :  { %6086 = vmatpush.bf16.msra.mxu3 %v11812_v22  ;;  %6099 = vmatpush.bf16.msrb.mxu0 %v11816_v63  ;;  %v14048_v22 = vld [vmem:[#allocation8 + $0x171c] sm:$0xf]  ;;  %v11920_v52 = vor.u32 %v14047_v27, %v11917_v32  ;;  %v11828_v27 = vor.u32 %v14028_v56, %v11827_v62  ;;  %v14118_v42 = vld [vmem:[#allocation8 + $0x194c] sm:$0xf] }
 0x352   :  { %v11925_v63 = vld [vmem:[#allocation8 + $0x1738] sm:$0xf0]  ;;  %v12197_v13 = vld [vmem:[#allocation8 + $0x1968] sm:$0xf0] }
 0x353   :  { %v11928_v53 = vor.u32 %v14048_v22, %v11925_v63  ;;  %v14020_v22 = vld [vmem:[#allocation8 + $0x1634] sm:$0xf0]  ;;  %v14016_v63 = vld [vmem:[#allocation8 + $0x161c] sm:$0xf] }
 0x354   :  { %6061 = vmatpush.bf16.msra.mxu1 %v11772_v5  ;;  %6074 = vmatpush.bf16.msra.mxu2 %v11776_v8  ;;  %v5065_v48 = vpop.f32.mrf.mxu1  ;;  %v11885_v5 = vld [vmem:[#allocation8 + $0x16f0] sm:$0xf0]  ;;  %v11891_v8 = vld [vmem:[#allocation8 + $0x16d8] sm:$0xf]  ;;  %v11796_v19 = vor.u32 %v14020_v22, %v11795_v34 }
 0x355   :  { %6087 = vmatpush.bf16.msra.mxu3 %v11780_v36  ;;  %6100 = vmatpush.bf16.msrb.mxu0 %v11784_v37  ;;  %v15025_v49 = vadd.f32 %v5065_v48, %v14990_v38  ;;  %v11884_v38 = vor.u32 %v14043_v21, %v11883_v44  ;;  %v11888_v36 = vor.u32 %v14039_v55, %v11885_v5  ;;  %v11851_v37 = vld [vmem:[#allocation8 + $0x1690] sm:$0xf]  ;;  %v14133_v44 = vld [vmem:[#allocation8 + $0x19c4] sm:$0xf]  ;;  %v14138_v5 = vld [vmem:[#allocation8 + $0x19e4] sm:$0xf0] }
 0x356   :  { %v12253_v21 = vld [vmem:[#allocation8 + $0x19e0] sm:$0xf0] }
 0x357   :  { %6062 = vmatmul.bf16.vlgmr.msra.gmra.mxu1 %v15018_v50  ;;  %6075 = vmatmul.bf16.vlgmr.msra.gmra.mxu2 %v15018_v50  ;;  %v5104_v1 = vpop.f32.mrf.mxu0 }
 0x358   :  { %6106 = vmatpush.bf16.msrb.mxu1 %v12012_v35  ;;  %6119 = vmatpush.bf16.msrb.mxu2 %v12016_v47  ;;  %v15028_v28 = vadd.f32 %v5104_v1, %v14993_v4  ;;  %v14035_v35 = vld [vmem:[#allocation8 + $0x16ac] sm:$0xf0]  ;;  %v11892_v47 = vor.u32 %v14044_v18, %v11891_v8  ;;  %v11797_v1 = vld [vmem:[#allocation8 + $0x1638] sm:$0xf0]  ;;  %v14134_v8 = vld [vmem:[#allocation8 + $0x19cc] sm:$0xf] }
 0x359   :  { %6132 = vmatpush.bf16.msrb.mxu3 %v12020_v51  ;;  %6145 = vmatpush.bf16.msra.mxu0 %v12024_v17  ;;  %v11853_v51 = vld [vmem:[#allocation8 + $0x16b0] sm:$0xf0]  ;;  %v11859_v17 = vld [vmem:[#allocation8 + $0x1698] sm:$0xf]  ;;  %v11852_v41 = vor.u32 %v14035_v35, %v11851_v37  ;;  %v12261_v18 = vld [vmem:[#allocation8 + $0x19e8] sm:$0xf0]  ;;  %v11800_v61 = vor.u32 %v14016_v63, %v11797_v1 }
 0x35a   :  { %6088 = vmatmul.bf16.vlgmr.msra.gmra.mxu3 %v15018_v50  ;;  %6101 = vmatmul.bf16.vlgmr.msrb.gmra.mxu0 %v15018_v50  ;;  %v5078_v4 = vpop.f32.mrf.mxu2  ;;  %v11856_v29 = vor.u32 %v14031_v12, %v11853_v51  ;;  %v11860_v46 = vor.u32 %v14036_v30, %v11859_v17  ;;  %v12219_v37 = vld [vmem:[#allocation8 + $0x1980] sm:$0xf]  ;;  %v12221_v12 = vld [vmem:[#allocation8 + $0x19a0] sm:$0xf0]  ;;  %v12227_v51 = vld [vmem:[#allocation8 + $0x1988] sm:$0xf] }
 0x35b   :  { %v15031_v6 = vadd.f32 %v5078_v4, %v14996_v16  ;;  %v11864_v16 = vor.u32 %v14032_v9, %v11861_v57  ;;  %v14129_v35 = vld [vmem:[#allocation8 + $0x199c] sm:$0xf0]  ;;  %v14125_v4 = vld [vmem:[#allocation8 + $0x1984] sm:$0xf]  ;;  %v14130_v17 = vld [vmem:[#allocation8 + $0x19a4] sm:$0xf0] }
 0x35c   :  { %6107 = vmatpush.bf16.msrb.mxu1 %v11980_v26  ;;  %6120 = vmatpush.bf16.msrb.mxu2 %v11984_v0  ;;  %v5067_v26 = vpop.f32.mrf.mxu1  ;;  %v12229_v30 = vld [vmem:[#allocation8 + $0x19a8] sm:$0xf0]  ;;  %v12220_v9 = vor.u32 %v14129_v35, %v12219_v37  ;;  %v12224_v57 = vor.u32 %v14125_v4, %v12221_v12  ;;  %v14105_v1 = vld [vmem:[#allocation8 + $0x18dc] sm:$0xf0]  ;;  %v14093_v37 = vld [vmem:[#allocation8 + $0x1884] sm:$0xf] }
 0x35d   :  { %6133 = vmatpush.bf16.msrb.mxu3 %v11988_v45  ;;  %6146 = vmatpush.bf16.msra.mxu0 %v11992_v60  ;;  %v5091_v7 = vpop.f32.mrf.mxu3  ;;  %v11819_v45 = vld [vmem:[#allocation8 + $0x1650] sm:$0xf]  ;;  %v12187_v26 = vld [vmem:[#allocation8 + $0x1940] sm:$0xf]  ;;  %v12093_v35 = vld [vmem:[#allocation8 + $0x18a0] sm:$0xf0] }
 0x35e   :  { %v15034_v11 = vadd.f32 %v5091_v7, %v14999_v39  ;;  %v14027_v60 = vld [vmem:[#allocation8 + $0x166c] sm:$0xf0]  ;;  %v14126_v7 = vld [vmem:[#allocation8 + $0x198c] sm:$0xf]  ;;  %v14098_v12 = vld [vmem:[#allocation8 + $0x18a4] sm:$0xf0] }
 0x35f   :  { %v5106_v0 = vpop.f32.mrf.mxu0  ;;  %v11787_v39 = vld [vmem:[#allocation8 + $0x1610] sm:$0xf] }
 0x360   :  { %6108 = vmatpush.bf16.msrb.mxu1 %v11948_v10  ;;  %6121 = vmatpush.bf16.msrb.mxu2 %v11952_v24  ;;  %v11829_v10 = vld [vmem:[#allocation8 + $0x1678] sm:$0xf0]  ;;  %v11820_v24 = vor.u32 %v14027_v60, %v11819_v45  ;;  %v14121_v0 = vld [vmem:[#allocation8 + $0x195c] sm:$0xf0]  ;;  %v14117_v45 = vld [vmem:[#allocation8 + $0x1944] sm:$0xf] }
 0x361   :  { %6134 = vmatpush.bf16.msrb.mxu3 %v11956_v2  ;;  %6147 = vmatpush.bf16.msra.mxu0 %v11960_v3  ;;  %v14015_v2 = vld [vmem:[#allocation8 + $0x1614] sm:$0xf]  ;;  %v11832_v32 = vor.u32 %v14024_v31, %v11829_v10  ;;  %v12189_v60 = vld [vmem:[#allocation8 + $0x1960] sm:$0xf0]  ;;  %v12188_v62 = vor.u32 %v14121_v0, %v12187_v26  ;;  %v12155_v31 = vld [vmem:[#allocation8 + $0x1900] sm:$0xf]  ;;  %v12096_v26 = vor.u32 %v14093_v37, %v12093_v35 }
 0x362   :  { %v11789_v3 = vld [vmem:[#allocation8 + $0x1630] sm:$0xf0]  ;;  %v5080_v14 = vpop.f32.mrf.mxu2  ;;  %v12192_v56 = vor.u32 %v14117_v45, %v12189_v60  ;;  %v14113_v10 = vld [vmem:[#allocation8 + $0x191c] sm:$0xf0]  ;;  %v14085_v45 = vld [vmem:[#allocation8 + $0x1844] sm:$0xf] }
 0x363   :  { %v11792_v55 = vor.u32 %v14015_v2, %v11789_v3  ;;  %v12163_v2 = vld [vmem:[#allocation8 + $0x1908] sm:$0xf]  ;;  %v12156_v22 = vor.u32 %v14113_v10, %v12155_v31  ;;  %v12059_v0 = vld [vmem:[#allocation8 + $0x1840] sm:$0xf]  ;;  %v12061_v60 = vld [vmem:[#allocation8 + $0x1860] sm:$0xf0] }
 0x364   :  { %6109 = vmatpush.bf16.msrb.mxu1 %v11916_v33  ;;  %6122 = vmatpush.bf16.msrb.mxu2 %v11920_v52  ;;  %v12251_v33 = vld [vmem:[#allocation8 + $0x19c0] sm:$0xf]  ;;  %v14114_v3 = vld [vmem:[#allocation8 + $0x1924] sm:$0xf0]  ;;  %v14077_v10 = vld [vmem:[#allocation8 + $0x1804] sm:$0xf] }
 0x365   :  { %6135 = vmatpush.bf16.msrb.mxu3 %v11924_v59  ;;  %6148 = vmatpush.bf16.msra.mxu0 %v11928_v53  ;;  %v5093_v48 = vpop.f32.mrf.mxu3  ;;  %v14137_v52 = vld [vmem:[#allocation8 + $0x19dc] sm:$0xf0]  ;;  %v12259_v59 = vld [vmem:[#allocation8 + $0x19c8] sm:$0xf]  ;;  %v11788_v53 = vor.u32 %v14019_v43, %v11787_v39  ;;  %v12157_v43 = vld [vmem:[#allocation8 + $0x1920] sm:$0xf0] }
 0x366   :  { %v12123_v48 = vld [vmem:[#allocation8 + $0x18c0] sm:$0xf]  ;;  %v14127_v37 = vld [vmem:[#allocation8 + $0x1994] sm:$0xf] }
 0x367   :  { %v14081_v31 = vld [vmem:[#allocation8 + $0x181c] sm:$0xf0]  ;;  %v12237_v35 = vld [vmem:[#allocation8 + $0x19b0] sm:$0xf0] }
 0x368   :  { %6110 = vmatpush.bf16.msrb.mxu1 %v11884_v38  ;;  %6123 = vmatpush.bf16.msrb.mxu2 %v11888_v36  ;;  %v12252_v38 = vor.u32 %v14137_v52, %v12251_v33  ;;  %v12256_v36 = vor.u32 %v14133_v44, %v12253_v21  ;;  %v12164_v52 = vor.u32 %v14114_v3, %v12163_v2  ;;  %v14101_v21 = vld [vmem:[#allocation8 + $0x18c4] sm:$0xf]  ;;  %v12035_v2 = vld [vmem:[#allocation8 + $0x1808] sm:$0xf] }
 0x369   :  { %6136 = vmatpush.bf16.msrb.mxu3 %v11892_v47  ;;  %6149 = vmatpush.bf16.msra.mxu0 %v11896_v58  ;;  %v12260_v47 = vor.u32 %v14138_v5, %v12259_v59  ;;  %v12264_v58 = vor.u32 %v14134_v8, %v12261_v18  ;;  %v12125_v59 = vld [vmem:[#allocation8 + $0x18e0] sm:$0xf0]  ;;  %v14102_v5 = vld [vmem:[#allocation8 + $0x18cc] sm:$0xf]  ;;  %v14082_v3 = vld [vmem:[#allocation8 + $0x1824] sm:$0xf0] }
 0x36a   :  { %v12133_v8 = vld [vmem:[#allocation8 + $0x18e8] sm:$0xf0]  ;;  %v12128_v18 = vor.u32 %v14101_v21, %v12125_v59 }
 0x36c   :  { %6111 = vmatpush.bf16.msrb.mxu1 %v11852_v41  ;;  %6124 = vmatpush.bf16.msrb.mxu2 %v11856_v29  ;;  %v12228_v41 = vor.u32 %v14130_v17, %v12227_v51  ;;  %v12232_v29 = vor.u32 %v14126_v7, %v12229_v30  ;;  %v14094_v51 = vld [vmem:[#allocation8 + $0x188c] sm:$0xf] }
 0x36d   :  { %6137 = vmatpush.bf16.msrb.mxu3 %v11860_v46  ;;  %6150 = vmatpush.bf16.msra.mxu0 %v11864_v16  ;;  %v12195_v46 = vld [vmem:[#allocation8 + $0x1948] sm:$0xf]  ;;  %v12101_v17 = vld [vmem:[#allocation8 + $0x18a8] sm:$0xf0] }
 0x36e   :  { %v14122_v16 = vld [vmem:[#allocation8 + $0x1964] sm:$0xf0] }
 0x36f   :  { %v12196_v39 = vor.u32 %v14122_v16, %v12195_v46  ;;  %v12067_v46 = vld [vmem:[#allocation8 + $0x1848] sm:$0xf] }
 0x370   :  { %6112 = vmatpush.bf16.msrb.mxu1 %v11820_v24  ;;  %6125 = vmatpush.bf16.msrb.mxu2 %v11824_v54  ;;  %v12200_v24 = vor.u32 %v14118_v42, %v12197_v13  ;;  %v14109_v54 = vld [vmem:[#allocation8 + $0x1904] sm:$0xf]  ;;  %v14090_v16 = vld [vmem:[#allocation8 + $0x1864] sm:$0xf0]  ;;  %v14086_v42 = vld [vmem:[#allocation8 + $0x184c] sm:$0xf] }
 0x371   :  { %6138 = vmatpush.bf16.msrb.mxu3 %v11828_v27  ;;  %6151 = vmatpush.bf16.msra.mxu0 %v11832_v32  ;;  %v14110_v27 = vld [vmem:[#allocation8 + $0x190c] sm:$0xf]  ;;  %v12160_v63 = vor.u32 %v14109_v54, %v12157_v43 }
 0x372   :  { %v12165_v32 = vld [vmem:[#allocation8 + $0x1928] sm:$0xf0] }
 0x373   :  { %v12168_v44 = vor.u32 %v14110_v27, %v12165_v32  ;;  %v12069_v13 = vld [vmem:[#allocation8 + $0x1868] sm:$0xf0]  ;;  %v14412_v32 = vld [vmem:[#allocation6] ss:$0 sm:$0xff] }
 0x374   :  { %6113 = vmatpush.bf16.msrb.mxu1 %v11788_v53  ;;  %6126 = vmatpush.bf16.msrb.mxu2 %v11792_v55  ;;  %v5117_v14 = vpop.f32.mrf.mxu1  ;;  %v12131_v53 = vld [vmem:[#allocation8 + $0x18c8] sm:$0xf]  ;;  %v12072_v54 = vor.u32 %v14086_v42, %v12069_v13  ;;  %v14078_v27 = vld [vmem:[#allocation8 + $0x180c] sm:$0xf] }
 0x375   :  { %6139 = vmatpush.bf16.msrb.mxu3 %v11796_v19  ;;  %6152 = vmatpush.bf16.msra.mxu0 %v11800_v61  ;;  %v14106_v55 = vld [vmem:[#allocation8 + $0x18e4] sm:$0xf0]  ;;  %v12091_v19 = vld [vmem:[#allocation8 + $0x1880] sm:$0xf] }
 0x376   :  { %v14097_v61 = vld [vmem:[#allocation8 + $0x189c] sm:$0xf0] }
 0x377   :  { %6114 = vmatmul.bf16.vlgmr.msrb.gmra.mxu1 %v15018_v50  ;;  %6127 = vmatmul.bf16.vlgmr.msrb.gmra.mxu2 %v15018_v50  ;;  %v5156_v34 = vpop.f32.mrf.mxu0 }
 0x378   :  { %6551 = vmatpush.bf16.msra.mxu1 %v12252_v38  ;;  %6564 = vmatpush.bf16.msra.mxu2 %v12256_v36  ;;  %v15044_v33 = vadd.f32 %v5156_v34, %v15009_v23  ;;  %v12132_v38 = vor.u32 %v14106_v55, %v12131_v53  ;;  %v12136_v36 = vor.u32 %v14102_v5, %v12133_v8  ;;  %v14140_v53 = vld [vmem:[#allocation8 + $0x19f4] sm:$0xf0]  ;;  %v14136_v55 = vld [vmem:[#allocation8 + $0x19dc] sm:$0xf] }
 0x379   :  { %6577 = vmatpush.bf16.msra.mxu3 %v12260_v47  ;;  %6590 = vmatpush.bf16.msrb.mxu0 %v12264_v58  ;;  %v12099_v47 = vld [vmem:[#allocation8 + $0x1888] sm:$0xf]  ;;  %v12277_v5 = vld [vmem:[#allocation8 + $0x19f8] sm:$0xf0]  ;;  %v12036_v8 = vor.u32 %v14082_v3, %v12035_v2 }
 0x37a   :  { %6140 = vmatmul.bf16.vlgmr.msrb.gmra.mxu3 %v15018_v50  ;;  %6153 = vmatmul.bf16.vlgmr.msra.gmra.mxu0 %v15018_v50  ;;  %v15041_v50 = vadd.f32 %v5117_v14, %v15006_v25  ;;  %v12124_v25 = vor.u32 %v14105_v1, %v12123_v48  ;;  %v5130_v23 = vpop.f32.mrf.mxu2  ;;  %v182_v14 = vadd.f32 %v14412_v32, %v14709_v40  ;;  %v14139_v48 = vld [vmem:[#allocation8 + $0x19ec] sm:$0xf0]  ;;  %v14135_v1 = vld [vmem:[#allocation8 + $0x19d4] sm:$0xf]  ;;  %v12181_v2 = vld [vmem:[#allocation8 + $0x1938] sm:$0xf0] }
 0x37b   :  { %v15047_v58 = vadd.f32 %v5130_v23, %v15012_v15  ;;  %v12104_v15 = vor.u32 %v14094_v51, %v12101_v17  ;;  %v12280_v23 = vor.u32 %v14136_v55, %v12277_v5  ;;  %v12245_v51 = vld [vmem:[#allocation8 + $0x19b8] sm:$0xf0] }
 0x37c   :  { %6552 = vmatpush.bf16.msra.mxu1 %v12220_v9  ;;  %6565 = vmatpush.bf16.msra.mxu2 %v12224_v57  ;;  %v5119_v30 = vpop.f32.mrf.mxu1  ;;  %v12092_v57 = vor.u32 %v14097_v61, %v12091_v19  ;;  %v12235_v61 = vld [vmem:[#allocation8 + $0x1990] sm:$0xf]  ;;  %v14104_v55 = vld [vmem:[#allocation8 + $0x18dc] sm:$0xf] }
 0x37d   :  { %6578 = vmatpush.bf16.msra.mxu3 %v12228_v41  ;;  %6591 = vmatpush.bf16.msrb.mxu0 %v12232_v29  ;;  %v5143_v4 = vpop.f32.mrf.mxu3  ;;  %v14089_v41 = vld [vmem:[#allocation8 + $0x185c] sm:$0xf0]  ;;  %v12100_v29 = vor.u32 %v14098_v12, %v12099_v47  ;;  %v12243_v47 = vld [vmem:[#allocation8 + $0x1998] sm:$0xf]  ;;  %v14128_v12 = vld [vmem:[#allocation8 + $0x199c] sm:$0xf] }
 0x37e   :  { %v15050_v7 = vadd.f32 %v5143_v4, %v15015_v20  ;;  %v12027_v20 = vld [vmem:[#allocation8 + $0x1800] sm:$0xf]  ;;  %v14132_v4 = vld [vmem:[#allocation8 + $0x19b4] sm:$0xf0]  ;;  %v12149_v5 = vld [vmem:[#allocation8 + $0x18f8] sm:$0xf0] }
 0x37f   :  { %v5158_v9 = vpop.f32.mrf.mxu0  ;;  %v12028_v21 = vor.u32 %v14081_v31, %v12027_v20  ;;  %v12171_v20 = vld [vmem:[#allocation8 + $0x1910] sm:$0xf] }
 0x380   :  { %6553 = vmatpush.bf16.msra.mxu1 %v12188_v62  ;;  %6566 = vmatpush.bf16.msra.mxu2 %v12192_v56  ;;  %v12060_v62 = vor.u32 %v14089_v41, %v12059_v0  ;;  %v12064_v56 = vor.u32 %v14085_v45, %v12061_v60  ;;  %v12240_v9 = vor.u32 %v14127_v37, %v12237_v35  ;;  %v12211_v45 = vld [vmem:[#allocation8 + $0x1958] sm:$0xf] }
 0x381   :  { %6579 = vmatpush.bf16.msra.mxu3 %v12196_v39  ;;  %6592 = vmatpush.bf16.msrb.mxu0 %v12200_v24  ;;  %v12029_v39 = vld [vmem:[#allocation8 + $0x1820] sm:$0xf0]  ;;  %v12068_v24 = vor.u32 %v14090_v16, %v12067_v46  ;;  %v12244_v0 = vor.u32 %v14132_v4, %v12243_v47  ;;  %v12248_v41 = vor.u32 %v14128_v12, %v12245_v51  ;;  %v14124_v60 = vld [vmem:[#allocation8 + $0x1974] sm:$0xf0]  ;;  %v14120_v46 = vld [vmem:[#allocation8 + $0x195c] sm:$0xf] }
 0x382   :  { %v5132_v43 = vpop.f32.mrf.mxu2  ;;  %v12032_v59 = vor.u32 %v14077_v10, %v12029_v39  ;;  %v12213_v16 = vld [vmem:[#allocation8 + $0x1978] sm:$0xf0]  ;;  %v14111_v10 = vld [vmem:[#allocation8 + $0x1914] sm:$0xf]  ;;  %v14100_v35 = vld [vmem:[#allocation8 + $0x18b4] sm:$0xf0] }
 0x383   :  { %v12216_v31 = vor.u32 %v14120_v46, %v12213_v16  ;;  %v12173_v39 = vld [vmem:[#allocation8 + $0x1930] sm:$0xf0]  ;;  %v14112_v43 = vld [vmem:[#allocation8 + $0x191c] sm:$0xf] }
 0x384   :  { %6554 = vmatpush.bf16.msra.mxu1 %v12156_v22  ;;  %6567 = vmatpush.bf16.msra.mxu2 %v12160_v63  ;;  %v12037_v22 = vld [vmem:[#allocation8 + $0x1828] sm:$0xf0]  ;;  %v12267_v63 = vld [vmem:[#allocation8 + $0x19d0] sm:$0xf]  ;;  %v14096_v47 = vld [vmem:[#allocation8 + $0x189c] sm:$0xf] }
 0x385   :  { %6580 = vmatpush.bf16.msra.mxu3 %v12164_v52  ;;  %6593 = vmatpush.bf16.msrb.mxu0 %v12168_v44  ;;  %v5145_v34 = vpop.f32.mrf.mxu3  ;;  %v12269_v52 = vld [vmem:[#allocation8 + $0x19f0] sm:$0xf0]  ;;  %v12275_v44 = vld [vmem:[#allocation8 + $0x19d8] sm:$0xf]  ;;  %v12268_v40 = vor.u32 %v14139_v48, %v12267_v63  ;;  %v14107_v63 = vld [vmem:[#allocation8 + $0x18ec] sm:$0xf0] }
 0x386   :  { %v12272_v19 = vor.u32 %v14135_v1, %v12269_v52  ;;  %v12176_v34 = vor.u32 %v14111_v10, %v12173_v39  ;;  %v12184_v52 = vor.u32 %v14112_v43, %v12181_v2  ;;  %v12117_v4 = vld [vmem:[#allocation8 + $0x18b8] sm:$0xf0] }
 0x387   :  { %v14088_v46 = vld [vmem:[#allocation8 + $0x185c] sm:$0xf] }
 0x388   :  { %6555 = vmatpush.bf16.msra.mxu1 %v12124_v25  ;;  %6568 = vmatpush.bf16.msra.mxu2 %v12128_v18  ;;  %v12040_v25 = vor.u32 %v14078_v27, %v12037_v22  ;;  %v187_v18 = vmax.f32 %v182_v14, 0.0  ;;  %v12139_v22 = vld [vmem:[#allocation8 + $0x18d0] sm:$0xf]  ;;  %v12085_v16 = vld [vmem:[#allocation8 + $0x1878] sm:$0xf0] }
 0x389   :  { %6581 = vmatpush.bf16.msra.mxu3 %v12132_v38  ;;  %6594 = vmatpush.bf16.msrb.mxu0 %v12136_v36  ;;  %v14131_v38 = vld [vmem:[#allocation8 + $0x19ac] sm:$0xf0]  ;;  %v12276_v36 = vor.u32 %v14140_v53, %v12275_v44  ;;  %v14103_v44 = vld [vmem:[#allocation8 + $0x18d4] sm:$0xf]  ;;  %v14108_v53 = vld [vmem:[#allocation8 + $0x18f4] sm:$0xf0]  ;;  %v12088_v10 = vor.u32 %v14088_v46, %v12085_v16 }
 0x38a   :  { %v15053_v17 = vpack.c.bf16 %v187_v18, %v187_v18  ;;  %v12236_v30 = vor.u32 %v14131_v38, %v12235_v61  ;;  %v14099_v18 = vld [vmem:[#allocation8 + $0x18ac] sm:$0xf0]  ;;  %v14095_v61 = vld [vmem:[#allocation8 + $0x1894] sm:$0xf]  ;;  %v14080_v43 = vld [vmem:[#allocation8 + $0x181c] sm:$0xf] }
 0x38b   :  { %v12109_v38 = vld [vmem:[#allocation8 + $0x18b0] sm:$0xf0]  ;;  %v14177_v46 = vld [vmem:[#allocation8 + $0x1b1c] sm:$0xf0] }
 0x38c   :  { %6556 = vmatpush.bf16.msra.mxu1 %v12092_v57  ;;  %6569 = vmatpush.bf16.msra.mxu2 %v12096_v26  ;;  %v12203_v57 = vld [vmem:[#allocation8 + $0x1950] sm:$0xf] }
 0x38d   :  { %6582 = vmatpush.bf16.msra.mxu3 %v12100_v29  ;;  %6595 = vmatpush.bf16.msrb.mxu0 %v12104_v15  ;;  %v14123_v26 = vld [vmem:[#allocation8 + $0x196c] sm:$0xf0]  ;;  %v14119_v29 = vld [vmem:[#allocation8 + $0x1954] sm:$0xf] }
 0x38e   :  { %v12205_v15 = vld [vmem:[#allocation8 + $0x1970] sm:$0xf0]  ;;  %v12204_v42 = vor.u32 %v14123_v26, %v12203_v57  ;;  %v12112_v57 = vor.u32 %v14095_v61, %v12109_v38  ;;  %v12075_v26 = vld [vmem:[#allocation8 + $0x1850] sm:$0xf]  ;;  %v12483_v61 = vld [vmem:[#allocation8 + $0x1b88] sm:$0xf] }
 0x38f   :  { %v12208_v13 = vor.u32 %v14119_v29, %v12205_v15  ;;  %v14087_v29 = vld [vmem:[#allocation8 + $0x1854] sm:$0xf]  ;;  %v14194_v38 = vld [vmem:[#allocation8 + $0x1ba4] sm:$0xf0] }
 0x390   :  { %6557 = vmatpush.bf16.msra.mxu1 %v12060_v62  ;;  %6570 = vmatpush.bf16.msra.mxu2 %v12064_v56  ;;  %v14115_v62 = vld [vmem:[#allocation8 + $0x192c] sm:$0xf0]  ;;  %v12212_v56 = vor.u32 %v14124_v60, %v12211_v45  ;;  %v12077_v15 = vld [vmem:[#allocation8 + $0x1870] sm:$0xf0]  ;;  %v12083_v45 = vld [vmem:[#allocation8 + $0x1858] sm:$0xf] }
 0x391   :  { %6583 = vmatpush.bf16.msra.mxu3 %v12068_v24  ;;  %6596 = vmatpush.bf16.msrb.mxu0 %v12072_v54  ;;  %v12179_v24 = vld [vmem:[#allocation8 + $0x1918] sm:$0xf]  ;;  %v12172_v14 = vor.u32 %v14115_v62, %v12171_v20  ;;  %v14083_v20 = vld [vmem:[#allocation8 + $0x182c] sm:$0xf0]  ;;  %v14079_v62 = vld [vmem:[#allocation8 + $0x1814] sm:$0xf] }
 0x392   :  { %v14116_v54 = vld [vmem:[#allocation8 + $0x1934] sm:$0xf0] }
 0x393   :  { %v12180_v1 = vor.u32 %v14116_v54, %v12179_v24  ;;  %v14092_v60 = vld [vmem:[#allocation8 + $0x1874] sm:$0xf0] }
 0x394   :  { %6558 = vmatpush.bf16.msra.mxu1 %v12028_v21  ;;  %6571 = vmatpush.bf16.msra.mxu2 %v12032_v59  ;;  %v5564_v3 = vpop.f32.mrf.mxu1  ;;  %v12141_v21 = vld [vmem:[#allocation8 + $0x18f0] sm:$0xf0]  ;;  %v12147_v59 = vld [vmem:[#allocation8 + $0x18d8] sm:$0xf] }
 0x395   :  { %6584 = vmatpush.bf16.msra.mxu3 %v12036_v8  ;;  %6597 = vmatpush.bf16.msrb.mxu0 %v12040_v25  ;;  %v15060_v27 = vadd.f32 %v5564_v3, %v15025_v49  ;;  %v12140_v49 = vor.u32 %v14107_v63, %v12139_v22  ;;  %v12144_v8 = vor.u32 %v14103_v44, %v12141_v21  ;;  %v12107_v25 = vld [vmem:[#allocation8 + $0x1890] sm:$0xf]  ;;  %v12051_v24 = vld [vmem:[#allocation8 + $0x1818] sm:$0xf]  ;;  %v12053_v3 = vld [vmem:[#allocation8 + $0x1838] sm:$0xf0] }
 0x396   :  { %v14084_v54 = vld [vmem:[#allocation8 + $0x1834] sm:$0xf0]  ;;  %v12509_v22 = vld [vmem:[#allocation8 + $0x1be0] sm:$0xf0]  ;;  %v12515_v63 = vld [vmem:[#allocation8 + $0x1bc8] sm:$0xf] }
 0x397   :  { %6559 = vmatmul.bf16.vlgmr.msra.gmra.mxu1 %v15053_v17  ;;  %6572 = vmatmul.bf16.vlgmr.msra.gmra.mxu2 %v15053_v17  ;;  %v5603_v32 = vpop.f32.mrf.mxu0  ;;  %v14202_v44 = vld [vmem:[#allocation8 + $0x1be4] sm:$0xf0]  ;;  %v14198_v21 = vld [vmem:[#allocation8 + $0x1bcc] sm:$0xf] }
 0x398   :  { %6603 = vmatpush.bf16.msrb.mxu1 %v12268_v40  ;;  %6616 = vmatpush.bf16.msrb.mxu2 %v12272_v19  ;;  %v15063_v48 = vadd.f32 %v5603_v32, %v15028_v28  ;;  %v12148_v40 = vor.u32 %v14108_v53, %v12147_v59  ;;  %v12152_v19 = vor.u32 %v14104_v55, %v12149_v5  ;;  %v12507_v32 = vld [vmem:[#allocation8 + $0x1bc0] sm:$0xf]  ;;  %v12517_v59 = vld [vmem:[#allocation8 + $0x1be8] sm:$0xf0] }
 0x399   :  { %6629 = vmatpush.bf16.msrb.mxu3 %v12276_v36  ;;  %6642 = vmatpush.bf16.msra.mxu0 %v12280_v23  ;;  %v12115_v36 = vld [vmem:[#allocation8 + $0x1898] sm:$0xf]  ;;  %v12052_v53 = vor.u32 %v14084_v54, %v12051_v24  ;;  %v12056_v55 = vor.u32 %v14080_v43, %v12053_v3  ;;  %v14169_v3 = vld [vmem:[#allocation8 + $0x1adc] sm:$0xf0] }
 0x39a   :  { %6585 = vmatmul.bf16.vlgmr.msra.gmra.mxu3 %v15053_v17  ;;  %6598 = vmatmul.bf16.vlgmr.msrb.gmra.mxu0 %v15053_v17  ;;  %v5577_v28 = vpop.f32.mrf.mxu2 }
 0x39b   :  { %v15066_v23 = vadd.f32 %v5577_v28, %v15031_v6  ;;  %v12120_v6 = vor.u32 %v14096_v47, %v12117_v4  ;;  %v12477_v28 = vld [vmem:[#allocation8 + $0x1ba0] sm:$0xf0]  ;;  %v12443_v4 = vld [vmem:[#allocation8 + $0x1b40] sm:$0xf] }
 0x39c   :  { %6604 = vmatpush.bf16.msrb.mxu1 %v12236_v30  ;;  %6617 = vmatpush.bf16.msrb.mxu2 %v12240_v9  ;;  %v5566_v51 = vpop.f32.mrf.mxu1  ;;  %v12108_v9 = vor.u32 %v14099_v18, %v12107_v25  ;;  %v14193_v25 = vld [vmem:[#allocation8 + $0x1b9c] sm:$0xf0]  ;;  %v12516_v18 = vor.u32 %v14202_v44, %v12515_v63  ;;  %v12381_v63 = vld [vmem:[#allocation8 + $0x1ae0] sm:$0xf0]  ;;  %v14166_v44 = vld [vmem:[#allocation8 + $0x1acc] sm:$0xf] }
 0x39d   :  { %6630 = vmatpush.bf16.msrb.mxu3 %v12244_v0  ;;  %6643 = vmatpush.bf16.msra.mxu0 %v12248_v41  ;;  %v5590_v37 = vpop.f32.mrf.mxu3  ;;  %v14091_v0 = vld [vmem:[#allocation8 + $0x186c] sm:$0xf0]  ;;  %v12116_v41 = vor.u32 %v14100_v35, %v12115_v36  ;;  %v14190_v36 = vld [vmem:[#allocation8 + $0x1b8c] sm:$0xf]  ;;  %v14185_v51 = vld [vmem:[#allocation8 + $0x1b5c] sm:$0xf0] }
 0x39e   :  { %v15069_v12 = vadd.f32 %v5590_v37, %v15034_v11  ;;  %v12043_v11 = vld [vmem:[#allocation8 + $0x1810] sm:$0xf]  ;;  %v12485_v37 = vld [vmem:[#allocation8 + $0x1ba8] sm:$0xf0] }
 0x39f   :  { %v5605_v30 = vpop.f32.mrf.mxu0 }
 0x3a0   :  { %6605 = vmatpush.bf16.msrb.mxu1 %v12204_v42  ;;  %6618 = vmatpush.bf16.msrb.mxu2 %v12208_v13  ;;  %v12076_v42 = vor.u32 %v14091_v0, %v12075_v26  ;;  %v12080_v13 = vor.u32 %v14087_v29, %v12077_v15  ;;  %v12484_v30 = vor.u32 %v14194_v38, %v12483_v61  ;;  %v12445_v26 = vld [vmem:[#allocation8 + $0x1b60] sm:$0xf0]  ;;  %v12451_v0 = vld [vmem:[#allocation8 + $0x1b48] sm:$0xf]  ;;  %v12453_v29 = vld [vmem:[#allocation8 + $0x1b68] sm:$0xf0] }
 0x3a1   :  { %6631 = vmatpush.bf16.msrb.mxu3 %v12212_v56  ;;  %6644 = vmatpush.bf16.msra.mxu0 %v12216_v31  ;;  %v12045_v56 = vld [vmem:[#allocation8 + $0x1830] sm:$0xf0]  ;;  %v12084_v31 = vor.u32 %v14092_v60, %v12083_v45  ;;  %v12444_v15 = vor.u32 %v14185_v51, %v12443_v4  ;;  %v12411_v60 = vld [vmem:[#allocation8 + $0x1b00] sm:$0xf]  ;;  %v14158_v61 = vld [vmem:[#allocation8 + $0x1a8c] sm:$0xf] }
 0x3a2   :  { %v5579_v39 = vpop.f32.mrf.mxu2  ;;  %v12412_v54 = vor.u32 %v14177_v46, %v12411_v60  ;;  %v12357_v38 = vld [vmem:[#allocation8 + $0x1aa8] sm:$0xf0]  ;;  %v12315_v51 = vld [vmem:[#allocation8 + $0x1a40] sm:$0xf]  ;;  %v14141_v46 = vld [vmem:[#allocation8 + $0x1a04] sm:$0xf] }
 0x3a3   :  { %v14145_v60 = vld [vmem:[#allocation8 + $0x1a1c] sm:$0xf0] }
 0x3a4   :  { %6606 = vmatpush.bf16.msrb.mxu1 %v12172_v14  ;;  %6619 = vmatpush.bf16.msrb.mxu2 %v12176_v34  ;;  %v14201_v14 = vld [vmem:[#allocation8 + $0x1bdc] sm:$0xf0]  ;;  %v14197_v34 = vld [vmem:[#allocation8 + $0x1bc4] sm:$0xf] }
 0x3a5   :  { %6632 = vmatpush.bf16.msrb.mxu3 %v12180_v1  ;;  %6645 = vmatpush.bf16.msra.mxu0 %v12184_v52  ;;  %v5592_v2 = vpop.f32.mrf.mxu3  ;;  %v12044_v1 = vor.u32 %v14083_v20, %v12043_v11  ;;  %v12048_v52 = vor.u32 %v14079_v62, %v12045_v56  ;;  %v12508_v5 = vor.u32 %v14201_v14, %v12507_v32  ;;  %v12419_v20 = vld [vmem:[#allocation8 + $0x1b08] sm:$0xf]  ;;  %v14174_v56 = vld [vmem:[#allocation8 + $0x1b0c] sm:$0xf] }
 0x3a6   :  { %v14178_v62 = vld [vmem:[#allocation8 + $0x1b24] sm:$0xf0]  ;;  %v12379_v2 = vld [vmem:[#allocation8 + $0x1ac0] sm:$0xf] }
 0x3a7   :  { %v12420_v14 = vor.u32 %v14178_v62, %v12419_v20  ;;  %v12291_v20 = vld [vmem:[#allocation8 + $0x1a08] sm:$0xf] }
 0x3a8   :  { %6607 = vmatpush.bf16.msrb.mxu1 %v12140_v49  ;;  %6620 = vmatpush.bf16.msrb.mxu2 %v12144_v8  ;;  %v12512_v49 = vor.u32 %v14197_v34, %v12509_v22  ;;  %v12475_v8 = vld [vmem:[#allocation8 + $0x1b80] sm:$0xf]  ;;  %v14165_v22 = vld [vmem:[#allocation8 + $0x1ac4] sm:$0xf]  ;;  %v14146_v62 = vld [vmem:[#allocation8 + $0x1a24] sm:$0xf0] }
 0x3a9   :  { %6633 = vmatpush.bf16.msrb.mxu3 %v12148_v40  ;;  %6646 = vmatpush.bf16.msra.mxu0 %v12152_v19  ;;  %v12520_v40 = vor.u32 %v14198_v21, %v12517_v59  ;;  %v14189_v19 = vld [vmem:[#allocation8 + $0x1b84] sm:$0xf]  ;;  %v12476_v35 = vor.u32 %v14193_v25, %v12475_v8  ;;  %v12389_v21 = vld [vmem:[#allocation8 + $0x1ae8] sm:$0xf0]  ;;  %v12384_v59 = vor.u32 %v14165_v22, %v12381_v63  ;;  %v14204_v63 = vld [vmem:[#allocation8 + $0x1bf4] sm:$0xf0] }
 0x3aa   :  { %v12480_v47 = vor.u32 %v14189_v19, %v12477_v28  ;;  %v14157_v8 = vld [vmem:[#allocation8 + $0x1a84] sm:$0xf]  ;;  %v14162_v28 = vld [vmem:[#allocation8 + $0x1aa4] sm:$0xf0] }
 0x3ab   :  { %v12349_v25 = vld [vmem:[#allocation8 + $0x1aa0] sm:$0xf0] }
 0x3ac   :  { %6608 = vmatpush.bf16.msrb.mxu1 %v12108_v9  ;;  %6621 = vmatpush.bf16.msrb.mxu2 %v12112_v57  ;;  %v12488_v9 = vor.u32 %v14190_v36, %v12485_v37  ;;  %v14181_v57 = vld [vmem:[#allocation8 + $0x1b44] sm:$0xf]  ;;  %v12352_v4 = vor.u32 %v14157_v8, %v12349_v25  ;;  %v12493_v8 = vld [vmem:[#allocation8 + $0x1bb0] sm:$0xf0]  ;;  %v12499_v25 = vld [vmem:[#allocation8 + $0x1b98] sm:$0xf] }
 0x3ad   :  { %6634 = vmatpush.bf16.msrb.mxu3 %v12116_v41  ;;  %6647 = vmatpush.bf16.msra.mxu0 %v12120_v6  ;;  %v14186_v41 = vld [vmem:[#allocation8 + $0x1b64] sm:$0xf0]  ;;  %v14182_v6 = vld [vmem:[#allocation8 + $0x1b4c] sm:$0xf]  ;;  %v12448_v45 = vor.u32 %v14181_v57, %v12445_v26  ;;  %v14149_v57 = vld [vmem:[#allocation8 + $0x1a44] sm:$0xf] }
 0x3ae   :  { %v12452_v16 = vor.u32 %v14186_v41, %v12451_v0  ;;  %v12456_v11 = vor.u32 %v14182_v6, %v12453_v29  ;;  %v12317_v26 = vld [vmem:[#allocation8 + $0x1a60] sm:$0xf0]  ;;  %v12323_v0 = vld [vmem:[#allocation8 + $0x1a48] sm:$0xf]  ;;  %v14150_v6 = vld [vmem:[#allocation8 + $0x1a4c] sm:$0xf] }
 0x3af   :  { %v14154_v41 = vld [vmem:[#allocation8 + $0x1a64] sm:$0xf0]  ;;  %v12325_v29 = vld [vmem:[#allocation8 + $0x1a68] sm:$0xf0] }
 0x3b0   :  { %6609 = vmatpush.bf16.msrb.mxu1 %v12076_v42  ;;  %6622 = vmatpush.bf16.msrb.mxu2 %v12080_v13  ;;  %v14173_v42 = vld [vmem:[#allocation8 + $0x1b04] sm:$0xf] }
 0x3b1   :  { %6635 = vmatpush.bf16.msrb.mxu3 %v12084_v31  ;;  %6648 = vmatpush.bf16.msra.mxu0 %v12088_v10  ;;  %v12413_v13 = vld [vmem:[#allocation8 + $0x1b20] sm:$0xf0]  ;;  %v12421_v31 = vld [vmem:[#allocation8 + $0x1b28] sm:$0xf0] }
 0x3b2   :  { %v12416_v43 = vor.u32 %v14173_v42, %v12413_v13  ;;  %v12424_v34 = vor.u32 %v14174_v56, %v12421_v31  ;;  %v12328_v42 = vor.u32 %v14150_v6, %v12325_v29  ;;  %v14142_v56 = vld [vmem:[#allocation8 + $0x1a0c] sm:$0xf]  ;;  %v12427_v29 = vld [vmem:[#allocation8 + $0x1b10] sm:$0xf] }
 0x3b4   :  { %6610 = vmatpush.bf16.msrb.mxu1 %v12044_v1  ;;  %6623 = vmatpush.bf16.msrb.mxu2 %v12048_v52  ;;  %v5616_v10 = vpop.f32.mrf.mxu1  ;;  %v12387_v1 = vld [vmem:[#allocation8 + $0x1ac8] sm:$0xf] }
 0x3b5   :  { %6636 = vmatpush.bf16.msrb.mxu3 %v12052_v53  ;;  %6649 = vmatpush.bf16.msra.mxu0 %v12056_v55  ;;  %v15076_v39 = vadd.f32 %v5616_v10, %v15041_v50  ;;  %v14170_v52 = vld [vmem:[#allocation8 + $0x1ae4] sm:$0xf0]  ;;  %v12380_v50 = vor.u32 %v14169_v3, %v12379_v2  ;;  %v12347_v53 = vld [vmem:[#allocation8 + $0x1a80] sm:$0xf]  ;;  %v12293_v10 = vld [vmem:[#allocation8 + $0x1a28] sm:$0xf0] }
 0x3b6   :  { %v14161_v55 = vld [vmem:[#allocation8 + $0x1a9c] sm:$0xf0]  ;;  %v14199_v2 = vld [vmem:[#allocation8 + $0x1bd4] sm:$0xf] }
 0x3b7   :  { %6611 = vmatmul.bf16.vlgmr.msrb.gmra.mxu1 %v15053_v17  ;;  %6624 = vmatmul.bf16.vlgmr.msrb.gmra.mxu2 %v15053_v17  ;;  %v5655_v24 = vpop.f32.mrf.mxu0  ;;  %v12525_v3 = vld [vmem:[#allocation8 + $0x1bf0] sm:$0xf0] }
 0x3b8   :  { %7053 = vmatpush.bf16.msra.mxu1 %v12508_v5  ;;  %7066 = vmatpush.bf16.msra.mxu2 %v12512_v49  ;;  %v15079_v32 = vadd.f32 %v5655_v24, %v15044_v33  ;;  %v12388_v5 = vor.u32 %v14170_v52, %v12387_v1  ;;  %v12392_v49 = vor.u32 %v14166_v44, %v12389_v21  ;;  %v12523_v24 = vld [vmem:[#allocation8 + $0x1bd0] sm:$0xf]  ;;  %v14200_v1 = vld [vmem:[#allocation8 + $0x1bdc] sm:$0xf] }
 0x3b9   :  { %7079 = vmatpush.bf16.msra.mxu3 %v12516_v18  ;;  %7092 = vmatpush.bf16.msrb.mxu0 %v12520_v40  ;;  %v12355_v18 = vld [vmem:[#allocation8 + $0x1a88] sm:$0xf]  ;;  %v12533_v52 = vld [vmem:[#allocation8 + $0x1bf8] sm:$0xf0]  ;;  %v12292_v44 = vor.u32 %v14146_v62, %v12291_v20  ;;  %v12296_v21 = vor.u32 %v14142_v56, %v12293_v10 }
 0x3ba   :  { %6637 = vmatmul.bf16.vlgmr.msrb.gmra.mxu3 %v15053_v17  ;;  %6650 = vmatmul.bf16.vlgmr.msra.gmra.mxu0 %v15053_v17  ;;  %v5629_v33 = vpop.f32.mrf.mxu2 }
 0x3bb   :  { %v15082_v40 = vadd.f32 %v5629_v33, %v15047_v58  ;;  %v12360_v58 = vor.u32 %v14158_v61, %v12357_v38  ;;  %v14191_v33 = vld [vmem:[#allocation8 + $0x1b94] sm:$0xf] }
 0x3bc   :  { %7054 = vmatpush.bf16.msra.mxu1 %v12476_v35  ;;  %7067 = vmatpush.bf16.msra.mxu2 %v12480_v47  ;;  %v5618_v37 = vpop.f32.mrf.mxu1  ;;  %v12348_v47 = vor.u32 %v14161_v55, %v12347_v53  ;;  %v12491_v55 = vld [vmem:[#allocation8 + $0x1b90] sm:$0xf] }
 0x3bd   :  { %7080 = vmatpush.bf16.msra.mxu3 %v12484_v30  ;;  %7093 = vmatpush.bf16.msrb.mxu0 %v12488_v9  ;;  %v5642_v19 = vpop.f32.mrf.mxu3  ;;  %v14153_v30 = vld [vmem:[#allocation8 + $0x1a5c] sm:$0xf0]  ;;  %v12356_v9 = vor.u32 %v14162_v28, %v12355_v18  ;;  %v14196_v18 = vld [vmem:[#allocation8 + $0x1bb4] sm:$0xf0]  ;;  %v12501_v28 = vld [vmem:[#allocation8 + $0x1bb8] sm:$0xf0]  ;;  %v12496_v37 = vor.u32 %v14191_v33, %v12493_v8 }
 0x3be   :  { %v15085_v36 = vadd.f32 %v5642_v19, %v15050_v7  ;;  %v12283_v7 = vld [vmem:[#allocation8 + $0x1a00] sm:$0xf]  ;;  %v14192_v19 = vld [vmem:[#allocation8 + $0x1b9c] sm:$0xf] }
 0x3bf   :  { %v5657_v35 = vpop.f32.mrf.mxu0 }
 0x3c0   :  { %7055 = vmatpush.bf16.msra.mxu1 %v12444_v15  ;;  %7068 = vmatpush.bf16.msra.mxu2 %v12448_v45  ;;  %v12316_v15 = vor.u32 %v14153_v30, %v12315_v51  ;;  %v12320_v45 = vor.u32 %v14149_v57, %v12317_v26  ;;  %v12459_v35 = vld [vmem:[#allocation8 + $0x1b50] sm:$0xf]  ;;  %v12504_v51 = vor.u32 %v14192_v19, %v12501_v28  ;;  %v14183_v30 = vld [vmem:[#allocation8 + $0x1b54] sm:$0xf]  ;;  %v14188_v57 = vld [vmem:[#allocation8 + $0x1b74] sm:$0xf0] }
 0x3c1   :  { %7081 = vmatpush.bf16.msra.mxu3 %v12452_v16  ;;  %7094 = vmatpush.bf16.msrb.mxu0 %v12456_v11  ;;  %v12285_v16 = vld [vmem:[#allocation8 + $0x1a20] sm:$0xf0]  ;;  %v12324_v11 = vor.u32 %v14154_v41, %v12323_v0  ;;  %v14184_v26 = vld [vmem:[#allocation8 + $0x1b5c] sm:$0xf] }
 0x3c2   :  { %v5631_v13 = vpop.f32.mrf.mxu2  ;;  %v12288_v22 = vor.u32 %v14141_v46, %v12285_v16  ;;  %v12469_v0 = vld [vmem:[#allocation8 + $0x1b78] sm:$0xf0]  ;;  %v12429_v46 = vld [vmem:[#allocation8 + $0x1b30] sm:$0xf0]  ;;  %v12435_v16 = vld [vmem:[#allocation8 + $0x1b18] sm:$0xf] }
 0x3c3   :  { %v12437_v13 = vld [vmem:[#allocation8 + $0x1b38] sm:$0xf0] }
 0x3c4   :  { %7056 = vmatpush.bf16.msra.mxu1 %v12412_v54  ;;  %7069 = vmatpush.bf16.msra.mxu2 %v12416_v43  ;;  %v14203_v54 = vld [vmem:[#allocation8 + $0x1bec] sm:$0xf0]  ;;  %v6729_v43 = vunpack.c.l.b16 %v15053_v17  ;;  %v12373_v19 = vld [vmem:[#allocation8 + $0x1ab8] sm:$0xf0] }
 0x3c5   :  { %7082 = vmatpush.bf16.msra.mxu3 %v12420_v14  ;;  %7095 = vmatpush.bf16.msrb.mxu0 %v12424_v34  ;;  %v5644_v31 = vpop.f32.mrf.mxu3  ;;  %v12531_v14 = vld [vmem:[#allocation8 + $0x1bd8] sm:$0xf]  ;;  %v12284_v34 = vor.u32 %v14145_v60, %v12283_v7  ;;  %v14195_v17 = vld [vmem:[#allocation8 + $0x1bac] sm:$0xf0]  ;;  %v14175_v60 = vld [vmem:[#allocation8 + $0x1b14] sm:$0xf] }
 0x3c6   :  { %v15088_v53 = vpack.c.b16 %v6729_v43, %v6729_v43  ;;  %v12492_v38 = vor.u32 %v14195_v17, %v12491_v55  ;;  %v14179_v7 = vld [vmem:[#allocation8 + $0x1b2c] sm:$0xf0]  ;;  %v12432_v10 = vor.u32 %v14175_v60, %v12429_v46  ;;  %v14159_v17 = vld [vmem:[#allocation8 + $0x1a94] sm:$0xf] }
 0x3c7   :  { %v12428_v31 = vor.u32 %v14179_v7, %v12427_v29  ;;  %v14147_v7 = vld [vmem:[#allocation8 + $0x1a2c] sm:$0xf0] }
 0x3c8   :  { %7057 = vmatpush.bf16.msra.mxu1 %v12380_v50  ;;  %7070 = vmatpush.bf16.msra.mxu2 %v12384_v59  ;;  %v12524_v50 = vor.u32 %v14203_v54, %v12523_v24  ;;  %v12528_v59 = vor.u32 %v14199_v2, %v12525_v3  ;;  %v15091_v61 = vrot.slane %v15088_v53, 1  ;;  %v12395_v24 = vld [vmem:[#allocation8 + $0x1ad0] sm:$0xf] }
 0x3c9   :  { %7083 = vmatpush.bf16.msra.mxu3 %v12388_v5  ;;  %7096 = vmatpush.bf16.msrb.mxu0 %v12392_v49  ;;  %v12532_v5 = vor.u32 %v14204_v63, %v12531_v14  ;;  %v12536_v49 = vor.u32 %v14200_v1, %v12533_v52  ;;  %v14171_v54 = vld [vmem:[#allocation8 + $0x1aec] sm:$0xf0]  ;;  %v14167_v14 = vld [vmem:[#allocation8 + $0x1ad4] sm:$0xf]  ;;  %v14172_v63 = vld [vmem:[#allocation8 + $0x1af4] sm:$0xf0] }
 0x3ca   :  { %v14168_v1 = vld [vmem:[#allocation8 + $0x1adc] sm:$0xf] }
 0x3cb   :  { %v12405_v52 = vld [vmem:[#allocation8 + $0x1af8] sm:$0xf0] }
 0x3cc   :  { %7058 = vmatpush.bf16.msra.mxu1 %v12348_v47  ;;  %7071 = vmatpush.bf16.msra.mxu2 %v12352_v4  ;;  %v14187_v47 = vld [vmem:[#allocation8 + $0x1b6c] sm:$0xf0]  ;;  %v12500_v4 = vor.u32 %v14196_v18, %v12499_v25  ;;  %v12408_v55 = vor.u32 %v14168_v1, %v12405_v52  ;;  %v14164_v25 = vld [vmem:[#allocation8 + $0x1ab4] sm:$0xf0]  ;;  %v14160_v18 = vld [vmem:[#allocation8 + $0x1a9c] sm:$0xf] }
 0x3cd   :  { %7084 = vmatpush.bf16.msra.mxu3 %v12356_v9  ;;  %7097 = vmatpush.bf16.msrb.mxu0 %v12360_v58  ;;  %v12461_v9 = vld [vmem:[#allocation8 + $0x1b70] sm:$0xf0]  ;;  %v12467_v58 = vld [vmem:[#allocation8 + $0x1b58] sm:$0xf]  ;;  %v12460_v41 = vor.u32 %v14187_v47, %v12459_v35 }
 0x3ce   :  { %v12464_v6 = vor.u32 %v14183_v30, %v12461_v9  ;;  %v14151_v9 = vld [vmem:[#allocation8 + $0x1a54] sm:$0xf] }
 0x3d0   :  { %7059 = vmatpush.bf16.msra.mxu1 %v12316_v15  ;;  %7072 = vmatpush.bf16.msra.mxu2 %v12320_v45  ;;  %v12468_v15 = vor.u32 %v14188_v57, %v12467_v58  ;;  %v12472_v45 = vor.u32 %v14184_v26, %v12469_v0  ;;  %v12333_v58 = vld [vmem:[#allocation8 + $0x1a70] sm:$0xf0]  ;;  %v12339_v57 = vld [vmem:[#allocation8 + $0x1a58] sm:$0xf]  ;;  %v14152_v0 = vld [vmem:[#allocation8 + $0x1a5c] sm:$0xf] }
 0x3d1   :  { %7085 = vmatpush.bf16.msra.mxu3 %v12324_v11  ;;  %7098 = vmatpush.bf16.msrb.mxu0 %v12328_v42  ;;  %v14180_v11 = vld [vmem:[#allocation8 + $0x1b34] sm:$0xf0]  ;;  %v14176_v42 = vld [vmem:[#allocation8 + $0x1b1c] sm:$0xf]  ;;  %v12336_v29 = vor.u32 %v14151_v9, %v12333_v58  ;;  %v14246_v9 = vld [vmem:[#allocation8 + $0x1d4c] sm:$0xf] }
 0x3d2   :  { %v12436_v2 = vor.u32 %v14180_v11, %v12435_v16  ;;  %v12440_v3 = vor.u32 %v14176_v42, %v12437_v13  ;;  %v14156_v26 = vld [vmem:[#allocation8 + $0x1a74] sm:$0xf0]  ;;  %v14144_v13 = vld [vmem:[#allocation8 + $0x1a1c] sm:$0xf]  ;;  %v12709_v58 = vld [vmem:[#allocation8 + $0x1d68] sm:$0xf0] }
 0x3d3   :  { %v12340_v60 = vor.u32 %v14156_v26, %v12339_v57  ;;  %v12307_v11 = vld [vmem:[#allocation8 + $0x1a18] sm:$0xf] }
 0x3d4   :  { %7060 = vmatpush.bf16.msra.mxu1 %v12284_v34  ;;  %7073 = vmatpush.bf16.msra.mxu2 %v12288_v22  ;;  %v6063_v20 = vpop.f32.mrf.mxu1  ;;  %v12397_v34 = vld [vmem:[#allocation8 + $0x1af0] sm:$0xf0]  ;;  %v12403_v22 = vld [vmem:[#allocation8 + $0x1ad8] sm:$0xf] }
 0x3d5   :  { %7086 = vmatpush.bf16.msra.mxu3 %v12292_v44  ;;  %7099 = vmatpush.bf16.msrb.mxu0 %v12296_v21  ;;  %v15098_v62 = vadd.f32 %v6063_v20, %v15060_v27  ;;  %v12396_v27 = vor.u32 %v14171_v54, %v12395_v24  ;;  %v12400_v44 = vor.u32 %v14167_v14, %v12397_v34  ;;  %v12363_v21 = vld [vmem:[#allocation8 + $0x1a90] sm:$0xf]  ;;  %v14148_v42 = vld [vmem:[#allocation8 + $0x1a34] sm:$0xf0]  ;;  %v14261_v24 = vld [vmem:[#allocation8 + $0x1dc4] sm:$0xf] }
 0x3d6   :  { %v12765_v54 = vld [vmem:[#allocation8 + $0x1de0] sm:$0xf0]  ;;  %v14266_v34 = vld [vmem:[#allocation8 + $0x1de4] sm:$0xf0]  ;;  %v12308_v1 = vor.u32 %v14148_v42, %v12307_v11 }
 0x3d7   :  { %7061 = vmatmul.bf16.vlgmr.msra.gmra.mxu1 %v15091_v61  ;;  %7074 = vmatmul.bf16.vlgmr.msra.gmra.mxu2 %v15091_v61  ;;  %v6102_v56 = vpop.f32.mrf.mxu0 }
 0x3d8   :  { %7105 = vmatpush.bf16.msrb.mxu1 %v12524_v50  ;;  %7118 = vmatpush.bf16.msrb.mxu2 %v12528_v59  ;;  %v15101_v43 = vadd.f32 %v6102_v56, %v15063_v48  ;;  %v14163_v50 = vld [vmem:[#allocation8 + $0x1aac] sm:$0xf0]  ;;  %v12404_v59 = vor.u32 %v14172_v63, %v12403_v22  ;;  %v12309_v56 = vld [vmem:[#allocation8 + $0x1a38] sm:$0xf0]  ;;  %v14262_v22 = vld [vmem:[#allocation8 + $0x1dcc] sm:$0xf] }
 0x3d9   :  { %7131 = vmatpush.bf16.msrb.mxu3 %v12532_v5  ;;  %7144 = vmatpush.bf16.msra.mxu0 %v12536_v49  ;;  %v12365_v5 = vld [vmem:[#allocation8 + $0x1ab0] sm:$0xf0]  ;;  %v12371_v49 = vld [vmem:[#allocation8 + $0x1a98] sm:$0xf]  ;;  %v12364_v35 = vor.u32 %v14163_v50, %v12363_v21  ;;  %v12773_v63 = vld [vmem:[#allocation8 + $0x1de8] sm:$0xf0]  ;;  %v12312_v52 = vor.u32 %v14144_v13, %v12309_v56 }
 0x3da   :  { %7087 = vmatmul.bf16.vlgmr.msra.gmra.mxu3 %v15091_v61  ;;  %7100 = vmatmul.bf16.vlgmr.msrb.gmra.mxu0 %v15091_v61  ;;  %v6076_v48 = vpop.f32.mrf.mxu2  ;;  %v12368_v47 = vor.u32 %v14159_v17, %v12365_v5  ;;  %v12372_v30 = vor.u32 %v14164_v25, %v12371_v49  ;;  %v12731_v21 = vld [vmem:[#allocation8 + $0x1d80] sm:$0xf]  ;;  %v12733_v17 = vld [vmem:[#allocation8 + $0x1da0] sm:$0xf0]  ;;  %v12739_v5 = vld [vmem:[#allocation8 + $0x1d88] sm:$0xf] }
 0x3db   :  { %v15104_v33 = vadd.f32 %v6076_v48, %v15066_v23  ;;  %v12376_v23 = vor.u32 %v14160_v18, %v12373_v19  ;;  %v14257_v50 = vld [vmem:[#allocation8 + $0x1d9c] sm:$0xf0]  ;;  %v14253_v48 = vld [vmem:[#allocation8 + $0x1d84] sm:$0xf]  ;;  %v14258_v49 = vld [vmem:[#allocation8 + $0x1da4] sm:$0xf0] }
 0x3dc   :  { %7106 = vmatpush.bf16.msrb.mxu1 %v12492_v38  ;;  %7119 = vmatpush.bf16.msrb.mxu2 %v12496_v37  ;;  %v6065_v38 = vpop.f32.mrf.mxu1  ;;  %v12741_v25 = vld [vmem:[#allocation8 + $0x1da8] sm:$0xf0]  ;;  %v12732_v18 = vor.u32 %v14257_v50, %v12731_v21  ;;  %v12736_v19 = vor.u32 %v14253_v48, %v12733_v17  ;;  %v14233_v56 = vld [vmem:[#allocation8 + $0x1cdc] sm:$0xf0]  ;;  %v14221_v21 = vld [vmem:[#allocation8 + $0x1c84] sm:$0xf] }
 0x3dd   :  { %7132 = vmatpush.bf16.msrb.mxu3 %v12500_v4  ;;  %7145 = vmatpush.bf16.msra.mxu0 %v12504_v51  ;;  %v6089_v8 = vpop.f32.mrf.mxu3  ;;  %v12331_v4 = vld [vmem:[#allocation8 + $0x1a50] sm:$0xf]  ;;  %v12699_v38 = vld [vmem:[#allocation8 + $0x1d40] sm:$0xf]  ;;  %v12605_v50 = vld [vmem:[#allocation8 + $0x1ca0] sm:$0xf0] }
 0x3de   :  { %v15107_v28 = vadd.f32 %v6089_v8, %v15069_v12  ;;  %v14155_v51 = vld [vmem:[#allocation8 + $0x1a6c] sm:$0xf0]  ;;  %v14254_v8 = vld [vmem:[#allocation8 + $0x1d8c] sm:$0xf]  ;;  %v14226_v17 = vld [vmem:[#allocation8 + $0x1ca4] sm:$0xf0] }
 0x3df   :  { %v6104_v37 = vpop.f32.mrf.mxu0  ;;  %v12299_v12 = vld [vmem:[#allocation8 + $0x1a10] sm:$0xf] }
 0x3e0   :  { %7107 = vmatpush.bf16.msrb.mxu1 %v12460_v41  ;;  %7120 = vmatpush.bf16.msrb.mxu2 %v12464_v6  ;;  %v12341_v41 = vld [vmem:[#allocation8 + $0x1a78] sm:$0xf0]  ;;  %v12332_v6 = vor.u32 %v14155_v51, %v12331_v4  ;;  %v14249_v37 = vld [vmem:[#allocation8 + $0x1d5c] sm:$0xf0]  ;;  %v14245_v4 = vld [vmem:[#allocation8 + $0x1d44] sm:$0xf] }
 0x3e1   :  { %7133 = vmatpush.bf16.msrb.mxu3 %v12468_v15  ;;  %7146 = vmatpush.bf16.msra.mxu0 %v12472_v45  ;;  %v14143_v15 = vld [vmem:[#allocation8 + $0x1a14] sm:$0xf]  ;;  %v12344_v46 = vor.u32 %v14152_v0, %v12341_v41  ;;  %v12701_v51 = vld [vmem:[#allocation8 + $0x1d60] sm:$0xf0]  ;;  %v12700_v57 = vor.u32 %v14249_v37, %v12699_v38  ;;  %v12667_v0 = vld [vmem:[#allocation8 + $0x1d00] sm:$0xf]  ;;  %v12608_v38 = vor.u32 %v14221_v21, %v12605_v50 }
 0x3e2   :  { %v12301_v45 = vld [vmem:[#allocation8 + $0x1a30] sm:$0xf0]  ;;  %v6078_v16 = vpop.f32.mrf.mxu2  ;;  %v12704_v26 = vor.u32 %v14245_v4, %v12701_v51  ;;  %v14241_v41 = vld [vmem:[#allocation8 + $0x1d1c] sm:$0xf0]  ;;  %v14213_v4 = vld [vmem:[#allocation8 + $0x1c44] sm:$0xf] }
 0x3e3   :  { %v12304_v14 = vor.u32 %v14143_v15, %v12301_v45  ;;  %v12675_v15 = vld [vmem:[#allocation8 + $0x1d08] sm:$0xf]  ;;  %v12668_v42 = vor.u32 %v14241_v41, %v12667_v0  ;;  %v12571_v37 = vld [vmem:[#allocation8 + $0x1c40] sm:$0xf]  ;;  %v12573_v51 = vld [vmem:[#allocation8 + $0x1c60] sm:$0xf0] }
 0x3e4   :  { %7108 = vmatpush.bf16.msrb.mxu1 %v12428_v31  ;;  %7121 = vmatpush.bf16.msrb.mxu2 %v12432_v10  ;;  %v12763_v31 = vld [vmem:[#allocation8 + $0x1dc0] sm:$0xf]  ;;  %v14242_v45 = vld [vmem:[#allocation8 + $0x1d24] sm:$0xf0]  ;;  %v14205_v41 = vld [vmem:[#allocation8 + $0x1c04] sm:$0xf] }
 0x3e5   :  { %7134 = vmatpush.bf16.msrb.mxu3 %v12436_v2  ;;  %7147 = vmatpush.bf16.msra.mxu0 %v12440_v3  ;;  %v6091_v20 = vpop.f32.mrf.mxu3  ;;  %v14265_v10 = vld [vmem:[#allocation8 + $0x1ddc] sm:$0xf0]  ;;  %v12771_v2 = vld [vmem:[#allocation8 + $0x1dc8] sm:$0xf]  ;;  %v12300_v3 = vor.u32 %v14147_v7, %v12299_v12  ;;  %v12669_v7 = vld [vmem:[#allocation8 + $0x1d20] sm:$0xf0] }
 0x3e6   :  { %v12635_v20 = vld [vmem:[#allocation8 + $0x1cc0] sm:$0xf]  ;;  %v12755_v21 = vld [vmem:[#allocation8 + $0x1d98] sm:$0xf] }
 0x3e7   :  { %v14209_v0 = vld [vmem:[#allocation8 + $0x1c1c] sm:$0xf0]  ;;  %v14260_v50 = vld [vmem:[#allocation8 + $0x1db4] sm:$0xf0] }
 0x3e8   :  { %7109 = vmatpush.bf16.msrb.mxu1 %v12396_v27  ;;  %7122 = vmatpush.bf16.msrb.mxu2 %v12400_v44  ;;  %v12764_v27 = vor.u32 %v14265_v10, %v12763_v31  ;;  %v12768_v44 = vor.u32 %v14261_v24, %v12765_v54  ;;  %v12676_v10 = vor.u32 %v14242_v45, %v12675_v15  ;;  %v14229_v54 = vld [vmem:[#allocation8 + $0x1cc4] sm:$0xf]  ;;  %v12547_v15 = vld [vmem:[#allocation8 + $0x1c08] sm:$0xf] }
 0x3e9   :  { %7135 = vmatpush.bf16.msrb.mxu3 %v12404_v59  ;;  %7148 = vmatpush.bf16.msra.mxu0 %v12408_v55  ;;  %v12772_v59 = vor.u32 %v14266_v34, %v12771_v2  ;;  %v12776_v55 = vor.u32 %v14262_v22, %v12773_v63  ;;  %v12637_v2 = vld [vmem:[#allocation8 + $0x1ce0] sm:$0xf0]  ;;  %v14230_v34 = vld [vmem:[#allocation8 + $0x1ccc] sm:$0xf]  ;;  %v14210_v45 = vld [vmem:[#allocation8 + $0x1c24] sm:$0xf0] }
 0x3ea   :  { %v12645_v22 = vld [vmem:[#allocation8 + $0x1ce8] sm:$0xf0]  ;;  %v12640_v63 = vor.u32 %v14229_v54, %v12637_v2  ;;  %v14268_v54 = vld [vmem:[#allocation8 + $0x1df4] sm:$0xf0]  ;;  %v14264_v2 = vld [vmem:[#allocation8 + $0x1ddc] sm:$0xf] }
 0x3ec   :  { %7110 = vmatpush.bf16.msrb.mxu1 %v12364_v35  ;;  %7123 = vmatpush.bf16.msrb.mxu2 %v12368_v47  ;;  %v12740_v35 = vor.u32 %v14258_v49, %v12739_v5  ;;  %v12744_v47 = vor.u32 %v14254_v8, %v12741_v25  ;;  %v14222_v5 = vld [vmem:[#allocation8 + $0x1c8c] sm:$0xf] }
 0x3ed   :  { %7136 = vmatpush.bf16.msrb.mxu3 %v12372_v30  ;;  %7149 = vmatpush.bf16.msra.mxu0 %v12376_v23  ;;  %v12707_v30 = vld [vmem:[#allocation8 + $0x1d48] sm:$0xf]  ;;  %v12613_v49 = vld [vmem:[#allocation8 + $0x1ca8] sm:$0xf0] }
 0x3ee   :  { %v14250_v23 = vld [vmem:[#allocation8 + $0x1d64] sm:$0xf0] }
 0x3ef   :  { %v12708_v12 = vor.u32 %v14250_v23, %v12707_v30  ;;  %v12579_v30 = vld [vmem:[#allocation8 + $0x1c48] sm:$0xf] }
 0x3f0   :  { %7111 = vmatpush.bf16.msrb.mxu1 %v12332_v6  ;;  %7124 = vmatpush.bf16.msrb.mxu2 %v12336_v29  ;;  %v12712_v6 = vor.u32 %v14246_v9, %v12709_v58  ;;  %v14237_v29 = vld [vmem:[#allocation8 + $0x1d04] sm:$0xf]  ;;  %v14218_v23 = vld [vmem:[#allocation8 + $0x1c64] sm:$0xf0]  ;;  %v14214_v9 = vld [vmem:[#allocation8 + $0x1c4c] sm:$0xf] }
 0x3f1   :  { %7137 = vmatpush.bf16.msrb.mxu3 %v12340_v60  ;;  %7150 = vmatpush.bf16.msra.mxu0 %v12344_v46  ;;  %v14238_v60 = vld [vmem:[#allocation8 + $0x1d0c] sm:$0xf]  ;;  %v12672_v13 = vor.u32 %v14237_v29, %v12669_v7 }
 0x3f2   :  { %v12677_v46 = vld [vmem:[#allocation8 + $0x1d28] sm:$0xf0] }
 0x3f3   :  { %v12680_v24 = vor.u32 %v14238_v60, %v12677_v46  ;;  %v12581_v58 = vld [vmem:[#allocation8 + $0x1c68] sm:$0xf0] }
 0x3f4   :  { %7112 = vmatpush.bf16.msrb.mxu1 %v12300_v3  ;;  %7125 = vmatpush.bf16.msrb.mxu2 %v12304_v14  ;;  %v6115_v16 = vpop.f32.mrf.mxu1  ;;  %v12643_v3 = vld [vmem:[#allocation8 + $0x1cc8] sm:$0xf]  ;;  %v12584_v29 = vor.u32 %v14214_v9, %v12581_v58  ;;  %v14206_v60 = vld [vmem:[#allocation8 + $0x1c0c] sm:$0xf]  ;;  %v12683_v9 = vld [vmem:[#allocation8 + $0x1d10] sm:$0xf] }
 0x3f5   :  { %7138 = vmatpush.bf16.msrb.mxu3 %v12308_v1  ;;  %7151 = vmatpush.bf16.msra.mxu0 %v12312_v52  ;;  %v14234_v14 = vld [vmem:[#allocation8 + $0x1ce4] sm:$0xf0]  ;;  %v12603_v1 = vld [vmem:[#allocation8 + $0x1c80] sm:$0xf]  ;;  %v14243_v58 = vld [vmem:[#allocation8 + $0x1d2c] sm:$0xf0] }
 0x3f6   :  { %v14225_v52 = vld [vmem:[#allocation8 + $0x1c9c] sm:$0xf0] }
 0x3f7   :  { %7113 = vmatmul.bf16.vlgmr.msrb.gmra.mxu1 %v15091_v61  ;;  %7126 = vmatmul.bf16.vlgmr.msrb.gmra.mxu2 %v15091_v61  ;;  %v6154_v11 = vpop.f32.mrf.mxu0 }
 0x3f8   :  { %7552 = vmatpush.bf16.msra.mxu1 %v12764_v27  ;;  %7565 = vmatpush.bf16.msra.mxu2 %v12768_v44  ;;  %v15117_v31 = vadd.f32 %v6154_v11, %v15079_v32  ;;  %v12644_v27 = vor.u32 %v14234_v14, %v12643_v3  ;;  %v12648_v44 = vor.u32 %v14230_v34, %v12645_v22  ;;  %v12779_v11 = vld [vmem:[#allocation8 + $0x1dd0] sm:$0xf]  ;;  %v12789_v3 = vld [vmem:[#allocation8 + $0x1df8] sm:$0xf0] }
 0x3f9   :  { %7578 = vmatpush.bf16.msra.mxu3 %v12772_v59  ;;  %7591 = vmatpush.bf16.msrb.mxu0 %v12776_v55  ;;  %v12611_v59 = vld [vmem:[#allocation8 + $0x1c88] sm:$0xf]  ;;  %v12548_v14 = vor.u32 %v14210_v45, %v12547_v15 }
 0x3fa   :  { %7139 = vmatmul.bf16.vlgmr.msrb.gmra.mxu3 %v15091_v61  ;;  %7152 = vmatmul.bf16.vlgmr.msra.gmra.mxu0 %v15091_v61  ;;  %v15114_v61 = vadd.f32 %v6115_v16, %v15076_v39  ;;  %v12636_v39 = vor.u32 %v14233_v56, %v12635_v20  ;;  %v6128_v32 = vpop.f32.mrf.mxu2  ;;  %v12549_v16 = vld [vmem:[#allocation8 + $0x1c28] sm:$0xf0]  ;;  %v12781_v20 = vld [vmem:[#allocation8 + $0x1df0] sm:$0xf0]  ;;  %v12787_v56 = vld [vmem:[#allocation8 + $0x1dd8] sm:$0xf] }
 0x3fb   :  { %v15120_v55 = vadd.f32 %v6128_v32, %v15082_v40  ;;  %v12616_v40 = vor.u32 %v14222_v5, %v12613_v49  ;;  %v12552_v34 = vor.u32 %v14206_v60, %v12549_v16  ;;  %v12749_v32 = vld [vmem:[#allocation8 + $0x1db0] sm:$0xf0]  ;;  %v12684_v60 = vor.u32 %v14243_v58, %v12683_v9  ;;  %v12651_v16 = vld [vmem:[#allocation8 + $0x1cd0] sm:$0xf] }
 0x3fc   :  { %7553 = vmatpush.bf16.msra.mxu1 %v12732_v18  ;;  %7566 = vmatpush.bf16.msra.mxu2 %v12736_v19  ;;  %v6117_v25 = vpop.f32.mrf.mxu1  ;;  %v12604_v19 = vor.u32 %v14225_v52, %v12603_v1  ;;  %v14259_v1 = vld [vmem:[#allocation8 + $0x1dac] sm:$0xf0]  ;;  %v12788_v52 = vor.u32 %v14268_v54, %v12787_v56  ;;  %v14231_v56 = vld [vmem:[#allocation8 + $0x1cd4] sm:$0xf]  ;;  %v14236_v54 = vld [vmem:[#allocation8 + $0x1cf4] sm:$0xf0] }
 0x3fd   :  { %7579 = vmatpush.bf16.msra.mxu3 %v12740_v35  ;;  %7592 = vmatpush.bf16.msrb.mxu0 %v12744_v47  ;;  %v6141_v48 = vpop.f32.mrf.mxu3  ;;  %v14217_v35 = vld [vmem:[#allocation8 + $0x1c5c] sm:$0xf0]  ;;  %v12612_v47 = vor.u32 %v14226_v17, %v12611_v59  ;;  %v14256_v59 = vld [vmem:[#allocation8 + $0x1d9c] sm:$0xf]  ;;  %v15126_v17 = vrot.slane %v15088_v53, 2 }
 0x3fe   :  { %v15123_v8 = vadd.f32 %v6141_v48, %v15085_v36  ;;  %v12539_v36 = vld [vmem:[#allocation8 + $0x1c00] sm:$0xf]  ;;  %v12757_v48 = vld [vmem:[#allocation8 + $0x1db8] sm:$0xf0]  ;;  %v12715_v25 = vld [vmem:[#allocation8 + $0x1d50] sm:$0xf] }
 0x3ff   :  { %v6156_v18 = vpop.f32.mrf.mxu0  ;;  %v14211_v58 = vld [vmem:[#allocation8 + $0x1c2c] sm:$0xf0] }
 0x400   :  { %7554 = vmatpush.bf16.msra.mxu1 %v12700_v57  ;;  %7567 = vmatpush.bf16.msra.mxu2 %v12704_v26  ;;  %v12572_v57 = vor.u32 %v14217_v35, %v12571_v37  ;;  %v12576_v26 = vor.u32 %v14213_v4, %v12573_v51  ;;  %v14251_v18 = vld [vmem:[#allocation8 + $0x1d6c] sm:$0xf0]  ;;  %v14247_v37 = vld [vmem:[#allocation8 + $0x1d54] sm:$0xf]  ;;  %v14248_v4 = vld [vmem:[#allocation8 + $0x1d5c] sm:$0xf] }
 0x401   :  { %7580 = vmatpush.bf16.msra.mxu3 %v12708_v12  ;;  %7593 = vmatpush.bf16.msrb.mxu0 %v12712_v6  ;;  %v12541_v12 = vld [vmem:[#allocation8 + $0x1c20] sm:$0xf0]  ;;  %v12580_v6 = vor.u32 %v14218_v23, %v12579_v30  ;;  %v12717_v35 = vld [vmem:[#allocation8 + $0x1d70] sm:$0xf0]  ;;  %v12725_v51 = vld [vmem:[#allocation8 + $0x1d78] sm:$0xf0]  ;;  %v12716_v30 = vor.u32 %v14251_v18, %v12715_v25 }
 0x402   :  { %v6130_v7 = vpop.f32.mrf.mxu2  ;;  %v12720_v23 = vor.u32 %v14247_v37, %v12717_v35  ;;  %v14215_v35 = vld [vmem:[#allocation8 + $0x1c54] sm:$0xf] }
 0x404   :  { %7555 = vmatpush.bf16.msra.mxu1 %v12668_v42  ;;  %7568 = vmatpush.bf16.msra.mxu2 %v12672_v13  ;;  %v14267_v42 = vld [vmem:[#allocation8 + $0x1dec] sm:$0xf0]  ;;  %v14263_v13 = vld [vmem:[#allocation8 + $0x1dd4] sm:$0xf] }
 0x405   :  { %7581 = vmatpush.bf16.msra.mxu3 %v12676_v10  ;;  %7594 = vmatpush.bf16.msrb.mxu0 %v12680_v24  ;;  %v6143_v46 = vpop.f32.mrf.mxu3  ;;  %v12540_v10 = vor.u32 %v14209_v0, %v12539_v36  ;;  %v12544_v24 = vor.u32 %v14205_v41, %v12541_v12  ;;  %v12780_v22 = vor.u32 %v14267_v42, %v12779_v11  ;;  %v12685_v0 = vld [vmem:[#allocation8 + $0x1d30] sm:$0xf0]  ;;  %v12691_v41 = vld [vmem:[#allocation8 + $0x1d18] sm:$0xf]  ;;  %v14235_v11 = vld [vmem:[#allocation8 + $0x1cec] sm:$0xf0] }
 0x406   :  { %v14244_v12 = vld [vmem:[#allocation8 + $0x1d34] sm:$0xf0] }
 0x408   :  { %7556 = vmatpush.bf16.msra.mxu1 %v12636_v39  ;;  %7569 = vmatpush.bf16.msra.mxu2 %v12640_v63  ;;  %v12784_v39 = vor.u32 %v14263_v13, %v12781_v20  ;;  %v12747_v63 = vld [vmem:[#allocation8 + $0x1d90] sm:$0xf]  ;;  %v12692_v13 = vor.u32 %v14244_v12, %v12691_v41  ;;  %v12563_v12 = vld [vmem:[#allocation8 + $0x1c18] sm:$0xf] }
 0x409   :  { %7582 = vmatpush.bf16.msra.mxu3 %v12644_v27  ;;  %7595 = vmatpush.bf16.msrb.mxu0 %v12648_v44  ;;  %v12792_v27 = vor.u32 %v14264_v2, %v12789_v3  ;;  %v14255_v44 = vld [vmem:[#allocation8 + $0x1d94] sm:$0xf]  ;;  %v12748_v5 = vor.u32 %v14259_v1, %v12747_v63  ;;  %v14232_v2 = vld [vmem:[#allocation8 + $0x1cdc] sm:$0xf] }
 0x40a   :  { %v12752_v49 = vor.u32 %v14255_v44, %v12749_v32  ;;  %v12661_v3 = vld [vmem:[#allocation8 + $0x1cf8] sm:$0xf0]  ;;  %v14223_v1 = vld [vmem:[#allocation8 + $0x1c94] sm:$0xf] }
 0x40b   :  { %v12664_v63 = vor.u32 %v14232_v2, %v12661_v3 }
 0x40c   :  { %7557 = vmatpush.bf16.msra.mxu1 %v12604_v19  ;;  %7570 = vmatpush.bf16.msra.mxu2 %v12608_v38  ;;  %v12756_v19 = vor.u32 %v14260_v50, %v12755_v21  ;;  %v12760_v38 = vor.u32 %v14256_v59, %v12757_v48  ;;  %v14228_v21 = vld [vmem:[#allocation8 + $0x1cb4] sm:$0xf0]  ;;  %v14224_v50 = vld [vmem:[#allocation8 + $0x1c9c] sm:$0xf] }
 0x40d   :  { %7583 = vmatpush.bf16.msra.mxu3 %v12612_v47  ;;  %7596 = vmatpush.bf16.msrb.mxu0 %v12616_v40  ;;  %v12723_v47 = vld [vmem:[#allocation8 + $0x1d58] sm:$0xf]  ;;  %v12629_v59 = vld [vmem:[#allocation8 + $0x1cb8] sm:$0xf0] }
 0x40e   :  { %v14252_v40 = vld [vmem:[#allocation8 + $0x1d74] sm:$0xf0] }
 0x40f   :  { %v12724_v36 = vor.u32 %v14252_v40, %v12723_v47  ;;  %v12589_v47 = vld [vmem:[#allocation8 + $0x1c70] sm:$0xf0]  ;;  %v12595_v40 = vld [vmem:[#allocation8 + $0x1c58] sm:$0xf] }
 0x410   :  { %7558 = vmatpush.bf16.msra.mxu1 %v12572_v57  ;;  %7571 = vmatpush.bf16.msra.mxu2 %v12576_v26  ;;  %v12728_v57 = vor.u32 %v14248_v4, %v12725_v51  ;;  %v14239_v26 = vld [vmem:[#allocation8 + $0x1d14] sm:$0xf]  ;;  %v14220_v4 = vld [vmem:[#allocation8 + $0x1c74] sm:$0xf0]  ;;  %v14216_v51 = vld [vmem:[#allocation8 + $0x1c5c] sm:$0xf]  ;;  %v12592_v9 = vor.u32 %v14215_v35, %v12589_v47 }
 0x411   :  { %7584 = vmatpush.bf16.msra.mxu3 %v12580_v6  ;;  %7597 = vmatpush.bf16.msrb.mxu0 %v12584_v29  ;;  %v14240_v6 = vld [vmem:[#allocation8 + $0x1d1c] sm:$0xf]  ;;  %v12688_v46 = vor.u32 %v14239_v26, %v12685_v0  ;;  %v12596_v26 = vor.u32 %v14220_v4, %v12595_v40  ;;  %v14310_v35 = vld [vmem:[#allocation8 + $0x1f4c] sm:$0xf] }
 0x412   :  { %v12693_v29 = vld [vmem:[#allocation8 + $0x1d38] sm:$0xf0]  ;;  %v12965_v47 = vld [vmem:[#allocation8 + $0x1f68] sm:$0xf0] }
 0x413   :  { %v12696_v20 = vor.u32 %v14240_v6, %v12693_v29  ;;  %v14212_v6 = vld [vmem:[#allocation8 + $0x1c34] sm:$0xf0]  ;;  %v14208_v29 = vld [vmem:[#allocation8 + $0x1c1c] sm:$0xf] }
 0x414   :  { %7559 = vmatpush.bf16.msra.mxu1 %v12540_v10  ;;  %7572 = vmatpush.bf16.msra.mxu2 %v12544_v24  ;;  %v6560_v7 = vpop.f32.mrf.mxu1  ;;  %v12653_v10 = vld [vmem:[#allocation8 + $0x1cf0] sm:$0xf0]  ;;  %v12659_v24 = vld [vmem:[#allocation8 + $0x1cd8] sm:$0xf]  ;;  %v12564_v2 = vor.u32 %v14212_v6, %v12563_v12 }
 0x415   :  { %7585 = vmatpush.bf16.msra.mxu3 %v12548_v14  ;;  %7598 = vmatpush.bf16.msrb.mxu0 %v12552_v34  ;;  %v15133_v15 = vadd.f32 %v6560_v7, %v15098_v62  ;;  %v12652_v62 = vor.u32 %v14235_v11, %v12651_v16  ;;  %v12656_v14 = vor.u32 %v14231_v56, %v12653_v10  ;;  %v12619_v34 = vld [vmem:[#allocation8 + $0x1c90] sm:$0xf]  ;;  %v14325_v16 = vld [vmem:[#allocation8 + $0x1fc4] sm:$0xf]  ;;  %v14330_v10 = vld [vmem:[#allocation8 + $0x1fe4] sm:$0xf0] }
 0x416   :  { %v13021_v11 = vld [vmem:[#allocation8 + $0x1fe0] sm:$0xf0] }
 0x417   :  { %7560 = vmatmul.bf16.vlgmr.msra.gmra.mxu1 %v15126_v17  ;;  %7573 = vmatmul.bf16.vlgmr.msra.gmra.mxu2 %v15126_v17  ;;  %v6599_v45 = vpop.f32.mrf.mxu0 }
 0x418   :  { %7604 = vmatpush.bf16.msrb.mxu1 %v12780_v22  ;;  %7617 = vmatpush.bf16.msrb.mxu2 %v12784_v39  ;;  %v15136_v42 = vadd.f32 %v6599_v45, %v15101_v43  ;;  %v14227_v22 = vld [vmem:[#allocation8 + $0x1cac] sm:$0xf0]  ;;  %v12660_v39 = vor.u32 %v14236_v54, %v12659_v24  ;;  %v12565_v45 = vld [vmem:[#allocation8 + $0x1c38] sm:$0xf0]  ;;  %v14326_v24 = vld [vmem:[#allocation8 + $0x1fcc] sm:$0xf] }
 0x419   :  { %7630 = vmatpush.bf16.msrb.mxu3 %v12788_v52  ;;  %7643 = vmatpush.bf16.msra.mxu0 %v12792_v27  ;;  %v12621_v52 = vld [vmem:[#allocation8 + $0x1cb0] sm:$0xf0]  ;;  %v12627_v27 = vld [vmem:[#allocation8 + $0x1c98] sm:$0xf]  ;;  %v12620_v25 = vor.u32 %v14227_v22, %v12619_v34  ;;  %v13029_v54 = vld [vmem:[#allocation8 + $0x1fe8] sm:$0xf0]  ;;  %v12568_v3 = vor.u32 %v14208_v29, %v12565_v45 }
 0x41a   :  { %7586 = vmatmul.bf16.vlgmr.msra.gmra.mxu3 %v15126_v17  ;;  %7599 = vmatmul.bf16.vlgmr.msrb.gmra.mxu0 %v15126_v17  ;;  %v6573_v43 = vpop.f32.mrf.mxu2  ;;  %v12624_v18 = vor.u32 %v14223_v1, %v12621_v52  ;;  %v12628_v37 = vor.u32 %v14228_v21, %v12627_v27  ;;  %v12987_v34 = vld [vmem:[#allocation8 + $0x1f80] sm:$0xf]  ;;  %v12989_v1 = vld [vmem:[#allocation8 + $0x1fa0] sm:$0xf0]  ;;  %v12995_v52 = vld [vmem:[#allocation8 + $0x1f88] sm:$0xf] }
 0x41b   :  { %v15139_v44 = vadd.f32 %v6573_v43, %v15104_v33  ;;  %v12632_v33 = vor.u32 %v14224_v50, %v12629_v59  ;;  %v14321_v22 = vld [vmem:[#allocation8 + $0x1f9c] sm:$0xf0]  ;;  %v14317_v43 = vld [vmem:[#allocation8 + $0x1f84] sm:$0xf]  ;;  %v14322_v27 = vld [vmem:[#allocation8 + $0x1fa4] sm:$0xf0] }
 0x41c   :  { %7605 = vmatpush.bf16.msrb.mxu1 %v12748_v5  ;;  %7618 = vmatpush.bf16.msrb.mxu2 %v12752_v49  ;;  %v6562_v5 = vpop.f32.mrf.mxu1  ;;  %v12997_v21 = vld [vmem:[#allocation8 + $0x1fa8] sm:$0xf0]  ;;  %v12988_v50 = vor.u32 %v14321_v22, %v12987_v34  ;;  %v12992_v59 = vor.u32 %v14317_v43, %v12989_v1  ;;  %v14297_v45 = vld [vmem:[#allocation8 + $0x1edc] sm:$0xf0]  ;;  %v14285_v34 = vld [vmem:[#allocation8 + $0x1e84] sm:$0xf] }
 0x41d   :  { %7631 = vmatpush.bf16.msrb.mxu3 %v12756_v19  ;;  %7644 = vmatpush.bf16.msra.mxu0 %v12760_v38  ;;  %v6586_v32 = vpop.f32.mrf.mxu3  ;;  %v12587_v19 = vld [vmem:[#allocation8 + $0x1c50] sm:$0xf]  ;;  %v12955_v5 = vld [vmem:[#allocation8 + $0x1f40] sm:$0xf]  ;;  %v12861_v22 = vld [vmem:[#allocation8 + $0x1ea0] sm:$0xf0] }
 0x41e   :  { %v15142_v48 = vadd.f32 %v6586_v32, %v15107_v28  ;;  %v14219_v38 = vld [vmem:[#allocation8 + $0x1c6c] sm:$0xf0]  ;;  %v14318_v32 = vld [vmem:[#allocation8 + $0x1f8c] sm:$0xf]  ;;  %v14290_v1 = vld [vmem:[#allocation8 + $0x1ea4] sm:$0xf0] }
 0x41f   :  { %v6601_v49 = vpop.f32.mrf.mxu0  ;;  %v12555_v28 = vld [vmem:[#allocation8 + $0x1c10] sm:$0xf] }
 0x420   :  { %7606 = vmatpush.bf16.msrb.mxu1 %v12716_v30  ;;  %7619 = vmatpush.bf16.msrb.mxu2 %v12720_v23  ;;  %v12597_v30 = vld [vmem:[#allocation8 + $0x1c78] sm:$0xf0]  ;;  %v12588_v23 = vor.u32 %v14219_v38, %v12587_v19  ;;  %v14313_v49 = vld [vmem:[#allocation8 + $0x1f5c] sm:$0xf0]  ;;  %v14309_v19 = vld [vmem:[#allocation8 + $0x1f44] sm:$0xf] }
 0x421   :  { %7632 = vmatpush.bf16.msrb.mxu3 %v12724_v36  ;;  %7645 = vmatpush.bf16.msra.mxu0 %v12728_v57  ;;  %v14207_v36 = vld [vmem:[#allocation8 + $0x1c14] sm:$0xf]  ;;  %v12600_v0 = vor.u32 %v14216_v51, %v12597_v30  ;;  %v12957_v38 = vld [vmem:[#allocation8 + $0x1f60] sm:$0xf0]  ;;  %v12956_v40 = vor.u32 %v14313_v49, %v12955_v5  ;;  %v12923_v51 = vld [vmem:[#allocation8 + $0x1f00] sm:$0xf]  ;;  %v12864_v5 = vor.u32 %v14285_v34, %v12861_v22 }
 0x422   :  { %v12557_v57 = vld [vmem:[#allocation8 + $0x1c30] sm:$0xf0]  ;;  %v6575_v41 = vpop.f32.mrf.mxu2  ;;  %v12960_v4 = vor.u32 %v14309_v19, %v12957_v38  ;;  %v14305_v30 = vld [vmem:[#allocation8 + $0x1f1c] sm:$0xf0]  ;;  %v14277_v19 = vld [vmem:[#allocation8 + $0x1e44] sm:$0xf] }
 0x423   :  { %v12560_v56 = vor.u32 %v14207_v36, %v12557_v57  ;;  %v12931_v36 = vld [vmem:[#allocation8 + $0x1f08] sm:$0xf]  ;;  %v12924_v6 = vor.u32 %v14305_v30, %v12923_v51  ;;  %v12827_v49 = vld [vmem:[#allocation8 + $0x1e40] sm:$0xf]  ;;  %v12829_v38 = vld [vmem:[#allocation8 + $0x1e60] sm:$0xf0] }
 0x424   :  { %7607 = vmatpush.bf16.msrb.mxu1 %v12684_v60  ;;  %7620 = vmatpush.bf16.msrb.mxu2 %v12688_v46  ;;  %v13019_v60 = vld [vmem:[#allocation8 + $0x1fc0] sm:$0xf]  ;;  %v14306_v57 = vld [vmem:[#allocation8 + $0x1f24] sm:$0xf0]  ;;  %v14269_v30 = vld [vmem:[#allocation8 + $0x1e04] sm:$0xf] }
 0x425   :  { %7633 = vmatpush.bf16.msrb.mxu3 %v12692_v13  ;;  %7646 = vmatpush.bf16.msra.mxu0 %v12696_v20  ;;  %v6588_v7 = vpop.f32.mrf.mxu3  ;;  %v14329_v46 = vld [vmem:[#allocation8 + $0x1fdc] sm:$0xf0]  ;;  %v13027_v13 = vld [vmem:[#allocation8 + $0x1fc8] sm:$0xf]  ;;  %v12556_v20 = vor.u32 %v14211_v58, %v12555_v28  ;;  %v12925_v58 = vld [vmem:[#allocation8 + $0x1f20] sm:$0xf0] }
 0x426   :  { %v12891_v7 = vld [vmem:[#allocation8 + $0x1ec0] sm:$0xf]  ;;  %v13011_v34 = vld [vmem:[#allocation8 + $0x1f98] sm:$0xf] }
 0x427   :  { %v14273_v51 = vld [vmem:[#allocation8 + $0x1e1c] sm:$0xf0]  ;;  %v14324_v22 = vld [vmem:[#allocation8 + $0x1fb4] sm:$0xf0] }
 0x428   :  { %7608 = vmatpush.bf16.msrb.mxu1 %v12652_v62  ;;  %7621 = vmatpush.bf16.msrb.mxu2 %v12656_v14  ;;  %v13020_v62 = vor.u32 %v14329_v46, %v13019_v60  ;;  %v13024_v14 = vor.u32 %v14325_v16, %v13021_v11  ;;  %v12932_v46 = vor.u32 %v14306_v57, %v12931_v36  ;;  %v14293_v11 = vld [vmem:[#allocation8 + $0x1ec4] sm:$0xf]  ;;  %v12803_v36 = vld [vmem:[#allocation8 + $0x1e08] sm:$0xf] }
 0x429   :  { %7634 = vmatpush.bf16.msrb.mxu3 %v12660_v39  ;;  %7647 = vmatpush.bf16.msra.mxu0 %v12664_v63  ;;  %v13028_v39 = vor.u32 %v14330_v10, %v13027_v13  ;;  %v13032_v63 = vor.u32 %v14326_v24, %v13029_v54  ;;  %v12893_v13 = vld [vmem:[#allocation8 + $0x1ee0] sm:$0xf0]  ;;  %v14294_v10 = vld [vmem:[#allocation8 + $0x1ecc] sm:$0xf]  ;;  %v14274_v57 = vld [vmem:[#allocation8 + $0x1e24] sm:$0xf0] }
 0x42a   :  { %v12901_v24 = vld [vmem:[#allocation8 + $0x1ee8] sm:$0xf0]  ;;  %v12896_v54 = vor.u32 %v14293_v11, %v12893_v13  ;;  %v14332_v11 = vld [vmem:[#allocation8 + $0x1ff4] sm:$0xf0]  ;;  %v14328_v13 = vld [vmem:[#allocation8 + $0x1fdc] sm:$0xf] }
 0x42c   :  { %7609 = vmatpush.bf16.msrb.mxu1 %v12620_v25  ;;  %7622 = vmatpush.bf16.msrb.mxu2 %v12624_v18  ;;  %v12996_v25 = vor.u32 %v14322_v27, %v12995_v52  ;;  %v13000_v18 = vor.u32 %v14318_v32, %v12997_v21  ;;  %v14286_v52 = vld [vmem:[#allocation8 + $0x1e8c] sm:$0xf] }
 0x42d   :  { %7635 = vmatpush.bf16.msrb.mxu3 %v12628_v37  ;;  %7648 = vmatpush.bf16.msra.mxu0 %v12632_v33  ;;  %v12963_v37 = vld [vmem:[#allocation8 + $0x1f48] sm:$0xf]  ;;  %v12869_v27 = vld [vmem:[#allocation8 + $0x1ea8] sm:$0xf0] }
 0x42e   :  { %v14314_v33 = vld [vmem:[#allocation8 + $0x1f64] sm:$0xf0] }
 0x42f   :  { %v12964_v28 = vor.u32 %v14314_v33, %v12963_v37  ;;  %v12835_v37 = vld [vmem:[#allocation8 + $0x1e48] sm:$0xf] }
 0x430   :  { %7610 = vmatpush.bf16.msrb.mxu1 %v12588_v23  ;;  %7623 = vmatpush.bf16.msrb.mxu2 %v12592_v9  ;;  %v12968_v23 = vor.u32 %v14310_v35, %v12965_v47  ;;  %v14301_v9 = vld [vmem:[#allocation8 + $0x1f04] sm:$0xf]  ;;  %v14282_v33 = vld [vmem:[#allocation8 + $0x1e64] sm:$0xf0]  ;;  %v14278_v35 = vld [vmem:[#allocation8 + $0x1e4c] sm:$0xf] }
 0x431   :  { %7636 = vmatpush.bf16.msrb.mxu3 %v12596_v26  ;;  %7649 = vmatpush.bf16.msra.mxu0 %v12600_v0  ;;  %v14302_v26 = vld [vmem:[#allocation8 + $0x1f0c] sm:$0xf]  ;;  %v12928_v29 = vor.u32 %v14301_v9, %v12925_v58 }
 0x432   :  { %v12933_v0 = vld [vmem:[#allocation8 + $0x1f28] sm:$0xf0] }
 0x433   :  { %v12936_v16 = vor.u32 %v14302_v26, %v12933_v0  ;;  %v12837_v47 = vld [vmem:[#allocation8 + $0x1e68] sm:$0xf0] }
 0x434   :  { %7611 = vmatpush.bf16.msrb.mxu1 %v12556_v20  ;;  %7624 = vmatpush.bf16.msrb.mxu2 %v12560_v56  ;;  %v6612_v41 = vpop.f32.mrf.mxu1  ;;  %v12899_v20 = vld [vmem:[#allocation8 + $0x1ec8] sm:$0xf]  ;;  %v12840_v9 = vor.u32 %v14278_v35, %v12837_v47  ;;  %v14270_v26 = vld [vmem:[#allocation8 + $0x1e0c] sm:$0xf]  ;;  %v14307_v35 = vld [vmem:[#allocation8 + $0x1f2c] sm:$0xf0] }
 0x435   :  { %7637 = vmatpush.bf16.msrb.mxu3 %v12564_v2  ;;  %7650 = vmatpush.bf16.msra.mxu0 %v12568_v3  ;;  %v14298_v56 = vld [vmem:[#allocation8 + $0x1ee4] sm:$0xf0]  ;;  %v12859_v2 = vld [vmem:[#allocation8 + $0x1e80] sm:$0xf] }
 0x436   :  { %v14289_v3 = vld [vmem:[#allocation8 + $0x1e9c] sm:$0xf0] }
 0x437   :  { %7612 = vmatmul.bf16.vlgmr.msrb.gmra.mxu1 %v15126_v17  ;;  %7625 = vmatmul.bf16.vlgmr.msrb.gmra.mxu2 %v15126_v17  ;;  %v6651_v12 = vpop.f32.mrf.mxu0 }
 0x438   :  { %8051 = vmatpush.bf16.msra.mxu1 %v13020_v62  ;;  %8064 = vmatpush.bf16.msra.mxu2 %v13024_v14  ;;  %v15152_v60 = vadd.f32 %v6651_v12, %v15117_v31  ;;  %v12900_v62 = vor.u32 %v14298_v56, %v12899_v20  ;;  %v12904_v14 = vor.u32 %v14294_v10, %v12901_v24  ;;  %v13035_v12 = vld [vmem:[#allocation8 + $0x1fd0] sm:$0xf]  ;;  %v13045_v20 = vld [vmem:[#allocation8 + $0x1ff8] sm:$0xf0] }
 0x439   :  { %8077 = vmatpush.bf16.msra.mxu3 %v13028_v39  ;;  %8090 = vmatpush.bf16.msrb.mxu0 %v13032_v63  ;;  %v12867_v39 = vld [vmem:[#allocation8 + $0x1e88] sm:$0xf]  ;;  %v12804_v56 = vor.u32 %v14274_v57, %v12803_v36 }
 0x43a   :  { %7638 = vmatmul.bf16.vlgmr.msrb.gmra.mxu3 %v15126_v17  ;;  %7651 = vmatmul.bf16.vlgmr.msra.gmra.mxu0 %v15126_v17  ;;  %v15149_v17 = vadd.f32 %v6612_v41, %v15114_v61  ;;  %v12892_v61 = vor.u32 %v14297_v45, %v12891_v7  ;;  %v6625_v31 = vpop.f32.mrf.mxu2  ;;  %v12805_v41 = vld [vmem:[#allocation8 + $0x1e28] sm:$0xf0]  ;;  %v13037_v7 = vld [vmem:[#allocation8 + $0x1ff0] sm:$0xf0]  ;;  %v13043_v45 = vld [vmem:[#allocation8 + $0x1fd8] sm:$0xf] }
 0x43b   :  { %v15155_v63 = vadd.f32 %v6625_v31, %v15120_v55  ;;  %v12872_v55 = vor.u32 %v14286_v52, %v12869_v27  ;;  %v12808_v10 = vor.u32 %v14270_v26, %v12805_v41  ;;  %v13005_v31 = vld [vmem:[#allocation8 + $0x1fb0] sm:$0xf0]  ;;  %v14299_v41 = vld [vmem:[#allocation8 + $0x1eec] sm:$0xf0] }
 0x43c   :  { %8052 = vmatpush.bf16.msra.mxu1 %v12988_v50  ;;  %8065 = vmatpush.bf16.msra.mxu2 %v12992_v59  ;;  %v6614_v21 = vpop.f32.mrf.mxu1  ;;  %v12860_v59 = vor.u32 %v14289_v3, %v12859_v2  ;;  %v14323_v2 = vld [vmem:[#allocation8 + $0x1fac] sm:$0xf0]  ;;  %v13044_v3 = vor.u32 %v14332_v11, %v13043_v45  ;;  %v12909_v45 = vld [vmem:[#allocation8 + $0x1ef0] sm:$0xf0]  ;;  %v14296_v11 = vld [vmem:[#allocation8 + $0x1edc] sm:$0xf] }
 0x43d   :  { %8078 = vmatpush.bf16.msra.mxu3 %v12996_v25  ;;  %8091 = vmatpush.bf16.msrb.mxu0 %v13000_v18  ;;  %v6638_v43 = vpop.f32.mrf.mxu3  ;;  %v14281_v25 = vld [vmem:[#allocation8 + $0x1e5c] sm:$0xf0]  ;;  %v12868_v18 = vor.u32 %v14290_v1, %v12867_v39  ;;  %v14320_v39 = vld [vmem:[#allocation8 + $0x1f9c] sm:$0xf]  ;;  %v15161_v1 = vrot.slane %v15088_v53, 3 }
 0x43e   :  { %v15158_v32 = vadd.f32 %v6638_v43, %v15123_v8  ;;  %v12795_v8 = vld [vmem:[#allocation8 + $0x1e00] sm:$0xf]  ;;  %v13013_v43 = vld [vmem:[#allocation8 + $0x1fb8] sm:$0xf0]  ;;  %v12971_v21 = vld [vmem:[#allocation8 + $0x1f50] sm:$0xf] }
 0x43f   :  { %v6653_v50 = vpop.f32.mrf.mxu0 }
 0x440   :  { %8053 = vmatpush.bf16.msra.mxu1 %v12956_v40  ;;  %8066 = vmatpush.bf16.msra.mxu2 %v12960_v4  ;;  %v12828_v40 = vor.u32 %v14281_v25, %v12827_v49  ;;  %v12832_v4 = vor.u32 %v14277_v19, %v12829_v38  ;;  %v14315_v50 = vld [vmem:[#allocation8 + $0x1f6c] sm:$0xf0]  ;;  %v14311_v49 = vld [vmem:[#allocation8 + $0x1f54] sm:$0xf]  ;;  %v14312_v19 = vld [vmem:[#allocation8 + $0x1f5c] sm:$0xf] }
 0x441   :  { %8079 = vmatpush.bf16.msra.mxu3 %v12964_v28  ;;  %8092 = vmatpush.bf16.msrb.mxu0 %v12968_v23  ;;  %v12797_v28 = vld [vmem:[#allocation8 + $0x1e20] sm:$0xf0]  ;;  %v12836_v23 = vor.u32 %v14282_v33, %v12835_v37  ;;  %v12973_v25 = vld [vmem:[#allocation8 + $0x1f70] sm:$0xf0]  ;;  %v12981_v38 = vld [vmem:[#allocation8 + $0x1f78] sm:$0xf0]  ;;  %v12972_v53 = vor.u32 %v14315_v50, %v12971_v21 }
 0x442   :  { %v6627_v58 = vpop.f32.mrf.mxu2  ;;  %v12976_v37 = vor.u32 %v14311_v49, %v12973_v25  ;;  %v12939_v33 = vld [vmem:[#allocation8 + $0x1f10] sm:$0xf]  ;;  %v14279_v49 = vld [vmem:[#allocation8 + $0x1e54] sm:$0xf] }
 0x443   :  { %v12940_v57 = vor.u32 %v14307_v35, %v12939_v33  ;;  %v12843_v50 = vld [vmem:[#allocation8 + $0x1e50] sm:$0xf]  ;;  %v12845_v25 = vld [vmem:[#allocation8 + $0x1e70] sm:$0xf0] }
 0x444   :  { %8054 = vmatpush.bf16.msra.mxu1 %v12924_v6  ;;  %8067 = vmatpush.bf16.msra.mxu2 %v12928_v29  ;;  %v14331_v6 = vld [vmem:[#allocation8 + $0x1fec] sm:$0xf0]  ;;  %v14327_v29 = vld [vmem:[#allocation8 + $0x1fd4] sm:$0xf] }
 0x445   :  { %8080 = vmatpush.bf16.msra.mxu3 %v12932_v46  ;;  %8093 = vmatpush.bf16.msrb.mxu0 %v12936_v16  ;;  %v6640_v0 = vpop.f32.mrf.mxu3  ;;  %v12796_v46 = vor.u32 %v14273_v51, %v12795_v8  ;;  %v12800_v16 = vor.u32 %v14269_v30, %v12797_v28  ;;  %v13036_v24 = vor.u32 %v14331_v6, %v13035_v12  ;;  %v12947_v51 = vld [vmem:[#allocation8 + $0x1f18] sm:$0xf]  ;;  %v14304_v28 = vld [vmem:[#allocation8 + $0x1f1c] sm:$0xf]  ;;  %v14275_v33 = vld [vmem:[#allocation8 + $0x1e2c] sm:$0xf0] }
 0x446   :  { %v12984_v8 = vor.u32 %v14312_v19, %v12981_v38  ;;  %v14308_v30 = vld [vmem:[#allocation8 + $0x1f34] sm:$0xf0]  ;;  %v12907_v0 = vld [vmem:[#allocation8 + $0x1ed0] sm:$0xf]  ;;  %v14280_v19 = vld [vmem:[#allocation8 + $0x1e5c] sm:$0xf] }
 0x447   :  { %v12948_v6 = vor.u32 %v14308_v30, %v12947_v51  ;;  %v12853_v38 = vld [vmem:[#allocation8 + $0x1e78] sm:$0xf0]  ;;  %v12819_v51 = vld [vmem:[#allocation8 + $0x1e18] sm:$0xf] }
 0x448   :  { %8055 = vmatpush.bf16.msra.mxu1 %v12892_v61  ;;  %8068 = vmatpush.bf16.msra.mxu2 %v12896_v54  ;;  %v13040_v61 = vor.u32 %v14327_v29, %v13037_v7  ;;  %v13003_v54 = vld [vmem:[#allocation8 + $0x1f90] sm:$0xf]  ;;  %v14295_v7 = vld [vmem:[#allocation8 + $0x1ed4] sm:$0xf] }
 0x449   :  { %8081 = vmatpush.bf16.msra.mxu3 %v12900_v62  ;;  %8094 = vmatpush.bf16.msrb.mxu0 %v12904_v14  ;;  %v13048_v62 = vor.u32 %v14328_v13, %v13045_v20  ;;  %v14319_v14 = vld [vmem:[#allocation8 + $0x1f94] sm:$0xf]  ;;  %v13004_v52 = vor.u32 %v14323_v2, %v13003_v54  ;;  %v12917_v13 = vld [vmem:[#allocation8 + $0x1ef8] sm:$0xf0]  ;;  %v12912_v20 = vor.u32 %v14295_v7, %v12909_v45 }
 0x44a   :  { %v13008_v27 = vor.u32 %v14319_v14, %v13005_v31  ;;  %v14287_v54 = vld [vmem:[#allocation8 + $0x1e94] sm:$0xf]  ;;  %v14292_v31 = vld [vmem:[#allocation8 + $0x1eb4] sm:$0xf0] }
 0x44b   :  { %v12877_v2 = vld [vmem:[#allocation8 + $0x1eb0] sm:$0xf0] }
 0x44c   :  { %8056 = vmatpush.bf16.msra.mxu1 %v12860_v59  ;;  %8069 = vmatpush.bf16.msra.mxu2 %v12864_v5  ;;  %v13012_v59 = vor.u32 %v14324_v22, %v13011_v34  ;;  %v13016_v5 = vor.u32 %v14320_v39, %v13013_v43  ;;  %v14288_v34 = vld [vmem:[#allocation8 + $0x1e9c] sm:$0xf]  ;;  %v12880_v21 = vor.u32 %v14287_v54, %v12877_v2  ;;  %v14348_v54 = vld [vmem:[#allocation11 + $0x78] sm:$0xff] }
 0x44d   :  { %8082 = vmatpush.bf16.msra.mxu3 %v12868_v18  ;;  %8095 = vmatpush.bf16.msrb.mxu0 %v12872_v55  ;;  %v12979_v18 = vld [vmem:[#allocation8 + $0x1f58] sm:$0xf]  ;;  %v12885_v22 = vld [vmem:[#allocation8 + $0x1eb8] sm:$0xf0]  ;;  %v14356_v2 = vld [vmem:[#allocation11 + $0xb8] sm:$0xff] }
 0x44e   :  { %v14316_v55 = vld [vmem:[#allocation8 + $0x1f74] sm:$0xf0] }
 0x44f   :  { %v12980_v47 = vor.u32 %v14316_v55, %v12979_v18  ;;  %v12851_v18 = vld [vmem:[#allocation8 + $0x1e58] sm:$0xf] }
 0x450   :  { %8057 = vmatpush.bf16.msra.mxu1 %v12828_v40  ;;  %8070 = vmatpush.bf16.msra.mxu2 %v12832_v4  ;;  %v14303_v40 = vld [vmem:[#allocation8 + $0x1f14] sm:$0xf]  ;;  %v14284_v55 = vld [vmem:[#allocation8 + $0x1e74] sm:$0xf0] }
 0x451   :  { %8083 = vmatpush.bf16.msra.mxu3 %v12836_v23  ;;  %8096 = vmatpush.bf16.msrb.mxu0 %v12840_v9  ;;  %v12941_v4 = vld [vmem:[#allocation8 + $0x1f30] sm:$0xf0]  ;;  %v12949_v23 = vld [vmem:[#allocation8 + $0x1f38] sm:$0xf0]  ;;  %v12852_v35 = vor.u32 %v14284_v55, %v12851_v18  ;;  %v14353_v18 = vld [vmem:[#allocation11 + $0xa0] sm:$0xff] }
 0x452   :  { %v12944_v26 = vor.u32 %v14303_v40, %v12941_v4  ;;  %v12952_v29 = vor.u32 %v14304_v28, %v12949_v23  ;;  %v14271_v40 = vld [vmem:[#allocation8 + $0x1e14] sm:$0xf]  ;;  %v14276_v28 = vld [vmem:[#allocation8 + $0x1e34] sm:$0xf0]  ;;  %v14272_v23 = vld [vmem:[#allocation8 + $0x1e1c] sm:$0xf] }
 0x453   :  { %v12813_v4 = vld [vmem:[#allocation8 + $0x1e30] sm:$0xf0]  ;;  %v14361_v55 = vld [vmem:[#allocation11 + $0xe0] sm:$0xff] }
 0x454   :  { %8058 = vmatpush.bf16.msra.mxu1 %v12796_v46  ;;  %8071 = vmatpush.bf16.msra.mxu2 %v12800_v16  ;;  %v7062_v9 = vpop.f32.mrf.mxu1  ;;  %v12915_v46 = vld [vmem:[#allocation8 + $0x1ed8] sm:$0xf] }
 0x455   :  { %8084 = vmatpush.bf16.msra.mxu3 %v12804_v56  ;;  %8097 = vmatpush.bf16.msrb.mxu0 %v12808_v10  ;;  %v15168_v58 = vadd.f32 %v7062_v9, %v15133_v15  ;;  %v14300_v16 = vld [vmem:[#allocation8 + $0x1ef4] sm:$0xf0]  ;;  %v12908_v15 = vor.u32 %v14299_v41, %v12907_v0  ;;  %v12875_v56 = vld [vmem:[#allocation8 + $0x1e90] sm:$0xf]  ;;  %v12821_v9 = vld [vmem:[#allocation8 + $0x1e38] sm:$0xf0] }
 0x456   :  { %v14291_v10 = vld [vmem:[#allocation8 + $0x1eac] sm:$0xf0]  ;;  %v12824_v0 = vor.u32 %v14272_v23, %v12821_v9 }
 0x457   :  { %8059 = vmatmul.bf16.vlgmr.msra.gmra.mxu1 %v15161_v1  ;;  %8072 = vmatmul.bf16.vlgmr.msra.gmra.mxu2 %v15161_v1  ;;  %v7101_v36 = vpop.f32.mrf.mxu0  ;;  %v14342_v23 = vld [vmem:[#allocation11 + $0x48] sm:$0xff] }
 0x458   :  { %8103 = vmatpush.bf16.msrb.mxu1 %v13036_v24  ;;  %8116 = vmatpush.bf16.msrb.mxu2 %v13040_v61  ;;  %v15171_v12 = vadd.f32 %v7101_v36, %v15136_v42  ;;  %v12916_v24 = vor.u32 %v14300_v16, %v12915_v46  ;;  %v12920_v61 = vor.u32 %v14296_v11, %v12917_v13  ;;  %v14350_v9 = vld [vmem:[#allocation11 + $0x88] sm:$0xff] }
 0x459   :  { %8129 = vmatpush.bf16.msrb.mxu3 %v13044_v3  ;;  %8142 = vmatpush.bf16.msra.mxu0 %v13048_v62  ;;  %v12883_v3 = vld [vmem:[#allocation8 + $0x1e98] sm:$0xf] }
 0x45a   :  { %8085 = vmatmul.bf16.vlgmr.msra.gmra.mxu3 %v15161_v1  ;;  %8098 = vmatmul.bf16.vlgmr.msrb.gmra.mxu0 %v15161_v1  ;;  %v7075_v42 = vpop.f32.mrf.mxu2 }
 0x45b   :  { %v15174_v62 = vadd.f32 %v7075_v42, %v15139_v44  ;;  %v12888_v44 = vor.u32 %v14288_v34, %v12885_v22  ;;  %v14347_v34 = vld [vmem:[#allocation11 + $0x70] sm:$0xff] }
 0x45c   :  { %8104 = vmatpush.bf16.msrb.mxu1 %v13004_v52  ;;  %8117 = vmatpush.bf16.msrb.mxu2 %v13008_v27  ;;  %v7064_v43 = vpop.f32.mrf.mxu1  ;;  %v12876_v27 = vor.u32 %v14291_v10, %v12875_v56  ;;  %v14363_v22 = vld [vmem:[#allocation11 + $0xf0] sm:$0xff] }
 0x45d   :  { %8130 = vmatpush.bf16.msrb.mxu3 %v13012_v59  ;;  %8143 = vmatpush.bf16.msra.mxu0 %v13016_v5  ;;  %v7088_v14 = vpop.f32.mrf.mxu3  ;;  %v14283_v59 = vld [vmem:[#allocation8 + $0x1e6c] sm:$0xf0]  ;;  %v12884_v5 = vor.u32 %v14292_v31, %v12883_v3 }
 0x45e   :  { %v15177_v39 = vadd.f32 %v7088_v14, %v15142_v48  ;;  %v12844_v48 = vor.u32 %v14283_v59, %v12843_v50  ;;  %v14364_v14 = vld [vmem:[#allocation11 + $0xf8] sm:$0xff]  ;;  %v14346_v50 = vld [vmem:[#allocation11 + $0x68] sm:$0xff] }
 0x45f   :  { %v7103_v52 = vpop.f32.mrf.mxu0  ;;  %v14354_v59 = vld [vmem:[#allocation11 + $0xa8] sm:$0xff] }
 0x460   :  { %8105 = vmatpush.bf16.msrb.mxu1 %v12972_v53  ;;  %8118 = vmatpush.bf16.msrb.mxu2 %v12976_v37  ;;  %v12848_v53 = vor.u32 %v14279_v49, %v12845_v25  ;;  %v12811_v37 = vld [vmem:[#allocation8 + $0x1e10] sm:$0xf]  ;;  %v14345_v49 = vld [vmem:[#allocation11 + $0x60] sm:$0xff] }
 0x461   :  { %8131 = vmatpush.bf16.msrb.mxu3 %v12980_v47  ;;  %8144 = vmatpush.bf16.msra.mxu0 %v12984_v8  ;;  %v12856_v47 = vor.u32 %v14280_v19, %v12853_v38  ;;  %v12812_v36 = vor.u32 %v14275_v33, %v12811_v37  ;;  %v14344_v37 = vld [vmem:[#allocation11 + $0x58] sm:$0xff] }
 0x462   :  { %v7077_v8 = vpop.f32.mrf.mxu2  ;;  %v14352_v33 = vld [vmem:[#allocation11 + $0x98] sm:$0xff] }
 0x463   :  { %v14343_v8 = vld [vmem:[#allocation11 + $0x50] sm:$0xff] }
 0x464   :  { %8106 = vmatpush.bf16.msrb.mxu1 %v12940_v57  ;;  %8119 = vmatpush.bf16.msrb.mxu2 %v12944_v26  ;;  %v12816_v57 = vor.u32 %v14271_v40, %v12813_v4  ;;  %v12820_v26 = vor.u32 %v14276_v28, %v12819_v51  ;;  %v14351_v40 = vld [vmem:[#allocation11 + $0x90] sm:$0xff]  ;;  %v14334_v28 = vld [vmem:[#allocation11 + $0x8] sm:$0xff] }
 0x465   :  { %8132 = vmatpush.bf16.msrb.mxu3 %v12948_v6  ;;  %8145 = vmatpush.bf16.msra.mxu0 %v12952_v29  ;;  %v7090_v30 = vpop.f32.mrf.mxu3  ;;  %v14359_v51 = vld [vmem:[#allocation11 + $0xd0] sm:$0xff] }
 0x468   :  { %8107 = vmatpush.bf16.msrb.mxu1 %v12908_v15  ;;  %8120 = vmatpush.bf16.msrb.mxu2 %v12912_v20 }
 0x469   :  { %8133 = vmatpush.bf16.msrb.mxu3 %v12916_v24  ;;  %8146 = vmatpush.bf16.msra.mxu0 %v12920_v61 }
 0x46c   :  { %8108 = vmatpush.bf16.msrb.mxu1 %v12876_v27  ;;  %8121 = vmatpush.bf16.msrb.mxu2 %v12880_v21  ;;  %v14338_v21 = vld [vmem:[#allocation11 + $0x28] sm:$0xff] }
 0x46d   :  { %8134 = vmatpush.bf16.msrb.mxu3 %v12884_v5  ;;  %8147 = vmatpush.bf16.msra.mxu0 %v12888_v44  ;;  %v14362_v5 = vld [vmem:[#allocation11 + $0xe8] sm:$0xff]  ;;  %v14337_v44 = vld [vmem:[#allocation11 + $0x20] sm:$0xff] }
 0x470   :  { %8109 = vmatpush.bf16.msrb.mxu1 %v12844_v48  ;;  %8122 = vmatpush.bf16.msrb.mxu2 %v12848_v53  ;;  %v14336_v53 = vld [vmem:[#allocation11 + $0x18] sm:$0xff] }
 0x471   :  { %8135 = vmatpush.bf16.msrb.mxu3 %v12852_v35  ;;  %8148 = vmatpush.bf16.msra.mxu0 %v12856_v47  ;;  %v14360_v35 = vld [vmem:[#allocation11 + $0xd8] sm:$0xff]  ;;  %v14335_v47 = vld [vmem:[#allocation11 + $0x10] sm:$0xff] }
 0x474   :  { %8110 = vmatpush.bf16.msrb.mxu1 %v12812_v36  ;;  %8123 = vmatpush.bf16.msrb.mxu2 %v12816_v57  ;;  %v7114_v41 = vpop.f32.mrf.mxu1  ;;  %v14358_v36 = vld [vmem:[#allocation11 + $0xc8] sm:$0xff]  ;;  %v14333_v57 = vld [vmem:[#allocation11] sm:$0xff] }
 0x475   :  { %8136 = vmatpush.bf16.msrb.mxu3 %v12820_v26  ;;  %8149 = vmatpush.bf16.msra.mxu0 %v12824_v0  ;;  %v7161_v6 = vadd.f32 %v7114_v41, %v15149_v17  ;;  %v14341_v26 = vld [vmem:[#allocation11 + $0x40] sm:$0xff] }
 0x476   :  { %v14349_v0 = vld [vmem:[#allocation11 + $0x80] sm:$0xff] }
 0x477   :  { %8111 = vmatmul.bf16.vlgmr.msrb.gmra.mxu1 %v15161_v1  ;;  %8124 = vmatmul.bf16.vlgmr.msrb.gmra.mxu2 %v15161_v1  ;;  %v7153_v29 = vpop.f32.mrf.mxu0  ;;  %v14357_v41 = vld [vmem:[#allocation11 + $0xc0] sm:$0xff] }
 0x478   :  { %8137 = vmatmul.bf16.vlgmr.msrb.gmra.mxu3 %v15161_v1  ;;  %8150 = vmatmul.bf16.vlgmr.msra.gmra.mxu0 %v15161_v1  ;;  %v15185_v7 = vadd.f32 %v7153_v29, %v15152_v60  ;;  %v14380_v29 = vld [vmem:[#allocation11 + $0x178] sm:$0xff] }
 0x479   :  { %8823 = vmatpush.bf16.msra.mxu2 %v14348_v54  ;;  %8836 = vmatpush.bf16.msra.mxu3 %v14356_v2  ;;  %v14370_v2 = vld [vmem:[#allocation11 + $0x128] sm:$0xff] }
 0x47a   :  { %v7127_v45 = vpop.f32.mrf.mxu2  ;;  %8849 = vmatpush.bf16.msrb.mxu0 %v14364_v14  ;;  %v14386_v14 = vld [vmem:[#allocation11 + $0x1a8] sm:$0xff] }
 0x47b   :  { %v15188_v46 = vadd.f32 %v7127_v45, %v15155_v63  ;;  %v14388_v45 = vld [vmem:[#allocation11 + $0x1b8] sm:$0xff] }
 0x47c   :  { %v7116_v13 = vpop.f32.mrf.mxu1 }
 0x47d   :  { %v7140_v16 = vpop.f32.mrf.mxu3  ;;  %8824 = vmatpush.bf16.msra.mxu2 %v14347_v34  ;;  %v15211_v13 = vld [vmem:[#allocation9] sm:$0xff] }
 0x47e   :  { %v15191_v11 = vadd.f32 %v7140_v16, %v15158_v32  ;;  %v14340_v32 = vld [vmem:[#allocation11 + $0x38] sm:$0xff]  ;;  %8850 = vmatpush.bf16.msrb.mxu0 %v14363_v22 }
 0x47f   :  { %v7155_v15 = vpop.f32.mrf.mxu0  ;;  %8810 = vmatpush.bf16.msra.mxu1 %v14340_v32  ;;  %v14396_v16 = vld [vmem:[#allocation11 + $0x1f8] sm:$0xff]  ;;  %v8239_v32 = vperm.slane %v15211_v13, 3 }
 0x480   :  { %v14371_v15 = vld [vmem:[#allocation11 + $0x130] sm:$0xff] }
 0x481   :  { %8825 = vmatpush.bf16.msra.mxu2 %v14346_v50  ;;  %v8246_v22 = vrot.slane %v8239_v32, 2  ;;  %v14377_v50 = vld [vmem:[#allocation11 + $0x160] sm:$0xff] }
 0x482   :  { %v7129_v20 = vpop.f32.mrf.mxu2  ;;  %8851 = vmatpush.bf16.msrb.mxu0 %v14362_v5 }
 0x483   :  { %v14379_v20 = vld [vmem:[#allocation11 + $0x170] sm:$0xff] }
 0x485   :  { %v7142_v56 = vpop.f32.mrf.mxu3  ;;  %8826 = vmatpush.bf16.msra.mxu2 %v14345_v49 }
 0x486   :  { %8852 = vmatpush.bf16.msrb.mxu0 %v14361_v55  ;;  %v14387_v56 = vld [vmem:[#allocation11 + $0x1b0] sm:$0xff] }
 0x489   :  { %8827 = vmatpush.bf16.msra.mxu2 %v14344_v37 }
 0x48a   :  { %8853 = vmatpush.bf16.msrb.mxu0 %v14360_v35  ;;  %v14384_v35 = vld [vmem:[#allocation11 + $0x198] sm:$0xff] }
 0x48d   :  { %8828 = vmatpush.bf16.msra.mxu2 %v14343_v8 }
 0x48e   :  { %8854 = vmatpush.bf16.msrb.mxu0 %v14359_v51 }
 0x491   :  { %8829 = vmatpush.bf16.msra.mxu2 %v14342_v23  ;;  %v14375_v23 = vld [vmem:[#allocation11 + $0x150] sm:$0xff] }
 0x492   :  { %8855 = vmatpush.bf16.msrb.mxu0 %v14358_v36 }
 0x494   :  { %v7561_v1 = vpop.f32.mrf.mxu1 }
 0x495   :  { %v15194_v10 = vadd.f32 %v7561_v1, %v15168_v58  ;;  %v14339_v58 = vld [vmem:[#allocation11 + $0x30] sm:$0xff]  ;;  %8830 = vmatpush.bf16.msra.mxu2 %v14341_v26 }
 0x496   :  { %8811 = vmatpush.bf16.msra.mxu1 %v14339_v58  ;;  %8856 = vmatpush.bf16.msrb.mxu0 %v14357_v41  ;;  %v14395_v1 = vld [vmem:[#allocation11 + $0x1f0] sm:$0xff]  ;;  %v8236_v58 = vperm.slane %v15211_v13, 0  ;;  %v14366_v41 = vld [vmem:[#allocation11 + $0x108] sm:$0xff] }
 0x497   :  { %v7600_v17 = vpop.f32.mrf.mxu0  ;;  %v14391_v26 = vld [vmem:[#allocation11 + $0x1d0] sm:$0xff] }
 0x498   :  { %v15197_v60 = vadd.f32 %v7600_v17, %v15171_v12  ;;  %v14355_v12 = vld [vmem:[#allocation11 + $0xb0] sm:$0xff] }
 0x499   :  { %8837 = vmatpush.bf16.msra.mxu3 %v14355_v12  ;;  %8875 = vmatpush.bf16.msrb.mxu2 %v14380_v29 }
 0x49a   :  { %v15199_v24 = vpop.f32.mrf.mxu2  ;;  %8812 = vmatpush.bf16.msra.mxu1 %v14338_v21  ;;  %8901 = vmatpush.bf16.msra.mxu0 %v14396_v16  ;;  %v14369_v21 = vld [vmem:[#allocation11 + $0x120] sm:$0xff]  ;;  %v14390_v16 = vld [vmem:[#allocation11 + $0x1c8] sm:$0xff] }
 0x49c   :  { %v7563_v61 = vpop.f32.mrf.mxu1 }
 0x49d   :  { %v15201_v63 = vpop.f32.mrf.mxu3  ;;  %8838 = vmatpush.bf16.msra.mxu3 %v14354_v59  ;;  %8876 = vmatpush.bf16.msrb.mxu2 %v14379_v20  ;;  %v8237_v61 = vperm.slane %v15211_v13, 1  ;;  %v14385_v59 = vld [vmem:[#allocation11 + $0x1a0] sm:$0xff] }
 0x49e   :  { %8813 = vmatpush.bf16.msra.mxu1 %v14337_v44  ;;  %8902 = vmatpush.bf16.msra.mxu0 %v14395_v1  ;;  %v7658_v5 = vadd.f32 %v15201_v63, %v15177_v39  ;;  %v14373_v20 = vld [vmem:[#allocation11 + $0x140] sm:$0xff] }
 0x49f   :  { %v7602_v42 = vpop.f32.mrf.mxu0  ;;  %v8244_v34 = vrot.slane %v8237_v61, 6  ;;  %v14389_v1 = vld [vmem:[#allocation11 + $0x1c0] sm:$0xff] }
 0x4a0   :  { %v8238_v42 = vperm.slane %v15211_v13, 2 }
 0x4a1   :  { %8839 = vmatpush.bf16.msra.mxu3 %v14353_v18  ;;  %v14393_v18 = vld [vmem:[#allocation11 + $0x1e0] sm:$0xff] }
 0x4a2   :  { %v7576_v3 = vpop.f32.mrf.mxu2  ;;  %8814 = vmatpush.bf16.msra.mxu1 %v14336_v53  ;;  %v8245_v12 = vrot.slane %v8238_v42, 4 }
 0x4a3   :  { %v14378_v3 = vld [vmem:[#allocation11 + $0x168] sm:$0xff] }
 0x4a4   :  { %8877 = vmatpush.bf16.msrb.mxu2 %v14378_v3 }
 0x4a5   :  { %v7589_v31 = vpop.f32.mrf.mxu3  ;;  %8840 = vmatpush.bf16.msra.mxu3 %v14352_v33  ;;  %v14376_v33 = vld [vmem:[#allocation11 + $0x158] sm:$0xff] }
 0x4a6   :  { %8815 = vmatpush.bf16.msra.mxu1 %v14335_v47  ;;  %v14394_v31 = vld [vmem:[#allocation11 + $0x1e8] sm:$0xff] }
 0x4a7   :  { %8903 = vmatpush.bf16.msra.mxu0 %v14394_v31 }
 0x4a8   :  { %8878 = vmatpush.bf16.msrb.mxu2 %v14377_v50 }
 0x4a9   :  { %8841 = vmatpush.bf16.msra.mxu3 %v14351_v40  ;;  %v14392_v40 = vld [vmem:[#allocation11 + $0x1d8] sm:$0xff] }
 0x4aa   :  { %8816 = vmatpush.bf16.msra.mxu1 %v14334_v28  ;;  %v14367_v28 = vld [vmem:[#allocation11 + $0x110] sm:$0xff] }
 0x4ab   :  { %8904 = vmatpush.bf16.msra.mxu0 %v14393_v18 }
 0x4ac   :  { %8879 = vmatpush.bf16.msrb.mxu2 %v14376_v33 }
 0x4ad   :  { %8842 = vmatpush.bf16.msra.mxu3 %v14350_v9  ;;  %v14383_v9 = vld [vmem:[#allocation11 + $0x190] sm:$0xff] }
 0x4ae   :  { %8817 = vmatpush.bf16.msra.mxu1 %v14333_v57 }
 0x4af   :  { %8905 = vmatpush.bf16.msra.mxu0 %v14392_v40 }
 0x4b0   :  { %8880 = vmatpush.bf16.msrb.mxu2 %v14375_v23 }
 0x4b1   :  { %8843 = vmatpush.bf16.msra.mxu3 %v14349_v0 }
 0x4b3   :  { %8906 = vmatpush.bf16.msra.mxu0 %v14391_v26 }
 0x4b4   :  { %v7613_v43 = vpop.f32.mrf.mxu1 }
 0x4b5   :  { %v15203_v52 = vadd.f32 %v7613_v43, %v7161_v6  ;;  %v14372_v6 = vld [vmem:[#allocation11 + $0x138] sm:$0xff]  ;;  %8888 = vmatpush.bf16.msrb.mxu3 %v14388_v45  ;;  %v7657_v43 = vadd.f32 %v15199_v24, %v15174_v62  ;;  %v8251_v62 = vsel %vm8181_vm1, %v8236_v58, %v8244_v34  ;;  %v8253_v24 = vsel %vm8183_vm2, %v8245_v12, %v8246_v22  ;;  %v14382_v45 = vld [vmem:[#allocation11 + $0x188] sm:$0xff] }
 0x4b6   :  { %8862 = vmatpush.bf16.msrb.mxu1 %v14372_v6  ;;  %v8255_v51 = vsel %vm8185_vm3, %v8251_v62, %v8253_v24  ;;  %v14374_v6 = vld [vmem:[#allocation11 + $0x148] sm:$0xff]  ;;  %v8241_v58 = vperm.slane %v15211_v13, 5  ;;  %v8242_v34 = vperm.slane %v15211_v13, 6  ;;  %v8243_v12 = vperm.slane %v15211_v13, 7 }
 0x4b7   :  { %v15205_v27 = vpop.f32.mrf.mxu0  ;;  %8881 = vmatpush.bf16.msrb.mxu2 %v14374_v6  ;;  %8907 = vmatpush.bf16.msra.mxu0 %v14390_v16 }
 0x4b8   :  { %v8247_v50 = vrot.slane %v8241_v58, 6 }
 0x4b9   :  { %8889 = vmatpush.bf16.msrb.mxu3 %v14387_v56  ;;  %v14381_v56 = vld [vmem:[#allocation11 + $0x180] sm:$0xff] }
 0x4ba   :  { %v15207_v25 = vpop.f32.mrf.mxu2  ;;  %8863 = vmatpush.bf16.msrb.mxu1 %v14371_v15  ;;  %v14365_v15 = vld [vmem:[#allocation11 + $0x100] sm:$0xff] }
 0x4bb   :  { %8882 = vmatpush.bf16.msrb.mxu2 %v14373_v20  ;;  %8908 = vmatpush.bf16.msra.mxu0 %v14389_v1 }
 0x4bc   :  { %v7615_v38 = vpop.f32.mrf.mxu1 }
 0x4bd   :  { %v15209_v19 = vpop.f32.mrf.mxu3  ;;  %8890 = vmatpush.bf16.msrb.mxu3 %v14386_v14 }
 0x4be   :  { %8864 = vmatpush.bf16.msrb.mxu1 %v14370_v2 }
 0x4bf   :  { %v7654_v48 = vpop.f32.mrf.mxu0 }
 0x4c1   :  { %8891 = vmatpush.bf16.msrb.mxu3 %v14385_v59  ;;  %v8248_v59 = vrot.slane %v8242_v34, 4 }
 0x4c2   :  { %v7628_v4 = vpop.f32.mrf.mxu2  ;;  %8865 = vmatpush.bf16.msrb.mxu1 %v14369_v21  ;;  %v8240_v21 = vperm.slane %v15211_v13, 4 }
 0x4c4   :  { %v8256_v24 = vsel %vm8181_vm1, %v8240_v21, %v8247_v50 }
 0x4c5   :  { %v7641_v30 = vpop.f32.mrf.mxu3  ;;  %8892 = vmatpush.bf16.msrb.mxu3 %v14384_v35 }
 0x4c9   :  { %8893 = vmatpush.bf16.msrb.mxu3 %v14383_v9 }
 0x4cd   :  { %8894 = vmatpush.bf16.msrb.mxu3 %v14382_v45 }
 0x4d1   :  { %8895 = vmatpush.bf16.msrb.mxu3 %v14381_v56 }
 0x4d4   :  { %v8060_v17 = vpop.f32.mrf.mxu1 }
 0x4d5   :  { %v8155_v37 = vadd.f32 %v8060_v17, %v15194_v10 }
 0x4d7   :  { %v8099_v54 = vpop.f32.mrf.mxu0 }
 0x4d8   :  { %v8158_v44 = vadd.f32 %v8099_v54, %v15197_v60  ;;  %v14368_v60 = vld [vmem:[#allocation11 + $0x118] sm:$0xff] }
 0x4d9   :  { %8866 = vmatpush.bf16.msrb.mxu1 %v14368_v60 }
 0x4da   :  { %v8073_v49 = vpop.f32.mrf.mxu2  ;;  %v8177_v47 = vrot.slane %v8158_v44, 2  ;;  %v7661_v44 = vadd.f32 %v15207_v25, %v15188_v46 }
 0x4db   :  { %v8156_v55 = vadd.f32 %v8073_v49, %v7657_v43  ;;  %v7663_v43 = vadd.f32 %v15205_v27, %v15185_v7  ;;  %v7662_v49 = vadd.f32 %v15209_v19, %v15191_v11 }
 0x4dc   :  { %v8062_v53 = vpop.f32.mrf.mxu1 }
 0x4dd   :  { %v8086_v38 = vpop.f32.mrf.mxu3  ;;  %v8175_v39 = vrot.slane %v8156_v55, 6  ;;  %8867 = vmatpush.bf16.msrb.mxu1 %v14367_v28 }
 0x4de   :  { %v8157_v48 = vadd.f32 %v8086_v38, %v7658_v5  ;;  %v8249_v5 = vrot.slane %v8243_v12, 2 }
 0x4df   :  { %v8101_v63 = vpop.f32.mrf.mxu0  ;;  %v8182_v4 = vsel %vm8181_vm1, %v8155_v37, %v8175_v39 }
 0x4e0   :  { %v8176_v8 = vrot.slane %v8157_v48, 4  ;;  %v8257_v7 = vsel %vm8183_vm2, %v8248_v59, %v8249_v5 }
 0x4e1   :  { %8868 = vmatpush.bf16.msrb.mxu1 %v14366_v41  ;;  %v8258_v11 = vsel %vm8185_vm3, %v8256_v24, %v8257_v7 }
 0x4e2   :  { %v8184_v30 = vsel %vm8183_vm2, %v8176_v8, %v8177_v47  ;;  %v8075_v57 = vpop.f32.mrf.mxu2 }
 0x4e3   :  { %v8186_v10 = vsel %vm8185_vm3, %v8182_v4, %v8184_v30 }
 0x4e4   :  { %v8261_v36 = vadd.f32 %v8255_v51, %v8186_v10 }
 0x4e5   :  { %v8088_v0 = vpop.f32.mrf.mxu3  ;;  %8869 = vmatpush.bf16.msrb.mxu1 %v14365_v15 }
 0x4e6   :  { %v8263_v29 = vmax.f32 %v8261_v36, 0.0 }
 0x4e8   :  { %8267 = vst [vmem:[#allocation1] ss:$4 sm:$0xff] %v8263_v29  ;;  %v14409_v29 = vld [vmem:[#allocation12] ss:$0 sm:$0xff] }
 0x4ef   :  { %v8270_v17 = vld.sshfl [vmem:[#allocation1] sm:$0xff pattern:$0x73625140]  ;;  %v8271_v61 = vld.sshfl [vmem:[#allocation1 + $0x8] sm:$0xff pattern:$0x73625140] }
 0x4f0   :  { %v8286_v42 = vpack.c.bf16 %v8270_v17, %v8270_v17  ;;  %v8287_v32 = vpack.c.bf16 %v8271_v61, %v8271_v61  ;;  %v8272_v54 = vld.sshfl [vmem:[#allocation1 + $0x10] sm:$0xff pattern:$0x73625140]  ;;  %v8273_v2 = vld.sshfl [vmem:[#allocation1 + $0x18] sm:$0xff pattern:$0x73625140] }
 0x4f1   :  { %v8288_v3 = vpack.c.bf16 %v8272_v54, %v8272_v54  ;;  %v8289_v14 = vpack.c.bf16 %v8273_v2, %v8273_v2 }
 0x4f2   :  { %8818 = vmatmul.bf16.vlgmr.msra.gmra.mxu1 %v8286_v42  ;;  %8831 = vmatmul.bf16.vlgmr.msra.gmra.mxu2 %v8287_v32 }
 0x4f3   :  { %8844 = vmatmul.bf16.vlgmr.msra.gmra.mxu3 %v8288_v3  ;;  %8857 = vmatmul.bf16.vlgmr.msrb.gmra.mxu0 %v8289_v14 }
 0x4f4   :  { %v8112_v31 = vpop.f32.mrf.mxu1 }
 0x4f5   :  { %v8151_v22 = vpop.f32.mrf.mxu0  ;;  %v8159_v13 = vadd.f32 %v8112_v31, %v15203_v52 }
 0x4f6   :  { %v8162_v18 = vadd.f32 %v8151_v22, %v7663_v43 }
 0x4f8   :  { %v8180_v39 = vrot.slane %v8162_v18, 2 }
 0x4fa   :  { %v8125_v55 = vpop.f32.mrf.mxu2 }
 0x4fb   :  { %v8160_v38 = vadd.f32 %v8125_v55, %v7661_v44  ;;  %v8138_v48 = vpop.f32.mrf.mxu3 }
 0x4fc   :  { %v8161_v62 = vadd.f32 %v8138_v48, %v7662_v49  ;;  %v8114_v27 = vpop.f32.mrf.mxu1 }
 0x4fd   :  { %v8178_v53 = vrot.slane %v8160_v38, 6  ;;  %v8153_v37 = vpop.f32.mrf.mxu0 }
 0x4fe   :  { %v8179_v63 = vrot.slane %v8161_v62, 4 }
 0x4ff   :  { %v8187_v46 = vsel %vm8181_vm1, %v8159_v13, %v8178_v53 }
 0x500   :  { %v8188_v25 = vsel %vm8183_vm2, %v8179_v63, %v8180_v39 }
 0x501   :  { %v8189_v19 = vsel %vm8185_vm3, %v8187_v46, %v8188_v25 }
 0x502   :  { %v8262_v60 = vadd.f32 %v8258_v11, %v8189_v19  ;;  %v8127_v33 = vpop.f32.mrf.mxu2 }
 0x503   :  { %v8140_v35 = vpop.f32.mrf.mxu3 }
 0x504   :  { %v8264_v47 = vmax.f32 %v8262_v60, 0.0 }
 0x506   :  { %8269 = vst [vmem:[#allocation1 + $0x20] ss:$4 sm:$0xff] %v8264_v47 }
 0x50d   :  { %v8274_v8 = vld.sshfl [vmem:[#allocation1 + $0x20] sm:$0xff pattern:$0x73625140]  ;;  %v8275_v40 = vld.sshfl [vmem:[#allocation1 + $0x28] sm:$0xff pattern:$0x73625140] }
 0x50e   :  { %v8290_v52 = vpack.c.bf16 %v8274_v8, %v8274_v8  ;;  %v8291_v4 = vpack.c.bf16 %v8275_v40, %v8275_v40  ;;  %v8276_v51 = vld.sshfl [vmem:[#allocation1 + $0x30] sm:$0xff pattern:$0x73625140]  ;;  %v8277_v30 = vld.sshfl [vmem:[#allocation1 + $0x38] sm:$0xff pattern:$0x73625140] }
 0x50f   :  { %v8292_v10 = vpack.c.bf16 %v8276_v51, %v8276_v51  ;;  %v8293_v28 = vpack.c.bf16 %v8277_v30, %v8277_v30 }
 0x510   :  { %8870 = vmatmul.bf16.vlgmr.msrb.gmra.mxu1 %v8290_v52  ;;  %8883 = vmatmul.bf16.vlgmr.msrb.gmra.mxu2 %v8291_v4 }
 0x511   :  { %8896 = vmatmul.bf16.vlgmr.msrb.gmra.mxu3 %v8292_v10  ;;  %8909 = vmatmul.bf16.vlgmr.msra.gmra.mxu0 %v8293_v28 }
 0x56f   :  { %v8819_v23 = vpop.f32.mrf.mxu1 }
 0x570   :  { %v8858_v9 = vpop.f32.mrf.mxu0  ;;  %v8820_v45 = vadd.f32 %v14409_v29, %v8819_v23 }
 0x575   :  { %v8832_v36 = vpop.f32.mrf.mxu2 }
 0x576   :  { %v8845_v57 = vpop.f32.mrf.mxu3  ;;  %v8833_v16 = vadd.f32 %v8832_v36, %v8820_v45 }
 0x577   :  { %v8821_v26 = vpop.f32.mrf.mxu1 }
 0x578   :  { %v8860_v0 = vpop.f32.mrf.mxu0  ;;  %v8846_v15 = vadd.f32 %v8845_v57, %v8833_v16 }
 0x57a   :  { %v8859_v1 = vadd.f32 %v8858_v9, %v8846_v15 }
 0x57d   :  { %v8834_v41 = vpop.f32.mrf.mxu2 }
 0x57e   :  { %v8847_v6 = vpop.f32.mrf.mxu3 }
 0x58d   :  { %v8871_v20 = vpop.f32.mrf.mxu1 }
 0x58e   :  { %v8910_v56 = vpop.f32.mrf.mxu0  ;;  %v8872_v17 = vadd.f32 %v8871_v20, %v8859_v1 }
 0x593   :  { %v8884_v61 = vpop.f32.mrf.mxu2 }
 0x594   :  { %v8885_v42 = vadd.f32 %v8884_v61, %v8872_v17  ;;  %v8897_v32 = vpop.f32.mrf.mxu3 }
 0x595   :  { %v8873_v54 = vpop.f32.mrf.mxu1 }
 0x596   :  { %v8898_v2 = vadd.f32 %v8897_v32, %v8885_v42  ;;  %v8912_v3 = vpop.f32.mrf.mxu0 }
 0x598   :  { %v8911_v14 = vadd.f32 %v8910_v56, %v8898_v2 }
 0x59a   :  { %8914 = vst [vmem:[#allocation14] sm:$0x3] %v8911_v14 }
 0x59b   :  { %v8886_v31 = vpop.f32.mrf.mxu2  ;;  %8925 = dma.vmem_to_hbm [thread:$0]  %s8921_s2, 32, %s8923_s16, [#allocation5]  }
 0x59c   :  { %v8899_v58 = vpop.f32.mrf.mxu3 }
 0x59d   :  { %14589 = dma.done.wait [#allocation5], 32  }
 0x59e   :  { %14590 = vsyncadd [#allocation5], 4294967264 }
 0x59f   :  { %8930 = vsyncpa [#allocation4], 1 }
 0x5a0   :  { %8931 = vsyncpa [#allocation7], 1 }
 0x5a1   :  { %8932 = vsyncpa [#allocation10], 1 }
 0x5a2   :  { %8933 = vsyncpa [#allocation13], 1 }
 0x5a3   :  { %8934 = vsyncpa [#allocation5], 1 }

</bundles_post_ra>
